<compile_context>
chip_gen: v7x
topology: tpu7x:2x2x1
jax: 0.10.0
libtpu: 0.0.40
codegen_flags: <defaults>
</compile_context>

<pallas_src>
import math

import jax
import jax.numpy as jnp
from jax.experimental import pallas as pl
from jax.experimental.pallas import tpu as pltpu

HID = 768
N_HEADS = 6
HEAD_DIM = HID // N_HEADS            # 128
INV_SCALE = 1.0 / math.sqrt(HEAD_DIM)
QKV = 3 * HID                        # 2304 (lane-aligned: 18 * 128)


def bert_mtl_attn_kernel(e_ref, m_ref, seg_ref, segt_ref, w_ref, b_ref, out_ref):
    # ---- fused QKV projection for both sequence positions -----------------
    #   lanes [0:768]=Q, [768:1536]=K, [1536:2304]=V  (all slices lane-aligned)
    e = e_ref[...].astype(jnp.bfloat16)          # [B, 768]
    m = m_ref[...].astype(jnp.bfloat16)          # [B, 768]
    w_qkv = w_ref[:, :QKV]                       # [768, 2304] bf16
    b_qkv = b_ref[:, :QKV]                       # [1,   2304] f32

    proj0 = jnp.dot(e, w_qkv, preferred_element_type=jnp.float32) + b_qkv   # [B, 2304]
    proj1 = jnp.dot(m, w_qkv, preferred_element_type=jnp.float32) + b_qkv   # [B, 2304]

    q0 = proj0[:, :HID]                          # only the pos-0 query is consumed
    k0 = proj0[:, HID:2 * HID]
    v0 = proj0[:, 2 * HID:QKV]
    k1 = proj1[:, HID:2 * HID]
    v1 = proj1[:, 2 * HID:QKV]

    # ---- per-head scores ---------------------------------------------------
    # Segmented lane-reduction over each 128-lane head via the precomputed
    # one-hot seg matrix (DMA'd concurrently with the weight slab).
    seg = seg_ref[...]                           # [768, 6] f32
    s00 = jnp.dot(q0 * k0, seg, preferred_element_type=jnp.float32) * INV_SCALE   # [B, 6]
    s01 = jnp.dot(q0 * k1, seg, preferred_element_type=jnp.float32) * INV_SCALE   # [B, 6]

    # ---- 2-way softmax as a logistic of the score difference ---------------
    #   p00 = softmax([s00, s01])[0] = 1 / (1 + exp(s01 - s00))
    # exp -> EUP, approx reciprocal -> EUP: both off the VALU critical path.
    p00 = pl.reciprocal(1.0 + jnp.exp(s01 - s00), approx=True)                    # [B, 6]

    # Broadcast per-head p00 back to 768 lanes with one small MXU dot, then
    # combine values:  out = p00*v0 + (1-p00)*v1 = v1 + p00_b * (v0 - v1)
    p0b = jnp.dot(p00, segt_ref[...], preferred_element_type=jnp.float32)         # [B, 768]
    x0 = v1 + p0b * (v0 - v1)                                                     # [B, 768]

    # ---- fused (attention.fc -> classifier) projection, lane-padded output --
    out_ref[...] = (jnp.dot(x0.astype(jnp.bfloat16), w_ref[:, QKV:],
                            preferred_element_type=jnp.float32) + b_ref[:, QKV:])


def pack_params(params):
    """One-time, model-load-time packing.  Nothing here runs per forward call."""
    num_labels = params["wc"].shape[1]
    out_pad = pl.cdiv(num_labels, 128) * 128
    pad = out_pad - num_labels

    # Fused QKV weight / bias so the 5 projection matmuls become 2 dots.
    w_qkv = jnp.concatenate([params["wq"], params["wk"], params["wv"]], axis=1)   # [768, 2304]
    b_qkv = jnp.concatenate([params["bq"], params["bk"], params["bv"]], axis=1)   # [1,   2304]

    # Fold the attention output projection into the classifier (exact: dropout
    # is an eval-mode no-op, no nonlinearity in between), pad to 128 lanes for
    # unmasked vector stores.
    wc_fused = jnp.pad(params["wo"] @ params["wc"], ((0, 0), (0, pad)))            # [768, out_pad]
    bc_fused = jnp.pad(params["bo"] @ params["wc"] + params["bc"],
                       ((0, 0), (0, pad)))                                         # [1,   out_pad]

    # Two slabs: one bf16 weight, one f32 bias (fewer DMA descriptors).
    w_slab = jnp.concatenate([w_qkv, wc_fused], axis=1).astype(jnp.bfloat16)       # [768, 2304+out_pad]
    b_slab = jnp.concatenate([b_qkv, bc_fused], axis=1).astype(jnp.float32)        # [1,   2304+out_pad]

    # Head one-hot matrices (precomputed constants, no in-kernel iota work).
    head = jnp.arange(HID, dtype=jnp.int32) // HEAD_DIM
    seg = (head[:, None] == jnp.arange(N_HEADS, dtype=jnp.int32)[None, :]
           ).astype(jnp.float32)                                                   # [768, 6]

    return dict(w=jax.device_put(w_slab), b=jax.device_put(b_slab),
                seg=jax.device_put(seg), segt=jax.device_put(seg.T),
                num_labels=num_labels)


def bert_mtl_attn_forward(embeds, emo_embeds, packed):
    """Per-call forward: just the pallas_call plus the final lane slice.
    Note: B should be a multiple of 8 for dense sublane tiling (B=8 tested)."""
    B = embeds.shape[0]
    out_pad = packed["w"].shape[1] - QKV
    vmem = pl.BlockSpec(memory_space=pltpu.MemorySpace.VMEM)
    out_padded = pl.pallas_call(
        bert_mtl_attn_kernel,
        out_shape=jax.ShapeDtypeStruct((B, out_pad), jnp.float32),
        in_specs=[vmem] * 6,
        out_specs=vmem,
        compiler_params=pltpu.CompilerParams(vmem_limit_bytes=32 << 20),
    )(embeds, emo_embeds, packed["seg"], packed["segt"], packed["w"], packed["b"])
    return out_padded[:, :packed["num_labels"]]


def init_params(key, num_labels):
    """Deterministic nn.Linear-style init (uniform +/-1/sqrt(fan_in)); weights [in, out]."""
    def linear(k, fan_in, fan_out):
        bound = 1.0 / math.sqrt(fan_in)
        kw, kb = jax.random.split(k)
        w = jax.random.uniform(kw, (fan_in, fan_out), jnp.float32, -bound, bound)
        b = jax.random.uniform(kb, (1, fan_out), jnp.float32, -bound, bound)
        return w, b

    ks = jax.random.split(key, 5)
    wq, bq = linear(ks[0], HID, HID)
    wk, bk = linear(ks[1], HID, HID)
    wv, bv = linear(ks[2], HID, HID)
    wo, bo = linear(ks[3], HID, HID)
    wc, bc = linear(ks[4], HID, num_labels)
    return dict(wq=wq, bq=bq, wk=wk, bk=bk, wv=wv, bv=bv,
                wo=wo, bo=bo, wc=wc, bc=bc)


def reference_forward(embeds, emo_embeds, p):
    """Plain-JAX (f32) mirror of the PyTorch forward (eval mode) for verification."""
    B = embeds.shape[0]
    comb = jnp.stack([embeds, emo_embeds], axis=1)              # [B, 2, 768]
    Q = comb @ p["wq"] + p["bq"][0]
    K = comb @ p["wk"] + p["bk"][0]
    V = comb @ p["wv"] + p["bv"][0]

    def split(x):
        return x.reshape(B, 2, N_HEADS, HEAD_DIM).transpose(0, 2, 1, 3)

    Qh, Kh, Vh = split(Q), split(K), split(V)
    attn = jnp.einsum("bhqd,bhkd->bhqk", Qh, Kh) / math.sqrt(HEAD_DIM)
    attn = jax.nn.softmax(attn, axis=-1)
    x = jnp.einsum("bhqk,bhkd->bhqd", attn, Vh)
    x = x.transpose(0, 2, 1, 3).reshape(B, 2, HID)
    x = x @ p["wo"] + p["bo"][0]
    out0 = x[:, 0, :]
    return out0 @ p["wc"] + p["bc"][0]


if __name__ == "__main__":
    B = 8
    NUM_LABELS = 4

    key = jax.random.PRNGKey(0)
    k_e, k_m, k_p = jax.random.split(key, 3)

    # Stand-ins for the pooled outputs of the two pretrained BERT encoders.
    # TODO(synk): enc_model / emo_model (HuggingFace AutoModel) have no Pallas
    # equivalent; their pooled [B, 768] outputs are synthesized here.
    embeds = jax.random.normal(k_e, (B, HID), jnp.float32)
    emo_embeds = jax.random.normal(k_m, (B, HID), jnp.float32)

    params = init_params(k_p, NUM_LABELS)

    # One-time model-load packing (hoisted out of the per-call forward).
    packed = pack_params(params)

    # Jit the per-call forward with the packed weights captured as constants:
    # a single dispatch per call, no per-call weight traffic.
    fwd = jax.jit(lambda e, m: bert_mtl_attn_forward(e, m, packed))

    logits = jax.block_until_ready(fwd(embeds, emo_embeds))

    ref = jax.block_until_ready(reference_forward(embeds, emo_embeds, params))
    assert logits.shape == (B, NUM_LABELS)
    # bf16 weights/activations in the kernel path vs f32 reference -> loosened tol.
    assert jnp.allclose(logits, ref, rtol=3e-2, atol=3e-2), (
        f"max abs err {jnp.max(jnp.abs(logits - ref))}")

    print("KERNEL_OK")
</pallas_src>

<mosaic_0001>
module attributes {stable_mosaic.version = 11 : i64} {
  func.func @bert_mtl_attn_kernel(%arg0: memref<8x768xf32, #tpu.memory_space<vmem>>, %arg1: memref<8x768xf32, #tpu.memory_space<vmem>>, %arg2: memref<768x6xf32, #tpu.memory_space<vmem>>, %arg3: memref<6x768xf32, #tpu.memory_space<vmem>>, %arg4: memref<768x2432xbf16, #tpu.memory_space<vmem>>, %arg5: memref<1x2432xf32, #tpu.memory_space<vmem>>, %arg6: memref<8x128xf32, #tpu.memory_space<vmem>>) attributes {dimension_semantics = [], scalar_prefetch = 0 : i64, scratch_operands = 0 : i64, tpu.core_type = #tpu.core_type<tc>} {
    %c0 = arith.constant 0 : index
    %c0_0 = arith.constant 0 : index
    %0 = vector.load %arg0[%c0, %c0_0] : memref<8x768xf32, #tpu.memory_space<vmem>>, vector<8x768xf32>
    %1 = arith.truncf %0 : vector<8x768xf32> to vector<8x768xbf16>
    %c0_1 = arith.constant 0 : index
    %c0_2 = arith.constant 0 : index
    %2 = vector.load %arg1[%c0_1, %c0_2] : memref<8x768xf32, #tpu.memory_space<vmem>>, vector<8x768xf32>
    %3 = arith.truncf %2 : vector<8x768xf32> to vector<8x768xbf16>
    %c0_3 = arith.constant 0 : index
    %c0_4 = arith.constant 0 : index
    %4 = vector.load %arg4[%c0_3, %c0_4] : memref<768x2432xbf16, #tpu.memory_space<vmem>>, vector<768x2304xbf16>
    %c0_5 = arith.constant 0 : index
    %c0_6 = arith.constant 0 : index
    %5 = vector.load %arg5[%c0_5, %c0_6] : memref<1x2432xf32, #tpu.memory_space<vmem>>, vector<1x2304xf32>
    %cst = arith.constant dense<0.000000e+00> : vector<8x2304xf32>
    %6 = tpu.matmul %1, %4, %cst {dimension_numbers = #tpu.dot_dimension_numbers<[1], [0], [0], [1], [0, 0, 1, 1], [], []>} : vector<8x768xbf16>, vector<768x2304xbf16>, vector<8x2304xf32> -> vector<8x2304xf32>
    %7 = vector.broadcast %5 : vector<1x2304xf32> to vector<8x2304xf32>
    %8 = arith.addf %6, %7 : vector<8x2304xf32>
    %cst_7 = arith.constant dense<0.000000e+00> : vector<8x2304xf32>
    %9 = tpu.matmul %3, %4, %cst_7 {dimension_numbers = #tpu.dot_dimension_numbers<[1], [0], [0], [1], [0, 0, 1, 1], [], []>} : vector<8x768xbf16>, vector<768x2304xbf16>, vector<8x2304xf32> -> vector<8x2304xf32>
    %10 = vector.broadcast %5 : vector<1x2304xf32> to vector<8x2304xf32>
    %11 = arith.addf %9, %10 : vector<8x2304xf32>
    %12 = vector.extract_strided_slice %8 {offsets = [0, 0], sizes = [8, 768], strides = [1, 1]} : vector<8x2304xf32> to vector<8x768xf32>
    %13 = vector.extract_strided_slice %8 {offsets = [0, 768], sizes = [8, 768], strides = [1, 1]} : vector<8x2304xf32> to vector<8x768xf32>
    %14 = vector.extract_strided_slice %8 {offsets = [0, 1536], sizes = [8, 768], strides = [1, 1]} : vector<8x2304xf32> to vector<8x768xf32>
    %15 = vector.extract_strided_slice %11 {offsets = [0, 768], sizes = [8, 768], strides = [1, 1]} : vector<8x2304xf32> to vector<8x768xf32>
    %16 = vector.extract_strided_slice %11 {offsets = [0, 1536], sizes = [8, 768], strides = [1, 1]} : vector<8x2304xf32> to vector<8x768xf32>
    %c0_8 = arith.constant 0 : index
    %c0_9 = arith.constant 0 : index
    %17 = vector.load %arg2[%c0_8, %c0_9] : memref<768x6xf32, #tpu.memory_space<vmem>>, vector<768x6xf32>
    %18 = arith.mulf %12, %13 : vector<8x768xf32>
    %cst_10 = arith.constant dense<0.000000e+00> : vector<8x6xf32>
    %19 = tpu.matmul %18, %17, %cst_10 {dimension_numbers = #tpu.dot_dimension_numbers<[1], [0], [0], [1], [0, 0, 1, 1], [], []>} : vector<8x768xf32>, vector<768x6xf32>, vector<8x6xf32> -> vector<8x6xf32>
    %cst_11 = arith.constant 0.0883883461 : f32
    %20 = vector.broadcast %cst_11 : f32 to vector<8x6xf32>
    %21 = arith.mulf %19, %20 : vector<8x6xf32>
    %22 = arith.mulf %12, %15 : vector<8x768xf32>
    %cst_12 = arith.constant dense<0.000000e+00> : vector<8x6xf32>
    %23 = tpu.matmul %22, %17, %cst_12 {dimension_numbers = #tpu.dot_dimension_numbers<[1], [0], [0], [1], [0, 0, 1, 1], [], []>} : vector<8x768xf32>, vector<768x6xf32>, vector<8x6xf32> -> vector<8x6xf32>
    %cst_13 = arith.constant 0.0883883461 : f32
    %24 = vector.broadcast %cst_13 : f32 to vector<8x6xf32>
    %25 = arith.mulf %23, %24 : vector<8x6xf32>
    %26 = arith.subf %25, %21 : vector<8x6xf32>
    %27 = math.exp %26 : vector<8x6xf32>
    %cst_14 = arith.constant 1.000000e+00 : f32
    %28 = vector.broadcast %cst_14 : f32 to vector<8x6xf32>
    %29 = arith.addf %28, %27 : vector<8x6xf32>
    %30 = tpu.reciprocal %29 {approx = true} : vector<8x6xf32> -> vector<8x6xf32>
    %c0_15 = arith.constant 0 : index
    %c0_16 = arith.constant 0 : index
    %31 = vector.load %arg3[%c0_15, %c0_16] : memref<6x768xf32, #tpu.memory_space<vmem>>, vector<6x768xf32>
    %cst_17 = arith.constant dense<0.000000e+00> : vector<8x768xf32>
    %32 = tpu.matmul %30, %31, %cst_17 {dimension_numbers = #tpu.dot_dimension_numbers<[1], [0], [0], [1], [0, 0, 1, 1], [], []>} : vector<8x6xf32>, vector<6x768xf32>, vector<8x768xf32> -> vector<8x768xf32>
    %33 = arith.subf %14, %16 : vector<8x768xf32>
    %34 = arith.mulf %32, %33 : vector<8x768xf32>
    %35 = arith.addf %16, %34 : vector<8x768xf32>
    %36 = arith.truncf %35 : vector<8x768xf32> to vector<8x768xbf16>
    %c0_18 = arith.constant 0 : index
    %c2304 = arith.constant 2304 : index
    %37 = vector.load %arg4[%c0_18, %c2304] : memref<768x2432xbf16, #tpu.memory_space<vmem>>, vector<768x128xbf16>
    %cst_19 = arith.constant dense<0.000000e+00> : vector<8x128xf32>
    %38 = tpu.matmul %36, %37, %cst_19 {dimension_numbers = #tpu.dot_dimension_numbers<[1], [0], [0], [1], [0, 0, 1, 1], [], []>} : vector<8x768xbf16>, vector<768x128xbf16>, vector<8x128xf32> -> vector<8x128xf32>
    %c0_20 = arith.constant 0 : index
    %c2304_21 = arith.constant 2304 : index
    %39 = vector.load %arg5[%c0_20, %c2304_21] : memref<1x2432xf32, #tpu.memory_space<vmem>>, vector<1x128xf32>
    %40 = vector.broadcast %39 : vector<1x128xf32> to vector<8x128xf32>
    %41 = arith.addf %38, %40 : vector<8x128xf32>
    %c0_22 = arith.constant 0 : index
    %c0_23 = arith.constant 0 : index
    %42 = vector.load %arg6[%c0_22, %c0_23] : memref<8x128xf32, #tpu.memory_space<vmem>>, vector<8x128xf32>
    tpu.vector_store %arg6[%c0_22, %c0_23], %41 {strides = array<i32>} : memref<8x128xf32, #tpu.memory_space<vmem>>, vector<8x128xf32>,
    return
  }
}

</mosaic_0001>

<bundles_post_ra>
// kernel: _lambda_.1
= control target key start
LH: loop header
LB: loop body
LE: loop exit
PB: predicated region body
PF: predicated region fallthrough
CT: control target
= control target key end

     0   :  { %vm7718_vm0 = vcmask 1045504   ;;  %vm7714_vm1 = vcmask 48128   ;;  %s17374_s4 = inlined_call_operand.vmem [shape: bf16[768,2432], index: 4, kind: input, shape index: {}]   ;;  %s17375_s0 = inlined_call_operand.vmem [shape: f32[8,768], index: 0, kind: input, shape index: {}]   ;;  %s17376_s1 = inlined_call_operand.vmem [shape: f32[8,768], index: 1, kind: input, shape index: {}]   ;;  %s17377_s5 = inlined_call_operand.vmem [shape: f32[1,2432], index: 5, kind: input, shape index: {}]   ;;  %s17378_s2 = inlined_call_operand.vmem [shape: f32[768,6], index: 2, kind: input, shape index: {}]   ;;  %s17379_s3 = inlined_call_operand.vmem [shape: f32[6,768], index: 3, kind: input, shape index: {}]   ;;  %s17380_s6 = inlined_call_operand.vmem [shape: f32[8,128], index: 6, kind: output, shape index: {}]  }
   0x1   :  { %v10031_v0 = vld [vmem:[%s17374_s4 + $0x4] ss:$76 sps:$4 sm:$0xff]   ;;  %v10033_v1 = vld [vmem:[%s17374_s4 + $0xc] ss:$76 sps:$4 sm:$0xff]   ;;  %v10036_v3 = vld [vmem:[%s17374_s4 + $0x8] ss:$76 sps:$4 sm:$0xff]  }
   0x2   :  { %5328 = vmatprep.subr.bf16.mxu0 %v10031_v0  ;;  %v10035_v2 = vld [vmem:[%s17374_s4] ss:$76 sps:$4 sm:$0xff]   ;;  %5451 = vmatprep.subr.bf16.mxu1 %v10033_v1  ;;  %v10037_v4 = vld [vmem:[%s17374_s4 + $0x9c] ss:$76 sps:$4 sm:$0xff]   ;;  %v10039_v5 = vld [vmem:[%s17374_s4 + $0xa4] ss:$76 sps:$4 sm:$0xff]  }
   0x3   :  { %5329 = vmatpush1.bf16.msra.mxu0 %v10035_v2  ;;  %5452 = vmatpush1.bf16.msra.mxu1 %v10036_v3  ;;  %v10041_v6 = vld [vmem:[%s17374_s4 + $0x98] ss:$76 sps:$4 sm:$0xff]   ;;  %v10042_v7 = vld [vmem:[%s17374_s4 + $0xa0] ss:$76 sps:$4 sm:$0xff]   ;;  %v10045_v9 = vld [vmem:[%s17374_s4 + $0x13c] ss:$76 sps:$4 sm:$0xff]  }
   0x4   :  { %5330 = vmatprep.subr.bf16.mxu0 %v10037_v4  ;;  %5453 = vmatprep.subr.bf16.mxu1 %v10039_v5  ;;  %v10043_v8 = vld [vmem:[%s17374_s4 + $0x134] ss:$76 sps:$4 sm:$0xff]   ;;  %v10047_v10 = vld [vmem:[%s17374_s4 + $0x130] ss:$76 sps:$4 sm:$0xff]   ;;  %v10048_v11 = vld [vmem:[%s17374_s4 + $0x138] ss:$76 sps:$4 sm:$0xff]  }
   0x5   :  { %v10049_v12 = vld [vmem:[%s17374_s4 + $0x1cc] ss:$76 sps:$4 sm:$0xff]   ;;  %v10051_v13 = vld [vmem:[%s17374_s4 + $0x1d4] ss:$76 sps:$4 sm:$0xff]   ;;  %v10054_v15 = vld [vmem:[%s17374_s4 + $0x1d0] ss:$76 sps:$4 sm:$0xff]  }
   0x6   :  { %v10053_v14 = vld [vmem:[%s17374_s4 + $0x1c8] ss:$76 sps:$4 sm:$0xff]   ;;  %v10055_v16 = vld [vmem:[%s17374_s4 + $0x264] ss:$76 sps:$4 sm:$0xff]   ;;  %v10057_v17 = vld [vmem:[%s17374_s4 + $0x26c] ss:$76 sps:$4 sm:$0xff]  }
   0x7   :  { %5331 = vmatpush1.bf16.msra.mxu0 %v10041_v6  ;;  %5454 = vmatpush1.bf16.msra.mxu1 %v10042_v7  ;;  %v10059_v18 = vld [vmem:[%s17374_s4 + $0x260] ss:$76 sps:$4 sm:$0xff]   ;;  %v10060_v19 = vld [vmem:[%s17374_s4 + $0x268] ss:$76 sps:$4 sm:$0xff]   ;;  %v10063_v21 = vld [vmem:[%s17374_s4 + $0x304] ss:$76 sps:$4 sm:$0xff]  }
   0x8   :  { %5332 = vmatprep.subr.bf16.mxu0 %v10043_v8  ;;  %5455 = vmatprep.subr.bf16.mxu1 %v10045_v9  ;;  %v10061_v20 = vld [vmem:[%s17374_s4 + $0x2fc] ss:$76 sps:$4 sm:$0xff]   ;;  %v10065_v22 = vld [vmem:[%s17374_s4 + $0x2f8] ss:$76 sps:$4 sm:$0xff]   ;;  %v10066_v23 = vld [vmem:[%s17374_s4 + $0x300] ss:$76 sps:$4 sm:$0xff]  }
   0x9   :  { %v10067_v24 = vld [vmem:[%s17374_s4 + $0x394] ss:$76 sps:$4 sm:$0xff]   ;;  %v10069_v25 = vld [vmem:[%s17374_s4 + $0x39c] ss:$76 sps:$4 sm:$0xff]   ;;  %v10072_v27 = vld [vmem:[%s17374_s4 + $0x398] ss:$76 sps:$4 sm:$0xff]  }
   0xa   :  { %v10071_v26 = vld [vmem:[%s17374_s4 + $0x390] ss:$76 sps:$4 sm:$0xff]   ;;  %v10073_v28 = vld [vmem:[%s17374_s4 + $0x42c] ss:$76 sps:$4 sm:$0xff]   ;;  %v10075_v29 = vld [vmem:[%s17374_s4 + $0x434] ss:$76 sps:$4 sm:$0xff]  }
   0xb   :  { %5333 = vmatpush1.bf16.msra.mxu0 %v10047_v10  ;;  %5456 = vmatpush1.bf16.msra.mxu1 %v10048_v11  ;;  %v10077_v30 = vld [vmem:[%s17374_s4 + $0x428] ss:$76 sps:$4 sm:$0xff]   ;;  %v10078_v31 = vld [vmem:[%s17374_s4 + $0x430] ss:$76 sps:$4 sm:$0xff]   ;;  %v10081_v33 = vld [vmem:[%s17374_s4 + $0x4cc] ss:$76 sps:$4 sm:$0xff]  }
   0xc   :  { %5334 = vmatprep.subr.bf16.mxu0 %v10049_v12  ;;  %5457 = vmatprep.subr.bf16.mxu1 %v10051_v13  ;;  %v10079_v32 = vld [vmem:[%s17374_s4 + $0x4c4] ss:$76 sps:$4 sm:$0xff]   ;;  %v10083_v34 = vld [vmem:[%s17374_s4 + $0x4c0] ss:$76 sps:$4 sm:$0xff]   ;;  %v10084_v35 = vld [vmem:[%s17374_s4 + $0x4c8] ss:$76 sps:$4 sm:$0xff]  }
   0xd   :  { %v10085_v36 = vld [vmem:[%s17374_s4 + $0x55c] ss:$76 sps:$4 sm:$0xff]   ;;  %v10087_v37 = vld [vmem:[%s17374_s4 + $0x564] ss:$76 sps:$4 sm:$0xff]   ;;  %v10090_v39 = vld [vmem:[%s17374_s4 + $0x560] ss:$76 sps:$4 sm:$0xff]  }
   0xe   :  { %v10089_v38 = vld [vmem:[%s17374_s4 + $0x558] ss:$76 sps:$4 sm:$0xff]   ;;  %v10091_v40 = vld [vmem:[%s17374_s4 + $0x5f4] ss:$76 sps:$4 sm:$0xff]   ;;  %v10093_v41 = vld [vmem:[%s17374_s4 + $0x5fc] ss:$76 sps:$4 sm:$0xff]  }
   0xf   :  { %5335 = vmatpush1.bf16.msra.mxu0 %v10053_v14  ;;  %5458 = vmatpush1.bf16.msra.mxu1 %v10054_v15  ;;  %v10095_v42 = vld [vmem:[%s17374_s4 + $0x5f0] ss:$76 sps:$4 sm:$0xff]   ;;  %v10096_v43 = vld [vmem:[%s17374_s4 + $0x5f8] ss:$76 sps:$4 sm:$0xff]   ;;  %v10099_v45 = vld [vmem:[%s17374_s4 + $0x694] ss:$76 sps:$4 sm:$0xff]  }
  0x10   :  { %5336 = vmatprep.subr.bf16.mxu0 %v10055_v16  ;;  %5459 = vmatprep.subr.bf16.mxu1 %v10057_v17  ;;  %v10097_v44 = vld [vmem:[%s17374_s4 + $0x68c] ss:$76 sps:$4 sm:$0xff]   ;;  %v10101_v47 = vld [vmem:[%s17374_s4 + $0x688] ss:$76 sps:$4 sm:$0xff]   ;;  %v10102_v49 = vld [vmem:[%s17374_s4 + $0x690] ss:$76 sps:$4 sm:$0xff]  }
  0x11   :  { %v25_v46 = vld [vmem:[%s17375_s0 + $0x8] sm:$0xff]  ;;  %v10103_v50 = vld [vmem:[%s17374_s4 + $0x724] ss:$76 sps:$4 sm:$0xff]   ;;  %v10115_v58 = vld [vmem:[%s17374_s4 + $0x854] ss:$76 sps:$4 sm:$0xff]  }
  0x12   :  { %v12135_v48 = vpack.c.bf16 %v25_v46, %v25_v46  ;;  %v10105_v51 = vld [vmem:[%s17374_s4 + $0x72c] ss:$76 sps:$4 sm:$0xff]   ;;  %v10108_v53 = vld [vmem:[%s17374_s4 + $0x728] ss:$76 sps:$4 sm:$0xff]   ;;  %v10111_v55 = vld [vmem:[%s17374_s4 + $0x7c4] ss:$76 sps:$4 sm:$0xff]  }
  0x13   :  { %5337 = vmatpush1.bf16.msra.mxu0 %v10059_v18  ;;  %5460 = vmatpush1.bf16.msra.mxu1 %v10060_v19  ;;  %v10107_v52 = vld [vmem:[%s17374_s4 + $0x720] ss:$76 sps:$4 sm:$0xff]   ;;  %v10109_v54 = vld [vmem:[%s17374_s4 + $0x7bc] ss:$76 sps:$4 sm:$0xff]   ;;  %v10113_v56 = vld [vmem:[%s17374_s4 + $0x7b8] ss:$76 sps:$4 sm:$0xff]  }
  0x14   :  { %5338 = vmatprep.subr.bf16.mxu0 %v10061_v20  ;;  %5461 = vmatprep.subr.bf16.mxu1 %v10063_v21  ;;  %v10114_v57 = vld [vmem:[%s17374_s4 + $0x7c0] ss:$76 sps:$4 sm:$0xff]   ;;  %v10117_v59 = vld [vmem:[%s17374_s4 + $0x85c] ss:$76 sps:$4 sm:$0xff]   ;;  %v10120_v61 = vld [vmem:[%s17374_s4 + $0x858] ss:$76 sps:$4 sm:$0xff]  }
  0x15   :  { %5360 = vmatprep.mubr.bf16.mxu0 %v12135_v48  ;;  %5483 = vmatprep.mubr.bf16.mxu1 %v12135_v48  ;;  %v10119_v60 = vld [vmem:[%s17374_s4 + $0x850] ss:$76 sps:$4 sm:$0xff]   ;;  %v10121_v62 = vld [vmem:[%s17374_s4 + $0x8ec] ss:$76 sps:$4 sm:$0xff]   ;;  %v10123_v63 = vld [vmem:[%s17374_s4 + $0x8f4] ss:$76 sps:$4 sm:$0xff]  }
  0x16   :  { %v10125_v0 = vld [vmem:[%s17374_s4 + $0x8e8] ss:$76 sps:$4 sm:$0xff]   ;;  %v10126_v1 = vld [vmem:[%s17374_s4 + $0x8f0] ss:$76 sps:$4 sm:$0xff]   ;;  %v24_v2 = vld [vmem:[%s17375_s0] sm:$0xff] }
  0x17   :  { %5339 = vmatpush1.bf16.msra.mxu0 %v10065_v22  ;;  %5462 = vmatpush1.bf16.msra.mxu1 %v10066_v23  ;;  %v10129_v3 = vld [vmem:[%s17374_s4 + $0x984] ss:$76 sps:$4 sm:$0xff]   ;;  %v10132_v4 = vld [vmem:[%s17374_s4 + $0x98c] ss:$76 sps:$4 sm:$0xff]   ;;  %v12199_v5 = vpack.c.bf16 %v24_v2, %v24_v2  ;;  %v10130_v7 = vld [vmem:[%s17374_s4 + $0x988] ss:$76 sps:$4 sm:$0xff]  }
  0x18   :  { %5340 = vmatprep.subr.bf16.mxu0 %v10067_v24  ;;  %5463 = vmatprep.subr.bf16.mxu1 %v10069_v25  ;;  %v10127_v6 = vld [vmem:[%s17374_s4 + $0x980] ss:$76 sps:$4 sm:$0xff]   ;;  %v10135_v8 = vld [vmem:[%s17374_s4 + $0xa1c] ss:$76 sps:$4 sm:$0xff]   ;;  %v10138_v9 = vld [vmem:[%s17374_s4 + $0xa24] ss:$76 sps:$4 sm:$0xff]  }
  0x19   :  { %v10133_v10 = vld [vmem:[%s17374_s4 + $0xa18] ss:$76 sps:$4 sm:$0xff]   ;;  %v10136_v11 = vld [vmem:[%s17374_s4 + $0xa20] ss:$76 sps:$4 sm:$0xff]   ;;  %v10144_v13 = vld [vmem:[%s17374_s4 + $0xabc] ss:$76 sps:$4 sm:$0xff]  }
  0x1a   :  { %v10141_v12 = vld [vmem:[%s17374_s4 + $0xab4] ss:$76 sps:$4 sm:$0xff]   ;;  %v10139_v14 = vld [vmem:[%s17374_s4 + $0xab0] ss:$76 sps:$4 sm:$0xff]   ;;  %v10142_v15 = vld [vmem:[%s17374_s4 + $0xab8] ss:$76 sps:$4 sm:$0xff]  }
  0x1b   :  { %5341 = vmatpush1.bf16.msra.mxu0 %v10071_v26  ;;  %5464 = vmatpush1.bf16.msra.mxu1 %v10072_v27  ;;  %v10147_v16 = vld [vmem:[%s17374_s4 + $0xb4c] ss:$76 sps:$4 sm:$0xff]   ;;  %v10150_v17 = vld [vmem:[%s17374_s4 + $0xb54] ss:$76 sps:$4 sm:$0xff]   ;;  %v10148_v19 = vld [vmem:[%s17374_s4 + $0xb50] ss:$76 sps:$4 sm:$0xff]  }
  0x1c   :  { %5342 = vmatprep.subr.bf16.mxu0 %v10073_v28  ;;  %5465 = vmatprep.subr.bf16.mxu1 %v10075_v29  ;;  %v10145_v18 = vld [vmem:[%s17374_s4 + $0xb48] ss:$76 sps:$4 sm:$0xff]   ;;  %v10153_v20 = vld [vmem:[%s17374_s4 + $0xbe4] ss:$76 sps:$4 sm:$0xff]   ;;  %v10156_v21 = vld [vmem:[%s17374_s4 + $0xbec] ss:$76 sps:$4 sm:$0xff]  }
  0x1d   :  { %v10151_v22 = vld [vmem:[%s17374_s4 + $0xbe0] ss:$76 sps:$4 sm:$0xff]   ;;  %v10154_v23 = vld [vmem:[%s17374_s4 + $0xbe8] ss:$76 sps:$4 sm:$0xff]   ;;  %v10162_v25 = vld [vmem:[%s17374_s4 + $0xc84] ss:$76 sps:$4 sm:$0xff]  }
  0x1e   :  { %v10159_v24 = vld [vmem:[%s17374_s4 + $0xc7c] ss:$76 sps:$4 sm:$0xff]   ;;  %v10157_v26 = vld [vmem:[%s17374_s4 + $0xc78] ss:$76 sps:$4 sm:$0xff]   ;;  %v10160_v27 = vld [vmem:[%s17374_s4 + $0xc80] ss:$76 sps:$4 sm:$0xff]  }
  0x1f   :  { %5343 = vmatpush1.bf16.msra.mxu0 %v10077_v30  ;;  %5466 = vmatpush1.bf16.msra.mxu1 %v10078_v31  ;;  %v10165_v28 = vld [vmem:[%s17374_s4 + $0xd14] ss:$76 sps:$4 sm:$0xff]   ;;  %v10168_v29 = vld [vmem:[%s17374_s4 + $0xd1c] ss:$76 sps:$4 sm:$0xff]   ;;  %v10214_v2 = vld [vmem:[%s17374_s4 + $0x11d8] ss:$76 sps:$4 sm:$0xff]  }
  0x20   :  { %5344 = vmatprep.subr.bf16.mxu0 %v10079_v32  ;;  %5467 = vmatprep.subr.bf16.mxu1 %v10081_v33  ;;  %v27_v30 = vld [vmem:[%s17375_s0 + $0x18] sm:$0xff]  ;;  %v10189_v46 = vld [vmem:[%s17374_s4 + $0xf74] ss:$76 sps:$4 sm:$0xff]  }
  0x21   :  { %v10163_v31 = vld [vmem:[%s17374_s4 + $0xd10] ss:$76 sps:$4 sm:$0xff]   ;;  %v12281_v32 = vpack.c.bf16 %v27_v30, %v27_v30  ;;  %v10166_v33 = vld [vmem:[%s17374_s4 + $0xd18] ss:$76 sps:$4 sm:$0xff]   ;;  %v10247_v30 = vld [vmem:[%s17374_s4 + $0x1560] ss:$76 sps:$4 sm:$0xff]  }
  0x23   :  { %5345 = vmatpush1.bf16.msra.mxu0 %v10083_v34  ;;  %5468 = vmatpush1.bf16.msra.mxu1 %v10084_v35  ;;  %v10171_v34 = vld [vmem:[%s17374_s4 + $0xdac] ss:$76 sps:$4 sm:$0xff]   ;;  %v10174_v35 = vld [vmem:[%s17374_s4 + $0xdb4] ss:$76 sps:$4 sm:$0xff]  }
  0x24   :  { %5346 = vmatprep.subr.bf16.mxu0 %v10085_v36  ;;  %5469 = vmatprep.subr.bf16.mxu1 %v10087_v37  ;;  %v10169_v36 = vld [vmem:[%s17374_s4 + $0xda8] ss:$76 sps:$4 sm:$0xff]   ;;  %v10172_v37 = vld [vmem:[%s17374_s4 + $0xdb0] ss:$76 sps:$4 sm:$0xff]  }
  0x27   :  { %5347 = vmatpush1.bf16.msra.mxu0 %v10089_v38  ;;  %5470 = vmatpush1.bf16.msra.mxu1 %v10090_v39  ;;  %v10177_v38 = vld [vmem:[%s17374_s4 + $0xe44] ss:$76 sps:$4 sm:$0xff]   ;;  %v10180_v39 = vld [vmem:[%s17374_s4 + $0xe4c] ss:$76 sps:$4 sm:$0xff]  }
  0x28   :  { %5348 = vmatprep.subr.bf16.mxu0 %v10091_v40  ;;  %5471 = vmatprep.subr.bf16.mxu1 %v10093_v41  ;;  %v10175_v40 = vld [vmem:[%s17374_s4 + $0xe40] ss:$76 sps:$4 sm:$0xff]   ;;  %v10178_v41 = vld [vmem:[%s17374_s4 + $0xe48] ss:$76 sps:$4 sm:$0xff]  }
  0x2b   :  { %5349 = vmatpush1.bf16.msra.mxu0 %v10095_v42  ;;  %5472 = vmatpush1.bf16.msra.mxu1 %v10096_v43  ;;  %v10183_v42 = vld [vmem:[%s17374_s4 + $0xedc] ss:$76 sps:$4 sm:$0xff]   ;;  %v10186_v43 = vld [vmem:[%s17374_s4 + $0xee4] ss:$76 sps:$4 sm:$0xff]  }
  0x2c   :  { %5350 = vmatprep.subr.bf16.mxu0 %v10097_v44  ;;  %5473 = vmatprep.subr.bf16.mxu1 %v10099_v45  ;;  %v10181_v44 = vld [vmem:[%s17374_s4 + $0xed8] ss:$76 sps:$4 sm:$0xff]   ;;  %v10184_v45 = vld [vmem:[%s17374_s4 + $0xee0] ss:$76 sps:$4 sm:$0xff]  }
  0x2f   :  { %5351 = vmatpush1.bf16.msra.mxu0 %v10101_v47  ;;  %5474 = vmatpush1.bf16.msra.mxu1 %v10102_v49  ;;  %v10192_v47 = vld [vmem:[%s17374_s4 + $0xf7c] ss:$76 sps:$4 sm:$0xff]  }
  0x30   :  { %5352 = vmatprep.subr.bf16.mxu0 %v10103_v50  ;;  %5475 = vmatprep.subr.bf16.mxu1 %v10105_v51  ;;  %v10187_v49 = vld [vmem:[%s17374_s4 + $0xf70] ss:$76 sps:$4 sm:$0xff]   ;;  %v10190_v50 = vld [vmem:[%s17374_s4 + $0xf78] ss:$76 sps:$4 sm:$0xff]  }
  0x31   :  { %v10195_v51 = vld [vmem:[%s17374_s4 + $0x100c] ss:$76 sps:$4 sm:$0xff]  }
  0x33   :  { %5353 = vmatpush1.bf16.msra.mxu0 %v10107_v52  ;;  %5476 = vmatpush1.bf16.msra.mxu1 %v10108_v53  ;;  %v10198_v52 = vld [vmem:[%s17374_s4 + $0x1014] ss:$76 sps:$4 sm:$0xff]  }
  0x34   :  { %5354 = vmatprep.subr.bf16.mxu0 %v10109_v54  ;;  %5477 = vmatprep.subr.bf16.mxu1 %v10111_v55  ;;  %v10193_v53 = vld [vmem:[%s17374_s4 + $0x1008] ss:$76 sps:$4 sm:$0xff]   ;;  %v10196_v54 = vld [vmem:[%s17374_s4 + $0x1010] ss:$76 sps:$4 sm:$0xff]  }
  0x35   :  { %v10201_v55 = vld [vmem:[%s17374_s4 + $0x10a4] ss:$76 sps:$4 sm:$0xff]  }
  0x37   :  { %5355 = vmatpush1.bf16.msra.mxu0 %v10113_v56  ;;  %5478 = vmatpush1.bf16.msra.mxu1 %v10114_v57  ;;  %v10204_v56 = vld [vmem:[%s17374_s4 + $0x10ac] ss:$76 sps:$4 sm:$0xff]  }
  0x38   :  { %5356 = vmatprep.subr.bf16.mxu0 %v10115_v58  ;;  %5479 = vmatprep.subr.bf16.mxu1 %v10117_v59  ;;  %v10199_v57 = vld [vmem:[%s17374_s4 + $0x10a0] ss:$76 sps:$4 sm:$0xff]   ;;  %v10202_v58 = vld [vmem:[%s17374_s4 + $0x10a8] ss:$76 sps:$4 sm:$0xff]  }
  0x39   :  { %v10207_v59 = vld [vmem:[%s17374_s4 + $0x113c] ss:$76 sps:$4 sm:$0xff]  }
  0x3b   :  { %5357 = vmatpush1.bf16.msra.mxu0 %v10119_v60  ;;  %5480 = vmatpush1.bf16.msra.mxu1 %v10120_v61  ;;  %v10210_v60 = vld [vmem:[%s17374_s4 + $0x1144] ss:$76 sps:$4 sm:$0xff]  }
  0x3c   :  { %5358 = vmatprep.subr.bf16.mxu0 %v10121_v62  ;;  %5481 = vmatprep.subr.bf16.mxu1 %v10123_v63  ;;  %v10205_v61 = vld [vmem:[%s17374_s4 + $0x1138] ss:$76 sps:$4 sm:$0xff]   ;;  %v10208_v62 = vld [vmem:[%s17374_s4 + $0x1140] ss:$76 sps:$4 sm:$0xff]  }
  0x3d   :  { %v10213_v63 = vld [vmem:[%s17374_s4 + $0x11d4] ss:$76 sps:$4 sm:$0xff]  }
  0x3f   :  { %5359 = vmatpush1.bf16.msra.mxu0 %v10125_v0  ;;  %5482 = vmatpush1.bf16.msra.mxu1 %v10126_v1  ;;  %v10216_v0 = vld [vmem:[%s17374_s4 + $0x11dc] ss:$76 sps:$4 sm:$0xff]  }
  0x40   :  { %5369 = vmatprep.subr.bf16.mxu0 %v10129_v3  ;;  %5492 = vmatprep.subr.bf16.mxu1 %v10132_v4  ;;  %v10211_v1 = vld [vmem:[%s17374_s4 + $0x11d0] ss:$76 sps:$4 sm:$0xff]   ;;  %v10219_v3 = vld [vmem:[%s17374_s4 + $0x126c] ss:$76 sps:$4 sm:$0xff]   ;;  %v10222_v4 = vld [vmem:[%s17374_s4 + $0x1274] ss:$76 sps:$4 sm:$0xff]  }
  0x42   :  { %5361 = vmatmul.mubr.bf16.vlgmr.msra.gmra.mrb[0].mxu0 %v12199_v5  ;;  %5484 = vmatmul.mubr.bf16.vlgmr.msra.gmra.mrb[0].mxu1 %v12199_v5 }
  0x43   :  { %5370 = vmatpush1.bf16.msra.mxu0 %v10127_v6  ;;  %5493 = vmatpush1.bf16.msra.mxu1 %v10130_v7  ;;  %v10217_v6 = vld [vmem:[%s17374_s4 + $0x1268] ss:$76 sps:$4 sm:$0xff]   ;;  %v10220_v7 = vld [vmem:[%s17374_s4 + $0x1270] ss:$76 sps:$4 sm:$0xff]  }
  0x44   :  { %5371 = vmatprep.subr.bf16.mxu0 %v10135_v8  ;;  %5494 = vmatprep.subr.bf16.mxu1 %v10138_v9  ;;  %v10225_v8 = vld [vmem:[%s17374_s4 + $0x1304] ss:$76 sps:$4 sm:$0xff]  }
  0x45   :  { %5401 = vmatprep.mubr.bf16.mxu0 %v12281_v32  ;;  %5524 = vmatprep.mubr.bf16.mxu1 %v12281_v32  ;;  %v26_v9 = vld [vmem:[%s17375_s0 + $0x10] sm:$0xff] }
  0x47   :  { %5372 = vmatpush1.bf16.msra.mxu0 %v10133_v10  ;;  %5495 = vmatpush1.bf16.msra.mxu1 %v10136_v11  ;;  %v10228_v10 = vld [vmem:[%s17374_s4 + $0x130c] ss:$76 sps:$4 sm:$0xff]  }
  0x48   :  { %5373 = vmatprep.subr.bf16.mxu0 %v10141_v12  ;;  %5496 = vmatprep.subr.bf16.mxu1 %v10144_v13  ;;  %v10223_v11 = vld [vmem:[%s17374_s4 + $0x1300] ss:$76 sps:$4 sm:$0xff]   ;;  %v12408_v12 = vpack.c.bf16 %v26_v9, %v26_v9  ;;  %v10226_v13 = vld [vmem:[%s17374_s4 + $0x1308] ss:$76 sps:$4 sm:$0xff]   ;;  %v10307_v9 = vld [vmem:[%s17374_s4 + $0x1b50] ss:$76 sps:$4 sm:$0xff]  }
  0x4b   :  { %5374 = vmatpush1.bf16.msra.mxu0 %v10139_v14  ;;  %5497 = vmatpush1.bf16.msra.mxu1 %v10142_v15  ;;  %v10231_v14 = vld [vmem:[%s17374_s4 + $0x139c] ss:$76 sps:$4 sm:$0xff]   ;;  %v10234_v15 = vld [vmem:[%s17374_s4 + $0x13a4] ss:$76 sps:$4 sm:$0xff]  }
  0x4c   :  { %5375 = vmatprep.subr.bf16.mxu0 %v10147_v16  ;;  %5498 = vmatprep.subr.bf16.mxu1 %v10150_v17  ;;  %v29_v16 = vld [vmem:[%s17375_s0 + $0x28] sm:$0xff] }
  0x4d   :  { %v12422_v17 = vpack.c.bf16 %v29_v16, %v29_v16  ;;  %v28_v16 = vld [vmem:[%s17375_s0 + $0x20] sm:$0xff] }
  0x4f   :  { %5376 = vmatpush1.bf16.msra.mxu0 %v10145_v18  ;;  %5499 = vmatpush1.bf16.msra.mxu1 %v10148_v19  ;;  %v10229_v18 = vld [vmem:[%s17374_s4 + $0x1398] ss:$76 sps:$4 sm:$0xff]   ;;  %v10232_v19 = vld [vmem:[%s17374_s4 + $0x13a0] ss:$76 sps:$4 sm:$0xff]  }
  0x50   :  { %5377 = vmatprep.subr.bf16.mxu0 %v10153_v20  ;;  %5500 = vmatprep.subr.bf16.mxu1 %v10156_v21  ;;  %v10237_v20 = vld [vmem:[%s17374_s4 + $0x1434] ss:$76 sps:$4 sm:$0xff]   ;;  %v10240_v21 = vld [vmem:[%s17374_s4 + $0x143c] ss:$76 sps:$4 sm:$0xff]  }
  0x53   :  { %5378 = vmatpush1.bf16.msra.mxu0 %v10151_v22  ;;  %5501 = vmatpush1.bf16.msra.mxu1 %v10154_v23  ;;  %v10235_v22 = vld [vmem:[%s17374_s4 + $0x1430] ss:$76 sps:$4 sm:$0xff]   ;;  %v10238_v23 = vld [vmem:[%s17374_s4 + $0x1438] ss:$76 sps:$4 sm:$0xff]  }
  0x54   :  { %5379 = vmatprep.subr.bf16.mxu0 %v10159_v24  ;;  %5502 = vmatprep.subr.bf16.mxu1 %v10162_v25  ;;  %v10243_v24 = vld [vmem:[%s17374_s4 + $0x14cc] ss:$76 sps:$4 sm:$0xff]   ;;  %v10246_v25 = vld [vmem:[%s17374_s4 + $0x14d4] ss:$76 sps:$4 sm:$0xff]  }
  0x57   :  { %5380 = vmatpush1.bf16.msra.mxu0 %v10157_v26  ;;  %5503 = vmatpush1.bf16.msra.mxu1 %v10160_v27  ;;  %v10241_v26 = vld [vmem:[%s17374_s4 + $0x14c8] ss:$76 sps:$4 sm:$0xff]   ;;  %v10244_v27 = vld [vmem:[%s17374_s4 + $0x14d0] ss:$76 sps:$4 sm:$0xff]  }
  0x58   :  { %5381 = vmatprep.subr.bf16.mxu0 %v10165_v28  ;;  %5504 = vmatprep.subr.bf16.mxu1 %v10168_v29  ;;  %v10249_v28 = vld [vmem:[%s17374_s4 + $0x1564] ss:$76 sps:$4 sm:$0xff]   ;;  %v10252_v29 = vld [vmem:[%s17374_s4 + $0x156c] ss:$76 sps:$4 sm:$0xff]  }
  0x5b   :  { %5382 = vmatpush1.bf16.msra.mxu0 %v10163_v31  ;;  %5505 = vmatpush1.bf16.msra.mxu1 %v10166_v33  ;;  %v10250_v31 = vld [vmem:[%s17374_s4 + $0x1568] ss:$76 sps:$4 sm:$0xff]  }
  0x5c   :  { %5383 = vmatprep.subr.bf16.mxu0 %v10171_v34  ;;  %5506 = vmatprep.subr.bf16.mxu1 %v10174_v35  ;;  %v10255_v33 = vld [vmem:[%s17374_s4 + $0x15fc] ss:$76 sps:$4 sm:$0xff]   ;;  %v10258_v34 = vld [vmem:[%s17374_s4 + $0x1604] ss:$76 sps:$4 sm:$0xff]  }
  0x5d   :  { %v10253_v35 = vld [vmem:[%s17374_s4 + $0x15f8] ss:$76 sps:$4 sm:$0xff]  }
  0x5f   :  { %5384 = vmatpush1.bf16.msra.mxu0 %v10169_v36  ;;  %5507 = vmatpush1.bf16.msra.mxu1 %v10172_v37  ;;  %v10256_v36 = vld [vmem:[%s17374_s4 + $0x1600] ss:$76 sps:$4 sm:$0xff]  }
  0x60   :  { %5385 = vmatprep.subr.bf16.mxu0 %v10177_v38  ;;  %5508 = vmatprep.subr.bf16.mxu1 %v10180_v39  ;;  %v10261_v37 = vld [vmem:[%s17374_s4 + $0x1694] ss:$76 sps:$4 sm:$0xff]   ;;  %v10264_v38 = vld [vmem:[%s17374_s4 + $0x169c] ss:$76 sps:$4 sm:$0xff]  }
  0x61   :  { %v10259_v39 = vld [vmem:[%s17374_s4 + $0x1690] ss:$76 sps:$4 sm:$0xff]  }
  0x63   :  { %5386 = vmatpush1.bf16.msra.mxu0 %v10175_v40  ;;  %5509 = vmatpush1.bf16.msra.mxu1 %v10178_v41  ;;  %v10262_v40 = vld [vmem:[%s17374_s4 + $0x1698] ss:$76 sps:$4 sm:$0xff]  }
  0x64   :  { %5387 = vmatprep.subr.bf16.mxu0 %v10183_v42  ;;  %5510 = vmatprep.subr.bf16.mxu1 %v10186_v43  ;;  %v10267_v41 = vld [vmem:[%s17374_s4 + $0x172c] ss:$76 sps:$4 sm:$0xff]   ;;  %v10270_v42 = vld [vmem:[%s17374_s4 + $0x1734] ss:$76 sps:$4 sm:$0xff]  }
  0x65   :  { %v10265_v43 = vld [vmem:[%s17374_s4 + $0x1728] ss:$76 sps:$4 sm:$0xff]  }
  0x67   :  { %5388 = vmatpush1.bf16.msra.mxu0 %v10181_v44  ;;  %5511 = vmatpush1.bf16.msra.mxu1 %v10184_v45  ;;  %v10268_v44 = vld [vmem:[%s17374_s4 + $0x1730] ss:$76 sps:$4 sm:$0xff]  }
  0x68   :  { %5389 = vmatprep.subr.bf16.mxu0 %v10189_v46  ;;  %5512 = vmatprep.subr.bf16.mxu1 %v10192_v47  ;;  %v10273_v45 = vld [vmem:[%s17374_s4 + $0x17c4] ss:$76 sps:$4 sm:$0xff]   ;;  %v10276_v46 = vld [vmem:[%s17374_s4 + $0x17cc] ss:$76 sps:$4 sm:$0xff]  }
  0x69   :  { %v10271_v47 = vld [vmem:[%s17374_s4 + $0x17c0] ss:$76 sps:$4 sm:$0xff]  }
  0x6b   :  { %5390 = vmatpush1.bf16.msra.mxu0 %v10187_v49  ;;  %5513 = vmatpush1.bf16.msra.mxu1 %v10190_v50  ;;  %v10274_v49 = vld [vmem:[%s17374_s4 + $0x17c8] ss:$76 sps:$4 sm:$0xff]  }
  0x6c   :  { %5391 = vmatprep.subr.bf16.mxu0 %v10195_v51  ;;  %5514 = vmatprep.subr.bf16.mxu1 %v10198_v52  ;;  %v10279_v50 = vld [vmem:[%s17374_s4 + $0x185c] ss:$76 sps:$4 sm:$0xff]   ;;  %v10282_v51 = vld [vmem:[%s17374_s4 + $0x1864] ss:$76 sps:$4 sm:$0xff]  }
  0x6d   :  { %v10277_v52 = vld [vmem:[%s17374_s4 + $0x1858] ss:$76 sps:$4 sm:$0xff]  }
  0x6f   :  { %5392 = vmatpush1.bf16.msra.mxu0 %v10193_v53  ;;  %5515 = vmatpush1.bf16.msra.mxu1 %v10196_v54  ;;  %v10280_v53 = vld [vmem:[%s17374_s4 + $0x1860] ss:$76 sps:$4 sm:$0xff]  }
  0x70   :  { %5393 = vmatprep.subr.bf16.mxu0 %v10201_v55  ;;  %5516 = vmatprep.subr.bf16.mxu1 %v10204_v56  ;;  %v10285_v54 = vld [vmem:[%s17374_s4 + $0x18f4] ss:$76 sps:$4 sm:$0xff]   ;;  %v10288_v55 = vld [vmem:[%s17374_s4 + $0x18fc] ss:$76 sps:$4 sm:$0xff]  }
  0x71   :  { %v10283_v56 = vld [vmem:[%s17374_s4 + $0x18f0] ss:$76 sps:$4 sm:$0xff]  }
  0x73   :  { %5394 = vmatpush1.bf16.msra.mxu0 %v10199_v57  ;;  %5517 = vmatpush1.bf16.msra.mxu1 %v10202_v58  ;;  %v10286_v57 = vld [vmem:[%s17374_s4 + $0x18f8] ss:$76 sps:$4 sm:$0xff]  }
  0x74   :  { %5395 = vmatprep.subr.bf16.mxu0 %v10207_v59  ;;  %5518 = vmatprep.subr.bf16.mxu1 %v10210_v60  ;;  %v10291_v58 = vld [vmem:[%s17374_s4 + $0x198c] ss:$76 sps:$4 sm:$0xff]   ;;  %v10294_v59 = vld [vmem:[%s17374_s4 + $0x1994] ss:$76 sps:$4 sm:$0xff]  }
  0x75   :  { %v10289_v60 = vld [vmem:[%s17374_s4 + $0x1988] ss:$76 sps:$4 sm:$0xff]  }
  0x77   :  { %5396 = vmatpush1.bf16.msra.mxu0 %v10205_v61  ;;  %5519 = vmatpush1.bf16.msra.mxu1 %v10208_v62  ;;  %v10292_v61 = vld [vmem:[%s17374_s4 + $0x1990] ss:$76 sps:$4 sm:$0xff]  }
  0x78   :  { %5397 = vmatprep.subr.bf16.mxu0 %v10213_v63  ;;  %5520 = vmatprep.subr.bf16.mxu1 %v10216_v0  ;;  %v10297_v62 = vld [vmem:[%s17374_s4 + $0x1a24] ss:$76 sps:$4 sm:$0xff]   ;;  %v10300_v63 = vld [vmem:[%s17374_s4 + $0x1a2c] ss:$76 sps:$4 sm:$0xff]  }
  0x79   :  { %v10295_v0 = vld [vmem:[%s17374_s4 + $0x1a20] ss:$76 sps:$4 sm:$0xff]  }
  0x7b   :  { %5398 = vmatpush1.bf16.msra.mxu0 %v10211_v1  ;;  %5521 = vmatpush1.bf16.msra.mxu1 %v10214_v2  ;;  %v10298_v1 = vld [vmem:[%s17374_s4 + $0x1a28] ss:$76 sps:$4 sm:$0xff]  }
  0x7c   :  { %5399 = vmatprep.subr.bf16.mxu0 %v10219_v3  ;;  %5522 = vmatprep.subr.bf16.mxu1 %v10222_v4  ;;  %v10303_v2 = vld [vmem:[%s17374_s4 + $0x1abc] ss:$76 sps:$4 sm:$0xff]   ;;  %v10306_v3 = vld [vmem:[%s17374_s4 + $0x1ac4] ss:$76 sps:$4 sm:$0xff]  }
  0x7d   :  { %v10301_v4 = vld [vmem:[%s17374_s4 + $0x1ab8] ss:$76 sps:$4 sm:$0xff]  }
  0x7f   :  { %5400 = vmatpush1.bf16.msra.mxu0 %v10217_v6  ;;  %5523 = vmatpush1.bf16.msra.mxu1 %v10220_v7  ;;  %v10304_v6 = vld [vmem:[%s17374_s4 + $0x1ac0] ss:$76 sps:$4 sm:$0xff]  }
  0x80   :  { %5410 = vmatprep.subr.bf16.mxu0 %v10225_v8  ;;  %5533 = vmatprep.subr.bf16.mxu1 %v10228_v10  ;;  %v10309_v7 = vld [vmem:[%s17374_s4 + $0x1b54] ss:$76 sps:$4 sm:$0xff]   ;;  %v10312_v8 = vld [vmem:[%s17374_s4 + $0x1b5c] ss:$76 sps:$4 sm:$0xff]   ;;  %v10310_v10 = vld [vmem:[%s17374_s4 + $0x1b58] ss:$76 sps:$4 sm:$0xff]  }
  0x82   :  { %5402 = vmatmul.mubr.bf16.vlgmr.msra.gmra.mrb[0].mxu0 %v12408_v12  ;;  %5525 = vmatmul.mubr.bf16.vlgmr.msra.gmra.mrb[0].mxu1 %v12408_v12 }
  0x83   :  { %5411 = vmatpush1.bf16.msra.mxu0 %v10223_v11  ;;  %5534 = vmatpush1.bf16.msra.mxu1 %v10226_v13  ;;  %v10315_v11 = vld [vmem:[%s17374_s4 + $0x1bec] ss:$76 sps:$4 sm:$0xff]   ;;  %v10318_v13 = vld [vmem:[%s17374_s4 + $0x1bf4] ss:$76 sps:$4 sm:$0xff]  }
  0x84   :  { %5412 = vmatprep.subr.bf16.mxu0 %v10231_v14  ;;  %5535 = vmatprep.subr.bf16.mxu1 %v10234_v15  ;;  %v10313_v14 = vld [vmem:[%s17374_s4 + $0x1be8] ss:$76 sps:$4 sm:$0xff]   ;;  %v10316_v15 = vld [vmem:[%s17374_s4 + $0x1bf0] ss:$76 sps:$4 sm:$0xff]  }
  0x85   :  { %5565 = vmatprep.mubr.bf16.mxu1 %v12422_v17  ;;  %5442 = vmatprep.mubr.bf16.mxu0 %v12422_v17 }
  0x87   :  { %5413 = vmatpush1.bf16.msra.mxu0 %v10229_v18  ;;  %5536 = vmatpush1.bf16.msra.mxu1 %v10232_v19  ;;  %v10321_v18 = vld [vmem:[%s17374_s4 + $0x14] ss:$76 sps:$4 sm:$0xff]   ;;  %v10324_v19 = vld [vmem:[%s17374_s4 + $0x1c] ss:$76 sps:$4 sm:$0xff]  }
  0x88   :  { %5414 = vmatprep.subr.bf16.mxu0 %v10237_v20  ;;  %5537 = vmatprep.subr.bf16.mxu1 %v10240_v21  ;;  %v12611_v20 = vpack.c.bf16 %v28_v16, %v28_v16  ;;  %v10319_v21 = vld [vmem:[%s17374_s4 + $0x10] ss:$76 sps:$4 sm:$0xff]   ;;  %v10408_v16 = vld [vmem:[%s17374_s4 + $0x86c] ss:$76 sps:$4 sm:$0xff]  }
  0x8b   :  { %5415 = vmatpush1.bf16.msra.mxu0 %v10235_v22  ;;  %5538 = vmatpush1.bf16.msra.mxu1 %v10238_v23  ;;  %v10322_v22 = vld [vmem:[%s17374_s4 + $0x18] ss:$76 sps:$4 sm:$0xff]  }
  0x8c   :  { %5416 = vmatprep.subr.bf16.mxu0 %v10243_v24  ;;  %5539 = vmatprep.subr.bf16.mxu1 %v10246_v25  ;;  %v10327_v23 = vld [vmem:[%s17374_s4 + $0xac] ss:$76 sps:$4 sm:$0xff]   ;;  %v10330_v24 = vld [vmem:[%s17374_s4 + $0xb4] ss:$76 sps:$4 sm:$0xff]  }
  0x8d   :  { %v10325_v25 = vld [vmem:[%s17374_s4 + $0xa8] ss:$76 sps:$4 sm:$0xff]  }
  0x8f   :  { %5417 = vmatpush1.bf16.msra.mxu0 %v10241_v26  ;;  %5540 = vmatpush1.bf16.msra.mxu1 %v10244_v27  ;;  %v10328_v26 = vld [vmem:[%s17374_s4 + $0xb0] ss:$76 sps:$4 sm:$0xff]  }
  0x90   :  { %5418 = vmatprep.subr.bf16.mxu0 %v10249_v28  ;;  %5541 = vmatprep.subr.bf16.mxu1 %v10252_v29  ;;  %v10333_v27 = vld [vmem:[%s17374_s4 + $0x144] ss:$76 sps:$4 sm:$0xff]   ;;  %v10336_v28 = vld [vmem:[%s17374_s4 + $0x14c] ss:$76 sps:$4 sm:$0xff]  }
  0x91   :  { %v10331_v29 = vld [vmem:[%s17374_s4 + $0x140] ss:$76 sps:$4 sm:$0xff]  }
  0x93   :  { %5419 = vmatpush1.bf16.msra.mxu0 %v10247_v30  ;;  %5542 = vmatpush1.bf16.msra.mxu1 %v10250_v31  ;;  %v10334_v30 = vld [vmem:[%s17374_s4 + $0x148] ss:$76 sps:$4 sm:$0xff]  }
  0x94   :  { %5420 = vmatprep.subr.bf16.mxu0 %v10255_v33  ;;  %5543 = vmatprep.subr.bf16.mxu1 %v10258_v34  ;;  %v10339_v31 = vld [vmem:[%s17374_s4 + $0x1dc] ss:$76 sps:$4 sm:$0xff]   ;;  %v10342_v33 = vld [vmem:[%s17374_s4 + $0x1e4] ss:$76 sps:$4 sm:$0xff]  }
  0x95   :  { %v10337_v34 = vld [vmem:[%s17374_s4 + $0x1d8] ss:$76 sps:$4 sm:$0xff]  }
  0x97   :  { %5421 = vmatpush1.bf16.msra.mxu0 %v10253_v35  ;;  %5544 = vmatpush1.bf16.msra.mxu1 %v10256_v36  ;;  %v10340_v35 = vld [vmem:[%s17374_s4 + $0x1e0] ss:$76 sps:$4 sm:$0xff]  }
  0x98   :  { %5422 = vmatprep.subr.bf16.mxu0 %v10261_v37  ;;  %5545 = vmatprep.subr.bf16.mxu1 %v10264_v38  ;;  %v10345_v36 = vld [vmem:[%s17374_s4 + $0x274] ss:$76 sps:$4 sm:$0xff]   ;;  %v10348_v37 = vld [vmem:[%s17374_s4 + $0x27c] ss:$76 sps:$4 sm:$0xff]  }
  0x99   :  { %v10343_v38 = vld [vmem:[%s17374_s4 + $0x270] ss:$76 sps:$4 sm:$0xff]  }
  0x9b   :  { %5423 = vmatpush1.bf16.msra.mxu0 %v10259_v39  ;;  %5546 = vmatpush1.bf16.msra.mxu1 %v10262_v40  ;;  %v10346_v39 = vld [vmem:[%s17374_s4 + $0x278] ss:$76 sps:$4 sm:$0xff]  }
  0x9c   :  { %5424 = vmatprep.subr.bf16.mxu0 %v10267_v41  ;;  %5547 = vmatprep.subr.bf16.mxu1 %v10270_v42  ;;  %v10351_v40 = vld [vmem:[%s17374_s4 + $0x30c] ss:$76 sps:$4 sm:$0xff]   ;;  %v10354_v41 = vld [vmem:[%s17374_s4 + $0x314] ss:$76 sps:$4 sm:$0xff]  }
  0x9d   :  { %v10349_v42 = vld [vmem:[%s17374_s4 + $0x308] ss:$76 sps:$4 sm:$0xff]  }
  0x9f   :  { %5425 = vmatpush1.bf16.msra.mxu0 %v10265_v43  ;;  %5548 = vmatpush1.bf16.msra.mxu1 %v10268_v44  ;;  %v10352_v43 = vld [vmem:[%s17374_s4 + $0x310] ss:$76 sps:$4 sm:$0xff]  }
  0xa0   :  { %5426 = vmatprep.subr.bf16.mxu0 %v10273_v45  ;;  %5549 = vmatprep.subr.bf16.mxu1 %v10276_v46  ;;  %v10357_v44 = vld [vmem:[%s17374_s4 + $0x3a4] ss:$76 sps:$4 sm:$0xff]   ;;  %v10360_v45 = vld [vmem:[%s17374_s4 + $0x3ac] ss:$76 sps:$4 sm:$0xff]  }
  0xa1   :  { %v10355_v46 = vld [vmem:[%s17374_s4 + $0x3a0] ss:$76 sps:$4 sm:$0xff]  }
  0xa3   :  { %5427 = vmatpush1.bf16.msra.mxu0 %v10271_v47  ;;  %5550 = vmatpush1.bf16.msra.mxu1 %v10274_v49  ;;  %v10358_v47 = vld [vmem:[%s17374_s4 + $0x3a8] ss:$76 sps:$4 sm:$0xff]  }
  0xa4   :  { %5428 = vmatprep.subr.bf16.mxu0 %v10279_v50  ;;  %5551 = vmatprep.subr.bf16.mxu1 %v10282_v51  ;;  %v10363_v49 = vld [vmem:[%s17374_s4 + $0x43c] ss:$76 sps:$4 sm:$0xff]   ;;  %v10366_v50 = vld [vmem:[%s17374_s4 + $0x444] ss:$76 sps:$4 sm:$0xff]  }
  0xa5   :  { %v10361_v51 = vld [vmem:[%s17374_s4 + $0x438] ss:$76 sps:$4 sm:$0xff]  }
  0xa7   :  { %5429 = vmatpush1.bf16.msra.mxu0 %v10277_v52  ;;  %5552 = vmatpush1.bf16.msra.mxu1 %v10280_v53  ;;  %v10364_v52 = vld [vmem:[%s17374_s4 + $0x440] ss:$76 sps:$4 sm:$0xff]  }
  0xa8   :  { %5430 = vmatprep.subr.bf16.mxu0 %v10285_v54  ;;  %5553 = vmatprep.subr.bf16.mxu1 %v10288_v55  ;;  %v10369_v53 = vld [vmem:[%s17374_s4 + $0x4d4] ss:$76 sps:$4 sm:$0xff]   ;;  %v10372_v54 = vld [vmem:[%s17374_s4 + $0x4dc] ss:$76 sps:$4 sm:$0xff]  }
  0xa9   :  { %v10367_v55 = vld [vmem:[%s17374_s4 + $0x4d0] ss:$76 sps:$4 sm:$0xff]  }
  0xab   :  { %5431 = vmatpush1.bf16.msra.mxu0 %v10283_v56  ;;  %5554 = vmatpush1.bf16.msra.mxu1 %v10286_v57  ;;  %v10370_v56 = vld [vmem:[%s17374_s4 + $0x4d8] ss:$76 sps:$4 sm:$0xff]  }
  0xac   :  { %5432 = vmatprep.subr.bf16.mxu0 %v10291_v58  ;;  %5555 = vmatprep.subr.bf16.mxu1 %v10294_v59  ;;  %v10375_v57 = vld [vmem:[%s17374_s4 + $0x56c] ss:$76 sps:$4 sm:$0xff]   ;;  %v10378_v58 = vld [vmem:[%s17374_s4 + $0x574] ss:$76 sps:$4 sm:$0xff]  }
  0xad   :  { %v10373_v59 = vld [vmem:[%s17374_s4 + $0x568] ss:$76 sps:$4 sm:$0xff]  }
  0xaf   :  { %5433 = vmatpush1.bf16.msra.mxu0 %v10289_v60  ;;  %5556 = vmatpush1.bf16.msra.mxu1 %v10292_v61  ;;  %v10376_v60 = vld [vmem:[%s17374_s4 + $0x570] ss:$76 sps:$4 sm:$0xff]  }
  0xb0   :  { %5434 = vmatprep.subr.bf16.mxu0 %v10297_v62  ;;  %5557 = vmatprep.subr.bf16.mxu1 %v10300_v63  ;;  %v10381_v61 = vld [vmem:[%s17374_s4 + $0x604] ss:$76 sps:$4 sm:$0xff]   ;;  %v10384_v62 = vld [vmem:[%s17374_s4 + $0x60c] ss:$76 sps:$4 sm:$0xff]  }
  0xb1   :  { %v10379_v63 = vld [vmem:[%s17374_s4 + $0x600] ss:$76 sps:$4 sm:$0xff]  }
  0xb3   :  { %5435 = vmatpush1.bf16.msra.mxu0 %v10295_v0  ;;  %5558 = vmatpush1.bf16.msra.mxu1 %v10298_v1  ;;  %v10382_v0 = vld [vmem:[%s17374_s4 + $0x608] ss:$76 sps:$4 sm:$0xff]  }
  0xb4   :  { %5436 = vmatprep.subr.bf16.mxu0 %v10303_v2  ;;  %5559 = vmatprep.subr.bf16.mxu1 %v10306_v3  ;;  %v10387_v1 = vld [vmem:[%s17374_s4 + $0x69c] ss:$76 sps:$4 sm:$0xff]   ;;  %v10390_v2 = vld [vmem:[%s17374_s4 + $0x6a4] ss:$76 sps:$4 sm:$0xff]  }
  0xb5   :  { %v10385_v3 = vld [vmem:[%s17374_s4 + $0x698] ss:$76 sps:$4 sm:$0xff]  }
  0xb7   :  { %5437 = vmatpush1.bf16.msra.mxu0 %v10301_v4  ;;  %5560 = vmatpush1.bf16.msra.mxu1 %v10304_v6  ;;  %v10388_v4 = vld [vmem:[%s17374_s4 + $0x6a0] ss:$76 sps:$4 sm:$0xff]  }
  0xb8   :  { %5438 = vmatprep.subr.bf16.mxu0 %v10309_v7  ;;  %5561 = vmatprep.subr.bf16.mxu1 %v10312_v8  ;;  %v10393_v6 = vld [vmem:[%s17374_s4 + $0x734] ss:$76 sps:$4 sm:$0xff]   ;;  %v10396_v7 = vld [vmem:[%s17374_s4 + $0x73c] ss:$76 sps:$4 sm:$0xff]  }
  0xb9   :  { %v10391_v8 = vld [vmem:[%s17374_s4 + $0x730] ss:$76 sps:$4 sm:$0xff]  }
  0xbb   :  { %5439 = vmatpush1.bf16.msra.mxu0 %v10307_v9  ;;  %5562 = vmatpush1.bf16.msra.mxu1 %v10310_v10  ;;  %v10394_v9 = vld [vmem:[%s17374_s4 + $0x738] ss:$76 sps:$4 sm:$0xff]  }
  0xbc   :  { %5440 = vmatprep.subr.bf16.mxu0 %v10315_v11  ;;  %5563 = vmatprep.subr.bf16.mxu1 %v10318_v13  ;;  %v10399_v10 = vld [vmem:[%s17374_s4 + $0x7cc] ss:$76 sps:$4 sm:$0xff]   ;;  %v10402_v11 = vld [vmem:[%s17374_s4 + $0x7d4] ss:$76 sps:$4 sm:$0xff]  }
  0xbd   :  { %v10397_v13 = vld [vmem:[%s17374_s4 + $0x7c8] ss:$76 sps:$4 sm:$0xff]  }
  0xbf   :  { %5441 = vmatpush1.bf16.msra.mxu0 %v10313_v14  ;;  %5564 = vmatpush1.bf16.msra.mxu1 %v10316_v15  ;;  %v10400_v14 = vld [vmem:[%s17374_s4 + $0x7d0] ss:$76 sps:$4 sm:$0xff]  }
  0xc0   :  { %5574 = vmatprep.subr.bf16.mxu0 %v10321_v18  ;;  %5697 = vmatprep.subr.bf16.mxu1 %v10324_v19  ;;  %v10405_v15 = vld [vmem:[%s17374_s4 + $0x864] ss:$76 sps:$4 sm:$0xff]   ;;  %v10403_v18 = vld [vmem:[%s17374_s4 + $0x860] ss:$76 sps:$4 sm:$0xff]   ;;  %v10406_v19 = vld [vmem:[%s17374_s4 + $0x868] ss:$76 sps:$4 sm:$0xff]  }
  0xc2   :  { %5566 = vmatmul.mubr.bf16.vlgmr.msra.gmra.mrb[0].mxu1 %v12611_v20  ;;  %5443 = vmatmul.mubr.bf16.vlgmr.msra.gmra.mrb[0].mxu0 %v12611_v20 }
  0xc3   :  { %5575 = vmatpush1.bf16.msra.mxu0 %v10319_v21  ;;  %5698 = vmatpush1.bf16.msra.mxu1 %v10322_v22  ;;  %v10411_v21 = vld [vmem:[%s17374_s4 + $0x8fc] ss:$76 sps:$4 sm:$0xff]   ;;  %v10414_v22 = vld [vmem:[%s17374_s4 + $0x904] ss:$76 sps:$4 sm:$0xff]  }
  0xc4   :  { %5576 = vmatprep.subr.bf16.mxu0 %v10327_v23  ;;  %5699 = vmatprep.subr.bf16.mxu1 %v10330_v24  ;;  %v10409_v23 = vld [vmem:[%s17374_s4 + $0x8f8] ss:$76 sps:$4 sm:$0xff]   ;;  %v10412_v24 = vld [vmem:[%s17374_s4 + $0x900] ss:$76 sps:$4 sm:$0xff]  }
  0xc5   :  { %5606 = vmatprep.mubr.bf16.mxu0 %v12135_v48  ;;  %5729 = vmatprep.mubr.bf16.mxu1 %v12135_v48 }
  0xc7   :  { %5577 = vmatpush1.bf16.msra.mxu0 %v10325_v25  ;;  %5700 = vmatpush1.bf16.msra.mxu1 %v10328_v26  ;;  %v10417_v25 = vld [vmem:[%s17374_s4 + $0x994] ss:$76 sps:$4 sm:$0xff]   ;;  %v10420_v26 = vld [vmem:[%s17374_s4 + $0x99c] ss:$76 sps:$4 sm:$0xff]  }
  0xc8   :  { %5578 = vmatprep.subr.bf16.mxu0 %v10333_v27  ;;  %5701 = vmatprep.subr.bf16.mxu1 %v10336_v28  ;;  %v10415_v27 = vld [vmem:[%s17374_s4 + $0x990] ss:$76 sps:$4 sm:$0xff]   ;;  %v10418_v28 = vld [vmem:[%s17374_s4 + $0x998] ss:$76 sps:$4 sm:$0xff]  }
  0xcb   :  { %5579 = vmatpush1.bf16.msra.mxu0 %v10331_v29  ;;  %5702 = vmatpush1.bf16.msra.mxu1 %v10334_v30  ;;  %v10423_v29 = vld [vmem:[%s17374_s4 + $0xa2c] ss:$76 sps:$4 sm:$0xff]   ;;  %v10426_v30 = vld [vmem:[%s17374_s4 + $0xa34] ss:$76 sps:$4 sm:$0xff]  }
  0xcc   :  { %5580 = vmatprep.subr.bf16.mxu0 %v10339_v31  ;;  %5703 = vmatprep.subr.bf16.mxu1 %v10342_v33  ;;  %v10421_v31 = vld [vmem:[%s17374_s4 + $0xa28] ss:$76 sps:$4 sm:$0xff]   ;;  %v10424_v33 = vld [vmem:[%s17374_s4 + $0xa30] ss:$76 sps:$4 sm:$0xff]  }
  0xcf   :  { %5581 = vmatpush1.bf16.msra.mxu0 %v10337_v34  ;;  %5704 = vmatpush1.bf16.msra.mxu1 %v10340_v35  ;;  %v10429_v34 = vld [vmem:[%s17374_s4 + $0xac4] ss:$76 sps:$4 sm:$0xff]   ;;  %v10432_v35 = vld [vmem:[%s17374_s4 + $0xacc] ss:$76 sps:$4 sm:$0xff]  }
  0xd0   :  { %5582 = vmatprep.subr.bf16.mxu0 %v10345_v36  ;;  %5705 = vmatprep.subr.bf16.mxu1 %v10348_v37  ;;  %v10427_v36 = vld [vmem:[%s17374_s4 + $0xac0] ss:$76 sps:$4 sm:$0xff]   ;;  %v10430_v37 = vld [vmem:[%s17374_s4 + $0xac8] ss:$76 sps:$4 sm:$0xff]  }
  0xd3   :  { %5583 = vmatpush1.bf16.msra.mxu0 %v10343_v38  ;;  %5706 = vmatpush1.bf16.msra.mxu1 %v10346_v39  ;;  %v10435_v38 = vld [vmem:[%s17374_s4 + $0xb5c] ss:$76 sps:$4 sm:$0xff]   ;;  %v10438_v39 = vld [vmem:[%s17374_s4 + $0xb64] ss:$76 sps:$4 sm:$0xff]  }
  0xd4   :  { %5584 = vmatprep.subr.bf16.mxu0 %v10351_v40  ;;  %5707 = vmatprep.subr.bf16.mxu1 %v10354_v41  ;;  %v10433_v40 = vld [vmem:[%s17374_s4 + $0xb58] ss:$76 sps:$4 sm:$0xff]   ;;  %v10436_v41 = vld [vmem:[%s17374_s4 + $0xb60] ss:$76 sps:$4 sm:$0xff]  }
  0xd7   :  { %5585 = vmatpush1.bf16.msra.mxu0 %v10349_v42  ;;  %5708 = vmatpush1.bf16.msra.mxu1 %v10352_v43  ;;  %v10441_v42 = vld [vmem:[%s17374_s4 + $0xbf4] ss:$76 sps:$4 sm:$0xff]   ;;  %v10444_v43 = vld [vmem:[%s17374_s4 + $0xbfc] ss:$76 sps:$4 sm:$0xff]  }
  0xd8   :  { %5586 = vmatprep.subr.bf16.mxu0 %v10357_v44  ;;  %5709 = vmatprep.subr.bf16.mxu1 %v10360_v45  ;;  %v10439_v44 = vld [vmem:[%s17374_s4 + $0xbf0] ss:$76 sps:$4 sm:$0xff]   ;;  %v10442_v45 = vld [vmem:[%s17374_s4 + $0xbf8] ss:$76 sps:$4 sm:$0xff]  }
  0xdb   :  { %5587 = vmatpush1.bf16.msra.mxu0 %v10355_v46  ;;  %5710 = vmatpush1.bf16.msra.mxu1 %v10358_v47  ;;  %v10447_v46 = vld [vmem:[%s17374_s4 + $0xc8c] ss:$76 sps:$4 sm:$0xff]   ;;  %v10450_v47 = vld [vmem:[%s17374_s4 + $0xc94] ss:$76 sps:$4 sm:$0xff]  }
  0xdc   :  { %5588 = vmatprep.subr.bf16.mxu0 %v10363_v49  ;;  %5711 = vmatprep.subr.bf16.mxu1 %v10366_v50  ;;  %v10445_v49 = vld [vmem:[%s17374_s4 + $0xc88] ss:$76 sps:$4 sm:$0xff]   ;;  %v10448_v50 = vld [vmem:[%s17374_s4 + $0xc90] ss:$76 sps:$4 sm:$0xff]  }
  0xdf   :  { %5589 = vmatpush1.bf16.msra.mxu0 %v10361_v51  ;;  %5712 = vmatpush1.bf16.msra.mxu1 %v10364_v52  ;;  %v10453_v51 = vld [vmem:[%s17374_s4 + $0xd24] ss:$76 sps:$4 sm:$0xff]   ;;  %v10456_v52 = vld [vmem:[%s17374_s4 + $0xd2c] ss:$76 sps:$4 sm:$0xff]  }
  0xe0   :  { %5590 = vmatprep.subr.bf16.mxu0 %v10369_v53  ;;  %5713 = vmatprep.subr.bf16.mxu1 %v10372_v54  ;;  %v10451_v53 = vld [vmem:[%s17374_s4 + $0xd20] ss:$76 sps:$4 sm:$0xff]   ;;  %v10454_v54 = vld [vmem:[%s17374_s4 + $0xd28] ss:$76 sps:$4 sm:$0xff]  }
  0xe3   :  { %5591 = vmatpush1.bf16.msra.mxu0 %v10367_v55  ;;  %5714 = vmatpush1.bf16.msra.mxu1 %v10370_v56  ;;  %v10459_v55 = vld [vmem:[%s17374_s4 + $0xdbc] ss:$76 sps:$4 sm:$0xff]   ;;  %v10462_v56 = vld [vmem:[%s17374_s4 + $0xdc4] ss:$76 sps:$4 sm:$0xff]  }
  0xe4   :  { %5592 = vmatprep.subr.bf16.mxu0 %v10375_v57  ;;  %5715 = vmatprep.subr.bf16.mxu1 %v10378_v58  ;;  %v10457_v57 = vld [vmem:[%s17374_s4 + $0xdb8] ss:$76 sps:$4 sm:$0xff]   ;;  %v10460_v58 = vld [vmem:[%s17374_s4 + $0xdc0] ss:$76 sps:$4 sm:$0xff]  }
  0xe7   :  { %5593 = vmatpush1.bf16.msra.mxu0 %v10373_v59  ;;  %5716 = vmatpush1.bf16.msra.mxu1 %v10376_v60  ;;  %v10465_v59 = vld [vmem:[%s17374_s4 + $0xe54] ss:$76 sps:$4 sm:$0xff]   ;;  %v10468_v60 = vld [vmem:[%s17374_s4 + $0xe5c] ss:$76 sps:$4 sm:$0xff]  }
  0xe8   :  { %5594 = vmatprep.subr.bf16.mxu0 %v10381_v61  ;;  %5717 = vmatprep.subr.bf16.mxu1 %v10384_v62  ;;  %v10463_v61 = vld [vmem:[%s17374_s4 + $0xe50] ss:$76 sps:$4 sm:$0xff]   ;;  %v10466_v62 = vld [vmem:[%s17374_s4 + $0xe58] ss:$76 sps:$4 sm:$0xff]  }
  0xeb   :  { %5595 = vmatpush1.bf16.msra.mxu0 %v10379_v63  ;;  %5718 = vmatpush1.bf16.msra.mxu1 %v10382_v0  ;;  %v10471_v63 = vld [vmem:[%s17374_s4 + $0xeec] ss:$76 sps:$4 sm:$0xff]   ;;  %v10474_v0 = vld [vmem:[%s17374_s4 + $0xef4] ss:$76 sps:$4 sm:$0xff]  }
  0xec   :  { %5596 = vmatprep.subr.bf16.mxu0 %v10387_v1  ;;  %5719 = vmatprep.subr.bf16.mxu1 %v10390_v2  ;;  %v10469_v1 = vld [vmem:[%s17374_s4 + $0xee8] ss:$76 sps:$4 sm:$0xff]   ;;  %v10472_v2 = vld [vmem:[%s17374_s4 + $0xef0] ss:$76 sps:$4 sm:$0xff]  }
  0xef   :  { %5597 = vmatpush1.bf16.msra.mxu0 %v10385_v3  ;;  %5720 = vmatpush1.bf16.msra.mxu1 %v10388_v4  ;;  %v10477_v3 = vld [vmem:[%s17374_s4 + $0xf84] ss:$76 sps:$4 sm:$0xff]   ;;  %v10480_v4 = vld [vmem:[%s17374_s4 + $0xf8c] ss:$76 sps:$4 sm:$0xff]  }
  0xf0   :  { %5598 = vmatprep.subr.bf16.mxu0 %v10393_v6  ;;  %5721 = vmatprep.subr.bf16.mxu1 %v10396_v7  ;;  %v10475_v6 = vld [vmem:[%s17374_s4 + $0xf80] ss:$76 sps:$4 sm:$0xff]   ;;  %v10478_v7 = vld [vmem:[%s17374_s4 + $0xf88] ss:$76 sps:$4 sm:$0xff]  }
  0xf3   :  { %5599 = vmatpush1.bf16.msra.mxu0 %v10391_v8  ;;  %5722 = vmatpush1.bf16.msra.mxu1 %v10394_v9  ;;  %v10483_v8 = vld [vmem:[%s17374_s4 + $0x101c] ss:$76 sps:$4 sm:$0xff]   ;;  %v10486_v9 = vld [vmem:[%s17374_s4 + $0x1024] ss:$76 sps:$4 sm:$0xff]  }
  0xf4   :  { %5600 = vmatprep.subr.bf16.mxu0 %v10399_v10  ;;  %5723 = vmatprep.subr.bf16.mxu1 %v10402_v11  ;;  %v10481_v10 = vld [vmem:[%s17374_s4 + $0x1018] ss:$76 sps:$4 sm:$0xff]   ;;  %v10484_v11 = vld [vmem:[%s17374_s4 + $0x1020] ss:$76 sps:$4 sm:$0xff]  }
  0xf7   :  { %5601 = vmatpush1.bf16.msra.mxu0 %v10397_v13  ;;  %5724 = vmatpush1.bf16.msra.mxu1 %v10400_v14  ;;  %v10489_v13 = vld [vmem:[%s17374_s4 + $0x10b4] ss:$76 sps:$4 sm:$0xff]   ;;  %v10492_v14 = vld [vmem:[%s17374_s4 + $0x10bc] ss:$76 sps:$4 sm:$0xff]  }
  0xf8   :  { %5602 = vmatprep.subr.bf16.mxu0 %v10405_v15  ;;  %5725 = vmatprep.subr.bf16.mxu1 %v10408_v16  ;;  %v10487_v15 = vld [vmem:[%s17374_s4 + $0x10b0] ss:$76 sps:$4 sm:$0xff]   ;;  %v10490_v16 = vld [vmem:[%s17374_s4 + $0x10b8] ss:$76 sps:$4 sm:$0xff]  }
  0xfb   :  { %5603 = vmatpush1.bf16.msra.mxu0 %v10403_v18  ;;  %5726 = vmatpush1.bf16.msra.mxu1 %v10406_v19  ;;  %v10495_v18 = vld [vmem:[%s17374_s4 + $0x114c] ss:$76 sps:$4 sm:$0xff]   ;;  %v10498_v19 = vld [vmem:[%s17374_s4 + $0x1154] ss:$76 sps:$4 sm:$0xff]  }
  0xfc   :  { %5604 = vmatprep.subr.bf16.mxu0 %v10411_v21  ;;  %5727 = vmatprep.subr.bf16.mxu1 %v10414_v22  ;;  %v10493_v21 = vld [vmem:[%s17374_s4 + $0x1148] ss:$76 sps:$4 sm:$0xff]   ;;  %v10496_v22 = vld [vmem:[%s17374_s4 + $0x1150] ss:$76 sps:$4 sm:$0xff]  }
  0xff   :  { %5605 = vmatpush1.bf16.msra.mxu0 %v10409_v23  ;;  %5728 = vmatpush1.bf16.msra.mxu1 %v10412_v24  ;;  %v10501_v23 = vld [vmem:[%s17374_s4 + $0x11e4] ss:$76 sps:$4 sm:$0xff]   ;;  %v10504_v24 = vld [vmem:[%s17374_s4 + $0x11ec] ss:$76 sps:$4 sm:$0xff]  }
 0x100   :  { %5615 = vmatprep.subr.bf16.mxu0 %v10417_v25  ;;  %5738 = vmatprep.subr.bf16.mxu1 %v10420_v26  ;;  %v10499_v25 = vld [vmem:[%s17374_s4 + $0x11e0] ss:$76 sps:$4 sm:$0xff]   ;;  %v10502_v26 = vld [vmem:[%s17374_s4 + $0x11e8] ss:$76 sps:$4 sm:$0xff]  }
 0x102   :  { %5607 = vmatmul.mubr.bf16.vlgmr.msra.gmra.mrb[4].mxu0 %v12199_v5  ;;  %5730 = vmatmul.mubr.bf16.vlgmr.msra.gmra.mrb[4].mxu1 %v12199_v5 }
 0x103   :  { %5616 = vmatpush1.bf16.msra.mxu0 %v10415_v27  ;;  %5739 = vmatpush1.bf16.msra.mxu1 %v10418_v28  ;;  %v10507_v27 = vld [vmem:[%s17374_s4 + $0x127c] ss:$76 sps:$4 sm:$0xff]   ;;  %v10510_v28 = vld [vmem:[%s17374_s4 + $0x1284] ss:$76 sps:$4 sm:$0xff]  }
 0x104   :  { %5617 = vmatprep.subr.bf16.mxu0 %v10423_v29  ;;  %5740 = vmatprep.subr.bf16.mxu1 %v10426_v30  ;;  %v10505_v29 = vld [vmem:[%s17374_s4 + $0x1278] ss:$76 sps:$4 sm:$0xff]   ;;  %v10508_v30 = vld [vmem:[%s17374_s4 + $0x1280] ss:$76 sps:$4 sm:$0xff]  }
 0x105   :  { %5647 = vmatprep.mubr.bf16.mxu0 %v12281_v32  ;;  %5770 = vmatprep.mubr.bf16.mxu1 %v12281_v32 }
 0x107   :  { %5618 = vmatpush1.bf16.msra.mxu0 %v10421_v31  ;;  %5741 = vmatpush1.bf16.msra.mxu1 %v10424_v33  ;;  %v10513_v31 = vld [vmem:[%s17374_s4 + $0x1314] ss:$76 sps:$4 sm:$0xff]   ;;  %v10516_v33 = vld [vmem:[%s17374_s4 + $0x131c] ss:$76 sps:$4 sm:$0xff]  }
 0x108   :  { %5619 = vmatprep.subr.bf16.mxu0 %v10429_v34  ;;  %5742 = vmatprep.subr.bf16.mxu1 %v10432_v35  ;;  %v10511_v34 = vld [vmem:[%s17374_s4 + $0x1310] ss:$76 sps:$4 sm:$0xff]   ;;  %v10514_v35 = vld [vmem:[%s17374_s4 + $0x1318] ss:$76 sps:$4 sm:$0xff]  }
 0x10b   :  { %5620 = vmatpush1.bf16.msra.mxu0 %v10427_v36  ;;  %5743 = vmatpush1.bf16.msra.mxu1 %v10430_v37  ;;  %v10519_v36 = vld [vmem:[%s17374_s4 + $0x13ac] ss:$76 sps:$4 sm:$0xff]   ;;  %v10522_v37 = vld [vmem:[%s17374_s4 + $0x13b4] ss:$76 sps:$4 sm:$0xff]  }
 0x10c   :  { %5621 = vmatprep.subr.bf16.mxu0 %v10435_v38  ;;  %5744 = vmatprep.subr.bf16.mxu1 %v10438_v39  ;;  %v10517_v38 = vld [vmem:[%s17374_s4 + $0x13a8] ss:$76 sps:$4 sm:$0xff]   ;;  %v10520_v39 = vld [vmem:[%s17374_s4 + $0x13b0] ss:$76 sps:$4 sm:$0xff]  }
 0x10f   :  { %5622 = vmatpush1.bf16.msra.mxu0 %v10433_v40  ;;  %5745 = vmatpush1.bf16.msra.mxu1 %v10436_v41  ;;  %v10525_v40 = vld [vmem:[%s17374_s4 + $0x1444] ss:$76 sps:$4 sm:$0xff]   ;;  %v10528_v41 = vld [vmem:[%s17374_s4 + $0x144c] ss:$76 sps:$4 sm:$0xff]  }
 0x110   :  { %5623 = vmatprep.subr.bf16.mxu0 %v10441_v42  ;;  %5746 = vmatprep.subr.bf16.mxu1 %v10444_v43  ;;  %v10523_v42 = vld [vmem:[%s17374_s4 + $0x1440] ss:$76 sps:$4 sm:$0xff]   ;;  %v10526_v43 = vld [vmem:[%s17374_s4 + $0x1448] ss:$76 sps:$4 sm:$0xff]  }
 0x113   :  { %5624 = vmatpush1.bf16.msra.mxu0 %v10439_v44  ;;  %5747 = vmatpush1.bf16.msra.mxu1 %v10442_v45  ;;  %v10531_v44 = vld [vmem:[%s17374_s4 + $0x14dc] ss:$76 sps:$4 sm:$0xff]   ;;  %v10534_v45 = vld [vmem:[%s17374_s4 + $0x14e4] ss:$76 sps:$4 sm:$0xff]  }
 0x114   :  { %5625 = vmatprep.subr.bf16.mxu0 %v10447_v46  ;;  %5748 = vmatprep.subr.bf16.mxu1 %v10450_v47  ;;  %v10529_v46 = vld [vmem:[%s17374_s4 + $0x14d8] ss:$76 sps:$4 sm:$0xff]   ;;  %v10532_v47 = vld [vmem:[%s17374_s4 + $0x14e0] ss:$76 sps:$4 sm:$0xff]  }
 0x117   :  { %5626 = vmatpush1.bf16.msra.mxu0 %v10445_v49  ;;  %5749 = vmatpush1.bf16.msra.mxu1 %v10448_v50  ;;  %v10537_v49 = vld [vmem:[%s17374_s4 + $0x1574] ss:$76 sps:$4 sm:$0xff]   ;;  %v10540_v50 = vld [vmem:[%s17374_s4 + $0x157c] ss:$76 sps:$4 sm:$0xff]  }
 0x118   :  { %5627 = vmatprep.subr.bf16.mxu0 %v10453_v51  ;;  %5750 = vmatprep.subr.bf16.mxu1 %v10456_v52  ;;  %v10535_v51 = vld [vmem:[%s17374_s4 + $0x1570] ss:$76 sps:$4 sm:$0xff]   ;;  %v10538_v52 = vld [vmem:[%s17374_s4 + $0x1578] ss:$76 sps:$4 sm:$0xff]  }
 0x11b   :  { %5628 = vmatpush1.bf16.msra.mxu0 %v10451_v53  ;;  %5751 = vmatpush1.bf16.msra.mxu1 %v10454_v54  ;;  %v10543_v53 = vld [vmem:[%s17374_s4 + $0x160c] ss:$76 sps:$4 sm:$0xff]   ;;  %v10546_v54 = vld [vmem:[%s17374_s4 + $0x1614] ss:$76 sps:$4 sm:$0xff]  }
 0x11c   :  { %5629 = vmatprep.subr.bf16.mxu0 %v10459_v55  ;;  %5752 = vmatprep.subr.bf16.mxu1 %v10462_v56  ;;  %v10541_v55 = vld [vmem:[%s17374_s4 + $0x1608] ss:$76 sps:$4 sm:$0xff]   ;;  %v10544_v56 = vld [vmem:[%s17374_s4 + $0x1610] ss:$76 sps:$4 sm:$0xff]  }
 0x11f   :  { %5630 = vmatpush1.bf16.msra.mxu0 %v10457_v57  ;;  %5753 = vmatpush1.bf16.msra.mxu1 %v10460_v58  ;;  %v10549_v57 = vld [vmem:[%s17374_s4 + $0x16a4] ss:$76 sps:$4 sm:$0xff]   ;;  %v10552_v58 = vld [vmem:[%s17374_s4 + $0x16ac] ss:$76 sps:$4 sm:$0xff]  }
 0x120   :  { %5631 = vmatprep.subr.bf16.mxu0 %v10465_v59  ;;  %5754 = vmatprep.subr.bf16.mxu1 %v10468_v60  ;;  %v10547_v59 = vld [vmem:[%s17374_s4 + $0x16a0] ss:$76 sps:$4 sm:$0xff]   ;;  %v10550_v60 = vld [vmem:[%s17374_s4 + $0x16a8] ss:$76 sps:$4 sm:$0xff]  }
 0x123   :  { %5632 = vmatpush1.bf16.msra.mxu0 %v10463_v61  ;;  %5755 = vmatpush1.bf16.msra.mxu1 %v10466_v62  ;;  %v10555_v61 = vld [vmem:[%s17374_s4 + $0x173c] ss:$76 sps:$4 sm:$0xff]   ;;  %v10558_v62 = vld [vmem:[%s17374_s4 + $0x1744] ss:$76 sps:$4 sm:$0xff]  }
 0x124   :  { %5633 = vmatprep.subr.bf16.mxu0 %v10471_v63  ;;  %5756 = vmatprep.subr.bf16.mxu1 %v10474_v0  ;;  %v10553_v63 = vld [vmem:[%s17374_s4 + $0x1738] ss:$76 sps:$4 sm:$0xff]   ;;  %v10556_v0 = vld [vmem:[%s17374_s4 + $0x1740] ss:$76 sps:$4 sm:$0xff]  }
 0x127   :  { %5634 = vmatpush1.bf16.msra.mxu0 %v10469_v1  ;;  %5757 = vmatpush1.bf16.msra.mxu1 %v10472_v2  ;;  %v10561_v1 = vld [vmem:[%s17374_s4 + $0x17d4] ss:$76 sps:$4 sm:$0xff]   ;;  %v10564_v2 = vld [vmem:[%s17374_s4 + $0x17dc] ss:$76 sps:$4 sm:$0xff]  }
 0x128   :  { %5635 = vmatprep.subr.bf16.mxu0 %v10477_v3  ;;  %5758 = vmatprep.subr.bf16.mxu1 %v10480_v4  ;;  %v10559_v3 = vld [vmem:[%s17374_s4 + $0x17d0] ss:$76 sps:$4 sm:$0xff]   ;;  %v10562_v4 = vld [vmem:[%s17374_s4 + $0x17d8] ss:$76 sps:$4 sm:$0xff]  }
 0x12b   :  { %5636 = vmatpush1.bf16.msra.mxu0 %v10475_v6  ;;  %5759 = vmatpush1.bf16.msra.mxu1 %v10478_v7  ;;  %v10567_v6 = vld [vmem:[%s17374_s4 + $0x186c] ss:$76 sps:$4 sm:$0xff]   ;;  %v10570_v7 = vld [vmem:[%s17374_s4 + $0x1874] ss:$76 sps:$4 sm:$0xff]  }
 0x12c   :  { %5637 = vmatprep.subr.bf16.mxu0 %v10483_v8  ;;  %5760 = vmatprep.subr.bf16.mxu1 %v10486_v9  ;;  %v10565_v8 = vld [vmem:[%s17374_s4 + $0x1868] ss:$76 sps:$4 sm:$0xff]   ;;  %v10568_v9 = vld [vmem:[%s17374_s4 + $0x1870] ss:$76 sps:$4 sm:$0xff]  }
 0x12f   :  { %5638 = vmatpush1.bf16.msra.mxu0 %v10481_v10  ;;  %5761 = vmatpush1.bf16.msra.mxu1 %v10484_v11  ;;  %v10573_v10 = vld [vmem:[%s17374_s4 + $0x1904] ss:$76 sps:$4 sm:$0xff]   ;;  %v10576_v11 = vld [vmem:[%s17374_s4 + $0x190c] ss:$76 sps:$4 sm:$0xff]  }
 0x130   :  { %5639 = vmatprep.subr.bf16.mxu0 %v10489_v13  ;;  %5762 = vmatprep.subr.bf16.mxu1 %v10492_v14  ;;  %v10571_v13 = vld [vmem:[%s17374_s4 + $0x1900] ss:$76 sps:$4 sm:$0xff]   ;;  %v10574_v14 = vld [vmem:[%s17374_s4 + $0x1908] ss:$76 sps:$4 sm:$0xff]  }
 0x133   :  { %5640 = vmatpush1.bf16.msra.mxu0 %v10487_v15  ;;  %5763 = vmatpush1.bf16.msra.mxu1 %v10490_v16  ;;  %v10579_v15 = vld [vmem:[%s17374_s4 + $0x199c] ss:$76 sps:$4 sm:$0xff]   ;;  %v10582_v16 = vld [vmem:[%s17374_s4 + $0x19a4] ss:$76 sps:$4 sm:$0xff]  }
 0x134   :  { %5641 = vmatprep.subr.bf16.mxu0 %v10495_v18  ;;  %5764 = vmatprep.subr.bf16.mxu1 %v10498_v19  ;;  %v10577_v18 = vld [vmem:[%s17374_s4 + $0x1998] ss:$76 sps:$4 sm:$0xff]   ;;  %v10580_v19 = vld [vmem:[%s17374_s4 + $0x19a0] ss:$76 sps:$4 sm:$0xff]  }
 0x137   :  { %5642 = vmatpush1.bf16.msra.mxu0 %v10493_v21  ;;  %5765 = vmatpush1.bf16.msra.mxu1 %v10496_v22  ;;  %v10585_v21 = vld [vmem:[%s17374_s4 + $0x1a34] ss:$76 sps:$4 sm:$0xff]   ;;  %v10588_v22 = vld [vmem:[%s17374_s4 + $0x1a3c] ss:$76 sps:$4 sm:$0xff]  }
 0x138   :  { %5643 = vmatprep.subr.bf16.mxu0 %v10501_v23  ;;  %5766 = vmatprep.subr.bf16.mxu1 %v10504_v24  ;;  %v10583_v23 = vld [vmem:[%s17374_s4 + $0x1a30] ss:$76 sps:$4 sm:$0xff]   ;;  %v10586_v24 = vld [vmem:[%s17374_s4 + $0x1a38] ss:$76 sps:$4 sm:$0xff]  }
 0x13b   :  { %5644 = vmatpush1.bf16.msra.mxu0 %v10499_v25  ;;  %5767 = vmatpush1.bf16.msra.mxu1 %v10502_v26  ;;  %v10591_v25 = vld [vmem:[%s17374_s4 + $0x1acc] ss:$76 sps:$4 sm:$0xff]   ;;  %v10594_v26 = vld [vmem:[%s17374_s4 + $0x1ad4] ss:$76 sps:$4 sm:$0xff]  }
 0x13c   :  { %5645 = vmatprep.subr.bf16.mxu0 %v10507_v27  ;;  %5768 = vmatprep.subr.bf16.mxu1 %v10510_v28  ;;  %v10589_v27 = vld [vmem:[%s17374_s4 + $0x1ac8] ss:$76 sps:$4 sm:$0xff]   ;;  %v10592_v28 = vld [vmem:[%s17374_s4 + $0x1ad0] ss:$76 sps:$4 sm:$0xff]  }
 0x13f   :  { %5646 = vmatpush1.bf16.msra.mxu0 %v10505_v29  ;;  %5769 = vmatpush1.bf16.msra.mxu1 %v10508_v30  ;;  %v10597_v29 = vld [vmem:[%s17374_s4 + $0x1b64] ss:$76 sps:$4 sm:$0xff]   ;;  %v10600_v30 = vld [vmem:[%s17374_s4 + $0x1b6c] ss:$76 sps:$4 sm:$0xff]  }
 0x140   :  { %5656 = vmatprep.subr.bf16.mxu0 %v10513_v31  ;;  %5779 = vmatprep.subr.bf16.mxu1 %v10516_v33  ;;  %v10595_v31 = vld [vmem:[%s17374_s4 + $0x1b60] ss:$76 sps:$4 sm:$0xff]   ;;  %v10598_v33 = vld [vmem:[%s17374_s4 + $0x1b68] ss:$76 sps:$4 sm:$0xff]  }
 0x142   :  { %5648 = vmatmul.mubr.bf16.vlgmr.msra.gmra.mrb[4].mxu0 %v12408_v12  ;;  %5771 = vmatmul.mubr.bf16.vlgmr.msra.gmra.mrb[4].mxu1 %v12408_v12 }
 0x143   :  { %5657 = vmatpush1.bf16.msra.mxu0 %v10511_v34  ;;  %5780 = vmatpush1.bf16.msra.mxu1 %v10514_v35  ;;  %v10603_v34 = vld [vmem:[%s17374_s4 + $0x1bfc] ss:$76 sps:$4 sm:$0xff]   ;;  %v10606_v35 = vld [vmem:[%s17374_s4 + $0x1c04] ss:$76 sps:$4 sm:$0xff]  }
 0x144   :  { %5658 = vmatprep.subr.bf16.mxu0 %v10519_v36  ;;  %5781 = vmatprep.subr.bf16.mxu1 %v10522_v37  ;;  %v10601_v36 = vld [vmem:[%s17374_s4 + $0x1bf8] ss:$76 sps:$4 sm:$0xff]   ;;  %v10604_v37 = vld [vmem:[%s17374_s4 + $0x1c00] ss:$76 sps:$4 sm:$0xff]  }
 0x145   :  { %5811 = vmatprep.mubr.bf16.mxu1 %v12422_v17  ;;  %5688 = vmatprep.mubr.bf16.mxu0 %v12422_v17 }
 0x147   :  { %5659 = vmatpush1.bf16.msra.mxu0 %v10517_v38  ;;  %5782 = vmatpush1.bf16.msra.mxu1 %v10520_v39  ;;  %v10609_v38 = vld [vmem:[%s17374_s4 + $0x24] ss:$76 sps:$4 sm:$0xff]   ;;  %v10612_v39 = vld [vmem:[%s17374_s4 + $0x2c] ss:$76 sps:$4 sm:$0xff]  }
 0x148   :  { %5660 = vmatprep.subr.bf16.mxu0 %v10525_v40  ;;  %5783 = vmatprep.subr.bf16.mxu1 %v10528_v41  ;;  %v10607_v40 = vld [vmem:[%s17374_s4 + $0x20] ss:$76 sps:$4 sm:$0xff]   ;;  %v10610_v41 = vld [vmem:[%s17374_s4 + $0x28] ss:$76 sps:$4 sm:$0xff]  }
 0x14b   :  { %5661 = vmatpush1.bf16.msra.mxu0 %v10523_v42  ;;  %5784 = vmatpush1.bf16.msra.mxu1 %v10526_v43  ;;  %v10615_v42 = vld [vmem:[%s17374_s4 + $0xbc] ss:$76 sps:$4 sm:$0xff]   ;;  %v10618_v43 = vld [vmem:[%s17374_s4 + $0xc4] ss:$76 sps:$4 sm:$0xff]  }
 0x14c   :  { %5662 = vmatprep.subr.bf16.mxu0 %v10531_v44  ;;  %5785 = vmatprep.subr.bf16.mxu1 %v10534_v45  ;;  %v10613_v44 = vld [vmem:[%s17374_s4 + $0xb8] ss:$76 sps:$4 sm:$0xff]   ;;  %v10616_v45 = vld [vmem:[%s17374_s4 + $0xc0] ss:$76 sps:$4 sm:$0xff]  }
 0x14f   :  { %5663 = vmatpush1.bf16.msra.mxu0 %v10529_v46  ;;  %5786 = vmatpush1.bf16.msra.mxu1 %v10532_v47  ;;  %v10621_v46 = vld [vmem:[%s17374_s4 + $0x154] ss:$76 sps:$4 sm:$0xff]   ;;  %v10624_v47 = vld [vmem:[%s17374_s4 + $0x15c] ss:$76 sps:$4 sm:$0xff]  }
 0x150   :  { %5664 = vmatprep.subr.bf16.mxu0 %v10537_v49  ;;  %5787 = vmatprep.subr.bf16.mxu1 %v10540_v50  ;;  %v10619_v49 = vld [vmem:[%s17374_s4 + $0x150] ss:$76 sps:$4 sm:$0xff]   ;;  %v10622_v50 = vld [vmem:[%s17374_s4 + $0x158] ss:$76 sps:$4 sm:$0xff]  }
 0x153   :  { %5665 = vmatpush1.bf16.msra.mxu0 %v10535_v51  ;;  %5788 = vmatpush1.bf16.msra.mxu1 %v10538_v52  ;;  %v10627_v51 = vld [vmem:[%s17374_s4 + $0x1ec] ss:$76 sps:$4 sm:$0xff]   ;;  %v10630_v52 = vld [vmem:[%s17374_s4 + $0x1f4] ss:$76 sps:$4 sm:$0xff]  }
 0x154   :  { %5666 = vmatprep.subr.bf16.mxu0 %v10543_v53  ;;  %5789 = vmatprep.subr.bf16.mxu1 %v10546_v54  ;;  %v10625_v53 = vld [vmem:[%s17374_s4 + $0x1e8] ss:$76 sps:$4 sm:$0xff]   ;;  %v10628_v54 = vld [vmem:[%s17374_s4 + $0x1f0] ss:$76 sps:$4 sm:$0xff]  }
 0x157   :  { %5667 = vmatpush1.bf16.msra.mxu0 %v10541_v55  ;;  %5790 = vmatpush1.bf16.msra.mxu1 %v10544_v56  ;;  %v10633_v55 = vld [vmem:[%s17374_s4 + $0x284] ss:$76 sps:$4 sm:$0xff]   ;;  %v10636_v56 = vld [vmem:[%s17374_s4 + $0x28c] ss:$76 sps:$4 sm:$0xff]  }
 0x158   :  { %5668 = vmatprep.subr.bf16.mxu0 %v10549_v57  ;;  %5791 = vmatprep.subr.bf16.mxu1 %v10552_v58  ;;  %v10631_v57 = vld [vmem:[%s17374_s4 + $0x280] ss:$76 sps:$4 sm:$0xff]   ;;  %v10634_v58 = vld [vmem:[%s17374_s4 + $0x288] ss:$76 sps:$4 sm:$0xff]  }
 0x15b   :  { %5669 = vmatpush1.bf16.msra.mxu0 %v10547_v59  ;;  %5792 = vmatpush1.bf16.msra.mxu1 %v10550_v60  ;;  %v10639_v59 = vld [vmem:[%s17374_s4 + $0x31c] ss:$76 sps:$4 sm:$0xff]   ;;  %v10642_v60 = vld [vmem:[%s17374_s4 + $0x324] ss:$76 sps:$4 sm:$0xff]  }
 0x15c   :  { %5670 = vmatprep.subr.bf16.mxu0 %v10555_v61  ;;  %5793 = vmatprep.subr.bf16.mxu1 %v10558_v62  ;;  %v10637_v61 = vld [vmem:[%s17374_s4 + $0x318] ss:$76 sps:$4 sm:$0xff]   ;;  %v10640_v62 = vld [vmem:[%s17374_s4 + $0x320] ss:$76 sps:$4 sm:$0xff]  }
 0x15f   :  { %5671 = vmatpush1.bf16.msra.mxu0 %v10553_v63  ;;  %5794 = vmatpush1.bf16.msra.mxu1 %v10556_v0  ;;  %v10645_v63 = vld [vmem:[%s17374_s4 + $0x3b4] ss:$76 sps:$4 sm:$0xff]   ;;  %v10648_v0 = vld [vmem:[%s17374_s4 + $0x3bc] ss:$76 sps:$4 sm:$0xff]  }
 0x160   :  { %5672 = vmatprep.subr.bf16.mxu0 %v10561_v1  ;;  %5795 = vmatprep.subr.bf16.mxu1 %v10564_v2 }
 0x163   :  { %5673 = vmatpush1.bf16.msra.mxu0 %v10559_v3  ;;  %5796 = vmatpush1.bf16.msra.mxu1 %v10562_v4 }
 0x164   :  { %5674 = vmatprep.subr.bf16.mxu0 %v10567_v6  ;;  %5797 = vmatprep.subr.bf16.mxu1 %v10570_v7  ;;  %v10643_v7 = vld [vmem:[%s17374_s4 + $0x3b0] ss:$76 sps:$4 sm:$0xff]  }
 0x167   :  { %5675 = vmatpush1.bf16.msra.mxu0 %v10565_v8  ;;  %5798 = vmatpush1.bf16.msra.mxu1 %v10568_v9  ;;  %v10646_v8 = vld [vmem:[%s17374_s4 + $0x3b8] ss:$76 sps:$4 sm:$0xff]  }
 0x168   :  { %5676 = vmatprep.subr.bf16.mxu0 %v10573_v10  ;;  %5799 = vmatprep.subr.bf16.mxu1 %v10576_v11 }
 0x16b   :  { %5677 = vmatpush1.bf16.msra.mxu0 %v10571_v13  ;;  %5800 = vmatpush1.bf16.msra.mxu1 %v10574_v14  ;;  %v10651_v13 = vld [vmem:[%s17374_s4 + $0x44c] ss:$76 sps:$4 sm:$0xff]   ;;  %v10654_v14 = vld [vmem:[%s17374_s4 + $0x454] ss:$76 sps:$4 sm:$0xff]  }
 0x16c   :  { %5678 = vmatprep.subr.bf16.mxu0 %v10579_v15  ;;  %5801 = vmatprep.subr.bf16.mxu1 %v10582_v16  ;;  %v10649_v15 = vld [vmem:[%s17374_s4 + $0x448] ss:$76 sps:$4 sm:$0xff]   ;;  %v10652_v16 = vld [vmem:[%s17374_s4 + $0x450] ss:$76 sps:$4 sm:$0xff]  }
 0x16f   :  { %5679 = vmatpush1.bf16.msra.mxu0 %v10577_v18  ;;  %5802 = vmatpush1.bf16.msra.mxu1 %v10580_v19  ;;  %v10657_v18 = vld [vmem:[%s17374_s4 + $0x4e4] ss:$76 sps:$4 sm:$0xff]   ;;  %v10660_v19 = vld [vmem:[%s17374_s4 + $0x4ec] ss:$76 sps:$4 sm:$0xff]  }
 0x170   :  { %5680 = vmatprep.subr.bf16.mxu0 %v10585_v21  ;;  %5803 = vmatprep.subr.bf16.mxu1 %v10588_v22  ;;  %v10655_v21 = vld [vmem:[%s17374_s4 + $0x4e0] ss:$76 sps:$4 sm:$0xff]   ;;  %v10658_v22 = vld [vmem:[%s17374_s4 + $0x4e8] ss:$76 sps:$4 sm:$0xff]  }
 0x173   :  { %5681 = vmatpush1.bf16.msra.mxu0 %v10583_v23  ;;  %5804 = vmatpush1.bf16.msra.mxu1 %v10586_v24  ;;  %v10663_v23 = vld [vmem:[%s17374_s4 + $0x57c] ss:$76 sps:$4 sm:$0xff]   ;;  %v10666_v24 = vld [vmem:[%s17374_s4 + $0x584] ss:$76 sps:$4 sm:$0xff]  }
 0x174   :  { %5682 = vmatprep.subr.bf16.mxu0 %v10591_v25  ;;  %5805 = vmatprep.subr.bf16.mxu1 %v10594_v26  ;;  %v10661_v25 = vld [vmem:[%s17374_s4 + $0x578] ss:$76 sps:$4 sm:$0xff]   ;;  %v10664_v26 = vld [vmem:[%s17374_s4 + $0x580] ss:$76 sps:$4 sm:$0xff]  }
 0x177   :  { %5683 = vmatpush1.bf16.msra.mxu0 %v10589_v27  ;;  %5806 = vmatpush1.bf16.msra.mxu1 %v10592_v28  ;;  %v10669_v27 = vld [vmem:[%s17374_s4 + $0x614] ss:$76 sps:$4 sm:$0xff]   ;;  %v10672_v28 = vld [vmem:[%s17374_s4 + $0x61c] ss:$76 sps:$4 sm:$0xff]  }
 0x178   :  { %5684 = vmatprep.subr.bf16.mxu0 %v10597_v29  ;;  %5807 = vmatprep.subr.bf16.mxu1 %v10600_v30  ;;  %v10667_v29 = vld [vmem:[%s17374_s4 + $0x610] ss:$76 sps:$4 sm:$0xff]   ;;  %v10670_v30 = vld [vmem:[%s17374_s4 + $0x618] ss:$76 sps:$4 sm:$0xff]  }
 0x17b   :  { %5685 = vmatpush1.bf16.msra.mxu0 %v10595_v31  ;;  %5808 = vmatpush1.bf16.msra.mxu1 %v10598_v33  ;;  %v10675_v31 = vld [vmem:[%s17374_s4 + $0x6ac] ss:$76 sps:$4 sm:$0xff]   ;;  %v10678_v33 = vld [vmem:[%s17374_s4 + $0x6b4] ss:$76 sps:$4 sm:$0xff]  }
 0x17c   :  { %5686 = vmatprep.subr.bf16.mxu0 %v10603_v34  ;;  %5809 = vmatprep.subr.bf16.mxu1 %v10606_v35  ;;  %v10673_v34 = vld [vmem:[%s17374_s4 + $0x6a8] ss:$76 sps:$4 sm:$0xff]   ;;  %v10676_v35 = vld [vmem:[%s17374_s4 + $0x6b0] ss:$76 sps:$4 sm:$0xff]  }
 0x17f   :  { %5687 = vmatpush1.bf16.msra.mxu0 %v10601_v36  ;;  %5810 = vmatpush1.bf16.msra.mxu1 %v10604_v37  ;;  %v10681_v36 = vld [vmem:[%s17374_s4 + $0x744] ss:$76 sps:$4 sm:$0xff]   ;;  %v10684_v37 = vld [vmem:[%s17374_s4 + $0x74c] ss:$76 sps:$4 sm:$0xff]  }
 0x180   :  { %5820 = vmatprep.subr.bf16.mxu0 %v10609_v38  ;;  %5943 = vmatprep.subr.bf16.mxu1 %v10612_v39  ;;  %v10679_v38 = vld [vmem:[%s17374_s4 + $0x740] ss:$76 sps:$4 sm:$0xff]   ;;  %v10682_v39 = vld [vmem:[%s17374_s4 + $0x748] ss:$76 sps:$4 sm:$0xff]  }
 0x182   :  { %5812 = vmatmul.mubr.bf16.vlgmr.msra.gmra.mrb[4].mxu1 %v12611_v20  ;;  %5689 = vmatmul.mubr.bf16.vlgmr.msra.gmra.mrb[4].mxu0 %v12611_v20 }
 0x183   :  { %5821 = vmatpush1.bf16.msra.mxu0 %v10607_v40  ;;  %5944 = vmatpush1.bf16.msra.mxu1 %v10610_v41  ;;  %v10687_v40 = vld [vmem:[%s17374_s4 + $0x7dc] ss:$76 sps:$4 sm:$0xff]   ;;  %v10690_v41 = vld [vmem:[%s17374_s4 + $0x7e4] ss:$76 sps:$4 sm:$0xff]  }
 0x184   :  { %5822 = vmatprep.subr.bf16.mxu0 %v10615_v42  ;;  %5945 = vmatprep.subr.bf16.mxu1 %v10618_v43  ;;  %v10685_v42 = vld [vmem:[%s17374_s4 + $0x7d8] ss:$76 sps:$4 sm:$0xff]   ;;  %v10688_v43 = vld [vmem:[%s17374_s4 + $0x7e0] ss:$76 sps:$4 sm:$0xff]  }
 0x185   :  { %5852 = vmatprep.mubr.bf16.mxu0 %v12135_v48  ;;  %5975 = vmatprep.mubr.bf16.mxu1 %v12135_v48 }
 0x187   :  { %5823 = vmatpush1.bf16.msra.mxu0 %v10613_v44  ;;  %5946 = vmatpush1.bf16.msra.mxu1 %v10616_v45  ;;  %v10693_v44 = vld [vmem:[%s17374_s4 + $0x874] ss:$76 sps:$4 sm:$0xff]   ;;  %v10696_v45 = vld [vmem:[%s17374_s4 + $0x87c] ss:$76 sps:$4 sm:$0xff]  }
 0x188   :  { %5824 = vmatprep.subr.bf16.mxu0 %v10621_v46  ;;  %5947 = vmatprep.subr.bf16.mxu1 %v10624_v47  ;;  %v10691_v46 = vld [vmem:[%s17374_s4 + $0x870] ss:$76 sps:$4 sm:$0xff]   ;;  %v10694_v47 = vld [vmem:[%s17374_s4 + $0x878] ss:$76 sps:$4 sm:$0xff]  }
 0x18b   :  { %5825 = vmatpush1.bf16.msra.mxu0 %v10619_v49  ;;  %5948 = vmatpush1.bf16.msra.mxu1 %v10622_v50  ;;  %v10699_v49 = vld [vmem:[%s17374_s4 + $0x90c] ss:$76 sps:$4 sm:$0xff]   ;;  %v10702_v50 = vld [vmem:[%s17374_s4 + $0x914] ss:$76 sps:$4 sm:$0xff]  }
 0x18c   :  { %5826 = vmatprep.subr.bf16.mxu0 %v10627_v51  ;;  %5949 = vmatprep.subr.bf16.mxu1 %v10630_v52  ;;  %v10697_v51 = vld [vmem:[%s17374_s4 + $0x908] ss:$76 sps:$4 sm:$0xff]   ;;  %v10700_v52 = vld [vmem:[%s17374_s4 + $0x910] ss:$76 sps:$4 sm:$0xff]  }
 0x18f   :  { %5827 = vmatpush1.bf16.msra.mxu0 %v10625_v53  ;;  %5950 = vmatpush1.bf16.msra.mxu1 %v10628_v54  ;;  %v10705_v53 = vld [vmem:[%s17374_s4 + $0x9a4] ss:$76 sps:$4 sm:$0xff]   ;;  %v10708_v54 = vld [vmem:[%s17374_s4 + $0x9ac] ss:$76 sps:$4 sm:$0xff]  }
 0x190   :  { %5828 = vmatprep.subr.bf16.mxu0 %v10633_v55  ;;  %5951 = vmatprep.subr.bf16.mxu1 %v10636_v56  ;;  %v10703_v55 = vld [vmem:[%s17374_s4 + $0x9a0] ss:$76 sps:$4 sm:$0xff]   ;;  %v10706_v56 = vld [vmem:[%s17374_s4 + $0x9a8] ss:$76 sps:$4 sm:$0xff]  }
 0x193   :  { %5829 = vmatpush1.bf16.msra.mxu0 %v10631_v57  ;;  %5952 = vmatpush1.bf16.msra.mxu1 %v10634_v58  ;;  %v10711_v57 = vld [vmem:[%s17374_s4 + $0xa3c] ss:$76 sps:$4 sm:$0xff]   ;;  %v10714_v58 = vld [vmem:[%s17374_s4 + $0xa44] ss:$76 sps:$4 sm:$0xff]  }
 0x194   :  { %5830 = vmatprep.subr.bf16.mxu0 %v10639_v59  ;;  %5953 = vmatprep.subr.bf16.mxu1 %v10642_v60  ;;  %v10709_v59 = vld [vmem:[%s17374_s4 + $0xa38] ss:$76 sps:$4 sm:$0xff]   ;;  %v10712_v60 = vld [vmem:[%s17374_s4 + $0xa40] ss:$76 sps:$4 sm:$0xff]  }
 0x195   :  { %v13277_v1 = vpop.f32.mrb[0].mxu1  ;;  %v13279_v2 = vpop.f32.mrb[0].mxu0 }
 0x196   :  { %v13281_v3 = vpop.f32.mrb[1].mxu1  ;;  %v13283_v4 = vpop.f32.mrb[1].mxu0 }
 0x197   :  { %v5571_v6 = vpop.f32.mrb[2].mxu1  ;;  %5831 = vmatpush1.bf16.msra.mxu0 %v10637_v61  ;;  %5954 = vmatpush1.bf16.msra.mxu1 %v10640_v62  ;;  %v5448_v9 = vpop.f32.mrb[2].mxu0  ;;  %v10717_v61 = vld [vmem:[%s17374_s4 + $0xad4] ss:$76 sps:$4 sm:$0xff]   ;;  %v10720_v62 = vld [vmem:[%s17374_s4 + $0xadc] ss:$76 sps:$4 sm:$0xff]  }
 0x198   :  { %v5572_v10 = vpop.f32.mrb[3].mxu1  ;;  %5832 = vmatprep.subr.bf16.mxu0 %v10645_v63  ;;  %5955 = vmatprep.subr.bf16.mxu1 %v10648_v0  ;;  %v5449_v11 = vpop.f32.mrb[3].mxu0  ;;  %v10715_v63 = vld [vmem:[%s17374_s4 + $0xad0] ss:$76 sps:$4 sm:$0xff]   ;;  %v10718_v0 = vld [vmem:[%s17374_s4 + $0xad8] ss:$76 sps:$4 sm:$0xff]  }
 0x199   :  { %v10723_v6 = vld [vmem:[%s17374_s4 + $0xb6c] ss:$76 sps:$4 sm:$0xff]   ;;  %v10724_v9 = vld [vmem:[%s17374_s4 + $0xb70] ss:$76 sps:$4 sm:$0xff]  }
 0x19a   :  { %v10729_v10 = vld [vmem:[%s17374_s4 + $0xc04] ss:$76 sps:$4 sm:$0xff]   ;;  %v10732_v11 = vld [vmem:[%s17374_s4 + $0xc0c] ss:$76 sps:$4 sm:$0xff]  }
 0x19b   :  { %5833 = vmatpush1.bf16.msra.mxu0 %v10643_v7  ;;  %5956 = vmatpush1.bf16.msra.mxu1 %v10646_v8  ;;  %v10726_v7 = vld [vmem:[%s17374_s4 + $0xb74] ss:$76 sps:$4 sm:$0xff]  }
 0x19c   :  { %5834 = vmatprep.subr.bf16.mxu0 %v10651_v13  ;;  %5957 = vmatprep.subr.bf16.mxu1 %v10654_v14  ;;  %v10721_v8 = vld [vmem:[%s17374_s4 + $0xb68] ss:$76 sps:$4 sm:$0xff]   ;;  %v10727_v13 = vld [vmem:[%s17374_s4 + $0xc00] ss:$76 sps:$4 sm:$0xff]  }
 0x19d   :  { %v10730_v14 = vld [vmem:[%s17374_s4 + $0xc08] ss:$76 sps:$4 sm:$0xff]  }
 0x19f   :  { %5835 = vmatpush1.bf16.msra.mxu0 %v10649_v15  ;;  %5958 = vmatpush1.bf16.msra.mxu1 %v10652_v16  ;;  %v10735_v15 = vld [vmem:[%s17374_s4 + $0xc9c] ss:$76 sps:$4 sm:$0xff]   ;;  %v10738_v16 = vld [vmem:[%s17374_s4 + $0xca4] ss:$76 sps:$4 sm:$0xff]  }
 0x1a0   :  { %5836 = vmatprep.subr.bf16.mxu0 %v10657_v18  ;;  %5959 = vmatprep.subr.bf16.mxu1 %v10660_v19  ;;  %v10733_v18 = vld [vmem:[%s17374_s4 + $0xc98] ss:$76 sps:$4 sm:$0xff]   ;;  %v10736_v19 = vld [vmem:[%s17374_s4 + $0xca0] ss:$76 sps:$4 sm:$0xff]  }
 0x1a3   :  { %5837 = vmatpush1.bf16.msra.mxu0 %v10655_v21  ;;  %5960 = vmatpush1.bf16.msra.mxu1 %v10658_v22  ;;  %v10741_v21 = vld [vmem:[%s17374_s4 + $0xd34] ss:$76 sps:$4 sm:$0xff]   ;;  %v10744_v22 = vld [vmem:[%s17374_s4 + $0xd3c] ss:$76 sps:$4 sm:$0xff]  }
 0x1a4   :  { %5838 = vmatprep.subr.bf16.mxu0 %v10663_v23  ;;  %5961 = vmatprep.subr.bf16.mxu1 %v10666_v24  ;;  %v10739_v23 = vld [vmem:[%s17374_s4 + $0xd30] ss:$76 sps:$4 sm:$0xff]   ;;  %v10742_v24 = vld [vmem:[%s17374_s4 + $0xd38] ss:$76 sps:$4 sm:$0xff]  }
 0x1a7   :  { %5839 = vmatpush1.bf16.msra.mxu0 %v10661_v25  ;;  %5962 = vmatpush1.bf16.msra.mxu1 %v10664_v26  ;;  %v10747_v25 = vld [vmem:[%s17374_s4 + $0xdcc] ss:$76 sps:$4 sm:$0xff]   ;;  %v10750_v26 = vld [vmem:[%s17374_s4 + $0xdd4] ss:$76 sps:$4 sm:$0xff]  }
 0x1a8   :  { %5840 = vmatprep.subr.bf16.mxu0 %v10669_v27  ;;  %5963 = vmatprep.subr.bf16.mxu1 %v10672_v28  ;;  %v10745_v27 = vld [vmem:[%s17374_s4 + $0xdc8] ss:$76 sps:$4 sm:$0xff]   ;;  %v10748_v28 = vld [vmem:[%s17374_s4 + $0xdd0] ss:$76 sps:$4 sm:$0xff]  }
 0x1ab   :  { %5841 = vmatpush1.bf16.msra.mxu0 %v10667_v29  ;;  %5964 = vmatpush1.bf16.msra.mxu1 %v10670_v30  ;;  %v10753_v29 = vld [vmem:[%s17374_s4 + $0xe64] ss:$76 sps:$4 sm:$0xff]   ;;  %v10756_v30 = vld [vmem:[%s17374_s4 + $0xe6c] ss:$76 sps:$4 sm:$0xff]  }
 0x1ac   :  { %5842 = vmatprep.subr.bf16.mxu0 %v10675_v31  ;;  %5965 = vmatprep.subr.bf16.mxu1 %v10678_v33  ;;  %v10751_v31 = vld [vmem:[%s17374_s4 + $0xe60] ss:$76 sps:$4 sm:$0xff]   ;;  %v10754_v33 = vld [vmem:[%s17374_s4 + $0xe68] ss:$76 sps:$4 sm:$0xff]  }
 0x1af   :  { %5843 = vmatpush1.bf16.msra.mxu0 %v10673_v34  ;;  %5966 = vmatpush1.bf16.msra.mxu1 %v10676_v35  ;;  %v10759_v34 = vld [vmem:[%s17374_s4 + $0xefc] ss:$76 sps:$4 sm:$0xff]   ;;  %v10762_v35 = vld [vmem:[%s17374_s4 + $0xf04] ss:$76 sps:$4 sm:$0xff]  }
 0x1b0   :  { %5844 = vmatprep.subr.bf16.mxu0 %v10681_v36  ;;  %5967 = vmatprep.subr.bf16.mxu1 %v10684_v37  ;;  %v10757_v36 = vld [vmem:[%s17374_s4 + $0xef8] ss:$76 sps:$4 sm:$0xff]   ;;  %v10760_v37 = vld [vmem:[%s17374_s4 + $0xf00] ss:$76 sps:$4 sm:$0xff]  }
 0x1b3   :  { %5845 = vmatpush1.bf16.msra.mxu0 %v10679_v38  ;;  %5968 = vmatpush1.bf16.msra.mxu1 %v10682_v39  ;;  %v10765_v38 = vld [vmem:[%s17374_s4 + $0xf94] ss:$76 sps:$4 sm:$0xff]   ;;  %v10768_v39 = vld [vmem:[%s17374_s4 + $0xf9c] ss:$76 sps:$4 sm:$0xff]  }
 0x1b4   :  { %5846 = vmatprep.subr.bf16.mxu0 %v10687_v40  ;;  %5969 = vmatprep.subr.bf16.mxu1 %v10690_v41  ;;  %v10763_v40 = vld [vmem:[%s17374_s4 + $0xf90] ss:$76 sps:$4 sm:$0xff]   ;;  %v10766_v41 = vld [vmem:[%s17374_s4 + $0xf98] ss:$76 sps:$4 sm:$0xff]  }
 0x1b7   :  { %5847 = vmatpush1.bf16.msra.mxu0 %v10685_v42  ;;  %5970 = vmatpush1.bf16.msra.mxu1 %v10688_v43  ;;  %v10771_v42 = vld [vmem:[%s17374_s4 + $0x102c] ss:$76 sps:$4 sm:$0xff]   ;;  %v10774_v43 = vld [vmem:[%s17374_s4 + $0x1034] ss:$76 sps:$4 sm:$0xff]  }
 0x1b8   :  { %5848 = vmatprep.subr.bf16.mxu0 %v10693_v44  ;;  %5971 = vmatprep.subr.bf16.mxu1 %v10696_v45  ;;  %v10769_v44 = vld [vmem:[%s17374_s4 + $0x1028] ss:$76 sps:$4 sm:$0xff]   ;;  %v10772_v45 = vld [vmem:[%s17374_s4 + $0x1030] ss:$76 sps:$4 sm:$0xff]  }
 0x1bb   :  { %5849 = vmatpush1.bf16.msra.mxu0 %v10691_v46  ;;  %5972 = vmatpush1.bf16.msra.mxu1 %v10694_v47  ;;  %v10777_v46 = vld [vmem:[%s17374_s4 + $0x10c4] ss:$76 sps:$4 sm:$0xff]   ;;  %v10780_v47 = vld [vmem:[%s17374_s4 + $0x10cc] ss:$76 sps:$4 sm:$0xff]  }
 0x1bc   :  { %5850 = vmatprep.subr.bf16.mxu0 %v10699_v49  ;;  %5973 = vmatprep.subr.bf16.mxu1 %v10702_v50  ;;  %v10775_v49 = vld [vmem:[%s17374_s4 + $0x10c0] ss:$76 sps:$4 sm:$0xff]   ;;  %v10778_v50 = vld [vmem:[%s17374_s4 + $0x10c8] ss:$76 sps:$4 sm:$0xff]  }
 0x1bf   :  { %5851 = vmatpush1.bf16.msra.mxu0 %v10697_v51  ;;  %5974 = vmatpush1.bf16.msra.mxu1 %v10700_v52  ;;  %v10783_v51 = vld [vmem:[%s17374_s4 + $0x115c] ss:$76 sps:$4 sm:$0xff]   ;;  %v10786_v52 = vld [vmem:[%s17374_s4 + $0x1164] ss:$76 sps:$4 sm:$0xff]  }
 0x1c0   :  { %5861 = vmatprep.subr.bf16.mxu0 %v10705_v53  ;;  %5984 = vmatprep.subr.bf16.mxu1 %v10708_v54  ;;  %v10781_v53 = vld [vmem:[%s17374_s4 + $0x1158] ss:$76 sps:$4 sm:$0xff]   ;;  %v10784_v54 = vld [vmem:[%s17374_s4 + $0x1160] ss:$76 sps:$4 sm:$0xff]  }
 0x1c2   :  { %5853 = vmatmul.mubr.bf16.vlgmr.msra.gmra.mrb[8].mxu0 %v12199_v5  ;;  %5976 = vmatmul.mubr.bf16.vlgmr.msra.gmra.mrb[8].mxu1 %v12199_v5 }
 0x1c3   :  { %5862 = vmatpush1.bf16.msra.mxu0 %v10703_v55  ;;  %5985 = vmatpush1.bf16.msra.mxu1 %v10706_v56  ;;  %v10789_v55 = vld [vmem:[%s17374_s4 + $0x11f4] ss:$76 sps:$4 sm:$0xff]   ;;  %v10792_v56 = vld [vmem:[%s17374_s4 + $0x11fc] ss:$76 sps:$4 sm:$0xff]  }
 0x1c4   :  { %5863 = vmatprep.subr.bf16.mxu0 %v10711_v57  ;;  %5986 = vmatprep.subr.bf16.mxu1 %v10714_v58  ;;  %v10787_v57 = vld [vmem:[%s17374_s4 + $0x11f0] ss:$76 sps:$4 sm:$0xff]   ;;  %v10790_v58 = vld [vmem:[%s17374_s4 + $0x11f8] ss:$76 sps:$4 sm:$0xff]  }
 0x1c5   :  { %5893 = vmatprep.mubr.bf16.mxu0 %v12281_v32  ;;  %6016 = vmatprep.mubr.bf16.mxu1 %v12281_v32 }
 0x1c7   :  { %5864 = vmatpush1.bf16.msra.mxu0 %v10709_v59  ;;  %5987 = vmatpush1.bf16.msra.mxu1 %v10712_v60  ;;  %v10795_v59 = vld [vmem:[%s17374_s4 + $0x128c] ss:$76 sps:$4 sm:$0xff]   ;;  %v10798_v60 = vld [vmem:[%s17374_s4 + $0x1294] ss:$76 sps:$4 sm:$0xff]  }
 0x1c8   :  { %5865 = vmatprep.subr.bf16.mxu0 %v10717_v61  ;;  %5988 = vmatprep.subr.bf16.mxu1 %v10720_v62  ;;  %v10793_v61 = vld [vmem:[%s17374_s4 + $0x1288] ss:$76 sps:$4 sm:$0xff]   ;;  %v10796_v62 = vld [vmem:[%s17374_s4 + $0x1290] ss:$76 sps:$4 sm:$0xff]  }
 0x1cb   :  { %5866 = vmatpush1.bf16.msra.mxu0 %v10715_v63  ;;  %5989 = vmatpush1.bf16.msra.mxu1 %v10718_v0  ;;  %v10801_v63 = vld [vmem:[%s17374_s4 + $0x1324] ss:$76 sps:$4 sm:$0xff]   ;;  %v10804_v0 = vld [vmem:[%s17374_s4 + $0x132c] ss:$76 sps:$4 sm:$0xff]  }
 0x1cc   :  { %5867 = vmatprep.subr.bf16.mxu0 %v10723_v6  ;;  %5990 = vmatprep.subr.bf16.mxu1 %v10726_v7  ;;  %v10799_v6 = vld [vmem:[%s17374_s4 + $0x1320] ss:$76 sps:$4 sm:$0xff]   ;;  %v10802_v7 = vld [vmem:[%s17374_s4 + $0x1328] ss:$76 sps:$4 sm:$0xff]  }
 0x1cf   :  { %5868 = vmatpush1.bf16.msra.mxu0 %v10721_v8  ;;  %5991 = vmatpush1.bf16.msra.mxu1 %v10724_v9  ;;  %v10807_v8 = vld [vmem:[%s17374_s4 + $0x13bc] ss:$76 sps:$4 sm:$0xff]   ;;  %v10810_v9 = vld [vmem:[%s17374_s4 + $0x13c4] ss:$76 sps:$4 sm:$0xff]  }
 0x1d0   :  { %5869 = vmatprep.subr.bf16.mxu0 %v10729_v10  ;;  %5992 = vmatprep.subr.bf16.mxu1 %v10732_v11  ;;  %v10805_v10 = vld [vmem:[%s17374_s4 + $0x13b8] ss:$76 sps:$4 sm:$0xff]   ;;  %v10808_v11 = vld [vmem:[%s17374_s4 + $0x13c0] ss:$76 sps:$4 sm:$0xff]  }
 0x1d3   :  { %5870 = vmatpush1.bf16.msra.mxu0 %v10727_v13  ;;  %5993 = vmatpush1.bf16.msra.mxu1 %v10730_v14  ;;  %v10813_v13 = vld [vmem:[%s17374_s4 + $0x1454] ss:$76 sps:$4 sm:$0xff]   ;;  %v10816_v14 = vld [vmem:[%s17374_s4 + $0x145c] ss:$76 sps:$4 sm:$0xff]  }
 0x1d4   :  { %5871 = vmatprep.subr.bf16.mxu0 %v10735_v15  ;;  %5994 = vmatprep.subr.bf16.mxu1 %v10738_v16  ;;  %v10811_v15 = vld [vmem:[%s17374_s4 + $0x1450] ss:$76 sps:$4 sm:$0xff]   ;;  %v10814_v16 = vld [vmem:[%s17374_s4 + $0x1458] ss:$76 sps:$4 sm:$0xff]  }
 0x1d7   :  { %5872 = vmatpush1.bf16.msra.mxu0 %v10733_v18  ;;  %5995 = vmatpush1.bf16.msra.mxu1 %v10736_v19  ;;  %v10819_v18 = vld [vmem:[%s17374_s4 + $0x14ec] ss:$76 sps:$4 sm:$0xff]   ;;  %v10822_v19 = vld [vmem:[%s17374_s4 + $0x14f4] ss:$76 sps:$4 sm:$0xff]  }
 0x1d8   :  { %5873 = vmatprep.subr.bf16.mxu0 %v10741_v21  ;;  %5996 = vmatprep.subr.bf16.mxu1 %v10744_v22  ;;  %v10817_v21 = vld [vmem:[%s17374_s4 + $0x14e8] ss:$76 sps:$4 sm:$0xff]   ;;  %v10820_v22 = vld [vmem:[%s17374_s4 + $0x14f0] ss:$76 sps:$4 sm:$0xff]  }
 0x1db   :  { %5874 = vmatpush1.bf16.msra.mxu0 %v10739_v23  ;;  %5997 = vmatpush1.bf16.msra.mxu1 %v10742_v24  ;;  %v10825_v23 = vld [vmem:[%s17374_s4 + $0x1584] ss:$76 sps:$4 sm:$0xff]   ;;  %v10828_v24 = vld [vmem:[%s17374_s4 + $0x158c] ss:$76 sps:$4 sm:$0xff]  }
 0x1dc   :  { %5875 = vmatprep.subr.bf16.mxu0 %v10747_v25  ;;  %5998 = vmatprep.subr.bf16.mxu1 %v10750_v26  ;;  %v10823_v25 = vld [vmem:[%s17374_s4 + $0x1580] ss:$76 sps:$4 sm:$0xff]   ;;  %v10826_v26 = vld [vmem:[%s17374_s4 + $0x1588] ss:$76 sps:$4 sm:$0xff]  }
 0x1df   :  { %5876 = vmatpush1.bf16.msra.mxu0 %v10745_v27  ;;  %5999 = vmatpush1.bf16.msra.mxu1 %v10748_v28  ;;  %v10831_v27 = vld [vmem:[%s17374_s4 + $0x161c] ss:$76 sps:$4 sm:$0xff]   ;;  %v10834_v28 = vld [vmem:[%s17374_s4 + $0x1624] ss:$76 sps:$4 sm:$0xff]  }
 0x1e0   :  { %5877 = vmatprep.subr.bf16.mxu0 %v10753_v29  ;;  %6000 = vmatprep.subr.bf16.mxu1 %v10756_v30  ;;  %v10829_v29 = vld [vmem:[%s17374_s4 + $0x1618] ss:$76 sps:$4 sm:$0xff]   ;;  %v10832_v30 = vld [vmem:[%s17374_s4 + $0x1620] ss:$76 sps:$4 sm:$0xff]  }
 0x1e3   :  { %5878 = vmatpush1.bf16.msra.mxu0 %v10751_v31  ;;  %6001 = vmatpush1.bf16.msra.mxu1 %v10754_v33  ;;  %v10837_v31 = vld [vmem:[%s17374_s4 + $0x16b4] ss:$76 sps:$4 sm:$0xff]   ;;  %v10840_v33 = vld [vmem:[%s17374_s4 + $0x16bc] ss:$76 sps:$4 sm:$0xff]  }
 0x1e4   :  { %5879 = vmatprep.subr.bf16.mxu0 %v10759_v34  ;;  %6002 = vmatprep.subr.bf16.mxu1 %v10762_v35  ;;  %v10835_v34 = vld [vmem:[%s17374_s4 + $0x16b0] ss:$76 sps:$4 sm:$0xff]   ;;  %v10838_v35 = vld [vmem:[%s17374_s4 + $0x16b8] ss:$76 sps:$4 sm:$0xff]  }
 0x1e7   :  { %5880 = vmatpush1.bf16.msra.mxu0 %v10757_v36  ;;  %6003 = vmatpush1.bf16.msra.mxu1 %v10760_v37  ;;  %v10843_v36 = vld [vmem:[%s17374_s4 + $0x174c] ss:$76 sps:$4 sm:$0xff]   ;;  %v10846_v37 = vld [vmem:[%s17374_s4 + $0x1754] ss:$76 sps:$4 sm:$0xff]  }
 0x1e8   :  { %5881 = vmatprep.subr.bf16.mxu0 %v10765_v38  ;;  %6004 = vmatprep.subr.bf16.mxu1 %v10768_v39  ;;  %v10841_v38 = vld [vmem:[%s17374_s4 + $0x1748] ss:$76 sps:$4 sm:$0xff]   ;;  %v10844_v39 = vld [vmem:[%s17374_s4 + $0x1750] ss:$76 sps:$4 sm:$0xff]  }
 0x1eb   :  { %5882 = vmatpush1.bf16.msra.mxu0 %v10763_v40  ;;  %6005 = vmatpush1.bf16.msra.mxu1 %v10766_v41  ;;  %v10849_v40 = vld [vmem:[%s17374_s4 + $0x17e4] ss:$76 sps:$4 sm:$0xff]   ;;  %v10852_v41 = vld [vmem:[%s17374_s4 + $0x17ec] ss:$76 sps:$4 sm:$0xff]  }
 0x1ec   :  { %5883 = vmatprep.subr.bf16.mxu0 %v10771_v42  ;;  %6006 = vmatprep.subr.bf16.mxu1 %v10774_v43  ;;  %v10847_v42 = vld [vmem:[%s17374_s4 + $0x17e0] ss:$76 sps:$4 sm:$0xff]   ;;  %v10850_v43 = vld [vmem:[%s17374_s4 + $0x17e8] ss:$76 sps:$4 sm:$0xff]  }
 0x1ef   :  { %5884 = vmatpush1.bf16.msra.mxu0 %v10769_v44  ;;  %6007 = vmatpush1.bf16.msra.mxu1 %v10772_v45  ;;  %v10855_v44 = vld [vmem:[%s17374_s4 + $0x187c] ss:$76 sps:$4 sm:$0xff]   ;;  %v10858_v45 = vld [vmem:[%s17374_s4 + $0x1884] ss:$76 sps:$4 sm:$0xff]  }
 0x1f0   :  { %5885 = vmatprep.subr.bf16.mxu0 %v10777_v46  ;;  %6008 = vmatprep.subr.bf16.mxu1 %v10780_v47  ;;  %v10853_v46 = vld [vmem:[%s17374_s4 + $0x1878] ss:$76 sps:$4 sm:$0xff]   ;;  %v10856_v47 = vld [vmem:[%s17374_s4 + $0x1880] ss:$76 sps:$4 sm:$0xff]  }
 0x1f3   :  { %5886 = vmatpush1.bf16.msra.mxu0 %v10775_v49  ;;  %6009 = vmatpush1.bf16.msra.mxu1 %v10778_v50  ;;  %v10861_v49 = vld [vmem:[%s17374_s4 + $0x1914] ss:$76 sps:$4 sm:$0xff]   ;;  %v10864_v50 = vld [vmem:[%s17374_s4 + $0x191c] ss:$76 sps:$4 sm:$0xff]  }
 0x1f4   :  { %5887 = vmatprep.subr.bf16.mxu0 %v10783_v51  ;;  %6010 = vmatprep.subr.bf16.mxu1 %v10786_v52  ;;  %v10859_v51 = vld [vmem:[%s17374_s4 + $0x1910] ss:$76 sps:$4 sm:$0xff]   ;;  %v10862_v52 = vld [vmem:[%s17374_s4 + $0x1918] ss:$76 sps:$4 sm:$0xff]  }
 0x1f7   :  { %5888 = vmatpush1.bf16.msra.mxu0 %v10781_v53  ;;  %6011 = vmatpush1.bf16.msra.mxu1 %v10784_v54  ;;  %v10867_v53 = vld [vmem:[%s17374_s4 + $0x19ac] ss:$76 sps:$4 sm:$0xff]   ;;  %v10870_v54 = vld [vmem:[%s17374_s4 + $0x19b4] ss:$76 sps:$4 sm:$0xff]  }
 0x1f8   :  { %5889 = vmatprep.subr.bf16.mxu0 %v10789_v55  ;;  %6012 = vmatprep.subr.bf16.mxu1 %v10792_v56  ;;  %v10865_v55 = vld [vmem:[%s17374_s4 + $0x19a8] ss:$76 sps:$4 sm:$0xff]   ;;  %v10868_v56 = vld [vmem:[%s17374_s4 + $0x19b0] ss:$76 sps:$4 sm:$0xff]  }
 0x1fb   :  { %5890 = vmatpush1.bf16.msra.mxu0 %v10787_v57  ;;  %6013 = vmatpush1.bf16.msra.mxu1 %v10790_v58  ;;  %v10873_v57 = vld [vmem:[%s17374_s4 + $0x1a44] ss:$76 sps:$4 sm:$0xff]   ;;  %v10876_v58 = vld [vmem:[%s17374_s4 + $0x1a4c] ss:$76 sps:$4 sm:$0xff]  }
 0x1fc   :  { %5891 = vmatprep.subr.bf16.mxu0 %v10795_v59  ;;  %6014 = vmatprep.subr.bf16.mxu1 %v10798_v60  ;;  %v10871_v59 = vld [vmem:[%s17374_s4 + $0x1a40] ss:$76 sps:$4 sm:$0xff]   ;;  %v10874_v60 = vld [vmem:[%s17374_s4 + $0x1a48] ss:$76 sps:$4 sm:$0xff]  }
 0x1ff   :  { %5892 = vmatpush1.bf16.msra.mxu0 %v10793_v61  ;;  %6015 = vmatpush1.bf16.msra.mxu1 %v10796_v62  ;;  %v10879_v61 = vld [vmem:[%s17374_s4 + $0x1adc] ss:$76 sps:$4 sm:$0xff]   ;;  %v10882_v62 = vld [vmem:[%s17374_s4 + $0x1ae4] ss:$76 sps:$4 sm:$0xff]  }
 0x200   :  { %5902 = vmatprep.subr.bf16.mxu0 %v10801_v63  ;;  %6025 = vmatprep.subr.bf16.mxu1 %v10804_v0  ;;  %v10877_v63 = vld [vmem:[%s17374_s4 + $0x1ad8] ss:$76 sps:$4 sm:$0xff]   ;;  %v10880_v0 = vld [vmem:[%s17374_s4 + $0x1ae0] ss:$76 sps:$4 sm:$0xff]  }
 0x202   :  { %5894 = vmatmul.mubr.bf16.vlgmr.msra.gmra.mrb[8].mxu0 %v12408_v12  ;;  %6017 = vmatmul.mubr.bf16.vlgmr.msra.gmra.mrb[8].mxu1 %v12408_v12 }
 0x203   :  { %5903 = vmatpush1.bf16.msra.mxu0 %v10799_v6  ;;  %6026 = vmatpush1.bf16.msra.mxu1 %v10802_v7  ;;  %v10885_v6 = vld [vmem:[%s17374_s4 + $0x1b74] ss:$76 sps:$4 sm:$0xff]   ;;  %v10888_v7 = vld [vmem:[%s17374_s4 + $0x1b7c] ss:$76 sps:$4 sm:$0xff]  }
 0x204   :  { %5904 = vmatprep.subr.bf16.mxu0 %v10807_v8  ;;  %6027 = vmatprep.subr.bf16.mxu1 %v10810_v9  ;;  %v10883_v8 = vld [vmem:[%s17374_s4 + $0x1b70] ss:$76 sps:$4 sm:$0xff]   ;;  %v10886_v9 = vld [vmem:[%s17374_s4 + $0x1b78] ss:$76 sps:$4 sm:$0xff]  }
 0x205   :  { %5934 = vmatprep.mubr.bf16.mxu0 %v12422_v17  ;;  %6057 = vmatprep.mubr.bf16.mxu1 %v12422_v17 }
 0x207   :  { %5905 = vmatpush1.bf16.msra.mxu0 %v10805_v10  ;;  %6028 = vmatpush1.bf16.msra.mxu1 %v10808_v11  ;;  %v10891_v10 = vld [vmem:[%s17374_s4 + $0x1c0c] ss:$76 sps:$4 sm:$0xff]   ;;  %v10894_v11 = vld [vmem:[%s17374_s4 + $0x1c14] ss:$76 sps:$4 sm:$0xff]  }
 0x208   :  { %5906 = vmatprep.subr.bf16.mxu0 %v10813_v13  ;;  %6029 = vmatprep.subr.bf16.mxu1 %v10816_v14  ;;  %v10889_v13 = vld [vmem:[%s17374_s4 + $0x1c08] ss:$76 sps:$4 sm:$0xff]   ;;  %v10892_v14 = vld [vmem:[%s17374_s4 + $0x1c10] ss:$76 sps:$4 sm:$0xff]  }
 0x20b   :  { %5907 = vmatpush1.bf16.msra.mxu0 %v10811_v15  ;;  %6030 = vmatpush1.bf16.msra.mxu1 %v10814_v16  ;;  %v10897_v15 = vld [vmem:[%s17374_s4 + $0x34] ss:$76 sps:$4 sm:$0xff]   ;;  %v10900_v16 = vld [vmem:[%s17374_s4 + $0x3c] ss:$76 sps:$4 sm:$0xff]  }
 0x20c   :  { %5908 = vmatprep.subr.bf16.mxu0 %v10819_v18  ;;  %6031 = vmatprep.subr.bf16.mxu1 %v10822_v19  ;;  %v10895_v18 = vld [vmem:[%s17374_s4 + $0x30] ss:$76 sps:$4 sm:$0xff]   ;;  %v10898_v19 = vld [vmem:[%s17374_s4 + $0x38] ss:$76 sps:$4 sm:$0xff]  }
 0x20f   :  { %5909 = vmatpush1.bf16.msra.mxu0 %v10817_v21  ;;  %6032 = vmatpush1.bf16.msra.mxu1 %v10820_v22  ;;  %v10903_v21 = vld [vmem:[%s17374_s4 + $0xcc] ss:$76 sps:$4 sm:$0xff]   ;;  %v10906_v22 = vld [vmem:[%s17374_s4 + $0xd4] ss:$76 sps:$4 sm:$0xff]  }
 0x210   :  { %5910 = vmatprep.subr.bf16.mxu0 %v10825_v23  ;;  %6033 = vmatprep.subr.bf16.mxu1 %v10828_v24  ;;  %v10901_v23 = vld [vmem:[%s17374_s4 + $0xc8] ss:$76 sps:$4 sm:$0xff]   ;;  %v10904_v24 = vld [vmem:[%s17374_s4 + $0xd0] ss:$76 sps:$4 sm:$0xff]  }
 0x213   :  { %5911 = vmatpush1.bf16.msra.mxu0 %v10823_v25  ;;  %6034 = vmatpush1.bf16.msra.mxu1 %v10826_v26  ;;  %v10909_v25 = vld [vmem:[%s17374_s4 + $0x164] ss:$76 sps:$4 sm:$0xff]   ;;  %v10912_v26 = vld [vmem:[%s17374_s4 + $0x16c] ss:$76 sps:$4 sm:$0xff]  }
 0x214   :  { %5912 = vmatprep.subr.bf16.mxu0 %v10831_v27  ;;  %6035 = vmatprep.subr.bf16.mxu1 %v10834_v28  ;;  %v10907_v27 = vld [vmem:[%s17374_s4 + $0x160] ss:$76 sps:$4 sm:$0xff]   ;;  %v10910_v28 = vld [vmem:[%s17374_s4 + $0x168] ss:$76 sps:$4 sm:$0xff]  }
 0x217   :  { %5913 = vmatpush1.bf16.msra.mxu0 %v10829_v29  ;;  %6036 = vmatpush1.bf16.msra.mxu1 %v10832_v30  ;;  %v10915_v29 = vld [vmem:[%s17374_s4 + $0x1fc] ss:$76 sps:$4 sm:$0xff]   ;;  %v10918_v30 = vld [vmem:[%s17374_s4 + $0x204] ss:$76 sps:$4 sm:$0xff]  }
 0x218   :  { %5914 = vmatprep.subr.bf16.mxu0 %v10837_v31  ;;  %6037 = vmatprep.subr.bf16.mxu1 %v10840_v33  ;;  %v10913_v31 = vld [vmem:[%s17374_s4 + $0x1f8] ss:$76 sps:$4 sm:$0xff]   ;;  %v10916_v33 = vld [vmem:[%s17374_s4 + $0x200] ss:$76 sps:$4 sm:$0xff]  }
 0x21b   :  { %5915 = vmatpush1.bf16.msra.mxu0 %v10835_v34  ;;  %6038 = vmatpush1.bf16.msra.mxu1 %v10838_v35  ;;  %v10921_v34 = vld [vmem:[%s17374_s4 + $0x294] ss:$76 sps:$4 sm:$0xff]   ;;  %v10924_v35 = vld [vmem:[%s17374_s4 + $0x29c] ss:$76 sps:$4 sm:$0xff]  }
 0x21c   :  { %5916 = vmatprep.subr.bf16.mxu0 %v10843_v36  ;;  %6039 = vmatprep.subr.bf16.mxu1 %v10846_v37  ;;  %v10919_v36 = vld [vmem:[%s17374_s4 + $0x290] ss:$76 sps:$4 sm:$0xff]   ;;  %v10922_v37 = vld [vmem:[%s17374_s4 + $0x298] ss:$76 sps:$4 sm:$0xff]  }
 0x21f   :  { %5917 = vmatpush1.bf16.msra.mxu0 %v10841_v38  ;;  %6040 = vmatpush1.bf16.msra.mxu1 %v10844_v39  ;;  %v10927_v38 = vld [vmem:[%s17374_s4 + $0x32c] ss:$76 sps:$4 sm:$0xff]   ;;  %v10930_v39 = vld [vmem:[%s17374_s4 + $0x334] ss:$76 sps:$4 sm:$0xff]  }
 0x220   :  { %5918 = vmatprep.subr.bf16.mxu0 %v10849_v40  ;;  %6041 = vmatprep.subr.bf16.mxu1 %v10852_v41  ;;  %v10925_v40 = vld [vmem:[%s17374_s4 + $0x328] ss:$76 sps:$4 sm:$0xff]   ;;  %v10928_v41 = vld [vmem:[%s17374_s4 + $0x330] ss:$76 sps:$4 sm:$0xff]  }
 0x223   :  { %5919 = vmatpush1.bf16.msra.mxu0 %v10847_v42  ;;  %6042 = vmatpush1.bf16.msra.mxu1 %v10850_v43  ;;  %v10933_v42 = vld [vmem:[%s17374_s4 + $0x3c4] ss:$76 sps:$4 sm:$0xff]   ;;  %v10936_v43 = vld [vmem:[%s17374_s4 + $0x3cc] ss:$76 sps:$4 sm:$0xff]  }
 0x224   :  { %5920 = vmatprep.subr.bf16.mxu0 %v10855_v44  ;;  %6043 = vmatprep.subr.bf16.mxu1 %v10858_v45 }
 0x227   :  { %5921 = vmatpush1.bf16.msra.mxu0 %v10853_v46  ;;  %6044 = vmatpush1.bf16.msra.mxu1 %v10856_v47 }
 0x228   :  { %5922 = vmatprep.subr.bf16.mxu0 %v10861_v49  ;;  %6045 = vmatprep.subr.bf16.mxu1 %v10864_v50  ;;  %v10931_v50 = vld [vmem:[%s17374_s4 + $0x3c0] ss:$76 sps:$4 sm:$0xff]  }
 0x22b   :  { %5923 = vmatpush1.bf16.msra.mxu0 %v10859_v51  ;;  %6046 = vmatpush1.bf16.msra.mxu1 %v10862_v52  ;;  %v10934_v51 = vld [vmem:[%s17374_s4 + $0x3c8] ss:$76 sps:$4 sm:$0xff]  }
 0x22c   :  { %5924 = vmatprep.subr.bf16.mxu0 %v10867_v53  ;;  %6047 = vmatprep.subr.bf16.mxu1 %v10870_v54 }
 0x22f   :  { %5925 = vmatpush1.bf16.msra.mxu0 %v10865_v55  ;;  %6048 = vmatpush1.bf16.msra.mxu1 %v10868_v56  ;;  %v10939_v55 = vld [vmem:[%s17374_s4 + $0x45c] ss:$76 sps:$4 sm:$0xff]   ;;  %v10942_v56 = vld [vmem:[%s17374_s4 + $0x464] ss:$76 sps:$4 sm:$0xff]  }
 0x230   :  { %5926 = vmatprep.subr.bf16.mxu0 %v10873_v57  ;;  %6049 = vmatprep.subr.bf16.mxu1 %v10876_v58  ;;  %v10937_v57 = vld [vmem:[%s17374_s4 + $0x458] ss:$76 sps:$4 sm:$0xff]   ;;  %v10940_v58 = vld [vmem:[%s17374_s4 + $0x460] ss:$76 sps:$4 sm:$0xff]  }
 0x233   :  { %5927 = vmatpush1.bf16.msra.mxu0 %v10871_v59  ;;  %6050 = vmatpush1.bf16.msra.mxu1 %v10874_v60  ;;  %v10945_v59 = vld [vmem:[%s17374_s4 + $0x4f4] ss:$76 sps:$4 sm:$0xff]   ;;  %v10948_v60 = vld [vmem:[%s17374_s4 + $0x4fc] ss:$76 sps:$4 sm:$0xff]  }
 0x234   :  { %5928 = vmatprep.subr.bf16.mxu0 %v10879_v61  ;;  %6051 = vmatprep.subr.bf16.mxu1 %v10882_v62  ;;  %v10943_v61 = vld [vmem:[%s17374_s4 + $0x4f0] ss:$76 sps:$4 sm:$0xff]   ;;  %v10946_v62 = vld [vmem:[%s17374_s4 + $0x4f8] ss:$76 sps:$4 sm:$0xff]  }
 0x237   :  { %5929 = vmatpush1.bf16.msra.mxu0 %v10877_v63  ;;  %6052 = vmatpush1.bf16.msra.mxu1 %v10880_v0  ;;  %v10951_v63 = vld [vmem:[%s17374_s4 + $0x58c] ss:$76 sps:$4 sm:$0xff]   ;;  %v10954_v0 = vld [vmem:[%s17374_s4 + $0x594] ss:$76 sps:$4 sm:$0xff]  }
 0x238   :  { %5930 = vmatprep.subr.bf16.mxu0 %v10885_v6  ;;  %6053 = vmatprep.subr.bf16.mxu1 %v10888_v7  ;;  %v10949_v6 = vld [vmem:[%s17374_s4 + $0x588] ss:$76 sps:$4 sm:$0xff]   ;;  %v10952_v7 = vld [vmem:[%s17374_s4 + $0x590] ss:$76 sps:$4 sm:$0xff]  }
 0x23b   :  { %5931 = vmatpush1.bf16.msra.mxu0 %v10883_v8  ;;  %6054 = vmatpush1.bf16.msra.mxu1 %v10886_v9  ;;  %v10957_v8 = vld [vmem:[%s17374_s4 + $0x624] ss:$76 sps:$4 sm:$0xff]   ;;  %v10960_v9 = vld [vmem:[%s17374_s4 + $0x62c] ss:$76 sps:$4 sm:$0xff]  }
 0x23c   :  { %5932 = vmatprep.subr.bf16.mxu0 %v10891_v10  ;;  %6055 = vmatprep.subr.bf16.mxu1 %v10894_v11  ;;  %v10955_v10 = vld [vmem:[%s17374_s4 + $0x620] ss:$76 sps:$4 sm:$0xff]   ;;  %v10958_v11 = vld [vmem:[%s17374_s4 + $0x628] ss:$76 sps:$4 sm:$0xff]  }
 0x23f   :  { %5933 = vmatpush1.bf16.msra.mxu0 %v10889_v13  ;;  %6056 = vmatpush1.bf16.msra.mxu1 %v10892_v14  ;;  %v10963_v13 = vld [vmem:[%s17374_s4 + $0x6bc] ss:$76 sps:$4 sm:$0xff]   ;;  %v10966_v14 = vld [vmem:[%s17374_s4 + $0x6c4] ss:$76 sps:$4 sm:$0xff]  }
 0x240   :  { %6066 = vmatprep.subr.bf16.mxu0 %v10897_v15  ;;  %6189 = vmatprep.subr.bf16.mxu1 %v10900_v16  ;;  %v10961_v15 = vld [vmem:[%s17374_s4 + $0x6b8] ss:$76 sps:$4 sm:$0xff]   ;;  %v10964_v16 = vld [vmem:[%s17374_s4 + $0x6c0] ss:$76 sps:$4 sm:$0xff]  }
 0x242   :  { %5935 = vmatmul.mubr.bf16.vlgmr.msra.gmra.mrb[8].mxu0 %v12611_v20  ;;  %6058 = vmatmul.mubr.bf16.vlgmr.msra.gmra.mrb[8].mxu1 %v12611_v20 }
 0x243   :  { %6067 = vmatpush1.bf16.msra.mxu0 %v10895_v18  ;;  %6190 = vmatpush1.bf16.msra.mxu1 %v10898_v19  ;;  %v10969_v18 = vld [vmem:[%s17374_s4 + $0x754] ss:$76 sps:$4 sm:$0xff]   ;;  %v10972_v19 = vld [vmem:[%s17374_s4 + $0x75c] ss:$76 sps:$4 sm:$0xff]  }
 0x244   :  { %6068 = vmatprep.subr.bf16.mxu0 %v10903_v21  ;;  %6191 = vmatprep.subr.bf16.mxu1 %v10906_v22  ;;  %v10967_v21 = vld [vmem:[%s17374_s4 + $0x750] ss:$76 sps:$4 sm:$0xff]   ;;  %v10970_v22 = vld [vmem:[%s17374_s4 + $0x758] ss:$76 sps:$4 sm:$0xff]  }
 0x245   :  { %6098 = vmatprep.mubr.bf16.mxu0 %v12135_v48  ;;  %6221 = vmatprep.mubr.bf16.mxu1 %v12135_v48 }
 0x247   :  { %6069 = vmatpush1.bf16.msra.mxu0 %v10901_v23  ;;  %6192 = vmatpush1.bf16.msra.mxu1 %v10904_v24  ;;  %v10975_v23 = vld [vmem:[%s17374_s4 + $0x7ec] ss:$76 sps:$4 sm:$0xff]   ;;  %v10978_v24 = vld [vmem:[%s17374_s4 + $0x7f4] ss:$76 sps:$4 sm:$0xff]  }
 0x248   :  { %6070 = vmatprep.subr.bf16.mxu0 %v10909_v25  ;;  %6193 = vmatprep.subr.bf16.mxu1 %v10912_v26  ;;  %v10973_v25 = vld [vmem:[%s17374_s4 + $0x7e8] ss:$76 sps:$4 sm:$0xff]   ;;  %v10976_v26 = vld [vmem:[%s17374_s4 + $0x7f0] ss:$76 sps:$4 sm:$0xff]  }
 0x24b   :  { %6071 = vmatpush1.bf16.msra.mxu0 %v10907_v27  ;;  %6194 = vmatpush1.bf16.msra.mxu1 %v10910_v28  ;;  %v10981_v27 = vld [vmem:[%s17374_s4 + $0x884] ss:$76 sps:$4 sm:$0xff]   ;;  %v10984_v28 = vld [vmem:[%s17374_s4 + $0x88c] ss:$76 sps:$4 sm:$0xff]  }
 0x24c   :  { %6072 = vmatprep.subr.bf16.mxu0 %v10915_v29  ;;  %6195 = vmatprep.subr.bf16.mxu1 %v10918_v30  ;;  %v10979_v29 = vld [vmem:[%s17374_s4 + $0x880] ss:$76 sps:$4 sm:$0xff]   ;;  %v10982_v30 = vld [vmem:[%s17374_s4 + $0x888] ss:$76 sps:$4 sm:$0xff]  }
 0x24f   :  { %6073 = vmatpush1.bf16.msra.mxu0 %v10913_v31  ;;  %6196 = vmatpush1.bf16.msra.mxu1 %v10916_v33  ;;  %v10987_v31 = vld [vmem:[%s17374_s4 + $0x91c] ss:$76 sps:$4 sm:$0xff]   ;;  %v10990_v33 = vld [vmem:[%s17374_s4 + $0x924] ss:$76 sps:$4 sm:$0xff]  }
 0x250   :  { %6074 = vmatprep.subr.bf16.mxu0 %v10921_v34  ;;  %6197 = vmatprep.subr.bf16.mxu1 %v10924_v35  ;;  %v10985_v34 = vld [vmem:[%s17374_s4 + $0x918] ss:$76 sps:$4 sm:$0xff]   ;;  %v10988_v35 = vld [vmem:[%s17374_s4 + $0x920] ss:$76 sps:$4 sm:$0xff]  }
 0x253   :  { %6075 = vmatpush1.bf16.msra.mxu0 %v10919_v36  ;;  %6198 = vmatpush1.bf16.msra.mxu1 %v10922_v37  ;;  %v10993_v36 = vld [vmem:[%s17374_s4 + $0x9b4] ss:$76 sps:$4 sm:$0xff]   ;;  %v10996_v37 = vld [vmem:[%s17374_s4 + $0x9bc] ss:$76 sps:$4 sm:$0xff]  }
 0x254   :  { %6076 = vmatprep.subr.bf16.mxu0 %v10927_v38  ;;  %6199 = vmatprep.subr.bf16.mxu1 %v10930_v39  ;;  %v10991_v38 = vld [vmem:[%s17374_s4 + $0x9b0] ss:$76 sps:$4 sm:$0xff]   ;;  %v10994_v39 = vld [vmem:[%s17374_s4 + $0x9b8] ss:$76 sps:$4 sm:$0xff]  }
 0x255   :  { %v13873_v44 = vpop.f32.mrb[4].mxu1  ;;  %v13875_v45 = vpop.f32.mrb[4].mxu0 }
 0x256   :  { %v13877_v46 = vpop.f32.mrb[5].mxu1  ;;  %v13879_v47 = vpop.f32.mrb[5].mxu0 }
 0x257   :  { %v5817_v49 = vpop.f32.mrb[6].mxu1  ;;  %6077 = vmatpush1.bf16.msra.mxu0 %v10925_v40  ;;  %6200 = vmatpush1.bf16.msra.mxu1 %v10928_v41  ;;  %v5694_v52 = vpop.f32.mrb[6].mxu0  ;;  %v10999_v40 = vld [vmem:[%s17374_s4 + $0xa4c] ss:$76 sps:$4 sm:$0xff]   ;;  %v11002_v41 = vld [vmem:[%s17374_s4 + $0xa54] ss:$76 sps:$4 sm:$0xff]  }
 0x258   :  { %v5818_v53 = vpop.f32.mrb[7].mxu1  ;;  %6078 = vmatprep.subr.bf16.mxu0 %v10933_v42  ;;  %6201 = vmatprep.subr.bf16.mxu1 %v10936_v43  ;;  %v5695_v54 = vpop.f32.mrb[7].mxu0  ;;  %v10997_v42 = vld [vmem:[%s17374_s4 + $0xa48] ss:$76 sps:$4 sm:$0xff]   ;;  %v11000_v43 = vld [vmem:[%s17374_s4 + $0xa50] ss:$76 sps:$4 sm:$0xff]  }
 0x259   :  { %v11005_v49 = vld [vmem:[%s17374_s4 + $0xae4] ss:$76 sps:$4 sm:$0xff]   ;;  %v11006_v52 = vld [vmem:[%s17374_s4 + $0xae8] ss:$76 sps:$4 sm:$0xff]  }
 0x25a   :  { %v11011_v53 = vld [vmem:[%s17374_s4 + $0xb7c] ss:$76 sps:$4 sm:$0xff]   ;;  %v11014_v54 = vld [vmem:[%s17374_s4 + $0xb84] ss:$76 sps:$4 sm:$0xff]  }
 0x25b   :  { %6079 = vmatpush1.bf16.msra.mxu0 %v10931_v50  ;;  %6202 = vmatpush1.bf16.msra.mxu1 %v10934_v51  ;;  %v11008_v50 = vld [vmem:[%s17374_s4 + $0xaec] ss:$76 sps:$4 sm:$0xff]  }
 0x25c   :  { %6080 = vmatprep.subr.bf16.mxu0 %v10939_v55  ;;  %6203 = vmatprep.subr.bf16.mxu1 %v10942_v56  ;;  %v11003_v51 = vld [vmem:[%s17374_s4 + $0xae0] ss:$76 sps:$4 sm:$0xff]   ;;  %v11009_v55 = vld [vmem:[%s17374_s4 + $0xb78] ss:$76 sps:$4 sm:$0xff]  }
 0x25d   :  { %v11012_v56 = vld [vmem:[%s17374_s4 + $0xb80] ss:$76 sps:$4 sm:$0xff]  }
 0x25f   :  { %6081 = vmatpush1.bf16.msra.mxu0 %v10937_v57  ;;  %6204 = vmatpush1.bf16.msra.mxu1 %v10940_v58  ;;  %v11017_v57 = vld [vmem:[%s17374_s4 + $0xc14] ss:$76 sps:$4 sm:$0xff]   ;;  %v11020_v58 = vld [vmem:[%s17374_s4 + $0xc1c] ss:$76 sps:$4 sm:$0xff]  }
 0x260   :  { %6082 = vmatprep.subr.bf16.mxu0 %v10945_v59  ;;  %6205 = vmatprep.subr.bf16.mxu1 %v10948_v60  ;;  %v11015_v59 = vld [vmem:[%s17374_s4 + $0xc10] ss:$76 sps:$4 sm:$0xff]   ;;  %v11018_v60 = vld [vmem:[%s17374_s4 + $0xc18] ss:$76 sps:$4 sm:$0xff]  }
 0x263   :  { %6083 = vmatpush1.bf16.msra.mxu0 %v10943_v61  ;;  %6206 = vmatpush1.bf16.msra.mxu1 %v10946_v62  ;;  %v11023_v61 = vld [vmem:[%s17374_s4 + $0xcac] ss:$76 sps:$4 sm:$0xff]   ;;  %v11026_v62 = vld [vmem:[%s17374_s4 + $0xcb4] ss:$76 sps:$4 sm:$0xff]  }
 0x264   :  { %6084 = vmatprep.subr.bf16.mxu0 %v10951_v63  ;;  %6207 = vmatprep.subr.bf16.mxu1 %v10954_v0  ;;  %v11021_v63 = vld [vmem:[%s17374_s4 + $0xca8] ss:$76 sps:$4 sm:$0xff]   ;;  %v11024_v0 = vld [vmem:[%s17374_s4 + $0xcb0] ss:$76 sps:$4 sm:$0xff]  }
 0x267   :  { %6085 = vmatpush1.bf16.msra.mxu0 %v10949_v6  ;;  %6208 = vmatpush1.bf16.msra.mxu1 %v10952_v7  ;;  %v11029_v6 = vld [vmem:[%s17374_s4 + $0xd44] ss:$76 sps:$4 sm:$0xff]   ;;  %v11032_v7 = vld [vmem:[%s17374_s4 + $0xd4c] ss:$76 sps:$4 sm:$0xff]  }
 0x268   :  { %6086 = vmatprep.subr.bf16.mxu0 %v10957_v8  ;;  %6209 = vmatprep.subr.bf16.mxu1 %v10960_v9  ;;  %v11027_v8 = vld [vmem:[%s17374_s4 + $0xd40] ss:$76 sps:$4 sm:$0xff]   ;;  %v11030_v9 = vld [vmem:[%s17374_s4 + $0xd48] ss:$76 sps:$4 sm:$0xff]  }
 0x26b   :  { %6087 = vmatpush1.bf16.msra.mxu0 %v10955_v10  ;;  %6210 = vmatpush1.bf16.msra.mxu1 %v10958_v11  ;;  %v11035_v10 = vld [vmem:[%s17374_s4 + $0xddc] ss:$76 sps:$4 sm:$0xff]   ;;  %v11038_v11 = vld [vmem:[%s17374_s4 + $0xde4] ss:$76 sps:$4 sm:$0xff]  }
 0x26c   :  { %6088 = vmatprep.subr.bf16.mxu0 %v10963_v13  ;;  %6211 = vmatprep.subr.bf16.mxu1 %v10966_v14  ;;  %v11033_v13 = vld [vmem:[%s17374_s4 + $0xdd8] ss:$76 sps:$4 sm:$0xff]   ;;  %v11036_v14 = vld [vmem:[%s17374_s4 + $0xde0] ss:$76 sps:$4 sm:$0xff]  }
 0x26f   :  { %6089 = vmatpush1.bf16.msra.mxu0 %v10961_v15  ;;  %6212 = vmatpush1.bf16.msra.mxu1 %v10964_v16  ;;  %v11041_v15 = vld [vmem:[%s17374_s4 + $0xe74] ss:$76 sps:$4 sm:$0xff]   ;;  %v11044_v16 = vld [vmem:[%s17374_s4 + $0xe7c] ss:$76 sps:$4 sm:$0xff]  }
 0x270   :  { %6090 = vmatprep.subr.bf16.mxu0 %v10969_v18  ;;  %6213 = vmatprep.subr.bf16.mxu1 %v10972_v19  ;;  %v11039_v18 = vld [vmem:[%s17374_s4 + $0xe70] ss:$76 sps:$4 sm:$0xff]   ;;  %v11042_v19 = vld [vmem:[%s17374_s4 + $0xe78] ss:$76 sps:$4 sm:$0xff]  }
 0x273   :  { %6091 = vmatpush1.bf16.msra.mxu0 %v10967_v21  ;;  %6214 = vmatpush1.bf16.msra.mxu1 %v10970_v22  ;;  %v11047_v21 = vld [vmem:[%s17374_s4 + $0xf0c] ss:$76 sps:$4 sm:$0xff]   ;;  %v11050_v22 = vld [vmem:[%s17374_s4 + $0xf14] ss:$76 sps:$4 sm:$0xff]  }
 0x274   :  { %6092 = vmatprep.subr.bf16.mxu0 %v10975_v23  ;;  %6215 = vmatprep.subr.bf16.mxu1 %v10978_v24  ;;  %v11045_v23 = vld [vmem:[%s17374_s4 + $0xf08] ss:$76 sps:$4 sm:$0xff]   ;;  %v11048_v24 = vld [vmem:[%s17374_s4 + $0xf10] ss:$76 sps:$4 sm:$0xff]  }
 0x277   :  { %6093 = vmatpush1.bf16.msra.mxu0 %v10973_v25  ;;  %6216 = vmatpush1.bf16.msra.mxu1 %v10976_v26  ;;  %v11053_v25 = vld [vmem:[%s17374_s4 + $0xfa4] ss:$76 sps:$4 sm:$0xff]   ;;  %v11056_v26 = vld [vmem:[%s17374_s4 + $0xfac] ss:$76 sps:$4 sm:$0xff]  }
 0x278   :  { %6094 = vmatprep.subr.bf16.mxu0 %v10981_v27  ;;  %6217 = vmatprep.subr.bf16.mxu1 %v10984_v28  ;;  %v11051_v27 = vld [vmem:[%s17374_s4 + $0xfa0] ss:$76 sps:$4 sm:$0xff]   ;;  %v11054_v28 = vld [vmem:[%s17374_s4 + $0xfa8] ss:$76 sps:$4 sm:$0xff]  }
 0x27b   :  { %6095 = vmatpush1.bf16.msra.mxu0 %v10979_v29  ;;  %6218 = vmatpush1.bf16.msra.mxu1 %v10982_v30  ;;  %v11059_v29 = vld [vmem:[%s17374_s4 + $0x103c] ss:$76 sps:$4 sm:$0xff]   ;;  %v11062_v30 = vld [vmem:[%s17374_s4 + $0x1044] ss:$76 sps:$4 sm:$0xff]  }
 0x27c   :  { %6096 = vmatprep.subr.bf16.mxu0 %v10987_v31  ;;  %6219 = vmatprep.subr.bf16.mxu1 %v10990_v33  ;;  %v11057_v31 = vld [vmem:[%s17374_s4 + $0x1038] ss:$76 sps:$4 sm:$0xff]   ;;  %v11060_v33 = vld [vmem:[%s17374_s4 + $0x1040] ss:$76 sps:$4 sm:$0xff]  }
 0x27f   :  { %6097 = vmatpush1.bf16.msra.mxu0 %v10985_v34  ;;  %6220 = vmatpush1.bf16.msra.mxu1 %v10988_v35  ;;  %v11065_v34 = vld [vmem:[%s17374_s4 + $0x10d4] ss:$76 sps:$4 sm:$0xff]   ;;  %v11068_v35 = vld [vmem:[%s17374_s4 + $0x10dc] ss:$76 sps:$4 sm:$0xff]  }
 0x280   :  { %6107 = vmatprep.subr.bf16.mxu0 %v10993_v36  ;;  %6230 = vmatprep.subr.bf16.mxu1 %v10996_v37  ;;  %v11063_v36 = vld [vmem:[%s17374_s4 + $0x10d0] ss:$76 sps:$4 sm:$0xff]   ;;  %v11066_v37 = vld [vmem:[%s17374_s4 + $0x10d8] ss:$76 sps:$4 sm:$0xff]  }
 0x282   :  { %6099 = vmatmul.mubr.bf16.vlgmr.msra.gmra.mrb[12].mxu0 %v12199_v5  ;;  %6222 = vmatmul.mubr.bf16.vlgmr.msra.gmra.mrb[12].mxu1 %v12199_v5 }
 0x283   :  { %6108 = vmatpush1.bf16.msra.mxu0 %v10991_v38  ;;  %6231 = vmatpush1.bf16.msra.mxu1 %v10994_v39  ;;  %v11071_v38 = vld [vmem:[%s17374_s4 + $0x116c] ss:$76 sps:$4 sm:$0xff]   ;;  %v11074_v39 = vld [vmem:[%s17374_s4 + $0x1174] ss:$76 sps:$4 sm:$0xff]  }
 0x284   :  { %6109 = vmatprep.subr.bf16.mxu0 %v10999_v40  ;;  %6232 = vmatprep.subr.bf16.mxu1 %v11002_v41  ;;  %v11069_v40 = vld [vmem:[%s17374_s4 + $0x1168] ss:$76 sps:$4 sm:$0xff]   ;;  %v11072_v41 = vld [vmem:[%s17374_s4 + $0x1170] ss:$76 sps:$4 sm:$0xff]  }
 0x285   :  { %6139 = vmatprep.mubr.bf16.mxu0 %v12281_v32  ;;  %6262 = vmatprep.mubr.bf16.mxu1 %v12281_v32 }
 0x287   :  { %6110 = vmatpush1.bf16.msra.mxu0 %v10997_v42  ;;  %6233 = vmatpush1.bf16.msra.mxu1 %v11000_v43  ;;  %v11077_v42 = vld [vmem:[%s17374_s4 + $0x1204] ss:$76 sps:$4 sm:$0xff]   ;;  %v11080_v43 = vld [vmem:[%s17374_s4 + $0x120c] ss:$76 sps:$4 sm:$0xff]  }
 0x288   :  { %6111 = vmatprep.subr.bf16.mxu0 %v11005_v49  ;;  %6234 = vmatprep.subr.bf16.mxu1 %v11008_v50  ;;  %v11075_v49 = vld [vmem:[%s17374_s4 + $0x1200] ss:$76 sps:$4 sm:$0xff]   ;;  %v11078_v50 = vld [vmem:[%s17374_s4 + $0x1208] ss:$76 sps:$4 sm:$0xff]  }
 0x28b   :  { %6112 = vmatpush1.bf16.msra.mxu0 %v11003_v51  ;;  %6235 = vmatpush1.bf16.msra.mxu1 %v11006_v52  ;;  %v11083_v51 = vld [vmem:[%s17374_s4 + $0x129c] ss:$76 sps:$4 sm:$0xff]   ;;  %v11086_v52 = vld [vmem:[%s17374_s4 + $0x12a4] ss:$76 sps:$4 sm:$0xff]  }
 0x28c   :  { %6113 = vmatprep.subr.bf16.mxu0 %v11011_v53  ;;  %6236 = vmatprep.subr.bf16.mxu1 %v11014_v54  ;;  %v11081_v53 = vld [vmem:[%s17374_s4 + $0x1298] ss:$76 sps:$4 sm:$0xff]   ;;  %v11084_v54 = vld [vmem:[%s17374_s4 + $0x12a0] ss:$76 sps:$4 sm:$0xff]  }
 0x28f   :  { %6114 = vmatpush1.bf16.msra.mxu0 %v11009_v55  ;;  %6237 = vmatpush1.bf16.msra.mxu1 %v11012_v56  ;;  %v11089_v55 = vld [vmem:[%s17374_s4 + $0x1334] ss:$76 sps:$4 sm:$0xff]   ;;  %v11092_v56 = vld [vmem:[%s17374_s4 + $0x133c] ss:$76 sps:$4 sm:$0xff]  }
 0x290   :  { %6115 = vmatprep.subr.bf16.mxu0 %v11017_v57  ;;  %6238 = vmatprep.subr.bf16.mxu1 %v11020_v58  ;;  %v11087_v57 = vld [vmem:[%s17374_s4 + $0x1330] ss:$76 sps:$4 sm:$0xff]   ;;  %v11090_v58 = vld [vmem:[%s17374_s4 + $0x1338] ss:$76 sps:$4 sm:$0xff]  }
 0x293   :  { %6116 = vmatpush1.bf16.msra.mxu0 %v11015_v59  ;;  %6239 = vmatpush1.bf16.msra.mxu1 %v11018_v60  ;;  %v11095_v59 = vld [vmem:[%s17374_s4 + $0x13cc] ss:$76 sps:$4 sm:$0xff]   ;;  %v11098_v60 = vld [vmem:[%s17374_s4 + $0x13d4] ss:$76 sps:$4 sm:$0xff]  }
 0x294   :  { %6117 = vmatprep.subr.bf16.mxu0 %v11023_v61  ;;  %6240 = vmatprep.subr.bf16.mxu1 %v11026_v62  ;;  %v11093_v61 = vld [vmem:[%s17374_s4 + $0x13c8] ss:$76 sps:$4 sm:$0xff]   ;;  %v11096_v62 = vld [vmem:[%s17374_s4 + $0x13d0] ss:$76 sps:$4 sm:$0xff]  }
 0x297   :  { %6118 = vmatpush1.bf16.msra.mxu0 %v11021_v63  ;;  %6241 = vmatpush1.bf16.msra.mxu1 %v11024_v0  ;;  %v11101_v63 = vld [vmem:[%s17374_s4 + $0x1464] ss:$76 sps:$4 sm:$0xff]   ;;  %v11104_v0 = vld [vmem:[%s17374_s4 + $0x146c] ss:$76 sps:$4 sm:$0xff]  }
 0x298   :  { %6119 = vmatprep.subr.bf16.mxu0 %v11029_v6  ;;  %6242 = vmatprep.subr.bf16.mxu1 %v11032_v7  ;;  %v11099_v6 = vld [vmem:[%s17374_s4 + $0x1460] ss:$76 sps:$4 sm:$0xff]   ;;  %v11102_v7 = vld [vmem:[%s17374_s4 + $0x1468] ss:$76 sps:$4 sm:$0xff]  }
 0x29b   :  { %6120 = vmatpush1.bf16.msra.mxu0 %v11027_v8  ;;  %6243 = vmatpush1.bf16.msra.mxu1 %v11030_v9  ;;  %v11107_v8 = vld [vmem:[%s17374_s4 + $0x14fc] ss:$76 sps:$4 sm:$0xff]   ;;  %v11110_v9 = vld [vmem:[%s17374_s4 + $0x1504] ss:$76 sps:$4 sm:$0xff]  }
 0x29c   :  { %6121 = vmatprep.subr.bf16.mxu0 %v11035_v10  ;;  %6244 = vmatprep.subr.bf16.mxu1 %v11038_v11  ;;  %v11105_v10 = vld [vmem:[%s17374_s4 + $0x14f8] ss:$76 sps:$4 sm:$0xff]   ;;  %v11108_v11 = vld [vmem:[%s17374_s4 + $0x1500] ss:$76 sps:$4 sm:$0xff]  }
 0x29f   :  { %6122 = vmatpush1.bf16.msra.mxu0 %v11033_v13  ;;  %6245 = vmatpush1.bf16.msra.mxu1 %v11036_v14  ;;  %v11113_v13 = vld [vmem:[%s17374_s4 + $0x1594] ss:$76 sps:$4 sm:$0xff]   ;;  %v11116_v14 = vld [vmem:[%s17374_s4 + $0x159c] ss:$76 sps:$4 sm:$0xff]  }
 0x2a0   :  { %6123 = vmatprep.subr.bf16.mxu0 %v11041_v15  ;;  %6246 = vmatprep.subr.bf16.mxu1 %v11044_v16  ;;  %v11111_v15 = vld [vmem:[%s17374_s4 + $0x1590] ss:$76 sps:$4 sm:$0xff]   ;;  %v11114_v16 = vld [vmem:[%s17374_s4 + $0x1598] ss:$76 sps:$4 sm:$0xff]  }
 0x2a3   :  { %6124 = vmatpush1.bf16.msra.mxu0 %v11039_v18  ;;  %6247 = vmatpush1.bf16.msra.mxu1 %v11042_v19  ;;  %v11119_v18 = vld [vmem:[%s17374_s4 + $0x162c] ss:$76 sps:$4 sm:$0xff]   ;;  %v11122_v19 = vld [vmem:[%s17374_s4 + $0x1634] ss:$76 sps:$4 sm:$0xff]  }
 0x2a4   :  { %6125 = vmatprep.subr.bf16.mxu0 %v11047_v21  ;;  %6248 = vmatprep.subr.bf16.mxu1 %v11050_v22  ;;  %v11117_v21 = vld [vmem:[%s17374_s4 + $0x1628] ss:$76 sps:$4 sm:$0xff]   ;;  %v11120_v22 = vld [vmem:[%s17374_s4 + $0x1630] ss:$76 sps:$4 sm:$0xff]  }
 0x2a7   :  { %6126 = vmatpush1.bf16.msra.mxu0 %v11045_v23  ;;  %6249 = vmatpush1.bf16.msra.mxu1 %v11048_v24  ;;  %v11125_v23 = vld [vmem:[%s17374_s4 + $0x16c4] ss:$76 sps:$4 sm:$0xff]   ;;  %v11128_v24 = vld [vmem:[%s17374_s4 + $0x16cc] ss:$76 sps:$4 sm:$0xff]  }
 0x2a8   :  { %6127 = vmatprep.subr.bf16.mxu0 %v11053_v25  ;;  %6250 = vmatprep.subr.bf16.mxu1 %v11056_v26  ;;  %v11123_v25 = vld [vmem:[%s17374_s4 + $0x16c0] ss:$76 sps:$4 sm:$0xff]   ;;  %v11126_v26 = vld [vmem:[%s17374_s4 + $0x16c8] ss:$76 sps:$4 sm:$0xff]  }
 0x2ab   :  { %6128 = vmatpush1.bf16.msra.mxu0 %v11051_v27  ;;  %6251 = vmatpush1.bf16.msra.mxu1 %v11054_v28  ;;  %v11131_v27 = vld [vmem:[%s17374_s4 + $0x175c] ss:$76 sps:$4 sm:$0xff]   ;;  %v11134_v28 = vld [vmem:[%s17374_s4 + $0x1764] ss:$76 sps:$4 sm:$0xff]  }
 0x2ac   :  { %6129 = vmatprep.subr.bf16.mxu0 %v11059_v29  ;;  %6252 = vmatprep.subr.bf16.mxu1 %v11062_v30  ;;  %v11129_v29 = vld [vmem:[%s17374_s4 + $0x1758] ss:$76 sps:$4 sm:$0xff]   ;;  %v11132_v30 = vld [vmem:[%s17374_s4 + $0x1760] ss:$76 sps:$4 sm:$0xff]  }
 0x2af   :  { %6130 = vmatpush1.bf16.msra.mxu0 %v11057_v31  ;;  %6253 = vmatpush1.bf16.msra.mxu1 %v11060_v33  ;;  %v11137_v31 = vld [vmem:[%s17374_s4 + $0x17f4] ss:$76 sps:$4 sm:$0xff]   ;;  %v11140_v33 = vld [vmem:[%s17374_s4 + $0x17fc] ss:$76 sps:$4 sm:$0xff]  }
 0x2b0   :  { %6131 = vmatprep.subr.bf16.mxu0 %v11065_v34  ;;  %6254 = vmatprep.subr.bf16.mxu1 %v11068_v35  ;;  %v11135_v34 = vld [vmem:[%s17374_s4 + $0x17f0] ss:$76 sps:$4 sm:$0xff]   ;;  %v11138_v35 = vld [vmem:[%s17374_s4 + $0x17f8] ss:$76 sps:$4 sm:$0xff]  }
 0x2b3   :  { %6132 = vmatpush1.bf16.msra.mxu0 %v11063_v36  ;;  %6255 = vmatpush1.bf16.msra.mxu1 %v11066_v37  ;;  %v11143_v36 = vld [vmem:[%s17374_s4 + $0x188c] ss:$76 sps:$4 sm:$0xff]   ;;  %v11146_v37 = vld [vmem:[%s17374_s4 + $0x1894] ss:$76 sps:$4 sm:$0xff]  }
 0x2b4   :  { %6133 = vmatprep.subr.bf16.mxu0 %v11071_v38  ;;  %6256 = vmatprep.subr.bf16.mxu1 %v11074_v39  ;;  %v11141_v38 = vld [vmem:[%s17374_s4 + $0x1888] ss:$76 sps:$4 sm:$0xff]   ;;  %v11144_v39 = vld [vmem:[%s17374_s4 + $0x1890] ss:$76 sps:$4 sm:$0xff]  }
 0x2b7   :  { %6134 = vmatpush1.bf16.msra.mxu0 %v11069_v40  ;;  %6257 = vmatpush1.bf16.msra.mxu1 %v11072_v41  ;;  %v11149_v40 = vld [vmem:[%s17374_s4 + $0x1924] ss:$76 sps:$4 sm:$0xff]   ;;  %v11152_v41 = vld [vmem:[%s17374_s4 + $0x192c] ss:$76 sps:$4 sm:$0xff]  }
 0x2b8   :  { %6135 = vmatprep.subr.bf16.mxu0 %v11077_v42  ;;  %6258 = vmatprep.subr.bf16.mxu1 %v11080_v43  ;;  %v11147_v42 = vld [vmem:[%s17374_s4 + $0x1920] ss:$76 sps:$4 sm:$0xff]   ;;  %v11150_v43 = vld [vmem:[%s17374_s4 + $0x1928] ss:$76 sps:$4 sm:$0xff]  }
 0x2bb   :  { %6136 = vmatpush1.bf16.msra.mxu0 %v11075_v49  ;;  %6259 = vmatpush1.bf16.msra.mxu1 %v11078_v50  ;;  %v11155_v49 = vld [vmem:[%s17374_s4 + $0x19bc] ss:$76 sps:$4 sm:$0xff]   ;;  %v11158_v50 = vld [vmem:[%s17374_s4 + $0x19c4] ss:$76 sps:$4 sm:$0xff]  }
 0x2bc   :  { %6137 = vmatprep.subr.bf16.mxu0 %v11083_v51  ;;  %6260 = vmatprep.subr.bf16.mxu1 %v11086_v52  ;;  %v11153_v51 = vld [vmem:[%s17374_s4 + $0x19b8] ss:$76 sps:$4 sm:$0xff]   ;;  %v11156_v52 = vld [vmem:[%s17374_s4 + $0x19c0] ss:$76 sps:$4 sm:$0xff]  }
 0x2bf   :  { %6138 = vmatpush1.bf16.msra.mxu0 %v11081_v53  ;;  %6261 = vmatpush1.bf16.msra.mxu1 %v11084_v54  ;;  %v11161_v53 = vld [vmem:[%s17374_s4 + $0x1a54] ss:$76 sps:$4 sm:$0xff]   ;;  %v11164_v54 = vld [vmem:[%s17374_s4 + $0x1a5c] ss:$76 sps:$4 sm:$0xff]  }
 0x2c0   :  { %6148 = vmatprep.subr.bf16.mxu0 %v11089_v55  ;;  %6271 = vmatprep.subr.bf16.mxu1 %v11092_v56  ;;  %v11159_v55 = vld [vmem:[%s17374_s4 + $0x1a50] ss:$76 sps:$4 sm:$0xff]   ;;  %v11162_v56 = vld [vmem:[%s17374_s4 + $0x1a58] ss:$76 sps:$4 sm:$0xff]  }
 0x2c2   :  { %6140 = vmatmul.mubr.bf16.vlgmr.msra.gmra.mrb[12].mxu0 %v12408_v12  ;;  %6263 = vmatmul.mubr.bf16.vlgmr.msra.gmra.mrb[12].mxu1 %v12408_v12 }
 0x2c3   :  { %6149 = vmatpush1.bf16.msra.mxu0 %v11087_v57  ;;  %6272 = vmatpush1.bf16.msra.mxu1 %v11090_v58  ;;  %v11167_v57 = vld [vmem:[%s17374_s4 + $0x1aec] ss:$76 sps:$4 sm:$0xff]   ;;  %v11170_v58 = vld [vmem:[%s17374_s4 + $0x1af4] ss:$76 sps:$4 sm:$0xff]  }
 0x2c4   :  { %6150 = vmatprep.subr.bf16.mxu0 %v11095_v59  ;;  %6273 = vmatprep.subr.bf16.mxu1 %v11098_v60  ;;  %v11165_v59 = vld [vmem:[%s17374_s4 + $0x1ae8] ss:$76 sps:$4 sm:$0xff]   ;;  %v11168_v60 = vld [vmem:[%s17374_s4 + $0x1af0] ss:$76 sps:$4 sm:$0xff]  }
 0x2c5   :  { %6303 = vmatprep.mubr.bf16.mxu1 %v12422_v17  ;;  %6180 = vmatprep.mubr.bf16.mxu0 %v12422_v17 }
 0x2c7   :  { %6151 = vmatpush1.bf16.msra.mxu0 %v11093_v61  ;;  %6274 = vmatpush1.bf16.msra.mxu1 %v11096_v62  ;;  %v11173_v61 = vld [vmem:[%s17374_s4 + $0x1b84] ss:$76 sps:$4 sm:$0xff]   ;;  %v11176_v62 = vld [vmem:[%s17374_s4 + $0x1b8c] ss:$76 sps:$4 sm:$0xff]  }
 0x2c8   :  { %6152 = vmatprep.subr.bf16.mxu0 %v11101_v63  ;;  %6275 = vmatprep.subr.bf16.mxu1 %v11104_v0  ;;  %v11171_v63 = vld [vmem:[%s17374_s4 + $0x1b80] ss:$76 sps:$4 sm:$0xff]   ;;  %v11174_v0 = vld [vmem:[%s17374_s4 + $0x1b88] ss:$76 sps:$4 sm:$0xff]  }
 0x2cb   :  { %6153 = vmatpush1.bf16.msra.mxu0 %v11099_v6  ;;  %6276 = vmatpush1.bf16.msra.mxu1 %v11102_v7  ;;  %v11179_v6 = vld [vmem:[%s17374_s4 + $0x1c1c] ss:$76 sps:$4 sm:$0xff]   ;;  %v11182_v7 = vld [vmem:[%s17374_s4 + $0x1c24] ss:$76 sps:$4 sm:$0xff]  }
 0x2cc   :  { %6154 = vmatprep.subr.bf16.mxu0 %v11107_v8  ;;  %6277 = vmatprep.subr.bf16.mxu1 %v11110_v9  ;;  %v11177_v8 = vld [vmem:[%s17374_s4 + $0x1c18] ss:$76 sps:$4 sm:$0xff]   ;;  %v11180_v9 = vld [vmem:[%s17374_s4 + $0x1c20] ss:$76 sps:$4 sm:$0xff]  }
 0x2cf   :  { %6155 = vmatpush1.bf16.msra.mxu0 %v11105_v10  ;;  %6278 = vmatpush1.bf16.msra.mxu1 %v11108_v11  ;;  %v11185_v10 = vld [vmem:[%s17374_s4 + $0x44] ss:$76 sps:$4 sm:$0xff]   ;;  %v37_v11 = vld [vmem:[%s17376_s1 + $0x8] sm:$0xff] }
 0x2d0   :  { %6156 = vmatprep.subr.bf16.mxu0 %v11113_v13  ;;  %6279 = vmatprep.subr.bf16.mxu1 %v11116_v14  ;;  %v11183_v13 = vld [vmem:[%s17374_s4 + $0x40] ss:$76 sps:$4 sm:$0xff]   ;;  %v11379_v14 = vld [vmem:[%s17374_s4 + $0x1c] ss:$76 sps:$4 sm:$0xff]  }
 0x2d3   :  { %6157 = vmatpush1.bf16.msra.mxu0 %v11111_v15  ;;  %6280 = vmatpush1.bf16.msra.mxu1 %v11114_v16  ;;  %v11188_v15 = vld [vmem:[%s17374_s4 + $0xdc] ss:$76 sps:$4 sm:$0xff]   ;;  %v14402_v16 = vpack.c.bf16 %v37_v11, %v37_v11  ;;  %v11399_v11 = vld [vmem:[%s17374_s4 + $0x60c] ss:$76 sps:$4 sm:$0xff]  }
 0x2d4   :  { %6158 = vmatprep.subr.bf16.mxu0 %v11119_v18  ;;  %6281 = vmatprep.subr.bf16.mxu1 %v11122_v19  ;;  %v11380_v18 = vld [vmem:[%s17374_s4 + $0x18] ss:$76 sps:$4 sm:$0xff]  }
 0x2d5   :  { %v11186_v19 = vld [vmem:[%s17374_s4 + $0xd8] ss:$76 sps:$4 sm:$0xff]  }
 0x2d7   :  { %6159 = vmatpush1.bf16.msra.mxu0 %v11117_v21  ;;  %6282 = vmatpush1.bf16.msra.mxu1 %v11120_v22  ;;  %v11381_v21 = vld [vmem:[%s17374_s4 + $0xb4] ss:$76 sps:$4 sm:$0xff]  }
 0x2d8   :  { %6160 = vmatprep.subr.bf16.mxu0 %v11125_v23  ;;  %6283 = vmatprep.subr.bf16.mxu1 %v11128_v24  ;;  %v11191_v22 = vld [vmem:[%s17374_s4 + $0x174] ss:$76 sps:$4 sm:$0xff]   ;;  %v11382_v23 = vld [vmem:[%s17374_s4 + $0xb0] ss:$76 sps:$4 sm:$0xff]  }
 0x2d9   :  { %v11189_v24 = vld [vmem:[%s17374_s4 + $0x170] ss:$76 sps:$4 sm:$0xff]  }
 0x2db   :  { %6161 = vmatpush1.bf16.msra.mxu0 %v11123_v25  ;;  %6284 = vmatpush1.bf16.msra.mxu1 %v11126_v26  ;;  %v11383_v25 = vld [vmem:[%s17374_s4 + $0x14c] ss:$76 sps:$4 sm:$0xff]   ;;  %v11384_v26 = vld [vmem:[%s17374_s4 + $0x148] ss:$76 sps:$4 sm:$0xff]  }
 0x2dc   :  { %6162 = vmatprep.subr.bf16.mxu0 %v11131_v27  ;;  %6285 = vmatprep.subr.bf16.mxu1 %v11134_v28  ;;  %v11192_v27 = vld [vmem:[%s17374_s4 + $0x208] ss:$76 sps:$4 sm:$0xff]   ;;  %v11385_v28 = vld [vmem:[%s17374_s4 + $0x1e4] ss:$76 sps:$4 sm:$0xff]  }
 0x2df   :  { %6163 = vmatpush1.bf16.msra.mxu0 %v11129_v29  ;;  %6286 = vmatpush1.bf16.msra.mxu1 %v11132_v30  ;;  %v11197_v29 = vld [vmem:[%s17374_s4 + $0x2a4] ss:$76 sps:$4 sm:$0xff]   ;;  %v11386_v30 = vld [vmem:[%s17374_s4 + $0x1e0] ss:$76 sps:$4 sm:$0xff]  }
 0x2e0   :  { %6164 = vmatprep.subr.bf16.mxu0 %v11137_v31  ;;  %6287 = vmatprep.subr.bf16.mxu1 %v11140_v33  ;;  %v11195_v31 = vld [vmem:[%s17374_s4 + $0x2a0] ss:$76 sps:$4 sm:$0xff]   ;;  %v11387_v33 = vld [vmem:[%s17374_s4 + $0x27c] ss:$76 sps:$4 sm:$0xff]  }
 0x2e3   :  { %6165 = vmatpush1.bf16.msra.mxu0 %v11135_v34  ;;  %6288 = vmatpush1.bf16.msra.mxu1 %v11138_v35  ;;  %v11200_v34 = vld [vmem:[%s17374_s4 + $0x33c] ss:$76 sps:$4 sm:$0xff]   ;;  %v11388_v35 = vld [vmem:[%s17374_s4 + $0x278] ss:$76 sps:$4 sm:$0xff]  }
 0x2e4   :  { %6166 = vmatprep.subr.bf16.mxu0 %v11143_v36  ;;  %6289 = vmatprep.subr.bf16.mxu1 %v11146_v37  ;;  %v11198_v36 = vld [vmem:[%s17374_s4 + $0x338] ss:$76 sps:$4 sm:$0xff]   ;;  %v11389_v37 = vld [vmem:[%s17374_s4 + $0x314] ss:$76 sps:$4 sm:$0xff]  }
 0x2e7   :  { %6167 = vmatpush1.bf16.msra.mxu0 %v11141_v38  ;;  %6290 = vmatpush1.bf16.msra.mxu1 %v11144_v39  ;;  %v11203_v38 = vld [vmem:[%s17374_s4 + $0x3d4] ss:$76 sps:$4 sm:$0xff]  }
 0x2e8   :  { %6168 = vmatprep.subr.bf16.mxu0 %v11149_v40  ;;  %6291 = vmatprep.subr.bf16.mxu1 %v11152_v41 }
 0x2eb   :  { %6169 = vmatpush1.bf16.msra.mxu0 %v11147_v42  ;;  %6292 = vmatpush1.bf16.msra.mxu1 %v11150_v43 }
 0x2ec   :  { %6170 = vmatprep.subr.bf16.mxu0 %v11155_v49  ;;  %6293 = vmatprep.subr.bf16.mxu1 %v11158_v50  ;;  %v11390_v49 = vld [vmem:[%s17374_s4 + $0x310] ss:$76 sps:$4 sm:$0xff]  }
 0x2ed   :  { %v11201_v50 = vld [vmem:[%s17374_s4 + $0x3d0] ss:$76 sps:$4 sm:$0xff]  }
 0x2ef   :  { %6171 = vmatpush1.bf16.msra.mxu0 %v11153_v51  ;;  %6294 = vmatpush1.bf16.msra.mxu1 %v11156_v52 }
 0x2f0   :  { %6172 = vmatprep.subr.bf16.mxu0 %v11161_v53  ;;  %6295 = vmatprep.subr.bf16.mxu1 %v11164_v54  ;;  %v11391_v53 = vld [vmem:[%s17374_s4 + $0x3ac] ss:$76 sps:$4 sm:$0xff]  }
 0x2f3   :  { %6173 = vmatpush1.bf16.msra.mxu0 %v11159_v55  ;;  %6296 = vmatpush1.bf16.msra.mxu1 %v11162_v56  ;;  %v11206_v55 = vld [vmem:[%s17374_s4 + $0x46c] ss:$76 sps:$4 sm:$0xff]   ;;  %v11392_v56 = vld [vmem:[%s17374_s4 + $0x3a8] ss:$76 sps:$4 sm:$0xff]  }
 0x2f4   :  { %6174 = vmatprep.subr.bf16.mxu0 %v11167_v57  ;;  %6297 = vmatprep.subr.bf16.mxu1 %v11170_v58  ;;  %v11204_v57 = vld [vmem:[%s17374_s4 + $0x468] ss:$76 sps:$4 sm:$0xff]   ;;  %v11393_v58 = vld [vmem:[%s17374_s4 + $0x444] ss:$76 sps:$4 sm:$0xff]  }
 0x2f7   :  { %6175 = vmatpush1.bf16.msra.mxu0 %v11165_v59  ;;  %6298 = vmatpush1.bf16.msra.mxu1 %v11168_v60  ;;  %v11209_v59 = vld [vmem:[%s17374_s4 + $0x504] ss:$76 sps:$4 sm:$0xff]   ;;  %v11394_v60 = vld [vmem:[%s17374_s4 + $0x440] ss:$76 sps:$4 sm:$0xff]  }
 0x2f8   :  { %6176 = vmatprep.subr.bf16.mxu0 %v11173_v61  ;;  %6299 = vmatprep.subr.bf16.mxu1 %v11176_v62  ;;  %v11207_v61 = vld [vmem:[%s17374_s4 + $0x500] ss:$76 sps:$4 sm:$0xff]   ;;  %v11395_v62 = vld [vmem:[%s17374_s4 + $0x4dc] ss:$76 sps:$4 sm:$0xff]  }
 0x2fb   :  { %6177 = vmatpush1.bf16.msra.mxu0 %v11171_v63  ;;  %6300 = vmatpush1.bf16.msra.mxu1 %v11174_v0  ;;  %v11212_v63 = vld [vmem:[%s17374_s4 + $0x59c] ss:$76 sps:$4 sm:$0xff]   ;;  %v11396_v0 = vld [vmem:[%s17374_s4 + $0x4d8] ss:$76 sps:$4 sm:$0xff]  }
 0x2fc   :  { %6178 = vmatprep.subr.bf16.mxu0 %v11179_v6  ;;  %6301 = vmatprep.subr.bf16.mxu1 %v11182_v7  ;;  %v11210_v6 = vld [vmem:[%s17374_s4 + $0x598] ss:$76 sps:$4 sm:$0xff]   ;;  %v11397_v7 = vld [vmem:[%s17374_s4 + $0x574] ss:$76 sps:$4 sm:$0xff]  }
 0x2ff   :  { %6179 = vmatpush1.bf16.msra.mxu0 %v11177_v8  ;;  %6302 = vmatpush1.bf16.msra.mxu1 %v11180_v9  ;;  %v11215_v8 = vld [vmem:[%s17374_s4 + $0x634] ss:$76 sps:$4 sm:$0xff]   ;;  %v11398_v9 = vld [vmem:[%s17374_s4 + $0x570] ss:$76 sps:$4 sm:$0xff]  }
 0x300   :  { %6312 = vmatprep.subr.bf16.mxu0 %v11185_v10  ;;  %6435 = vmatprep.subr.bf16.mxu1 %v11379_v14  ;;  %v11213_v10 = vld [vmem:[%s17374_s4 + $0x630] ss:$76 sps:$4 sm:$0xff]   ;;  %v11400_v14 = vld [vmem:[%s17374_s4 + $0x608] ss:$76 sps:$4 sm:$0xff]  }
 0x302   :  { %6304 = vmatmul.mubr.bf16.vlgmr.msra.gmra.mrb[12].mxu1 %v12611_v20  ;;  %6181 = vmatmul.mubr.bf16.vlgmr.msra.gmra.mrb[12].mxu0 %v12611_v20 }
 0x303   :  { %6313 = vmatpush1.bf16.msra.mxu0 %v11183_v13  ;;  %6436 = vmatpush1.bf16.msra.mxu1 %v11380_v18  ;;  %v11218_v13 = vld [vmem:[%s17374_s4 + $0x6cc] ss:$76 sps:$4 sm:$0xff]   ;;  %v11401_v18 = vld [vmem:[%s17374_s4 + $0x6a4] ss:$76 sps:$4 sm:$0xff]  }
 0x304   :  { %6314 = vmatprep.subr.bf16.mxu0 %v11188_v15  ;;  %6437 = vmatprep.subr.bf16.mxu1 %v11381_v21  ;;  %v11216_v15 = vld [vmem:[%s17374_s4 + $0x6c8] ss:$76 sps:$4 sm:$0xff]   ;;  %v11402_v21 = vld [vmem:[%s17374_s4 + $0x6a0] ss:$76 sps:$4 sm:$0xff]  }
 0x305   :  { %6344 = vmatprep.mubr.bf16.mxu0 %v12135_v48  ;;  %6467 = vmatprep.mubr.bf16.mxu1 %v14402_v16  ;;  %v11194_v48 = vld [vmem:[%s17374_s4 + $0x20c] ss:$76 sps:$4 sm:$0xff]  }
 0x307   :  { %6315 = vmatpush1.bf16.msra.mxu0 %v11186_v19  ;;  %6438 = vmatpush1.bf16.msra.mxu1 %v11382_v23  ;;  %v11221_v19 = vld [vmem:[%s17374_s4 + $0x764] ss:$76 sps:$4 sm:$0xff]   ;;  %v11403_v23 = vld [vmem:[%s17374_s4 + $0x73c] ss:$76 sps:$4 sm:$0xff]  }
 0x308   :  { %6316 = vmatprep.subr.bf16.mxu0 %v11191_v22  ;;  %6439 = vmatprep.subr.bf16.mxu1 %v11383_v25  ;;  %v11219_v22 = vld [vmem:[%s17374_s4 + $0x760] ss:$76 sps:$4 sm:$0xff]   ;;  %v11404_v25 = vld [vmem:[%s17374_s4 + $0x738] ss:$76 sps:$4 sm:$0xff]  }
 0x30b   :  { %6317 = vmatpush1.bf16.msra.mxu0 %v11189_v24  ;;  %6440 = vmatpush1.bf16.msra.mxu1 %v11384_v26  ;;  %v11224_v24 = vld [vmem:[%s17374_s4 + $0x7fc] ss:$76 sps:$4 sm:$0xff]   ;;  %v11405_v26 = vld [vmem:[%s17374_s4 + $0x7d4] ss:$76 sps:$4 sm:$0xff]  }
 0x30c   :  { %6318 = vmatprep.subr.bf16.mxu0 %v11194_v48  ;;  %6441 = vmatprep.subr.bf16.mxu1 %v11385_v28  ;;  %v11222_v48 = vld [vmem:[%s17374_s4 + $0x7f8] ss:$76 sps:$4 sm:$0xff]   ;;  %v11406_v28 = vld [vmem:[%s17374_s4 + $0x7d0] ss:$76 sps:$4 sm:$0xff]  }
 0x30f   :  { %6319 = vmatpush1.bf16.msra.mxu0 %v11192_v27  ;;  %6442 = vmatpush1.bf16.msra.mxu1 %v11386_v30  ;;  %v11227_v27 = vld [vmem:[%s17374_s4 + $0x894] ss:$76 sps:$4 sm:$0xff]   ;;  %v11407_v30 = vld [vmem:[%s17374_s4 + $0x86c] ss:$76 sps:$4 sm:$0xff]  }
 0x310   :  { %6320 = vmatprep.subr.bf16.mxu0 %v11197_v29  ;;  %6443 = vmatprep.subr.bf16.mxu1 %v11387_v33  ;;  %v11225_v29 = vld [vmem:[%s17374_s4 + $0x890] ss:$76 sps:$4 sm:$0xff]   ;;  %v11408_v33 = vld [vmem:[%s17374_s4 + $0x868] ss:$76 sps:$4 sm:$0xff]  }
 0x313   :  { %6321 = vmatpush1.bf16.msra.mxu0 %v11195_v31  ;;  %6444 = vmatpush1.bf16.msra.mxu1 %v11388_v35  ;;  %v11230_v31 = vld [vmem:[%s17374_s4 + $0x92c] ss:$76 sps:$4 sm:$0xff]   ;;  %v36_v35 = vld [vmem:[%s17376_s1] sm:$0xff] }
 0x314   :  { %6322 = vmatprep.subr.bf16.mxu0 %v11200_v34  ;;  %6445 = vmatprep.subr.bf16.mxu1 %v11389_v37  ;;  %v11228_v34 = vld [vmem:[%s17374_s4 + $0x928] ss:$76 sps:$4 sm:$0xff]   ;;  %v11233_v37 = vld [vmem:[%s17374_s4 + $0x9c4] ss:$76 sps:$4 sm:$0xff]  }
 0x315   :  { %v14468_v39 = vpop.f32.mrb[8].mxu0  ;;  %v14470_v40 = vpop.f32.mrb[8].mxu1 }
 0x316   :  { %v14472_v41 = vpop.f32.mrb[9].mxu0  ;;  %v14474_v42 = vpop.f32.mrb[9].mxu1 }
 0x317   :  { %v6063_v43 = vpop.f32.mrb[10].mxu1  ;;  %6323 = vmatpush1.bf16.msra.mxu0 %v11198_v36  ;;  %6446 = vmatpush1.bf16.msra.mxu1 %v11390_v49  ;;  %v5940_v51 = vpop.f32.mrb[10].mxu0  ;;  %v11409_v36 = vld [vmem:[%s17374_s4 + $0x904] ss:$76 sps:$4 sm:$0xff]   ;;  %v11410_v49 = vld [vmem:[%s17374_s4 + $0x900] ss:$76 sps:$4 sm:$0xff]  }
 0x318   :  { %v6064_v52 = vpop.f32.mrb[11].mxu1  ;;  %6324 = vmatprep.subr.bf16.mxu0 %v11203_v38  ;;  %6447 = vmatprep.subr.bf16.mxu1 %v11391_v53  ;;  %v5941_v54 = vpop.f32.mrb[11].mxu0  ;;  %v14599_v38 = vpack.c.bf16 %v36_v35, %v36_v35  ;;  %v39_v43 = vld [vmem:[%s17376_s1 + $0x18] sm:$0xff] }
 0x319   :  { %v11411_v51 = vld [vmem:[%s17374_s4 + $0x99c] ss:$76 sps:$4 sm:$0xff]   ;;  %v14616_v53 = vpack.c.bf16 %v39_v43, %v39_v43  ;;  %v11412_v54 = vld [vmem:[%s17374_s4 + $0x998] ss:$76 sps:$4 sm:$0xff]  }
 0x31a   :  { %v11236_v52 = vld [vmem:[%s17374_s4 + $0xa5c] ss:$76 sps:$4 sm:$0xff]   ;;  %v11431_v35 = vld [vmem:[%s17374_s4 + $0xf8c] ss:$76 sps:$4 sm:$0xff]  }
 0x31b   :  { %6325 = vmatpush1.bf16.msra.mxu0 %v11201_v50  ;;  %6448 = vmatpush1.bf16.msra.mxu1 %v11392_v56  ;;  %v11231_v50 = vld [vmem:[%s17374_s4 + $0x9c0] ss:$76 sps:$4 sm:$0xff]   ;;  %v11264_v43 = vld [vmem:[%s17374_s4 + $0x1048] ss:$76 sps:$4 sm:$0xff]  }
 0x31c   :  { %6326 = vmatprep.subr.bf16.mxu0 %v11206_v55  ;;  %6449 = vmatprep.subr.bf16.mxu1 %v11393_v58  ;;  %v11234_v55 = vld [vmem:[%s17374_s4 + $0xa58] ss:$76 sps:$4 sm:$0xff]   ;;  %v11413_v56 = vld [vmem:[%s17374_s4 + $0xa34] ss:$76 sps:$4 sm:$0xff]   ;;  %v11237_v58 = vld [vmem:[%s17374_s4 + $0xaf0] ss:$76 sps:$4 sm:$0xff]  }
 0x31f   :  { %6327 = vmatpush1.bf16.msra.mxu0 %v11204_v57  ;;  %6450 = vmatpush1.bf16.msra.mxu1 %v11394_v60  ;;  %v11414_v57 = vld [vmem:[%s17374_s4 + $0xa30] ss:$76 sps:$4 sm:$0xff]   ;;  %v11416_v60 = vld [vmem:[%s17374_s4 + $0xac8] ss:$76 sps:$4 sm:$0xff]  }
 0x320   :  { %6328 = vmatprep.subr.bf16.mxu0 %v11209_v59  ;;  %6451 = vmatprep.subr.bf16.mxu1 %v11395_v62  ;;  %v11415_v59 = vld [vmem:[%s17374_s4 + $0xacc] ss:$76 sps:$4 sm:$0xff]   ;;  %v11417_v62 = vld [vmem:[%s17374_s4 + $0xb64] ss:$76 sps:$4 sm:$0xff]  }
 0x323   :  { %6329 = vmatpush1.bf16.msra.mxu0 %v11207_v61  ;;  %6452 = vmatpush1.bf16.msra.mxu1 %v11396_v0  ;;  %v11240_v61 = vld [vmem:[%s17374_s4 + $0xb88] ss:$76 sps:$4 sm:$0xff]   ;;  %v11418_v0 = vld [vmem:[%s17374_s4 + $0xb60] ss:$76 sps:$4 sm:$0xff]  }
 0x324   :  { %6330 = vmatprep.subr.bf16.mxu0 %v11212_v63  ;;  %6453 = vmatprep.subr.bf16.mxu1 %v11397_v7  ;;  %v11245_v63 = vld [vmem:[%s17374_s4 + $0xc24] ss:$76 sps:$4 sm:$0xff]   ;;  %v11419_v7 = vld [vmem:[%s17374_s4 + $0xbfc] ss:$76 sps:$4 sm:$0xff]  }
 0x327   :  { %6331 = vmatpush1.bf16.msra.mxu0 %v11210_v6  ;;  %6454 = vmatpush1.bf16.msra.mxu1 %v11398_v9  ;;  %v11243_v6 = vld [vmem:[%s17374_s4 + $0xc20] ss:$76 sps:$4 sm:$0xff]   ;;  %v11420_v9 = vld [vmem:[%s17374_s4 + $0xbf8] ss:$76 sps:$4 sm:$0xff]  }
 0x328   :  { %6332 = vmatprep.subr.bf16.mxu0 %v11215_v8  ;;  %6455 = vmatprep.subr.bf16.mxu1 %v11399_v11  ;;  %v11248_v8 = vld [vmem:[%s17374_s4 + $0xcbc] ss:$76 sps:$4 sm:$0xff]   ;;  %v11421_v11 = vld [vmem:[%s17374_s4 + $0xc94] ss:$76 sps:$4 sm:$0xff]  }
 0x32b   :  { %6333 = vmatpush1.bf16.msra.mxu0 %v11213_v10  ;;  %6456 = vmatpush1.bf16.msra.mxu1 %v11400_v14  ;;  %v11246_v10 = vld [vmem:[%s17374_s4 + $0xcb8] ss:$76 sps:$4 sm:$0xff]   ;;  %v11422_v14 = vld [vmem:[%s17374_s4 + $0xc90] ss:$76 sps:$4 sm:$0xff]  }
 0x32c   :  { %6334 = vmatprep.subr.bf16.mxu0 %v11218_v13  ;;  %6457 = vmatprep.subr.bf16.mxu1 %v11401_v18  ;;  %v11251_v13 = vld [vmem:[%s17374_s4 + $0xd54] ss:$76 sps:$4 sm:$0xff]   ;;  %v11423_v18 = vld [vmem:[%s17374_s4 + $0xd2c] ss:$76 sps:$4 sm:$0xff]  }
 0x32f   :  { %6335 = vmatpush1.bf16.msra.mxu0 %v11216_v15  ;;  %6458 = vmatpush1.bf16.msra.mxu1 %v11402_v21  ;;  %v11249_v15 = vld [vmem:[%s17374_s4 + $0xd50] ss:$76 sps:$4 sm:$0xff]   ;;  %v11424_v21 = vld [vmem:[%s17374_s4 + $0xd28] ss:$76 sps:$4 sm:$0xff]  }
 0x330   :  { %6336 = vmatprep.subr.bf16.mxu0 %v11221_v19  ;;  %6459 = vmatprep.subr.bf16.mxu1 %v11403_v23  ;;  %v11254_v19 = vld [vmem:[%s17374_s4 + $0xdec] ss:$76 sps:$4 sm:$0xff]   ;;  %v11425_v23 = vld [vmem:[%s17374_s4 + $0xdc4] ss:$76 sps:$4 sm:$0xff]  }
 0x333   :  { %6337 = vmatpush1.bf16.msra.mxu0 %v11219_v22  ;;  %6460 = vmatpush1.bf16.msra.mxu1 %v11404_v25  ;;  %v11252_v22 = vld [vmem:[%s17374_s4 + $0xde8] ss:$76 sps:$4 sm:$0xff]   ;;  %v11426_v25 = vld [vmem:[%s17374_s4 + $0xdc0] ss:$76 sps:$4 sm:$0xff]  }
 0x334   :  { %6338 = vmatprep.subr.bf16.mxu0 %v11224_v24  ;;  %6461 = vmatprep.subr.bf16.mxu1 %v11405_v26  ;;  %v11257_v24 = vld [vmem:[%s17374_s4 + $0xe84] ss:$76 sps:$4 sm:$0xff]   ;;  %v11427_v26 = vld [vmem:[%s17374_s4 + $0xe5c] ss:$76 sps:$4 sm:$0xff]  }
 0x337   :  { %6339 = vmatpush1.bf16.msra.mxu0 %v11222_v48  ;;  %6462 = vmatpush1.bf16.msra.mxu1 %v11406_v28  ;;  %v11255_v48 = vld [vmem:[%s17374_s4 + $0xe80] ss:$76 sps:$4 sm:$0xff]   ;;  %v11428_v28 = vld [vmem:[%s17374_s4 + $0xe58] ss:$76 sps:$4 sm:$0xff]  }
 0x338   :  { %6340 = vmatprep.subr.bf16.mxu0 %v11227_v27  ;;  %6463 = vmatprep.subr.bf16.mxu1 %v11407_v30  ;;  %v11260_v27 = vld [vmem:[%s17374_s4 + $0xf1c] ss:$76 sps:$4 sm:$0xff]   ;;  %v11429_v30 = vld [vmem:[%s17374_s4 + $0xef4] ss:$76 sps:$4 sm:$0xff]  }
 0x33b   :  { %6341 = vmatpush1.bf16.msra.mxu0 %v11225_v29  ;;  %6464 = vmatpush1.bf16.msra.mxu1 %v11408_v33  ;;  %v11258_v29 = vld [vmem:[%s17374_s4 + $0xf18] ss:$76 sps:$4 sm:$0xff]   ;;  %v11430_v33 = vld [vmem:[%s17374_s4 + $0xef0] ss:$76 sps:$4 sm:$0xff]  }
 0x33c   :  { %6342 = vmatprep.subr.bf16.mxu0 %v11230_v31  ;;  %6465 = vmatprep.subr.bf16.mxu1 %v11409_v36  ;;  %v11263_v31 = vld [vmem:[%s17374_s4 + $0xfb4] ss:$76 sps:$4 sm:$0xff]   ;;  %v11266_v36 = vld [vmem:[%s17374_s4 + $0x104c] ss:$76 sps:$4 sm:$0xff]  }
 0x33f   :  { %6343 = vmatpush1.bf16.msra.mxu0 %v11228_v34  ;;  %6466 = vmatpush1.bf16.msra.mxu1 %v11410_v49  ;;  %v11261_v34 = vld [vmem:[%s17374_s4 + $0xfb0] ss:$76 sps:$4 sm:$0xff]  }
 0x340   :  { %6353 = vmatprep.subr.bf16.mxu0 %v11233_v37  ;;  %6476 = vmatprep.subr.bf16.mxu1 %v11411_v51  ;;  %v11432_v37 = vld [vmem:[%s17374_s4 + $0xf88] ss:$76 sps:$4 sm:$0xff]   ;;  %v11433_v49 = vld [vmem:[%s17374_s4 + $0x1024] ss:$76 sps:$4 sm:$0xff]   ;;  %v11434_v51 = vld [vmem:[%s17374_s4 + $0x1020] ss:$76 sps:$4 sm:$0xff]  }
 0x342   :  { %6345 = vmatmul.mubr.bf16.vlgmr.msra.gmra.mrb[16].mxu0 %v12199_v5  ;;  %6468 = vmatmul.mubr.bf16.vlgmr.msra.gmra.mrb[16].mxu1 %v14599_v38  ;;  %v11239_v5 = vld [vmem:[%s17374_s4 + $0xaf4] ss:$76 sps:$4 sm:$0xff]  }
 0x343   :  { %6354 = vmatpush1.bf16.msra.mxu0 %v11231_v50  ;;  %6477 = vmatpush1.bf16.msra.mxu1 %v11412_v54  ;;  %v11269_v50 = vld [vmem:[%s17374_s4 + $0x10e4] ss:$76 sps:$4 sm:$0xff]   ;;  %v11435_v54 = vld [vmem:[%s17374_s4 + $0x10bc] ss:$76 sps:$4 sm:$0xff]  }
 0x344   :  { %6355 = vmatprep.subr.bf16.mxu0 %v11236_v52  ;;  %6478 = vmatprep.subr.bf16.mxu1 %v11413_v56  ;;  %v11267_v52 = vld [vmem:[%s17374_s4 + $0x10e0] ss:$76 sps:$4 sm:$0xff]   ;;  %v11436_v56 = vld [vmem:[%s17374_s4 + $0x10b8] ss:$76 sps:$4 sm:$0xff]  }
 0x345   :  { %6385 = vmatprep.mubr.bf16.mxu0 %v12281_v32  ;;  %6508 = vmatprep.mubr.bf16.mxu1 %v14616_v53  ;;  %v11242_v32 = vld [vmem:[%s17374_s4 + $0xb8c] ss:$76 sps:$4 sm:$0xff]  }
 0x347   :  { %6356 = vmatpush1.bf16.msra.mxu0 %v11234_v55  ;;  %6479 = vmatpush1.bf16.msra.mxu1 %v11414_v57  ;;  %v11272_v55 = vld [vmem:[%s17374_s4 + $0x117c] ss:$76 sps:$4 sm:$0xff]   ;;  %v11437_v57 = vld [vmem:[%s17374_s4 + $0x1154] ss:$76 sps:$4 sm:$0xff]  }
 0x348   :  { %6357 = vmatprep.subr.bf16.mxu0 %v11239_v5  ;;  %6480 = vmatprep.subr.bf16.mxu1 %v11415_v59  ;;  %v11270_v5 = vld [vmem:[%s17374_s4 + $0x1178] ss:$76 sps:$4 sm:$0xff]   ;;  %v11438_v59 = vld [vmem:[%s17374_s4 + $0x1150] ss:$76 sps:$4 sm:$0xff]  }
 0x34b   :  { %6358 = vmatpush1.bf16.msra.mxu0 %v11237_v58  ;;  %6481 = vmatpush1.bf16.msra.mxu1 %v11416_v60  ;;  %v11275_v58 = vld [vmem:[%s17374_s4 + $0x1214] ss:$76 sps:$4 sm:$0xff]   ;;  %v11439_v60 = vld [vmem:[%s17374_s4 + $0x11ec] ss:$76 sps:$4 sm:$0xff]  }
 0x34c   :  { %6359 = vmatprep.subr.bf16.mxu0 %v11242_v32  ;;  %6482 = vmatprep.subr.bf16.mxu1 %v11417_v62  ;;  %v11273_v32 = vld [vmem:[%s17374_s4 + $0x1210] ss:$76 sps:$4 sm:$0xff]   ;;  %v11440_v62 = vld [vmem:[%s17374_s4 + $0x11e8] ss:$76 sps:$4 sm:$0xff]  }
 0x34f   :  { %6360 = vmatpush1.bf16.msra.mxu0 %v11240_v61  ;;  %6483 = vmatpush1.bf16.msra.mxu1 %v11418_v0  ;;  %v11278_v61 = vld [vmem:[%s17374_s4 + $0x12ac] ss:$76 sps:$4 sm:$0xff]   ;;  %v38_v0 = vld [vmem:[%s17376_s1 + $0x10] sm:$0xff] }
 0x350   :  { %6361 = vmatprep.subr.bf16.mxu0 %v11245_v63  ;;  %6484 = vmatprep.subr.bf16.mxu1 %v11419_v7  ;;  %v11276_v63 = vld [vmem:[%s17374_s4 + $0x12a8] ss:$76 sps:$4 sm:$0xff]   ;;  %v11281_v7 = vld [vmem:[%s17374_s4 + $0x1344] ss:$76 sps:$4 sm:$0xff]  }
 0x353   :  { %6362 = vmatpush1.bf16.msra.mxu0 %v11243_v6  ;;  %6485 = vmatpush1.bf16.msra.mxu1 %v11420_v9  ;;  %v11441_v6 = vld [vmem:[%s17374_s4 + $0x1284] ss:$76 sps:$4 sm:$0xff]   ;;  %v41_v9 = vld [vmem:[%s17376_s1 + $0x28] sm:$0xff] }
 0x354   :  { %6363 = vmatprep.subr.bf16.mxu0 %v11248_v8  ;;  %6486 = vmatprep.subr.bf16.mxu1 %v11421_v11  ;;  %v14805_v8 = vpack.c.bf16 %v38_v0, %v38_v0  ;;  %v11279_v11 = vld [vmem:[%s17374_s4 + $0x1340] ss:$76 sps:$4 sm:$0xff]  }
 0x355   :  { %v11463_v0 = vld [vmem:[%s17374_s4 + $0x190c] ss:$76 sps:$4 sm:$0xff]  }
 0x357   :  { %6364 = vmatpush1.bf16.msra.mxu0 %v11246_v10  ;;  %6487 = vmatpush1.bf16.msra.mxu1 %v11422_v14  ;;  %v11442_v10 = vld [vmem:[%s17374_s4 + $0x1280] ss:$76 sps:$4 sm:$0xff]   ;;  %v11284_v14 = vld [vmem:[%s17374_s4 + $0x13dc] ss:$76 sps:$4 sm:$0xff]  }
 0x358   :  { %6365 = vmatprep.subr.bf16.mxu0 %v11251_v13  ;;  %6488 = vmatprep.subr.bf16.mxu1 %v11423_v18  ;;  %v11443_v13 = vld [vmem:[%s17374_s4 + $0x131c] ss:$76 sps:$4 sm:$0xff]   ;;  %v11444_v18 = vld [vmem:[%s17374_s4 + $0x1318] ss:$76 sps:$4 sm:$0xff]  }
 0x35b   :  { %6366 = vmatpush1.bf16.msra.mxu0 %v11249_v15  ;;  %6489 = vmatpush1.bf16.msra.mxu1 %v11424_v21  ;;  %v14822_v15 = vpack.c.bf16 %v41_v9, %v41_v9  ;;  %v11445_v21 = vld [vmem:[%s17374_s4 + $0x13b4] ss:$76 sps:$4 sm:$0xff]  }
 0x35c   :  { %6367 = vmatprep.subr.bf16.mxu0 %v11254_v19  ;;  %6490 = vmatprep.subr.bf16.mxu1 %v11425_v23  ;;  %v11282_v19 = vld [vmem:[%s17374_s4 + $0x13d8] ss:$76 sps:$4 sm:$0xff]   ;;  %v11285_v23 = vld [vmem:[%s17374_s4 + $0x1470] ss:$76 sps:$4 sm:$0xff]   ;;  %v11312_v9 = vld [vmem:[%s17374_s4 + $0x19c8] ss:$76 sps:$4 sm:$0xff]  }
 0x35f   :  { %6368 = vmatpush1.bf16.msra.mxu0 %v11252_v22  ;;  %6491 = vmatpush1.bf16.msra.mxu1 %v11426_v25  ;;  %v11446_v22 = vld [vmem:[%s17374_s4 + $0x13b0] ss:$76 sps:$4 sm:$0xff]   ;;  %v11448_v25 = vld [vmem:[%s17374_s4 + $0x1448] ss:$76 sps:$4 sm:$0xff]  }
 0x360   :  { %6369 = vmatprep.subr.bf16.mxu0 %v11257_v24  ;;  %6492 = vmatprep.subr.bf16.mxu1 %v11427_v26  ;;  %v11447_v24 = vld [vmem:[%s17374_s4 + $0x144c] ss:$76 sps:$4 sm:$0xff]   ;;  %v11449_v26 = vld [vmem:[%s17374_s4 + $0x14e4] ss:$76 sps:$4 sm:$0xff]  }
 0x363   :  { %6370 = vmatpush1.bf16.msra.mxu0 %v11255_v48  ;;  %6493 = vmatpush1.bf16.msra.mxu1 %v11428_v28  ;;  %v11288_v48 = vld [vmem:[%s17374_s4 + $0x1508] ss:$76 sps:$4 sm:$0xff]   ;;  %v11450_v28 = vld [vmem:[%s17374_s4 + $0x14e0] ss:$76 sps:$4 sm:$0xff]  }
 0x364   :  { %6371 = vmatprep.subr.bf16.mxu0 %v11260_v27  ;;  %6494 = vmatprep.subr.bf16.mxu1 %v11429_v30  ;;  %v11293_v27 = vld [vmem:[%s17374_s4 + $0x15a4] ss:$76 sps:$4 sm:$0xff]   ;;  %v11451_v30 = vld [vmem:[%s17374_s4 + $0x157c] ss:$76 sps:$4 sm:$0xff]  }
 0x367   :  { %6372 = vmatpush1.bf16.msra.mxu0 %v11258_v29  ;;  %6495 = vmatpush1.bf16.msra.mxu1 %v11430_v33  ;;  %v11291_v29 = vld [vmem:[%s17374_s4 + $0x15a0] ss:$76 sps:$4 sm:$0xff]   ;;  %v11452_v33 = vld [vmem:[%s17374_s4 + $0x1578] ss:$76 sps:$4 sm:$0xff]  }
 0x368   :  { %6373 = vmatprep.subr.bf16.mxu0 %v11263_v31  ;;  %6496 = vmatprep.subr.bf16.mxu1 %v11431_v35  ;;  %v11296_v31 = vld [vmem:[%s17374_s4 + $0x163c] ss:$76 sps:$4 sm:$0xff]   ;;  %v11453_v35 = vld [vmem:[%s17374_s4 + $0x1614] ss:$76 sps:$4 sm:$0xff]  }
 0x36b   :  { %6374 = vmatpush1.bf16.msra.mxu0 %v11261_v34  ;;  %6497 = vmatpush1.bf16.msra.mxu1 %v11432_v37  ;;  %v11294_v34 = vld [vmem:[%s17374_s4 + $0x1638] ss:$76 sps:$4 sm:$0xff]   ;;  %v11454_v37 = vld [vmem:[%s17374_s4 + $0x1610] ss:$76 sps:$4 sm:$0xff]  }
 0x36c   :  { %6375 = vmatprep.subr.bf16.mxu0 %v11266_v36  ;;  %6498 = vmatprep.subr.bf16.mxu1 %v11433_v49  ;;  %v11299_v36 = vld [vmem:[%s17374_s4 + $0x16d4] ss:$76 sps:$4 sm:$0xff]   ;;  %v11455_v49 = vld [vmem:[%s17374_s4 + $0x16ac] ss:$76 sps:$4 sm:$0xff]  }
 0x36f   :  { %6376 = vmatpush1.bf16.msra.mxu0 %v11264_v43  ;;  %6499 = vmatpush1.bf16.msra.mxu1 %v11434_v51  ;;  %v11297_v43 = vld [vmem:[%s17374_s4 + $0x16d0] ss:$76 sps:$4 sm:$0xff]   ;;  %v11456_v51 = vld [vmem:[%s17374_s4 + $0x16a8] ss:$76 sps:$4 sm:$0xff]  }
 0x370   :  { %6377 = vmatprep.subr.bf16.mxu0 %v11269_v50  ;;  %6500 = vmatprep.subr.bf16.mxu1 %v11435_v54  ;;  %v11302_v50 = vld [vmem:[%s17374_s4 + $0x176c] ss:$76 sps:$4 sm:$0xff]   ;;  %v11457_v54 = vld [vmem:[%s17374_s4 + $0x1744] ss:$76 sps:$4 sm:$0xff]  }
 0x373   :  { %6378 = vmatpush1.bf16.msra.mxu0 %v11267_v52  ;;  %6501 = vmatpush1.bf16.msra.mxu1 %v11436_v56  ;;  %v11300_v52 = vld [vmem:[%s17374_s4 + $0x1768] ss:$76 sps:$4 sm:$0xff]   ;;  %v11458_v56 = vld [vmem:[%s17374_s4 + $0x1740] ss:$76 sps:$4 sm:$0xff]  }
 0x374   :  { %6379 = vmatprep.subr.bf16.mxu0 %v11272_v55  ;;  %6502 = vmatprep.subr.bf16.mxu1 %v11437_v57  ;;  %v11305_v55 = vld [vmem:[%s17374_s4 + $0x1804] ss:$76 sps:$4 sm:$0xff]   ;;  %v11459_v57 = vld [vmem:[%s17374_s4 + $0x17dc] ss:$76 sps:$4 sm:$0xff]  }
 0x377   :  { %6380 = vmatpush1.bf16.msra.mxu0 %v11270_v5  ;;  %6503 = vmatpush1.bf16.msra.mxu1 %v11438_v59  ;;  %v11303_v5 = vld [vmem:[%s17374_s4 + $0x1800] ss:$76 sps:$4 sm:$0xff]   ;;  %v11460_v59 = vld [vmem:[%s17374_s4 + $0x17d8] ss:$76 sps:$4 sm:$0xff]  }
 0x378   :  { %6381 = vmatprep.subr.bf16.mxu0 %v11275_v58  ;;  %6504 = vmatprep.subr.bf16.mxu1 %v11439_v60  ;;  %v11308_v58 = vld [vmem:[%s17374_s4 + $0x189c] ss:$76 sps:$4 sm:$0xff]   ;;  %v11461_v60 = vld [vmem:[%s17374_s4 + $0x1874] ss:$76 sps:$4 sm:$0xff]  }
 0x37b   :  { %6382 = vmatpush1.bf16.msra.mxu0 %v11273_v32  ;;  %6505 = vmatpush1.bf16.msra.mxu1 %v11440_v62  ;;  %v11306_v32 = vld [vmem:[%s17374_s4 + $0x1898] ss:$76 sps:$4 sm:$0xff]   ;;  %v11462_v62 = vld [vmem:[%s17374_s4 + $0x1870] ss:$76 sps:$4 sm:$0xff]  }
 0x37c   :  { %6383 = vmatprep.subr.bf16.mxu0 %v11278_v61  ;;  %6506 = vmatprep.subr.bf16.mxu1 %v11441_v6  ;;  %v11311_v61 = vld [vmem:[%s17374_s4 + $0x1934] ss:$76 sps:$4 sm:$0xff]   ;;  %v11314_v6 = vld [vmem:[%s17374_s4 + $0x19cc] ss:$76 sps:$4 sm:$0xff]  }
 0x37f   :  { %6384 = vmatpush1.bf16.msra.mxu0 %v11276_v63  ;;  %6507 = vmatpush1.bf16.msra.mxu1 %v11442_v10  ;;  %v11309_v63 = vld [vmem:[%s17374_s4 + $0x1930] ss:$76 sps:$4 sm:$0xff]  }
 0x380   :  { %6394 = vmatprep.subr.bf16.mxu0 %v11281_v7  ;;  %6517 = vmatprep.subr.bf16.mxu1 %v11443_v13  ;;  %v11464_v7 = vld [vmem:[%s17374_s4 + $0x1908] ss:$76 sps:$4 sm:$0xff]   ;;  %v11465_v10 = vld [vmem:[%s17374_s4 + $0x19a4] ss:$76 sps:$4 sm:$0xff]   ;;  %v11466_v13 = vld [vmem:[%s17374_s4 + $0x19a0] ss:$76 sps:$4 sm:$0xff]  }
 0x382   :  { %6386 = vmatmul.mubr.bf16.vlgmr.msra.gmra.mrb[16].mxu0 %v12408_v12  ;;  %6509 = vmatmul.mubr.bf16.vlgmr.msra.gmra.mrb[16].mxu1 %v14805_v8  ;;  %v11287_v12 = vld [vmem:[%s17374_s4 + $0x1474] ss:$76 sps:$4 sm:$0xff]  }
 0x383   :  { %6395 = vmatpush1.bf16.msra.mxu0 %v11279_v11  ;;  %6518 = vmatpush1.bf16.msra.mxu1 %v11444_v18  ;;  %v11317_v11 = vld [vmem:[%s17374_s4 + $0x1a64] ss:$76 sps:$4 sm:$0xff]   ;;  %v11467_v18 = vld [vmem:[%s17374_s4 + $0x1a3c] ss:$76 sps:$4 sm:$0xff]  }
 0x384   :  { %6396 = vmatprep.subr.bf16.mxu0 %v11284_v14  ;;  %6519 = vmatprep.subr.bf16.mxu1 %v11445_v21  ;;  %v11315_v14 = vld [vmem:[%s17374_s4 + $0x1a60] ss:$76 sps:$4 sm:$0xff]   ;;  %v11468_v21 = vld [vmem:[%s17374_s4 + $0x1a38] ss:$76 sps:$4 sm:$0xff]  }
 0x385   :  { %6549 = vmatprep.mubr.bf16.mxu1 %v14822_v15  ;;  %6426 = vmatprep.mubr.bf16.mxu0 %v12422_v17  ;;  %v11290_v17 = vld [vmem:[%s17374_s4 + $0x150c] ss:$76 sps:$4 sm:$0xff]  }
 0x387   :  { %6397 = vmatpush1.bf16.msra.mxu0 %v11282_v19  ;;  %6520 = vmatpush1.bf16.msra.mxu1 %v11446_v22  ;;  %v11320_v19 = vld [vmem:[%s17374_s4 + $0x1afc] ss:$76 sps:$4 sm:$0xff]   ;;  %v11469_v22 = vld [vmem:[%s17374_s4 + $0x1ad4] ss:$76 sps:$4 sm:$0xff]  }
 0x388   :  { %6398 = vmatprep.subr.bf16.mxu0 %v11287_v12  ;;  %6521 = vmatprep.subr.bf16.mxu1 %v11447_v24  ;;  %v11318_v12 = vld [vmem:[%s17374_s4 + $0x1af8] ss:$76 sps:$4 sm:$0xff]   ;;  %v11470_v24 = vld [vmem:[%s17374_s4 + $0x1ad0] ss:$76 sps:$4 sm:$0xff]  }
 0x38b   :  { %6399 = vmatpush1.bf16.msra.mxu0 %v11285_v23  ;;  %6522 = vmatpush1.bf16.msra.mxu1 %v11448_v25  ;;  %v11323_v23 = vld [vmem:[%s17374_s4 + $0x1b94] ss:$76 sps:$4 sm:$0xff]   ;;  %v11471_v25 = vld [vmem:[%s17374_s4 + $0x1b6c] ss:$76 sps:$4 sm:$0xff]  }
 0x38c   :  { %6400 = vmatprep.subr.bf16.mxu0 %v11290_v17  ;;  %6523 = vmatprep.subr.bf16.mxu1 %v11449_v26  ;;  %v11321_v17 = vld [vmem:[%s17374_s4 + $0x1b90] ss:$76 sps:$4 sm:$0xff]   ;;  %v11472_v26 = vld [vmem:[%s17374_s4 + $0x1b68] ss:$76 sps:$4 sm:$0xff]  }
 0x38f   :  { %6401 = vmatpush1.bf16.msra.mxu0 %v11288_v48  ;;  %6524 = vmatpush1.bf16.msra.mxu1 %v11450_v28  ;;  %v11326_v48 = vld [vmem:[%s17374_s4 + $0x1c2c] ss:$76 sps:$4 sm:$0xff]   ;;  %v40_v28 = vld [vmem:[%s17376_s1 + $0x20] sm:$0xff] }
 0x390   :  { %6402 = vmatprep.subr.bf16.mxu0 %v11293_v27  ;;  %6525 = vmatprep.subr.bf16.mxu1 %v11451_v30  ;;  %v11324_v27 = vld [vmem:[%s17374_s4 + $0x1c28] ss:$76 sps:$4 sm:$0xff]   ;;  %v15008_v30 = vpack.c.bf16 %v40_v28, %v40_v28 }
 0x391   :  { %v11510_v28 = vld [vmem:[%s17374_s4 + $0x4e8] ss:$76 sps:$4 sm:$0xff]  }
 0x392   :  { %17400 = vst [vmem:[#allocation2_spill] sm:$0xff] %v15008_v30 }
 0x393   :  { %6403 = vmatpush1.bf16.msra.mxu0 %v11291_v29  ;;  %6526 = vmatpush1.bf16.msra.mxu1 %v11452_v33  ;;  %v11473_v29 = vld [vmem:[%s17374_s4 + $0x1c04] ss:$76 sps:$4 sm:$0xff]  }
 0x394   :  { %6404 = vmatprep.subr.bf16.mxu0 %v11296_v31  ;;  %6527 = vmatprep.subr.bf16.mxu1 %v11453_v35  ;;  %v11474_v31 = vld [vmem:[%s17374_s4 + $0x1c00] ss:$76 sps:$4 sm:$0xff]   ;;  %v11475_v33 = vld [vmem:[%s17374_s4 + $0x24] ss:$76 sps:$4 sm:$0xff]  }
 0x395   :  { %v11477_v35 = vld [vmem:[%s17374_s4 + $0x20] ss:$76 sps:$4 sm:$0xff]  }
 0x397   :  { %6405 = vmatpush1.bf16.msra.mxu0 %v11294_v34  ;;  %6528 = vmatpush1.bf16.msra.mxu1 %v11454_v37  ;;  %v11476_v34 = vld [vmem:[%s17374_s4 + $0x2c] ss:$76 sps:$4 sm:$0xff]   ;;  %v11479_v37 = vld [vmem:[%s17374_s4 + $0xbc] ss:$76 sps:$4 sm:$0xff]  }
 0x398   :  { %6406 = vmatprep.subr.bf16.mxu0 %v11299_v36  ;;  %6529 = vmatprep.subr.bf16.mxu1 %v11455_v49  ;;  %v11478_v36 = vld [vmem:[%s17374_s4 + $0x28] ss:$76 sps:$4 sm:$0xff]   ;;  %v11482_v49 = vld [vmem:[%s17374_s4 + $0xc0] ss:$76 sps:$4 sm:$0xff]  }
 0x39b   :  { %6407 = vmatpush1.bf16.msra.mxu0 %v11297_v43  ;;  %6530 = vmatpush1.bf16.msra.mxu1 %v11456_v51  ;;  %v11480_v43 = vld [vmem:[%s17374_s4 + $0xc4] ss:$76 sps:$4 sm:$0xff]   ;;  %v11484_v51 = vld [vmem:[%s17374_s4 + $0x15c] ss:$76 sps:$4 sm:$0xff]  }
 0x39c   :  { %6408 = vmatprep.subr.bf16.mxu0 %v11302_v50  ;;  %6531 = vmatprep.subr.bf16.mxu1 %v11457_v54  ;;  %v11483_v50 = vld [vmem:[%s17374_s4 + $0x154] ss:$76 sps:$4 sm:$0xff]   ;;  %v11486_v54 = vld [vmem:[%s17374_s4 + $0x158] ss:$76 sps:$4 sm:$0xff]  }
 0x39f   :  { %6409 = vmatpush1.bf16.msra.mxu0 %v11300_v52  ;;  %6532 = vmatpush1.bf16.msra.mxu1 %v11458_v56  ;;  %v11485_v52 = vld [vmem:[%s17374_s4 + $0x150] ss:$76 sps:$4 sm:$0xff]   ;;  %v11488_v56 = vld [vmem:[%s17374_s4 + $0x1f4] ss:$76 sps:$4 sm:$0xff]  }
 0x3a0   :  { %6410 = vmatprep.subr.bf16.mxu0 %v11305_v55  ;;  %6533 = vmatprep.subr.bf16.mxu1 %v11459_v57  ;;  %v11487_v55 = vld [vmem:[%s17374_s4 + $0x1ec] ss:$76 sps:$4 sm:$0xff]   ;;  %v11490_v57 = vld [vmem:[%s17374_s4 + $0x1f0] ss:$76 sps:$4 sm:$0xff]  }
 0x3a3   :  { %6411 = vmatpush1.bf16.msra.mxu0 %v11303_v5  ;;  %6534 = vmatpush1.bf16.msra.mxu1 %v11460_v59  ;;  %v11489_v5 = vld [vmem:[%s17374_s4 + $0x1e8] ss:$76 sps:$4 sm:$0xff]   ;;  %v11492_v59 = vld [vmem:[%s17374_s4 + $0x28c] ss:$76 sps:$4 sm:$0xff]  }
 0x3a4   :  { %6412 = vmatprep.subr.bf16.mxu0 %v11308_v58  ;;  %6535 = vmatprep.subr.bf16.mxu1 %v11461_v60  ;;  %v11491_v58 = vld [vmem:[%s17374_s4 + $0x284] ss:$76 sps:$4 sm:$0xff]   ;;  %v11494_v60 = vld [vmem:[%s17374_s4 + $0x288] ss:$76 sps:$4 sm:$0xff]  }
 0x3a7   :  { %6413 = vmatpush1.bf16.msra.mxu0 %v11306_v32  ;;  %6536 = vmatpush1.bf16.msra.mxu1 %v11462_v62  ;;  %v11493_v32 = vld [vmem:[%s17374_s4 + $0x280] ss:$76 sps:$4 sm:$0xff]   ;;  %v11496_v62 = vld [vmem:[%s17374_s4 + $0x324] ss:$76 sps:$4 sm:$0xff]  }
 0x3a8   :  { %6414 = vmatprep.subr.bf16.mxu0 %v11311_v61  ;;  %6537 = vmatprep.subr.bf16.mxu1 %v11463_v0  ;;  %v11495_v61 = vld [vmem:[%s17374_s4 + $0x31c] ss:$76 sps:$4 sm:$0xff]  }
 0x3ab   :  { %6415 = vmatpush1.bf16.msra.mxu0 %v11309_v63  ;;  %6538 = vmatpush1.bf16.msra.mxu1 %v11464_v7 }
 0x3ac   :  { %6416 = vmatprep.subr.bf16.mxu0 %v11314_v6  ;;  %6539 = vmatprep.subr.bf16.mxu1 %v11465_v10  ;;  %v11497_v10 = vld [vmem:[%s17374_s4 + $0x318] ss:$76 sps:$4 sm:$0xff]  }
 0x3af   :  { %6417 = vmatpush1.bf16.msra.mxu0 %v11312_v9  ;;  %6540 = vmatpush1.bf16.msra.mxu1 %v11466_v13 }
 0x3b0   :  { %6418 = vmatprep.subr.bf16.mxu0 %v11317_v11  ;;  %6541 = vmatprep.subr.bf16.mxu1 %v11467_v18  ;;  %v11498_v11 = vld [vmem:[%s17374_s4 + $0x320] ss:$76 sps:$4 sm:$0xff]  }
 0x3b1   :  { %v11499_v18 = vld [vmem:[%s17374_s4 + $0x3b4] ss:$76 sps:$4 sm:$0xff]  }
 0x3b3   :  { %6419 = vmatpush1.bf16.msra.mxu0 %v11315_v14  ;;  %6542 = vmatpush1.bf16.msra.mxu1 %v11468_v21 }
 0x3b4   :  { %6420 = vmatprep.subr.bf16.mxu0 %v11320_v19  ;;  %6543 = vmatprep.subr.bf16.mxu1 %v11469_v22  ;;  %v11500_v19 = vld [vmem:[%s17374_s4 + $0x3bc] ss:$76 sps:$4 sm:$0xff]   ;;  %v11502_v22 = vld [vmem:[%s17374_s4 + $0x3b8] ss:$76 sps:$4 sm:$0xff]  }
 0x3b7   :  { %6421 = vmatpush1.bf16.msra.mxu0 %v11318_v12  ;;  %6544 = vmatpush1.bf16.msra.mxu1 %v11470_v24  ;;  %v11501_v12 = vld [vmem:[%s17374_s4 + $0x3b0] ss:$76 sps:$4 sm:$0xff]   ;;  %v11504_v24 = vld [vmem:[%s17374_s4 + $0x454] ss:$76 sps:$4 sm:$0xff]  }
 0x3b8   :  { %6422 = vmatprep.subr.bf16.mxu0 %v11323_v23  ;;  %6545 = vmatprep.subr.bf16.mxu1 %v11471_v25  ;;  %v11503_v23 = vld [vmem:[%s17374_s4 + $0x44c] ss:$76 sps:$4 sm:$0xff]   ;;  %v11506_v25 = vld [vmem:[%s17374_s4 + $0x450] ss:$76 sps:$4 sm:$0xff]  }
 0x3bb   :  { %6423 = vmatpush1.bf16.msra.mxu0 %v11321_v17  ;;  %6546 = vmatpush1.bf16.msra.mxu1 %v11472_v26  ;;  %v11505_v17 = vld [vmem:[%s17374_s4 + $0x448] ss:$76 sps:$4 sm:$0xff]   ;;  %v11508_v26 = vld [vmem:[%s17374_s4 + $0x4ec] ss:$76 sps:$4 sm:$0xff]  }
 0x3bc   :  { %6424 = vmatprep.subr.bf16.mxu0 %v11326_v48  ;;  %6547 = vmatprep.subr.bf16.mxu1 %v11473_v29  ;;  %v11507_v48 = vld [vmem:[%s17374_s4 + $0x4e4] ss:$76 sps:$4 sm:$0xff]   ;;  %v11511_v29 = vld [vmem:[%s17374_s4 + $0x57c] ss:$76 sps:$4 sm:$0xff]  }
 0x3bf   :  { %6425 = vmatpush1.bf16.msra.mxu0 %v11324_v27  ;;  %6548 = vmatpush1.bf16.msra.mxu1 %v11474_v31  ;;  %v11509_v27 = vld [vmem:[%s17374_s4 + $0x4e0] ss:$76 sps:$4 sm:$0xff]   ;;  %v11512_v31 = vld [vmem:[%s17374_s4 + $0x584] ss:$76 sps:$4 sm:$0xff]  }
 0x3c0   :  { %6558 = vmatprep.subr.bf16.mxu0 %v11475_v33  ;;  %6681 = vmatprep.subr.bf16.mxu1 %v11476_v34  ;;  %v11513_v33 = vld [vmem:[%s17374_s4 + $0x578] ss:$76 sps:$4 sm:$0xff]   ;;  %v11514_v34 = vld [vmem:[%s17374_s4 + $0x580] ss:$76 sps:$4 sm:$0xff]  }
 0x3c2   :  { %6550 = vmatmul.mubr.bf16.vlgmr.msra.gmra.mrb[16].mxu1 %v15008_v30  ;;  %6427 = vmatmul.mubr.bf16.vlgmr.msra.gmra.mrb[16].mxu0 %v12611_v20  ;;  %v11481_v20 = vld [vmem:[%s17374_s4 + $0xb8] ss:$76 sps:$4 sm:$0xff]  }
 0x3c3   :  { %6559 = vmatpush1.bf16.msra.mxu0 %v11477_v35  ;;  %6682 = vmatpush1.bf16.msra.mxu1 %v11478_v36  ;;  %v11515_v35 = vld [vmem:[%s17374_s4 + $0x614] ss:$76 sps:$4 sm:$0xff]   ;;  %v11516_v36 = vld [vmem:[%s17374_s4 + $0x61c] ss:$76 sps:$4 sm:$0xff]  }
 0x3c4   :  { %6560 = vmatprep.subr.bf16.mxu0 %v11479_v37  ;;  %6683 = vmatprep.subr.bf16.mxu1 %v11480_v43  ;;  %v11517_v37 = vld [vmem:[%s17374_s4 + $0x610] ss:$76 sps:$4 sm:$0xff]   ;;  %v11518_v43 = vld [vmem:[%s17374_s4 + $0x618] ss:$76 sps:$4 sm:$0xff]  }
 0x3c5   :  { %6590 = vmatprep.mubr.bf16.mxu0 %v14402_v16  ;;  %6713 = vmatprep.mubr.bf16.mxu1 %v14402_v16 }
 0x3c7   :  { %6561 = vmatpush1.bf16.msra.mxu0 %v11481_v20  ;;  %6684 = vmatpush1.bf16.msra.mxu1 %v11482_v49  ;;  %v11519_v20 = vld [vmem:[%s17374_s4 + $0x6ac] ss:$76 sps:$4 sm:$0xff]   ;;  %v11520_v49 = vld [vmem:[%s17374_s4 + $0x6b4] ss:$76 sps:$4 sm:$0xff]  }
 0x3c8   :  { %6562 = vmatprep.subr.bf16.mxu0 %v11483_v50  ;;  %6685 = vmatprep.subr.bf16.mxu1 %v11484_v51  ;;  %v11521_v50 = vld [vmem:[%s17374_s4 + $0x6a8] ss:$76 sps:$4 sm:$0xff]   ;;  %v11522_v51 = vld [vmem:[%s17374_s4 + $0x6b0] ss:$76 sps:$4 sm:$0xff]  }
 0x3cb   :  { %6563 = vmatpush1.bf16.msra.mxu0 %v11485_v52  ;;  %6686 = vmatpush1.bf16.msra.mxu1 %v11486_v54  ;;  %v11523_v52 = vld [vmem:[%s17374_s4 + $0x744] ss:$76 sps:$4 sm:$0xff]   ;;  %v11524_v54 = vld [vmem:[%s17374_s4 + $0x74c] ss:$76 sps:$4 sm:$0xff]  }
 0x3cc   :  { %6564 = vmatprep.subr.bf16.mxu0 %v11487_v55  ;;  %6687 = vmatprep.subr.bf16.mxu1 %v11488_v56  ;;  %v11525_v55 = vld [vmem:[%s17374_s4 + $0x740] ss:$76 sps:$4 sm:$0xff]   ;;  %v11526_v56 = vld [vmem:[%s17374_s4 + $0x748] ss:$76 sps:$4 sm:$0xff]  }
 0x3cf   :  { %6565 = vmatpush1.bf16.msra.mxu0 %v11489_v5  ;;  %6688 = vmatpush1.bf16.msra.mxu1 %v11490_v57  ;;  %v11527_v5 = vld [vmem:[%s17374_s4 + $0x7dc] ss:$76 sps:$4 sm:$0xff]   ;;  %v11528_v57 = vld [vmem:[%s17374_s4 + $0x7e4] ss:$76 sps:$4 sm:$0xff]  }
 0x3d0   :  { %6566 = vmatprep.subr.bf16.mxu0 %v11491_v58  ;;  %6689 = vmatprep.subr.bf16.mxu1 %v11492_v59  ;;  %v11529_v58 = vld [vmem:[%s17374_s4 + $0x7d8] ss:$76 sps:$4 sm:$0xff]   ;;  %v11530_v59 = vld [vmem:[%s17374_s4 + $0x7e0] ss:$76 sps:$4 sm:$0xff]  }
 0x3d3   :  { %6567 = vmatpush1.bf16.msra.mxu0 %v11493_v32  ;;  %6690 = vmatpush1.bf16.msra.mxu1 %v11494_v60  ;;  %v11531_v32 = vld [vmem:[%s17374_s4 + $0x874] ss:$76 sps:$4 sm:$0xff]   ;;  %v11532_v60 = vld [vmem:[%s17374_s4 + $0x87c] ss:$76 sps:$4 sm:$0xff]  }
 0x3d4   :  { %6568 = vmatprep.subr.bf16.mxu0 %v11495_v61  ;;  %6691 = vmatprep.subr.bf16.mxu1 %v11496_v62  ;;  %v11533_v61 = vld [vmem:[%s17374_s4 + $0x870] ss:$76 sps:$4 sm:$0xff]   ;;  %v11534_v62 = vld [vmem:[%s17374_s4 + $0x878] ss:$76 sps:$4 sm:$0xff]  }
 0x3d5   :  { %v15083_v63 = vpop.f32.mrb[12].mxu1  ;;  %v15085_v0 = vpop.f32.mrb[12].mxu0 }
 0x3d6   :  { %17401 = vst [vmem:[#allocation3_spill] sm:$0xff] %v15083_v63  ;;  %17402 = vst [vmem:[#allocation4_spill] sm:$0xff] %v15085_v0  ;;  %v15087_v6 = vpop.f32.mrb[13].mxu1  ;;  %v15089_v7 = vpop.f32.mrb[13].mxu0  ;;  %v7217_v0 = vld [vmem:[%s17378_s2 + $0x160] sm:$0xff] }
 0x3d7   :  { %17403 = vst [vmem:[#allocation5_spill] sm:$0xff] %v15087_v6  ;;  %17404 = vst [vmem:[#allocation6_spill] sm:$0xff] %v15089_v7  ;;  %v6309_v9 = vpop.f32.mrb[14].mxu1  ;;  %6569 = vmatpush1.bf16.msra.mxu0 %v11497_v10  ;;  %6692 = vmatpush1.bf16.msra.mxu1 %v11498_v11  ;;  %v6186_v13 = vpop.f32.mrb[14].mxu0  ;;  %v11536_v10 = vld [vmem:[%s17374_s4 + $0x914] ss:$76 sps:$4 sm:$0xff]  }
 0x3d8   :  { %v6310_v14 = vpop.f32.mrb[15].mxu1  ;;  %6570 = vmatprep.subr.bf16.mxu0 %v11499_v18  ;;  %6693 = vmatprep.subr.bf16.mxu1 %v11500_v19  ;;  %v6187_v21 = vpop.f32.mrb[15].mxu0  ;;  %v11535_v9 = vld [vmem:[%s17374_s4 + $0x90c] ss:$76 sps:$4 sm:$0xff]   ;;  %v11537_v11 = vld [vmem:[%s17374_s4 + $0x908] ss:$76 sps:$4 sm:$0xff]  }
 0x3d9   :  { %v11538_v13 = vld [vmem:[%s17374_s4 + $0x910] ss:$76 sps:$4 sm:$0xff]   ;;  %v11540_v18 = vld [vmem:[%s17374_s4 + $0x9ac] ss:$76 sps:$4 sm:$0xff]   ;;  %v11542_v21 = vld [vmem:[%s17374_s4 + $0x9a8] ss:$76 sps:$4 sm:$0xff]  }
 0x3da   :  { %v11539_v14 = vld [vmem:[%s17374_s4 + $0x9a4] ss:$76 sps:$4 sm:$0xff]   ;;  %v11541_v19 = vld [vmem:[%s17374_s4 + $0x9a0] ss:$76 sps:$4 sm:$0xff]  }
 0x3db   :  { %6571 = vmatpush1.bf16.msra.mxu0 %v11501_v12  ;;  %6694 = vmatpush1.bf16.msra.mxu1 %v11502_v22  ;;  %v11543_v12 = vld [vmem:[%s17374_s4 + $0xa3c] ss:$76 sps:$4 sm:$0xff]   ;;  %v11544_v22 = vld [vmem:[%s17374_s4 + $0xa44] ss:$76 sps:$4 sm:$0xff]  }
 0x3dc   :  { %6572 = vmatprep.subr.bf16.mxu0 %v11503_v23  ;;  %6695 = vmatprep.subr.bf16.mxu1 %v11504_v24  ;;  %v11545_v23 = vld [vmem:[%s17374_s4 + $0xa38] ss:$76 sps:$4 sm:$0xff]   ;;  %v11546_v24 = vld [vmem:[%s17374_s4 + $0xa40] ss:$76 sps:$4 sm:$0xff]   ;;  %v7215_v7 = vld [vmem:[%s17378_s2 + $0x150] sm:$0xff] }
 0x3df   :  { %6573 = vmatpush1.bf16.msra.mxu0 %v11505_v17  ;;  %6696 = vmatpush1.bf16.msra.mxu1 %v11506_v25  ;;  %v11547_v17 = vld [vmem:[%s17374_s4 + $0xad4] ss:$76 sps:$4 sm:$0xff]   ;;  %v11548_v25 = vld [vmem:[%s17374_s4 + $0xadc] ss:$76 sps:$4 sm:$0xff]  }
 0x3e0   :  { %6574 = vmatprep.subr.bf16.mxu0 %v11507_v48  ;;  %6697 = vmatprep.subr.bf16.mxu1 %v11508_v26  ;;  %v11549_v48 = vld [vmem:[%s17374_s4 + $0xad0] ss:$76 sps:$4 sm:$0xff]   ;;  %v11550_v26 = vld [vmem:[%s17374_s4 + $0xad8] ss:$76 sps:$4 sm:$0xff]  }
 0x3e3   :  { %6575 = vmatpush1.bf16.msra.mxu0 %v11509_v27  ;;  %6698 = vmatpush1.bf16.msra.mxu1 %v11510_v28  ;;  %v11551_v27 = vld [vmem:[%s17374_s4 + $0xb6c] ss:$76 sps:$4 sm:$0xff]   ;;  %v11552_v28 = vld [vmem:[%s17374_s4 + $0xb74] ss:$76 sps:$4 sm:$0xff]  }
 0x3e4   :  { %6576 = vmatprep.subr.bf16.mxu0 %v11511_v29  ;;  %6699 = vmatprep.subr.bf16.mxu1 %v11512_v31  ;;  %v11553_v29 = vld [vmem:[%s17374_s4 + $0xb68] ss:$76 sps:$4 sm:$0xff]   ;;  %v11554_v31 = vld [vmem:[%s17374_s4 + $0xb70] ss:$76 sps:$4 sm:$0xff]  }
 0x3e7   :  { %6577 = vmatpush1.bf16.msra.mxu0 %v11513_v33  ;;  %6700 = vmatpush1.bf16.msra.mxu1 %v11514_v34  ;;  %v11555_v33 = vld [vmem:[%s17374_s4 + $0xc04] ss:$76 sps:$4 sm:$0xff]   ;;  %v11556_v34 = vld [vmem:[%s17374_s4 + $0xc0c] ss:$76 sps:$4 sm:$0xff]  }
 0x3e8   :  { %6578 = vmatprep.subr.bf16.mxu0 %v11515_v35  ;;  %6701 = vmatprep.subr.bf16.mxu1 %v11516_v36  ;;  %v11557_v35 = vld [vmem:[%s17374_s4 + $0xc00] ss:$76 sps:$4 sm:$0xff]   ;;  %v11558_v36 = vld [vmem:[%s17374_s4 + $0xc08] ss:$76 sps:$4 sm:$0xff]  }
 0x3eb   :  { %6579 = vmatpush1.bf16.msra.mxu0 %v11517_v37  ;;  %6702 = vmatpush1.bf16.msra.mxu1 %v11518_v43  ;;  %v11559_v37 = vld [vmem:[%s17374_s4 + $0xc9c] ss:$76 sps:$4 sm:$0xff]   ;;  %v11560_v43 = vld [vmem:[%s17374_s4 + $0xca4] ss:$76 sps:$4 sm:$0xff]  }
 0x3ec   :  { %6580 = vmatprep.subr.bf16.mxu0 %v11519_v20  ;;  %6703 = vmatprep.subr.bf16.mxu1 %v11520_v49  ;;  %v11561_v20 = vld [vmem:[%s17374_s4 + $0xc98] ss:$76 sps:$4 sm:$0xff]   ;;  %v11562_v49 = vld [vmem:[%s17374_s4 + $0xca0] ss:$76 sps:$4 sm:$0xff]  }
 0x3ef   :  { %6581 = vmatpush1.bf16.msra.mxu0 %v11521_v50  ;;  %6704 = vmatpush1.bf16.msra.mxu1 %v11522_v51  ;;  %v11563_v50 = vld [vmem:[%s17374_s4 + $0xd34] ss:$76 sps:$4 sm:$0xff]   ;;  %v11564_v51 = vld [vmem:[%s17374_s4 + $0xd3c] ss:$76 sps:$4 sm:$0xff]  }
 0x3f0   :  { %6582 = vmatprep.subr.bf16.mxu0 %v11523_v52  ;;  %6705 = vmatprep.subr.bf16.mxu1 %v11524_v54  ;;  %v11565_v52 = vld [vmem:[%s17374_s4 + $0xd30] ss:$76 sps:$4 sm:$0xff]   ;;  %v11566_v54 = vld [vmem:[%s17374_s4 + $0xd38] ss:$76 sps:$4 sm:$0xff]  }
 0x3f3   :  { %6583 = vmatpush1.bf16.msra.mxu0 %v11525_v55  ;;  %6706 = vmatpush1.bf16.msra.mxu1 %v11526_v56  ;;  %v11567_v55 = vld [vmem:[%s17374_s4 + $0xdcc] ss:$76 sps:$4 sm:$0xff]   ;;  %v11568_v56 = vld [vmem:[%s17374_s4 + $0xdd4] ss:$76 sps:$4 sm:$0xff]  }
 0x3f4   :  { %6584 = vmatprep.subr.bf16.mxu0 %v11527_v5  ;;  %6707 = vmatprep.subr.bf16.mxu1 %v11528_v57  ;;  %v11569_v5 = vld [vmem:[%s17374_s4 + $0xdc8] ss:$76 sps:$4 sm:$0xff]   ;;  %v11570_v57 = vld [vmem:[%s17374_s4 + $0xdd0] ss:$76 sps:$4 sm:$0xff]  }
 0x3f7   :  { %6585 = vmatpush1.bf16.msra.mxu0 %v11529_v58  ;;  %6708 = vmatpush1.bf16.msra.mxu1 %v11530_v59  ;;  %v11571_v58 = vld [vmem:[%s17374_s4 + $0xe64] ss:$76 sps:$4 sm:$0xff]   ;;  %v11572_v59 = vld [vmem:[%s17374_s4 + $0xe6c] ss:$76 sps:$4 sm:$0xff]  }
 0x3f8   :  { %6586 = vmatprep.subr.bf16.mxu0 %v11531_v32  ;;  %6709 = vmatprep.subr.bf16.mxu1 %v11532_v60  ;;  %v11573_v32 = vld [vmem:[%s17374_s4 + $0xe60] ss:$76 sps:$4 sm:$0xff]   ;;  %v11574_v60 = vld [vmem:[%s17374_s4 + $0xe68] ss:$76 sps:$4 sm:$0xff]  }
 0x3fb   :  { %6587 = vmatpush1.bf16.msra.mxu0 %v11533_v61  ;;  %6710 = vmatpush1.bf16.msra.mxu1 %v11534_v62  ;;  %v11575_v61 = vld [vmem:[%s17374_s4 + $0xefc] ss:$76 sps:$4 sm:$0xff]   ;;  %v11576_v62 = vld [vmem:[%s17374_s4 + $0xf04] ss:$76 sps:$4 sm:$0xff]  }
 0x3fc   :  { %6588 = vmatprep.subr.bf16.mxu0 %v11535_v9  ;;  %6711 = vmatprep.subr.bf16.mxu1 %v11536_v10  ;;  %v11577_v9 = vld [vmem:[%s17374_s4 + $0xef8] ss:$76 sps:$4 sm:$0xff]   ;;  %v11578_v10 = vld [vmem:[%s17374_s4 + $0xf00] ss:$76 sps:$4 sm:$0xff]  }
 0x3ff   :  { %6589 = vmatpush1.bf16.msra.mxu0 %v11537_v11  ;;  %6712 = vmatpush1.bf16.msra.mxu1 %v11538_v13  ;;  %v11579_v11 = vld [vmem:[%s17374_s4 + $0xf94] ss:$76 sps:$4 sm:$0xff]   ;;  %v11580_v13 = vld [vmem:[%s17374_s4 + $0xf9c] ss:$76 sps:$4 sm:$0xff]  }
 0x400   :  { %6599 = vmatprep.subr.bf16.mxu0 %v11539_v14  ;;  %6722 = vmatprep.subr.bf16.mxu1 %v11540_v18  ;;  %v11581_v14 = vld [vmem:[%s17374_s4 + $0xf90] ss:$76 sps:$4 sm:$0xff]   ;;  %v11582_v18 = vld [vmem:[%s17374_s4 + $0xf98] ss:$76 sps:$4 sm:$0xff]  }
 0x402   :  { %6591 = vmatmul.mubr.bf16.vlgmr.msra.gmra.mrb[20].mxu0 %v14599_v38  ;;  %6714 = vmatmul.mubr.bf16.vlgmr.msra.gmra.mrb[20].mxu1 %v14599_v38 }
 0x403   :  { %6600 = vmatpush1.bf16.msra.mxu0 %v11541_v19  ;;  %6723 = vmatpush1.bf16.msra.mxu1 %v11542_v21  ;;  %v11583_v19 = vld [vmem:[%s17374_s4 + $0x102c] ss:$76 sps:$4 sm:$0xff]   ;;  %v11584_v21 = vld [vmem:[%s17374_s4 + $0x1034] ss:$76 sps:$4 sm:$0xff]  }
 0x404   :  { %6601 = vmatprep.subr.bf16.mxu0 %v11543_v12  ;;  %6724 = vmatprep.subr.bf16.mxu1 %v11544_v22  ;;  %v11585_v12 = vld [vmem:[%s17374_s4 + $0x1028] ss:$76 sps:$4 sm:$0xff]   ;;  %v11586_v22 = vld [vmem:[%s17374_s4 + $0x1030] ss:$76 sps:$4 sm:$0xff]  }
 0x405   :  { %6631 = vmatprep.mubr.bf16.mxu0 %v14616_v53  ;;  %6754 = vmatprep.mubr.bf16.mxu1 %v14616_v53 }
 0x407   :  { %6602 = vmatpush1.bf16.msra.mxu0 %v11545_v23  ;;  %6725 = vmatpush1.bf16.msra.mxu1 %v11546_v24  ;;  %v11587_v23 = vld [vmem:[%s17374_s4 + $0x10c4] ss:$76 sps:$4 sm:$0xff]   ;;  %v11588_v24 = vld [vmem:[%s17374_s4 + $0x10cc] ss:$76 sps:$4 sm:$0xff]  }
 0x408   :  { %6603 = vmatprep.subr.bf16.mxu0 %v11547_v17  ;;  %6726 = vmatprep.subr.bf16.mxu1 %v11548_v25  ;;  %v11589_v17 = vld [vmem:[%s17374_s4 + $0x10c0] ss:$76 sps:$4 sm:$0xff]   ;;  %v11590_v25 = vld [vmem:[%s17374_s4 + $0x10c8] ss:$76 sps:$4 sm:$0xff]  }
 0x40b   :  { %6604 = vmatpush1.bf16.msra.mxu0 %v11549_v48  ;;  %6727 = vmatpush1.bf16.msra.mxu1 %v11550_v26  ;;  %v11591_v48 = vld [vmem:[%s17374_s4 + $0x115c] ss:$76 sps:$4 sm:$0xff]   ;;  %v11592_v26 = vld [vmem:[%s17374_s4 + $0x1164] ss:$76 sps:$4 sm:$0xff]  }
 0x40c   :  { %6605 = vmatprep.subr.bf16.mxu0 %v11551_v27  ;;  %6728 = vmatprep.subr.bf16.mxu1 %v11552_v28  ;;  %v11593_v27 = vld [vmem:[%s17374_s4 + $0x1158] ss:$76 sps:$4 sm:$0xff]   ;;  %v11594_v28 = vld [vmem:[%s17374_s4 + $0x1160] ss:$76 sps:$4 sm:$0xff]  }
 0x40f   :  { %6606 = vmatpush1.bf16.msra.mxu0 %v11553_v29  ;;  %6729 = vmatpush1.bf16.msra.mxu1 %v11554_v31  ;;  %v11595_v29 = vld [vmem:[%s17374_s4 + $0x11f4] ss:$76 sps:$4 sm:$0xff]   ;;  %v11596_v31 = vld [vmem:[%s17374_s4 + $0x11fc] ss:$76 sps:$4 sm:$0xff]  }
 0x410   :  { %6607 = vmatprep.subr.bf16.mxu0 %v11555_v33  ;;  %6730 = vmatprep.subr.bf16.mxu1 %v11556_v34  ;;  %v11597_v33 = vld [vmem:[%s17374_s4 + $0x11f0] ss:$76 sps:$4 sm:$0xff]   ;;  %v11598_v34 = vld [vmem:[%s17374_s4 + $0x11f8] ss:$76 sps:$4 sm:$0xff]  }
 0x413   :  { %6608 = vmatpush1.bf16.msra.mxu0 %v11557_v35  ;;  %6731 = vmatpush1.bf16.msra.mxu1 %v11558_v36  ;;  %v11599_v35 = vld [vmem:[%s17374_s4 + $0x128c] ss:$76 sps:$4 sm:$0xff]   ;;  %v11600_v36 = vld [vmem:[%s17374_s4 + $0x1294] ss:$76 sps:$4 sm:$0xff]  }
 0x414   :  { %6609 = vmatprep.subr.bf16.mxu0 %v11559_v37  ;;  %6732 = vmatprep.subr.bf16.mxu1 %v11560_v43  ;;  %v11601_v37 = vld [vmem:[%s17374_s4 + $0x1288] ss:$76 sps:$4 sm:$0xff]   ;;  %v11602_v43 = vld [vmem:[%s17374_s4 + $0x1290] ss:$76 sps:$4 sm:$0xff]  }
 0x417   :  { %6610 = vmatpush1.bf16.msra.mxu0 %v11561_v20  ;;  %6733 = vmatpush1.bf16.msra.mxu1 %v11562_v49  ;;  %v11603_v20 = vld [vmem:[%s17374_s4 + $0x1324] ss:$76 sps:$4 sm:$0xff]   ;;  %v11604_v49 = vld [vmem:[%s17374_s4 + $0x132c] ss:$76 sps:$4 sm:$0xff]  }
 0x418   :  { %6611 = vmatprep.subr.bf16.mxu0 %v11563_v50  ;;  %6734 = vmatprep.subr.bf16.mxu1 %v11564_v51  ;;  %v11605_v50 = vld [vmem:[%s17374_s4 + $0x1320] ss:$76 sps:$4 sm:$0xff]   ;;  %v11606_v51 = vld [vmem:[%s17374_s4 + $0x1328] ss:$76 sps:$4 sm:$0xff]  }
 0x41b   :  { %6612 = vmatpush1.bf16.msra.mxu0 %v11565_v52  ;;  %6735 = vmatpush1.bf16.msra.mxu1 %v11566_v54  ;;  %v11607_v52 = vld [vmem:[%s17374_s4 + $0x13bc] ss:$76 sps:$4 sm:$0xff]   ;;  %v11608_v54 = vld [vmem:[%s17374_s4 + $0x13c4] ss:$76 sps:$4 sm:$0xff]  }
 0x41c   :  { %6613 = vmatprep.subr.bf16.mxu0 %v11567_v55  ;;  %6736 = vmatprep.subr.bf16.mxu1 %v11568_v56  ;;  %v11609_v55 = vld [vmem:[%s17374_s4 + $0x13b8] ss:$76 sps:$4 sm:$0xff]   ;;  %v11610_v56 = vld [vmem:[%s17374_s4 + $0x13c0] ss:$76 sps:$4 sm:$0xff]  }
 0x41f   :  { %6614 = vmatpush1.bf16.msra.mxu0 %v11569_v5  ;;  %6737 = vmatpush1.bf16.msra.mxu1 %v11570_v57  ;;  %v11611_v5 = vld [vmem:[%s17374_s4 + $0x1454] ss:$76 sps:$4 sm:$0xff]   ;;  %v11612_v57 = vld [vmem:[%s17374_s4 + $0x145c] ss:$76 sps:$4 sm:$0xff]  }
 0x420   :  { %6615 = vmatprep.subr.bf16.mxu0 %v11571_v58  ;;  %6738 = vmatprep.subr.bf16.mxu1 %v11572_v59  ;;  %v11613_v58 = vld [vmem:[%s17374_s4 + $0x1450] ss:$76 sps:$4 sm:$0xff]   ;;  %v11614_v59 = vld [vmem:[%s17374_s4 + $0x1458] ss:$76 sps:$4 sm:$0xff]  }
 0x423   :  { %6616 = vmatpush1.bf16.msra.mxu0 %v11573_v32  ;;  %6739 = vmatpush1.bf16.msra.mxu1 %v11574_v60  ;;  %v11615_v32 = vld [vmem:[%s17374_s4 + $0x14ec] ss:$76 sps:$4 sm:$0xff]   ;;  %v11616_v60 = vld [vmem:[%s17374_s4 + $0x14f4] ss:$76 sps:$4 sm:$0xff]  }
 0x424   :  { %6617 = vmatprep.subr.bf16.mxu0 %v11575_v61  ;;  %6740 = vmatprep.subr.bf16.mxu1 %v11576_v62  ;;  %v11617_v61 = vld [vmem:[%s17374_s4 + $0x14e8] ss:$76 sps:$4 sm:$0xff]   ;;  %v11618_v62 = vld [vmem:[%s17374_s4 + $0x14f0] ss:$76 sps:$4 sm:$0xff]  }
 0x427   :  { %6618 = vmatpush1.bf16.msra.mxu0 %v11577_v9  ;;  %6741 = vmatpush1.bf16.msra.mxu1 %v11578_v10  ;;  %v11619_v9 = vld [vmem:[%s17374_s4 + $0x1584] ss:$76 sps:$4 sm:$0xff]   ;;  %v11620_v10 = vld [vmem:[%s17374_s4 + $0x158c] ss:$76 sps:$4 sm:$0xff]  }
 0x428   :  { %6619 = vmatprep.subr.bf16.mxu0 %v11579_v11  ;;  %6742 = vmatprep.subr.bf16.mxu1 %v11580_v13  ;;  %v11621_v11 = vld [vmem:[%s17374_s4 + $0x1580] ss:$76 sps:$4 sm:$0xff]   ;;  %v11622_v13 = vld [vmem:[%s17374_s4 + $0x1588] ss:$76 sps:$4 sm:$0xff]  }
 0x42b   :  { %6620 = vmatpush1.bf16.msra.mxu0 %v11581_v14  ;;  %6743 = vmatpush1.bf16.msra.mxu1 %v11582_v18  ;;  %v11623_v14 = vld [vmem:[%s17374_s4 + $0x161c] ss:$76 sps:$4 sm:$0xff]   ;;  %v11624_v18 = vld [vmem:[%s17374_s4 + $0x1624] ss:$76 sps:$4 sm:$0xff]  }
 0x42c   :  { %6621 = vmatprep.subr.bf16.mxu0 %v11583_v19  ;;  %6744 = vmatprep.subr.bf16.mxu1 %v11584_v21  ;;  %v11625_v19 = vld [vmem:[%s17374_s4 + $0x1618] ss:$76 sps:$4 sm:$0xff]   ;;  %v11626_v21 = vld [vmem:[%s17374_s4 + $0x1620] ss:$76 sps:$4 sm:$0xff]  }
 0x42f   :  { %6622 = vmatpush1.bf16.msra.mxu0 %v11585_v12  ;;  %6745 = vmatpush1.bf16.msra.mxu1 %v11586_v22  ;;  %v11627_v12 = vld [vmem:[%s17374_s4 + $0x16b4] ss:$76 sps:$4 sm:$0xff]   ;;  %v11628_v22 = vld [vmem:[%s17374_s4 + $0x16bc] ss:$76 sps:$4 sm:$0xff]  }
 0x430   :  { %6623 = vmatprep.subr.bf16.mxu0 %v11587_v23  ;;  %6746 = vmatprep.subr.bf16.mxu1 %v11588_v24  ;;  %v11629_v23 = vld [vmem:[%s17374_s4 + $0x16b0] ss:$76 sps:$4 sm:$0xff]   ;;  %v11630_v24 = vld [vmem:[%s17374_s4 + $0x16b8] ss:$76 sps:$4 sm:$0xff]  }
 0x433   :  { %6624 = vmatpush1.bf16.msra.mxu0 %v11589_v17  ;;  %6747 = vmatpush1.bf16.msra.mxu1 %v11590_v25  ;;  %v11631_v17 = vld [vmem:[%s17374_s4 + $0x174c] ss:$76 sps:$4 sm:$0xff]   ;;  %v11632_v25 = vld [vmem:[%s17374_s4 + $0x1754] ss:$76 sps:$4 sm:$0xff]  }
 0x434   :  { %6625 = vmatprep.subr.bf16.mxu0 %v11591_v48  ;;  %6748 = vmatprep.subr.bf16.mxu1 %v11592_v26  ;;  %v11633_v48 = vld [vmem:[%s17374_s4 + $0x1748] ss:$76 sps:$4 sm:$0xff]   ;;  %v11634_v26 = vld [vmem:[%s17374_s4 + $0x1750] ss:$76 sps:$4 sm:$0xff]  }
 0x437   :  { %6626 = vmatpush1.bf16.msra.mxu0 %v11593_v27  ;;  %6749 = vmatpush1.bf16.msra.mxu1 %v11594_v28  ;;  %v11635_v27 = vld [vmem:[%s17374_s4 + $0x17e4] ss:$76 sps:$4 sm:$0xff]   ;;  %v11636_v28 = vld [vmem:[%s17374_s4 + $0x17ec] ss:$76 sps:$4 sm:$0xff]  }
 0x438   :  { %6627 = vmatprep.subr.bf16.mxu0 %v11595_v29  ;;  %6750 = vmatprep.subr.bf16.mxu1 %v11596_v31  ;;  %v11637_v29 = vld [vmem:[%s17374_s4 + $0x17e0] ss:$76 sps:$4 sm:$0xff]   ;;  %v11638_v31 = vld [vmem:[%s17374_s4 + $0x17e8] ss:$76 sps:$4 sm:$0xff]  }
 0x43b   :  { %6628 = vmatpush1.bf16.msra.mxu0 %v11597_v33  ;;  %6751 = vmatpush1.bf16.msra.mxu1 %v11598_v34  ;;  %v11639_v33 = vld [vmem:[%s17374_s4 + $0x187c] ss:$76 sps:$4 sm:$0xff]   ;;  %v11640_v34 = vld [vmem:[%s17374_s4 + $0x1884] ss:$76 sps:$4 sm:$0xff]  }
 0x43c   :  { %6629 = vmatprep.subr.bf16.mxu0 %v11599_v35  ;;  %6752 = vmatprep.subr.bf16.mxu1 %v11600_v36  ;;  %v11641_v35 = vld [vmem:[%s17374_s4 + $0x1878] ss:$76 sps:$4 sm:$0xff]   ;;  %v11642_v36 = vld [vmem:[%s17374_s4 + $0x1880] ss:$76 sps:$4 sm:$0xff]  }
 0x43f   :  { %6630 = vmatpush1.bf16.msra.mxu0 %v11601_v37  ;;  %6753 = vmatpush1.bf16.msra.mxu1 %v11602_v43  ;;  %v11643_v37 = vld [vmem:[%s17374_s4 + $0x1914] ss:$76 sps:$4 sm:$0xff]   ;;  %v11644_v43 = vld [vmem:[%s17374_s4 + $0x191c] ss:$76 sps:$4 sm:$0xff]  }
 0x440   :  { %6640 = vmatprep.subr.bf16.mxu0 %v11603_v20  ;;  %6763 = vmatprep.subr.bf16.mxu1 %v11604_v49  ;;  %v11645_v20 = vld [vmem:[%s17374_s4 + $0x1910] ss:$76 sps:$4 sm:$0xff]   ;;  %v11646_v49 = vld [vmem:[%s17374_s4 + $0x1918] ss:$76 sps:$4 sm:$0xff]  }
 0x442   :  { %6632 = vmatmul.mubr.bf16.vlgmr.msra.gmra.mrb[20].mxu0 %v14805_v8  ;;  %6755 = vmatmul.mubr.bf16.vlgmr.msra.gmra.mrb[20].mxu1 %v14805_v8 }
 0x443   :  { %6641 = vmatpush1.bf16.msra.mxu0 %v11605_v50  ;;  %6764 = vmatpush1.bf16.msra.mxu1 %v11606_v51  ;;  %v11647_v50 = vld [vmem:[%s17374_s4 + $0x19ac] ss:$76 sps:$4 sm:$0xff]   ;;  %v11648_v51 = vld [vmem:[%s17374_s4 + $0x19b4] ss:$76 sps:$4 sm:$0xff]  }
 0x444   :  { %6642 = vmatprep.subr.bf16.mxu0 %v11607_v52  ;;  %6765 = vmatprep.subr.bf16.mxu1 %v11608_v54  ;;  %v11649_v52 = vld [vmem:[%s17374_s4 + $0x19a8] ss:$76 sps:$4 sm:$0xff]   ;;  %v11650_v54 = vld [vmem:[%s17374_s4 + $0x19b0] ss:$76 sps:$4 sm:$0xff]  }
 0x445   :  { %6672 = vmatprep.mubr.bf16.mxu0 %v14822_v15  ;;  %6795 = vmatprep.mubr.bf16.mxu1 %v14822_v15 }
 0x447   :  { %6643 = vmatpush1.bf16.msra.mxu0 %v11609_v55  ;;  %6766 = vmatpush1.bf16.msra.mxu1 %v11610_v56  ;;  %v11651_v55 = vld [vmem:[%s17374_s4 + $0x1a44] ss:$76 sps:$4 sm:$0xff]   ;;  %v11652_v56 = vld [vmem:[%s17374_s4 + $0x1a4c] ss:$76 sps:$4 sm:$0xff]  }
 0x448   :  { %6644 = vmatprep.subr.bf16.mxu0 %v11611_v5  ;;  %6767 = vmatprep.subr.bf16.mxu1 %v11612_v57  ;;  %v11653_v5 = vld [vmem:[%s17374_s4 + $0x1a40] ss:$76 sps:$4 sm:$0xff]   ;;  %v11654_v57 = vld [vmem:[%s17374_s4 + $0x1a48] ss:$76 sps:$4 sm:$0xff]  }
 0x44b   :  { %6645 = vmatpush1.bf16.msra.mxu0 %v11613_v58  ;;  %6768 = vmatpush1.bf16.msra.mxu1 %v11614_v59  ;;  %v11655_v58 = vld [vmem:[%s17374_s4 + $0x1adc] ss:$76 sps:$4 sm:$0xff]   ;;  %v11656_v59 = vld [vmem:[%s17374_s4 + $0x1ae4] ss:$76 sps:$4 sm:$0xff]  }
 0x44c   :  { %6646 = vmatprep.subr.bf16.mxu0 %v11615_v32  ;;  %6769 = vmatprep.subr.bf16.mxu1 %v11616_v60  ;;  %v11657_v32 = vld [vmem:[%s17374_s4 + $0x1ad8] ss:$76 sps:$4 sm:$0xff]   ;;  %v11658_v60 = vld [vmem:[%s17374_s4 + $0x1ae0] ss:$76 sps:$4 sm:$0xff]  }
 0x44f   :  { %6647 = vmatpush1.bf16.msra.mxu0 %v11617_v61  ;;  %6770 = vmatpush1.bf16.msra.mxu1 %v11618_v62  ;;  %v11659_v61 = vld [vmem:[%s17374_s4 + $0x1b74] ss:$76 sps:$4 sm:$0xff]   ;;  %v11660_v62 = vld [vmem:[%s17374_s4 + $0x1b7c] ss:$76 sps:$4 sm:$0xff]  }
 0x450   :  { %6648 = vmatprep.subr.bf16.mxu0 %v11619_v9  ;;  %6771 = vmatprep.subr.bf16.mxu1 %v11620_v10  ;;  %v11661_v9 = vld [vmem:[%s17374_s4 + $0x1b70] ss:$76 sps:$4 sm:$0xff]   ;;  %v11662_v10 = vld [vmem:[%s17374_s4 + $0x1b78] ss:$76 sps:$4 sm:$0xff]  }
 0x453   :  { %6649 = vmatpush1.bf16.msra.mxu0 %v11621_v11  ;;  %6772 = vmatpush1.bf16.msra.mxu1 %v11622_v13  ;;  %v11663_v11 = vld [vmem:[%s17374_s4 + $0x1c0c] ss:$76 sps:$4 sm:$0xff]   ;;  %v11664_v13 = vld [vmem:[%s17374_s4 + $0x1c14] ss:$76 sps:$4 sm:$0xff]  }
 0x454   :  { %6650 = vmatprep.subr.bf16.mxu0 %v11623_v14  ;;  %6773 = vmatprep.subr.bf16.mxu1 %v11624_v18  ;;  %v11665_v14 = vld [vmem:[%s17374_s4 + $0x1c08] ss:$76 sps:$4 sm:$0xff]   ;;  %v11666_v18 = vld [vmem:[%s17374_s4 + $0x1c10] ss:$76 sps:$4 sm:$0xff]  }
 0x457   :  { %6651 = vmatpush1.bf16.msra.mxu0 %v11625_v19  ;;  %6774 = vmatpush1.bf16.msra.mxu1 %v11626_v21  ;;  %v11667_v19 = vld [vmem:[%s17374_s4 + $0x34] ss:$76 sps:$4 sm:$0xff]   ;;  %v11668_v21 = vld [vmem:[%s17374_s4 + $0x3c] ss:$76 sps:$4 sm:$0xff]  }
 0x458   :  { %6652 = vmatprep.subr.bf16.mxu0 %v11627_v12  ;;  %6775 = vmatprep.subr.bf16.mxu1 %v11628_v22  ;;  %v11669_v12 = vld [vmem:[%s17374_s4 + $0x30] ss:$76 sps:$4 sm:$0xff]   ;;  %v11670_v22 = vld [vmem:[%s17374_s4 + $0x38] ss:$76 sps:$4 sm:$0xff]  }
 0x45b   :  { %6653 = vmatpush1.bf16.msra.mxu0 %v11629_v23  ;;  %6776 = vmatpush1.bf16.msra.mxu1 %v11630_v24  ;;  %v11671_v23 = vld [vmem:[%s17374_s4 + $0xcc] ss:$76 sps:$4 sm:$0xff]   ;;  %v11672_v24 = vld [vmem:[%s17374_s4 + $0xd4] ss:$76 sps:$4 sm:$0xff]  }
 0x45c   :  { %6654 = vmatprep.subr.bf16.mxu0 %v11631_v17  ;;  %6777 = vmatprep.subr.bf16.mxu1 %v11632_v25  ;;  %v11673_v17 = vld [vmem:[%s17374_s4 + $0xc8] ss:$76 sps:$4 sm:$0xff]   ;;  %v11674_v25 = vld [vmem:[%s17374_s4 + $0xd0] ss:$76 sps:$4 sm:$0xff]  }
 0x45f   :  { %6655 = vmatpush1.bf16.msra.mxu0 %v11633_v48  ;;  %6778 = vmatpush1.bf16.msra.mxu1 %v11634_v26  ;;  %v11675_v48 = vld [vmem:[%s17374_s4 + $0x164] ss:$76 sps:$4 sm:$0xff]   ;;  %v11676_v26 = vld [vmem:[%s17374_s4 + $0x16c] ss:$76 sps:$4 sm:$0xff]  }
 0x460   :  { %6656 = vmatprep.subr.bf16.mxu0 %v11635_v27  ;;  %6779 = vmatprep.subr.bf16.mxu1 %v11636_v28  ;;  %v11677_v27 = vld [vmem:[%s17374_s4 + $0x160] ss:$76 sps:$4 sm:$0xff]   ;;  %v11678_v28 = vld [vmem:[%s17374_s4 + $0x168] ss:$76 sps:$4 sm:$0xff]  }
 0x463   :  { %6657 = vmatpush1.bf16.msra.mxu0 %v11637_v29  ;;  %6780 = vmatpush1.bf16.msra.mxu1 %v11638_v31  ;;  %v11679_v29 = vld [vmem:[%s17374_s4 + $0x1fc] ss:$76 sps:$4 sm:$0xff]   ;;  %v11680_v31 = vld [vmem:[%s17374_s4 + $0x204] ss:$76 sps:$4 sm:$0xff]  }
 0x464   :  { %6658 = vmatprep.subr.bf16.mxu0 %v11639_v33  ;;  %6781 = vmatprep.subr.bf16.mxu1 %v11640_v34  ;;  %v11681_v33 = vld [vmem:[%s17374_s4 + $0x1f8] ss:$76 sps:$4 sm:$0xff]   ;;  %v11682_v34 = vld [vmem:[%s17374_s4 + $0x200] ss:$76 sps:$4 sm:$0xff]  }
 0x467   :  { %6659 = vmatpush1.bf16.msra.mxu0 %v11641_v35  ;;  %6782 = vmatpush1.bf16.msra.mxu1 %v11642_v36  ;;  %v11683_v35 = vld [vmem:[%s17374_s4 + $0x294] ss:$76 sps:$4 sm:$0xff]   ;;  %v11684_v36 = vld [vmem:[%s17374_s4 + $0x29c] ss:$76 sps:$4 sm:$0xff]  }
 0x468   :  { %6660 = vmatprep.subr.bf16.mxu0 %v11643_v37  ;;  %6783 = vmatprep.subr.bf16.mxu1 %v11644_v43  ;;  %v11685_v37 = vld [vmem:[%s17374_s4 + $0x290] ss:$76 sps:$4 sm:$0xff]   ;;  %v11686_v43 = vld [vmem:[%s17374_s4 + $0x298] ss:$76 sps:$4 sm:$0xff]  }
 0x46b   :  { %6661 = vmatpush1.bf16.msra.mxu0 %v11645_v20  ;;  %6784 = vmatpush1.bf16.msra.mxu1 %v11646_v49  ;;  %v11687_v20 = vld [vmem:[%s17374_s4 + $0x32c] ss:$76 sps:$4 sm:$0xff]   ;;  %v11688_v49 = vld [vmem:[%s17374_s4 + $0x334] ss:$76 sps:$4 sm:$0xff]  }
 0x46c   :  { %6662 = vmatprep.subr.bf16.mxu0 %v11647_v50  ;;  %6785 = vmatprep.subr.bf16.mxu1 %v11648_v51 }
 0x46f   :  { %6663 = vmatpush1.bf16.msra.mxu0 %v11649_v52  ;;  %6786 = vmatpush1.bf16.msra.mxu1 %v11650_v54 }
 0x470   :  { %6664 = vmatprep.subr.bf16.mxu0 %v11651_v55  ;;  %6787 = vmatprep.subr.bf16.mxu1 %v11652_v56  ;;  %v11689_v56 = vld [vmem:[%s17374_s4 + $0x328] ss:$76 sps:$4 sm:$0xff]  }
 0x473   :  { %6665 = vmatpush1.bf16.msra.mxu0 %v11653_v5  ;;  %6788 = vmatpush1.bf16.msra.mxu1 %v11654_v57  ;;  %v11690_v5 = vld [vmem:[%s17374_s4 + $0x330] ss:$76 sps:$4 sm:$0xff]  }
 0x474   :  { %6666 = vmatprep.subr.bf16.mxu0 %v11655_v58  ;;  %6789 = vmatprep.subr.bf16.mxu1 %v11656_v59  ;;  %v11691_v59 = vld [vmem:[%s17374_s4 + $0x3c4] ss:$76 sps:$4 sm:$0xff]  }
 0x477   :  { %6667 = vmatpush1.bf16.msra.mxu0 %v11657_v32  ;;  %6790 = vmatpush1.bf16.msra.mxu1 %v11658_v60  ;;  %v11692_v32 = vld [vmem:[%s17374_s4 + $0x3cc] ss:$76 sps:$4 sm:$0xff]  }
 0x478   :  { %6668 = vmatprep.subr.bf16.mxu0 %v11659_v61  ;;  %6791 = vmatprep.subr.bf16.mxu1 %v11660_v62  ;;  %v11693_v61 = vld [vmem:[%s17374_s4 + $0x3c0] ss:$76 sps:$4 sm:$0xff]   ;;  %v11694_v62 = vld [vmem:[%s17374_s4 + $0x3c8] ss:$76 sps:$4 sm:$0xff]  }
 0x47b   :  { %6669 = vmatpush1.bf16.msra.mxu0 %v11661_v9  ;;  %6792 = vmatpush1.bf16.msra.mxu1 %v11662_v10  ;;  %v11695_v9 = vld [vmem:[%s17374_s4 + $0x45c] ss:$76 sps:$4 sm:$0xff]   ;;  %v11696_v10 = vld [vmem:[%s17374_s4 + $0x464] ss:$76 sps:$4 sm:$0xff]  }
 0x47c   :  { %6670 = vmatprep.subr.bf16.mxu0 %v11663_v11  ;;  %6793 = vmatprep.subr.bf16.mxu1 %v11664_v13  ;;  %v11697_v11 = vld [vmem:[%s17374_s4 + $0x458] ss:$76 sps:$4 sm:$0xff]   ;;  %v11698_v13 = vld [vmem:[%s17374_s4 + $0x460] ss:$76 sps:$4 sm:$0xff]  }
 0x47f   :  { %6671 = vmatpush1.bf16.msra.mxu0 %v11665_v14  ;;  %6794 = vmatpush1.bf16.msra.mxu1 %v11666_v18  ;;  %v11699_v14 = vld [vmem:[%s17374_s4 + $0x4f4] ss:$76 sps:$4 sm:$0xff]   ;;  %v11700_v18 = vld [vmem:[%s17374_s4 + $0x4fc] ss:$76 sps:$4 sm:$0xff]  }
 0x480   :  { %6804 = vmatprep.subr.bf16.mxu0 %v11667_v19  ;;  %6927 = vmatprep.subr.bf16.mxu1 %v11668_v21  ;;  %v11701_v19 = vld [vmem:[%s17374_s4 + $0x4f0] ss:$76 sps:$4 sm:$0xff]   ;;  %v11702_v21 = vld [vmem:[%s17374_s4 + $0x4f8] ss:$76 sps:$4 sm:$0xff]  }
 0x482   :  { %6673 = vmatmul.mubr.bf16.vlgmr.msra.gmra.mrb[20].mxu0 %v15008_v30  ;;  %6796 = vmatmul.mubr.bf16.vlgmr.msra.gmra.mrb[20].mxu1 %v15008_v30 }
 0x483   :  { %6805 = vmatpush1.bf16.msra.mxu0 %v11669_v12  ;;  %6928 = vmatpush1.bf16.msra.mxu1 %v11670_v22  ;;  %v11703_v12 = vld [vmem:[%s17374_s4 + $0x58c] ss:$76 sps:$4 sm:$0xff]   ;;  %v11704_v22 = vld [vmem:[%s17374_s4 + $0x594] ss:$76 sps:$4 sm:$0xff]  }
 0x484   :  { %6806 = vmatprep.subr.bf16.mxu0 %v11671_v23  ;;  %6929 = vmatprep.subr.bf16.mxu1 %v11672_v24  ;;  %v11705_v23 = vld [vmem:[%s17374_s4 + $0x588] ss:$76 sps:$4 sm:$0xff]   ;;  %v11706_v24 = vld [vmem:[%s17374_s4 + $0x590] ss:$76 sps:$4 sm:$0xff]  }
 0x485   :  { %6836 = vmatprep.mubr.bf16.mxu0 %v14402_v16  ;;  %6959 = vmatprep.mubr.bf16.mxu1 %v14402_v16 }
 0x487   :  { %6807 = vmatpush1.bf16.msra.mxu0 %v11673_v17  ;;  %6930 = vmatpush1.bf16.msra.mxu1 %v11674_v25  ;;  %v11707_v17 = vld [vmem:[%s17374_s4 + $0x624] ss:$76 sps:$4 sm:$0xff]   ;;  %v11708_v25 = vld [vmem:[%s17374_s4 + $0x62c] ss:$76 sps:$4 sm:$0xff]  }
 0x488   :  { %6808 = vmatprep.subr.bf16.mxu0 %v11675_v48  ;;  %6931 = vmatprep.subr.bf16.mxu1 %v11676_v26  ;;  %v11709_v48 = vld [vmem:[%s17374_s4 + $0x620] ss:$76 sps:$4 sm:$0xff]   ;;  %v11710_v26 = vld [vmem:[%s17374_s4 + $0x628] ss:$76 sps:$4 sm:$0xff]  }
 0x48b   :  { %6809 = vmatpush1.bf16.msra.mxu0 %v11677_v27  ;;  %6932 = vmatpush1.bf16.msra.mxu1 %v11678_v28  ;;  %v11711_v27 = vld [vmem:[%s17374_s4 + $0x6bc] ss:$76 sps:$4 sm:$0xff]   ;;  %v11712_v28 = vld [vmem:[%s17374_s4 + $0x6c4] ss:$76 sps:$4 sm:$0xff]  }
 0x48c   :  { %6810 = vmatprep.subr.bf16.mxu0 %v11679_v29  ;;  %6933 = vmatprep.subr.bf16.mxu1 %v11680_v31  ;;  %v11713_v29 = vld [vmem:[%s17374_s4 + $0x6b8] ss:$76 sps:$4 sm:$0xff]   ;;  %v11714_v31 = vld [vmem:[%s17374_s4 + $0x6c0] ss:$76 sps:$4 sm:$0xff]  }
 0x48f   :  { %6811 = vmatpush1.bf16.msra.mxu0 %v11681_v33  ;;  %6934 = vmatpush1.bf16.msra.mxu1 %v11682_v34  ;;  %v11715_v33 = vld [vmem:[%s17374_s4 + $0x754] ss:$76 sps:$4 sm:$0xff]   ;;  %v11716_v34 = vld [vmem:[%s17374_s4 + $0x75c] ss:$76 sps:$4 sm:$0xff]  }
 0x490   :  { %6812 = vmatprep.subr.bf16.mxu0 %v11683_v35  ;;  %6935 = vmatprep.subr.bf16.mxu1 %v11684_v36  ;;  %v11717_v35 = vld [vmem:[%s17374_s4 + $0x750] ss:$76 sps:$4 sm:$0xff]   ;;  %v11718_v36 = vld [vmem:[%s17374_s4 + $0x758] ss:$76 sps:$4 sm:$0xff]  }
 0x493   :  { %6813 = vmatpush1.bf16.msra.mxu0 %v11685_v37  ;;  %6936 = vmatpush1.bf16.msra.mxu1 %v11686_v43  ;;  %v11719_v37 = vld [vmem:[%s17374_s4 + $0x7ec] ss:$76 sps:$4 sm:$0xff]   ;;  %v11720_v43 = vld [vmem:[%s17374_s4 + $0x7f4] ss:$76 sps:$4 sm:$0xff]  }
 0x494   :  { %6814 = vmatprep.subr.bf16.mxu0 %v11687_v20  ;;  %6937 = vmatprep.subr.bf16.mxu1 %v11688_v49  ;;  %v11721_v20 = vld [vmem:[%s17374_s4 + $0x7e8] ss:$76 sps:$4 sm:$0xff]   ;;  %v11722_v49 = vld [vmem:[%s17374_s4 + $0x7f0] ss:$76 sps:$4 sm:$0xff]  }
 0x495   :  { %v15679_v50 = vpop.f32.mrb[16].mxu1  ;;  %v15681_v51 = vpop.f32.mrb[16].mxu0 }
 0x496   :  { %17405 = vst [vmem:[#allocation7_spill] sm:$0xff] %v15681_v51  ;;  %v15683_v52 = vpop.f32.mrb[17].mxu1  ;;  %v15685_v54 = vpop.f32.mrb[17].mxu0  ;;  %v7213_v51 = vld [vmem:[%s17378_s2 + $0x140] sm:$0xff] }
 0x497   :  { %17406 = vst [vmem:[#allocation8_spill] sm:$0xff] %v15685_v54  ;;  %v6555_v55 = vpop.f32.mrb[18].mxu1  ;;  %6815 = vmatpush1.bf16.msra.mxu0 %v11689_v56  ;;  %6938 = vmatpush1.bf16.msra.mxu1 %v11690_v5  ;;  %v6432_v57 = vpop.f32.mrb[18].mxu0  ;;  %v11724_v56 = vld [vmem:[%s17374_s4 + $0x88c] ss:$76 sps:$4 sm:$0xff]  }
 0x498   :  { %v6556_v58 = vpop.f32.mrb[19].mxu1  ;;  %6816 = vmatprep.subr.bf16.mxu0 %v11691_v59  ;;  %6939 = vmatprep.subr.bf16.mxu1 %v11692_v32  ;;  %v6433_v60 = vpop.f32.mrb[19].mxu0  ;;  %v11723_v55 = vld [vmem:[%s17374_s4 + $0x884] ss:$76 sps:$4 sm:$0xff]   ;;  %v11725_v5 = vld [vmem:[%s17374_s4 + $0x880] ss:$76 sps:$4 sm:$0xff]  }
 0x499   :  { %v11726_v57 = vld [vmem:[%s17374_s4 + $0x888] ss:$76 sps:$4 sm:$0xff]   ;;  %v11728_v59 = vld [vmem:[%s17374_s4 + $0x924] ss:$76 sps:$4 sm:$0xff]   ;;  %v11730_v60 = vld [vmem:[%s17374_s4 + $0x920] ss:$76 sps:$4 sm:$0xff]  }
 0x49a   :  { %v11727_v58 = vld [vmem:[%s17374_s4 + $0x91c] ss:$76 sps:$4 sm:$0xff]   ;;  %v11729_v32 = vld [vmem:[%s17374_s4 + $0x918] ss:$76 sps:$4 sm:$0xff]  }
 0x49b   :  { %6817 = vmatpush1.bf16.msra.mxu0 %v11693_v61  ;;  %6940 = vmatpush1.bf16.msra.mxu1 %v11694_v62  ;;  %v11731_v61 = vld [vmem:[%s17374_s4 + $0x9b4] ss:$76 sps:$4 sm:$0xff]   ;;  %v11732_v62 = vld [vmem:[%s17374_s4 + $0x9bc] ss:$76 sps:$4 sm:$0xff]  }
 0x49c   :  { %6818 = vmatprep.subr.bf16.mxu0 %v11695_v9  ;;  %6941 = vmatprep.subr.bf16.mxu1 %v11696_v10  ;;  %v11733_v9 = vld [vmem:[%s17374_s4 + $0x9b0] ss:$76 sps:$4 sm:$0xff]   ;;  %v11734_v10 = vld [vmem:[%s17374_s4 + $0x9b8] ss:$76 sps:$4 sm:$0xff]  }
 0x49f   :  { %6819 = vmatpush1.bf16.msra.mxu0 %v11697_v11  ;;  %6942 = vmatpush1.bf16.msra.mxu1 %v11698_v13  ;;  %v11735_v11 = vld [vmem:[%s17374_s4 + $0xa4c] ss:$76 sps:$4 sm:$0xff]   ;;  %v11736_v13 = vld [vmem:[%s17374_s4 + $0xa54] ss:$76 sps:$4 sm:$0xff]  }
 0x4a0   :  { %6820 = vmatprep.subr.bf16.mxu0 %v11699_v14  ;;  %6943 = vmatprep.subr.bf16.mxu1 %v11700_v18  ;;  %v11737_v14 = vld [vmem:[%s17374_s4 + $0xa48] ss:$76 sps:$4 sm:$0xff]   ;;  %v11738_v18 = vld [vmem:[%s17374_s4 + $0xa50] ss:$76 sps:$4 sm:$0xff]  }
 0x4a3   :  { %6821 = vmatpush1.bf16.msra.mxu0 %v11701_v19  ;;  %6944 = vmatpush1.bf16.msra.mxu1 %v11702_v21  ;;  %v11739_v19 = vld [vmem:[%s17374_s4 + $0xae4] ss:$76 sps:$4 sm:$0xff]   ;;  %v11740_v21 = vld [vmem:[%s17374_s4 + $0xaec] ss:$76 sps:$4 sm:$0xff]  }
 0x4a4   :  { %6822 = vmatprep.subr.bf16.mxu0 %v11703_v12  ;;  %6945 = vmatprep.subr.bf16.mxu1 %v11704_v22  ;;  %v11741_v12 = vld [vmem:[%s17374_s4 + $0xae0] ss:$76 sps:$4 sm:$0xff]   ;;  %v11742_v22 = vld [vmem:[%s17374_s4 + $0xae8] ss:$76 sps:$4 sm:$0xff]  }
 0x4a7   :  { %6823 = vmatpush1.bf16.msra.mxu0 %v11705_v23  ;;  %6946 = vmatpush1.bf16.msra.mxu1 %v11706_v24  ;;  %v11743_v23 = vld [vmem:[%s17374_s4 + $0xb7c] ss:$76 sps:$4 sm:$0xff]   ;;  %v11744_v24 = vld [vmem:[%s17374_s4 + $0xb84] ss:$76 sps:$4 sm:$0xff]  }
 0x4a8   :  { %6824 = vmatprep.subr.bf16.mxu0 %v11707_v17  ;;  %6947 = vmatprep.subr.bf16.mxu1 %v11708_v25  ;;  %v11745_v17 = vld [vmem:[%s17374_s4 + $0xb78] ss:$76 sps:$4 sm:$0xff]   ;;  %v11746_v25 = vld [vmem:[%s17374_s4 + $0xb80] ss:$76 sps:$4 sm:$0xff]  }
 0x4ab   :  { %6825 = vmatpush1.bf16.msra.mxu0 %v11709_v48  ;;  %6948 = vmatpush1.bf16.msra.mxu1 %v11710_v26  ;;  %v11747_v48 = vld [vmem:[%s17374_s4 + $0xc14] ss:$76 sps:$4 sm:$0xff]   ;;  %v11748_v26 = vld [vmem:[%s17374_s4 + $0xc1c] ss:$76 sps:$4 sm:$0xff]  }
 0x4ac   :  { %6826 = vmatprep.subr.bf16.mxu0 %v11711_v27  ;;  %6949 = vmatprep.subr.bf16.mxu1 %v11712_v28  ;;  %v11749_v27 = vld [vmem:[%s17374_s4 + $0xc10] ss:$76 sps:$4 sm:$0xff]   ;;  %v11750_v28 = vld [vmem:[%s17374_s4 + $0xc18] ss:$76 sps:$4 sm:$0xff]  }
 0x4af   :  { %6827 = vmatpush1.bf16.msra.mxu0 %v11713_v29  ;;  %6950 = vmatpush1.bf16.msra.mxu1 %v11714_v31  ;;  %v11751_v29 = vld [vmem:[%s17374_s4 + $0xcac] ss:$76 sps:$4 sm:$0xff]   ;;  %v11752_v31 = vld [vmem:[%s17374_s4 + $0xcb4] ss:$76 sps:$4 sm:$0xff]  }
 0x4b0   :  { %6828 = vmatprep.subr.bf16.mxu0 %v11715_v33  ;;  %6951 = vmatprep.subr.bf16.mxu1 %v11716_v34  ;;  %v11753_v33 = vld [vmem:[%s17374_s4 + $0xca8] ss:$76 sps:$4 sm:$0xff]   ;;  %v11754_v34 = vld [vmem:[%s17374_s4 + $0xcb0] ss:$76 sps:$4 sm:$0xff]  }
 0x4b3   :  { %6829 = vmatpush1.bf16.msra.mxu0 %v11717_v35  ;;  %6952 = vmatpush1.bf16.msra.mxu1 %v11718_v36  ;;  %v11755_v35 = vld [vmem:[%s17374_s4 + $0xd44] ss:$76 sps:$4 sm:$0xff]   ;;  %v11756_v36 = vld [vmem:[%s17374_s4 + $0xd4c] ss:$76 sps:$4 sm:$0xff]  }
 0x4b4   :  { %6830 = vmatprep.subr.bf16.mxu0 %v11719_v37  ;;  %6953 = vmatprep.subr.bf16.mxu1 %v11720_v43  ;;  %v11757_v37 = vld [vmem:[%s17374_s4 + $0xd40] ss:$76 sps:$4 sm:$0xff]   ;;  %v11758_v43 = vld [vmem:[%s17374_s4 + $0xd48] ss:$76 sps:$4 sm:$0xff]  }
 0x4b7   :  { %6831 = vmatpush1.bf16.msra.mxu0 %v11721_v20  ;;  %6954 = vmatpush1.bf16.msra.mxu1 %v11722_v49  ;;  %v11759_v20 = vld [vmem:[%s17374_s4 + $0xddc] ss:$76 sps:$4 sm:$0xff]   ;;  %v11760_v49 = vld [vmem:[%s17374_s4 + $0xde4] ss:$76 sps:$4 sm:$0xff]  }
 0x4b8   :  { %6832 = vmatprep.subr.bf16.mxu0 %v11723_v55  ;;  %6955 = vmatprep.subr.bf16.mxu1 %v11724_v56  ;;  %v11761_v55 = vld [vmem:[%s17374_s4 + $0xdd8] ss:$76 sps:$4 sm:$0xff]   ;;  %v11762_v56 = vld [vmem:[%s17374_s4 + $0xde0] ss:$76 sps:$4 sm:$0xff]  }
 0x4bb   :  { %6833 = vmatpush1.bf16.msra.mxu0 %v11725_v5  ;;  %6956 = vmatpush1.bf16.msra.mxu1 %v11726_v57  ;;  %v11763_v5 = vld [vmem:[%s17374_s4 + $0xe74] ss:$76 sps:$4 sm:$0xff]   ;;  %v11764_v57 = vld [vmem:[%s17374_s4 + $0xe7c] ss:$76 sps:$4 sm:$0xff]  }
 0x4bc   :  { %6834 = vmatprep.subr.bf16.mxu0 %v11727_v58  ;;  %6957 = vmatprep.subr.bf16.mxu1 %v11728_v59  ;;  %v11765_v58 = vld [vmem:[%s17374_s4 + $0xe70] ss:$76 sps:$4 sm:$0xff]   ;;  %v11766_v59 = vld [vmem:[%s17374_s4 + $0xe78] ss:$76 sps:$4 sm:$0xff]  }
 0x4bf   :  { %6835 = vmatpush1.bf16.msra.mxu0 %v11729_v32  ;;  %6958 = vmatpush1.bf16.msra.mxu1 %v11730_v60  ;;  %v11767_v32 = vld [vmem:[%s17374_s4 + $0xf0c] ss:$76 sps:$4 sm:$0xff]   ;;  %v11768_v60 = vld [vmem:[%s17374_s4 + $0xf14] ss:$76 sps:$4 sm:$0xff]  }
 0x4c0   :  { %6845 = vmatprep.subr.bf16.mxu0 %v11731_v61  ;;  %6968 = vmatprep.subr.bf16.mxu1 %v11732_v62  ;;  %v11769_v61 = vld [vmem:[%s17374_s4 + $0xf08] ss:$76 sps:$4 sm:$0xff]   ;;  %v11770_v62 = vld [vmem:[%s17374_s4 + $0xf10] ss:$76 sps:$4 sm:$0xff]  }
 0x4c2   :  { %6837 = vmatmul.mubr.bf16.vlgmr.msra.gmra.mrb[24].mxu0 %v14599_v38  ;;  %6960 = vmatmul.mubr.bf16.vlgmr.msra.gmra.mrb[24].mxu1 %v14599_v38 }
 0x4c3   :  { %6846 = vmatpush1.bf16.msra.mxu0 %v11733_v9  ;;  %6969 = vmatpush1.bf16.msra.mxu1 %v11734_v10  ;;  %v11771_v9 = vld [vmem:[%s17374_s4 + $0xfa4] ss:$76 sps:$4 sm:$0xff]   ;;  %v11772_v10 = vld [vmem:[%s17374_s4 + $0xfac] ss:$76 sps:$4 sm:$0xff]  }
 0x4c4   :  { %6847 = vmatprep.subr.bf16.mxu0 %v11735_v11  ;;  %6970 = vmatprep.subr.bf16.mxu1 %v11736_v13  ;;  %v11773_v11 = vld [vmem:[%s17374_s4 + $0xfa0] ss:$76 sps:$4 sm:$0xff]   ;;  %v11774_v13 = vld [vmem:[%s17374_s4 + $0xfa8] ss:$76 sps:$4 sm:$0xff]  }
 0x4c5   :  { %6877 = vmatprep.mubr.bf16.mxu0 %v14616_v53  ;;  %7000 = vmatprep.mubr.bf16.mxu1 %v14616_v53 }
 0x4c7   :  { %6848 = vmatpush1.bf16.msra.mxu0 %v11737_v14  ;;  %6971 = vmatpush1.bf16.msra.mxu1 %v11738_v18  ;;  %v11775_v14 = vld [vmem:[%s17374_s4 + $0x103c] ss:$76 sps:$4 sm:$0xff]   ;;  %v11776_v18 = vld [vmem:[%s17374_s4 + $0x1044] ss:$76 sps:$4 sm:$0xff]  }
 0x4c8   :  { %6849 = vmatprep.subr.bf16.mxu0 %v11739_v19  ;;  %6972 = vmatprep.subr.bf16.mxu1 %v11740_v21  ;;  %v11777_v19 = vld [vmem:[%s17374_s4 + $0x1038] ss:$76 sps:$4 sm:$0xff]   ;;  %v11778_v21 = vld [vmem:[%s17374_s4 + $0x1040] ss:$76 sps:$4 sm:$0xff]  }
 0x4cb   :  { %6850 = vmatpush1.bf16.msra.mxu0 %v11741_v12  ;;  %6973 = vmatpush1.bf16.msra.mxu1 %v11742_v22  ;;  %v11779_v12 = vld [vmem:[%s17374_s4 + $0x10d4] ss:$76 sps:$4 sm:$0xff]   ;;  %v11780_v22 = vld [vmem:[%s17374_s4 + $0x10dc] ss:$76 sps:$4 sm:$0xff]  }
 0x4cc   :  { %6851 = vmatprep.subr.bf16.mxu0 %v11743_v23  ;;  %6974 = vmatprep.subr.bf16.mxu1 %v11744_v24  ;;  %v11781_v23 = vld [vmem:[%s17374_s4 + $0x10d0] ss:$76 sps:$4 sm:$0xff]   ;;  %v11782_v24 = vld [vmem:[%s17374_s4 + $0x10d8] ss:$76 sps:$4 sm:$0xff]  }
 0x4cf   :  { %6852 = vmatpush1.bf16.msra.mxu0 %v11745_v17  ;;  %6975 = vmatpush1.bf16.msra.mxu1 %v11746_v25  ;;  %v11783_v17 = vld [vmem:[%s17374_s4 + $0x116c] ss:$76 sps:$4 sm:$0xff]   ;;  %v11784_v25 = vld [vmem:[%s17374_s4 + $0x1174] ss:$76 sps:$4 sm:$0xff]  }
 0x4d0   :  { %6853 = vmatprep.subr.bf16.mxu0 %v11747_v48  ;;  %6976 = vmatprep.subr.bf16.mxu1 %v11748_v26  ;;  %v11785_v48 = vld [vmem:[%s17374_s4 + $0x1168] ss:$76 sps:$4 sm:$0xff]   ;;  %v11786_v26 = vld [vmem:[%s17374_s4 + $0x1170] ss:$76 sps:$4 sm:$0xff]  }
 0x4d3   :  { %6854 = vmatpush1.bf16.msra.mxu0 %v11749_v27  ;;  %6977 = vmatpush1.bf16.msra.mxu1 %v11750_v28  ;;  %v11787_v27 = vld [vmem:[%s17374_s4 + $0x1204] ss:$76 sps:$4 sm:$0xff]   ;;  %v11788_v28 = vld [vmem:[%s17374_s4 + $0x120c] ss:$76 sps:$4 sm:$0xff]  }
 0x4d4   :  { %6855 = vmatprep.subr.bf16.mxu0 %v11751_v29  ;;  %6978 = vmatprep.subr.bf16.mxu1 %v11752_v31  ;;  %v11789_v29 = vld [vmem:[%s17374_s4 + $0x1200] ss:$76 sps:$4 sm:$0xff]   ;;  %v11790_v31 = vld [vmem:[%s17374_s4 + $0x1208] ss:$76 sps:$4 sm:$0xff]  }
 0x4d7   :  { %6856 = vmatpush1.bf16.msra.mxu0 %v11753_v33  ;;  %6979 = vmatpush1.bf16.msra.mxu1 %v11754_v34  ;;  %v11791_v33 = vld [vmem:[%s17374_s4 + $0x129c] ss:$76 sps:$4 sm:$0xff]   ;;  %v11792_v34 = vld [vmem:[%s17374_s4 + $0x12a4] ss:$76 sps:$4 sm:$0xff]  }
 0x4d8   :  { %6857 = vmatprep.subr.bf16.mxu0 %v11755_v35  ;;  %6980 = vmatprep.subr.bf16.mxu1 %v11756_v36  ;;  %v11793_v35 = vld [vmem:[%s17374_s4 + $0x1298] ss:$76 sps:$4 sm:$0xff]   ;;  %v11794_v36 = vld [vmem:[%s17374_s4 + $0x12a0] ss:$76 sps:$4 sm:$0xff]  }
 0x4db   :  { %6858 = vmatpush1.bf16.msra.mxu0 %v11757_v37  ;;  %6981 = vmatpush1.bf16.msra.mxu1 %v11758_v43  ;;  %v11795_v37 = vld [vmem:[%s17374_s4 + $0x1334] ss:$76 sps:$4 sm:$0xff]   ;;  %v11796_v43 = vld [vmem:[%s17374_s4 + $0x133c] ss:$76 sps:$4 sm:$0xff]  }
 0x4dc   :  { %6859 = vmatprep.subr.bf16.mxu0 %v11759_v20  ;;  %6982 = vmatprep.subr.bf16.mxu1 %v11760_v49  ;;  %v11797_v20 = vld [vmem:[%s17374_s4 + $0x1330] ss:$76 sps:$4 sm:$0xff]   ;;  %v11798_v49 = vld [vmem:[%s17374_s4 + $0x1338] ss:$76 sps:$4 sm:$0xff]  }
 0x4df   :  { %6860 = vmatpush1.bf16.msra.mxu0 %v11761_v55  ;;  %6983 = vmatpush1.bf16.msra.mxu1 %v11762_v56  ;;  %v11799_v55 = vld [vmem:[%s17374_s4 + $0x13cc] ss:$76 sps:$4 sm:$0xff]   ;;  %v11800_v56 = vld [vmem:[%s17374_s4 + $0x13d4] ss:$76 sps:$4 sm:$0xff]  }
 0x4e0   :  { %6861 = vmatprep.subr.bf16.mxu0 %v11763_v5  ;;  %6984 = vmatprep.subr.bf16.mxu1 %v11764_v57  ;;  %v11801_v5 = vld [vmem:[%s17374_s4 + $0x13c8] ss:$76 sps:$4 sm:$0xff]   ;;  %v11802_v57 = vld [vmem:[%s17374_s4 + $0x13d0] ss:$76 sps:$4 sm:$0xff]  }
 0x4e3   :  { %6862 = vmatpush1.bf16.msra.mxu0 %v11765_v58  ;;  %6985 = vmatpush1.bf16.msra.mxu1 %v11766_v59  ;;  %v11803_v58 = vld [vmem:[%s17374_s4 + $0x1464] ss:$76 sps:$4 sm:$0xff]   ;;  %v11804_v59 = vld [vmem:[%s17374_s4 + $0x146c] ss:$76 sps:$4 sm:$0xff]  }
 0x4e4   :  { %6863 = vmatprep.subr.bf16.mxu0 %v11767_v32  ;;  %6986 = vmatprep.subr.bf16.mxu1 %v11768_v60  ;;  %v11805_v32 = vld [vmem:[%s17374_s4 + $0x1460] ss:$76 sps:$4 sm:$0xff]   ;;  %v11806_v60 = vld [vmem:[%s17374_s4 + $0x1468] ss:$76 sps:$4 sm:$0xff]  }
 0x4e7   :  { %6864 = vmatpush1.bf16.msra.mxu0 %v11769_v61  ;;  %6987 = vmatpush1.bf16.msra.mxu1 %v11770_v62  ;;  %v11807_v61 = vld [vmem:[%s17374_s4 + $0x14fc] ss:$76 sps:$4 sm:$0xff]   ;;  %v11808_v62 = vld [vmem:[%s17374_s4 + $0x1504] ss:$76 sps:$4 sm:$0xff]  }
 0x4e8   :  { %6865 = vmatprep.subr.bf16.mxu0 %v11771_v9  ;;  %6988 = vmatprep.subr.bf16.mxu1 %v11772_v10  ;;  %v11809_v9 = vld [vmem:[%s17374_s4 + $0x14f8] ss:$76 sps:$4 sm:$0xff]   ;;  %v11810_v10 = vld [vmem:[%s17374_s4 + $0x1500] ss:$76 sps:$4 sm:$0xff]  }
 0x4eb   :  { %6866 = vmatpush1.bf16.msra.mxu0 %v11773_v11  ;;  %6989 = vmatpush1.bf16.msra.mxu1 %v11774_v13  ;;  %v11811_v11 = vld [vmem:[%s17374_s4 + $0x1594] ss:$76 sps:$4 sm:$0xff]   ;;  %v11812_v13 = vld [vmem:[%s17374_s4 + $0x159c] ss:$76 sps:$4 sm:$0xff]  }
 0x4ec   :  { %6867 = vmatprep.subr.bf16.mxu0 %v11775_v14  ;;  %6990 = vmatprep.subr.bf16.mxu1 %v11776_v18  ;;  %v11813_v14 = vld [vmem:[%s17374_s4 + $0x1590] ss:$76 sps:$4 sm:$0xff]   ;;  %v11814_v18 = vld [vmem:[%s17374_s4 + $0x1598] ss:$76 sps:$4 sm:$0xff]  }
 0x4ef   :  { %6868 = vmatpush1.bf16.msra.mxu0 %v11777_v19  ;;  %6991 = vmatpush1.bf16.msra.mxu1 %v11778_v21  ;;  %v11815_v19 = vld [vmem:[%s17374_s4 + $0x162c] ss:$76 sps:$4 sm:$0xff]   ;;  %v11816_v21 = vld [vmem:[%s17374_s4 + $0x1634] ss:$76 sps:$4 sm:$0xff]  }
 0x4f0   :  { %6869 = vmatprep.subr.bf16.mxu0 %v11779_v12  ;;  %6992 = vmatprep.subr.bf16.mxu1 %v11780_v22  ;;  %v11817_v12 = vld [vmem:[%s17374_s4 + $0x1628] ss:$76 sps:$4 sm:$0xff]   ;;  %v11818_v22 = vld [vmem:[%s17374_s4 + $0x1630] ss:$76 sps:$4 sm:$0xff]  }
 0x4f3   :  { %6870 = vmatpush1.bf16.msra.mxu0 %v11781_v23  ;;  %6993 = vmatpush1.bf16.msra.mxu1 %v11782_v24  ;;  %v11819_v23 = vld [vmem:[%s17374_s4 + $0x16c4] ss:$76 sps:$4 sm:$0xff]   ;;  %v11820_v24 = vld [vmem:[%s17374_s4 + $0x16cc] ss:$76 sps:$4 sm:$0xff]  }
 0x4f4   :  { %6871 = vmatprep.subr.bf16.mxu0 %v11783_v17  ;;  %6994 = vmatprep.subr.bf16.mxu1 %v11784_v25  ;;  %v11821_v17 = vld [vmem:[%s17374_s4 + $0x16c0] ss:$76 sps:$4 sm:$0xff]   ;;  %v11822_v25 = vld [vmem:[%s17374_s4 + $0x16c8] ss:$76 sps:$4 sm:$0xff]  }
 0x4f7   :  { %6872 = vmatpush1.bf16.msra.mxu0 %v11785_v48  ;;  %6995 = vmatpush1.bf16.msra.mxu1 %v11786_v26  ;;  %v11823_v48 = vld [vmem:[%s17374_s4 + $0x175c] ss:$76 sps:$4 sm:$0xff]   ;;  %v11824_v26 = vld [vmem:[%s17374_s4 + $0x1764] ss:$76 sps:$4 sm:$0xff]  }
 0x4f8   :  { %6873 = vmatprep.subr.bf16.mxu0 %v11787_v27  ;;  %6996 = vmatprep.subr.bf16.mxu1 %v11788_v28  ;;  %v11825_v27 = vld [vmem:[%s17374_s4 + $0x1758] ss:$76 sps:$4 sm:$0xff]   ;;  %v11826_v28 = vld [vmem:[%s17374_s4 + $0x1760] ss:$76 sps:$4 sm:$0xff]  }
 0x4fb   :  { %6874 = vmatpush1.bf16.msra.mxu0 %v11789_v29  ;;  %6997 = vmatpush1.bf16.msra.mxu1 %v11790_v31  ;;  %v11827_v29 = vld [vmem:[%s17374_s4 + $0x17f4] ss:$76 sps:$4 sm:$0xff]   ;;  %v11828_v31 = vld [vmem:[%s17374_s4 + $0x17fc] ss:$76 sps:$4 sm:$0xff]  }
 0x4fc   :  { %6875 = vmatprep.subr.bf16.mxu0 %v11791_v33  ;;  %6998 = vmatprep.subr.bf16.mxu1 %v11792_v34  ;;  %v11829_v33 = vld [vmem:[%s17374_s4 + $0x17f0] ss:$76 sps:$4 sm:$0xff]   ;;  %v11830_v34 = vld [vmem:[%s17374_s4 + $0x17f8] ss:$76 sps:$4 sm:$0xff]  }
 0x4ff   :  { %6876 = vmatpush1.bf16.msra.mxu0 %v11793_v35  ;;  %6999 = vmatpush1.bf16.msra.mxu1 %v11794_v36  ;;  %v11831_v35 = vld [vmem:[%s17374_s4 + $0x188c] ss:$76 sps:$4 sm:$0xff]   ;;  %v11832_v36 = vld [vmem:[%s17374_s4 + $0x1894] ss:$76 sps:$4 sm:$0xff]  }
 0x500   :  { %6886 = vmatprep.subr.bf16.mxu0 %v11795_v37  ;;  %7009 = vmatprep.subr.bf16.mxu1 %v11796_v43  ;;  %v11833_v37 = vld [vmem:[%s17374_s4 + $0x1888] ss:$76 sps:$4 sm:$0xff]   ;;  %v11834_v43 = vld [vmem:[%s17374_s4 + $0x1890] ss:$76 sps:$4 sm:$0xff]  }
 0x502   :  { %6878 = vmatmul.mubr.bf16.vlgmr.msra.gmra.mrb[24].mxu0 %v14805_v8  ;;  %7001 = vmatmul.mubr.bf16.vlgmr.msra.gmra.mrb[24].mxu1 %v14805_v8 }
 0x503   :  { %6887 = vmatpush1.bf16.msra.mxu0 %v11797_v20  ;;  %7010 = vmatpush1.bf16.msra.mxu1 %v11798_v49  ;;  %v11835_v20 = vld [vmem:[%s17374_s4 + $0x1924] ss:$76 sps:$4 sm:$0xff]   ;;  %v11836_v49 = vld [vmem:[%s17374_s4 + $0x192c] ss:$76 sps:$4 sm:$0xff]  }
 0x504   :  { %6888 = vmatprep.subr.bf16.mxu0 %v11799_v55  ;;  %7011 = vmatprep.subr.bf16.mxu1 %v11800_v56  ;;  %v11837_v55 = vld [vmem:[%s17374_s4 + $0x1920] ss:$76 sps:$4 sm:$0xff]   ;;  %v11838_v56 = vld [vmem:[%s17374_s4 + $0x1928] ss:$76 sps:$4 sm:$0xff]  }
 0x505   :  { %6918 = vmatprep.mubr.bf16.mxu0 %v14822_v15  ;;  %7041 = vmatprep.mubr.bf16.mxu1 %v14822_v15 }
 0x507   :  { %6889 = vmatpush1.bf16.msra.mxu0 %v11801_v5  ;;  %7012 = vmatpush1.bf16.msra.mxu1 %v11802_v57  ;;  %v11839_v5 = vld [vmem:[%s17374_s4 + $0x19bc] ss:$76 sps:$4 sm:$0xff]   ;;  %v11840_v57 = vld [vmem:[%s17374_s4 + $0x19c4] ss:$76 sps:$4 sm:$0xff]  }
 0x508   :  { %6890 = vmatprep.subr.bf16.mxu0 %v11803_v58  ;;  %7013 = vmatprep.subr.bf16.mxu1 %v11804_v59  ;;  %v11841_v58 = vld [vmem:[%s17374_s4 + $0x19b8] ss:$76 sps:$4 sm:$0xff]   ;;  %v11842_v59 = vld [vmem:[%s17374_s4 + $0x19c0] ss:$76 sps:$4 sm:$0xff]  }
 0x50b   :  { %6891 = vmatpush1.bf16.msra.mxu0 %v11805_v32  ;;  %7014 = vmatpush1.bf16.msra.mxu1 %v11806_v60  ;;  %v918_v32 = vlaneseq  ;;  %v11843_v60 = vld [vmem:[%s17374_s4 + $0x1a54] ss:$76 sps:$4 sm:$0xff]  }
 0x50c   :  { %6892 = vmatprep.subr.bf16.mxu0 %v11807_v61  ;;  %7015 = vmatprep.subr.bf16.mxu1 %v11808_v62  ;;  %v11844_v61 = vld [vmem:[%s17374_s4 + $0x1a5c] ss:$76 sps:$4 sm:$0xff]  }
 0x50d   :  { %v11845_v62 = vld [vmem:[%s17374_s4 + $0x1a50] ss:$76 sps:$4 sm:$0xff]  }
 0x50f   :  { %6893 = vmatpush1.bf16.msra.mxu0 %v11809_v9  ;;  %7016 = vmatpush1.bf16.msra.mxu1 %v11810_v10  ;;  %v11846_v9 = vld [vmem:[%s17374_s4 + $0x1a58] ss:$76 sps:$4 sm:$0xff]   ;;  %v16169_v10 = vshrl.u32 %v918_v32, 7  ;;  %v11860_v32 = vld [vmem:[%s17374_s4 + $0x40] ss:$76 sps:$4 sm:$0xff]  }
 0x510   :  { %6894 = vmatprep.subr.bf16.mxu0 %v11811_v11  ;;  %7017 = vmatprep.subr.bf16.mxu1 %v11812_v13  ;;  %v11847_v11 = vld [vmem:[%s17374_s4 + $0x1aec] ss:$76 sps:$4 sm:$0xff]   ;;  %v11848_v13 = vld [vmem:[%s17374_s4 + $0x1af4] ss:$76 sps:$4 sm:$0xff]  }
 0x511   :  { %v17416_v63 = vsub.s32 2, %v16169_v10 }
 0x513   :  { %6895 = vmatpush1.bf16.msra.mxu0 %v11813_v14  ;;  %7018 = vmatpush1.bf16.msra.mxu1 %v11814_v18  ;;  %v17381_v14 = vsub.s32 7, %v16169_v10  ;;  %v11849_v18 = vld [vmem:[%s17374_s4 + $0x1ae8] ss:$76 sps:$4 sm:$0xff]  }
 0x514   :  { %6896 = vmatprep.subr.bf16.mxu0 %v11815_v19  ;;  %7019 = vmatprep.subr.bf16.mxu1 %v11816_v21  ;;  %v11850_v19 = vld [vmem:[%s17374_s4 + $0x1af0] ss:$76 sps:$4 sm:$0xff]   ;;  %v16185_v21 = vsub.s32 1, %v16169_v10 }
 0x516   :  { %17407 = vst [vmem:[#allocation9_spill] sm:$0xff] %v16185_v21 }
 0x517   :  { %6897 = vmatpush1.bf16.msra.mxu0 %v11817_v12  ;;  %7020 = vmatpush1.bf16.msra.mxu1 %v11818_v22  ;;  %v11851_v12 = vld [vmem:[%s17374_s4 + $0x1b84] ss:$76 sps:$4 sm:$0xff]   ;;  %v11852_v22 = vld [vmem:[%s17374_s4 + $0x1b8c] ss:$76 sps:$4 sm:$0xff]  }
 0x518   :  { %6898 = vmatprep.subr.bf16.mxu0 %v11819_v23  ;;  %7021 = vmatprep.subr.bf16.mxu1 %v11820_v24  ;;  %v16196_v23 = vld [vmem:[%s17377_s5] sm:$0xff] }
 0x519   :  { %v7189_v24 = vld [vmem:[%s17378_s2 + $0x80] sm:$0xff] }
 0x51b   :  { %6899 = vmatpush1.bf16.msra.mxu0 %v11821_v17  ;;  %7022 = vmatpush1.bf16.msra.mxu1 %v11822_v25  ;;  %v7190_v17 = vld [vmem:[%s17378_s2 + $0x88] sm:$0xff]  ;;  %v16207_v25 = vrot.slane %v16196_v23, %v17381_v14 }
 0x51c   :  { %6900 = vmatprep.subr.bf16.mxu0 %v11823_v48  ;;  %7023 = vmatprep.subr.bf16.mxu1 %v11824_v26  ;;  %v11853_v48 = vld [vmem:[%s17374_s4 + $0x1b80] ss:$76 sps:$4 sm:$0xff]   ;;  %v11854_v26 = vld [vmem:[%s17374_s4 + $0x1b88] ss:$76 sps:$4 sm:$0xff]  }
 0x51f   :  { %6901 = vmatpush1.bf16.msra.mxu0 %v11825_v27  ;;  %7024 = vmatpush1.bf16.msra.mxu1 %v11826_v28  ;;  %v925_v27 = vrot.slane %v16196_v23, %v16185_v21  ;;  %v11855_v28 = vld [vmem:[%s17374_s4 + $0x1c1c] ss:$76 sps:$4 sm:$0xff]  }
 0x520   :  { %6902 = vmatprep.subr.bf16.mxu0 %v11827_v29  ;;  %7025 = vmatprep.subr.bf16.mxu1 %v11828_v31  ;;  %v11856_v29 = vld [vmem:[%s17374_s4 + $0x1c24] ss:$76 sps:$4 sm:$0xff]   ;;  %v16223_v31 = vpack.c.bf16 %v7190_v17, %v7189_v24  ;;  %v7180_v17 = vld [vmem:[%s17378_s2 + $0x38] sm:$0xff] }
 0x523   :  { %6903 = vmatpush1.bf16.msra.mxu0 %v11829_v33  ;;  %7026 = vmatpush1.bf16.msra.mxu1 %v11830_v34  ;;  %v7173_v33 = vld [vmem:[%s17378_s2] sm:$0xff]  ;;  %v7174_v34 = vld [vmem:[%s17378_s2 + $0x8] sm:$0xff] }
 0x524   :  { %6904 = vmatprep.subr.bf16.mxu0 %v11831_v35  ;;  %7027 = vmatprep.subr.bf16.mxu1 %v11832_v36  ;;  %v9887_v35 = vadd.f32 %v13877_v46, %v16207_v25  ;;  %v7191_v36 = vld [vmem:[%s17378_s2 + $0x90] sm:$0xff]  ;;  %v16248_v46 = vadd.f32 %v13283_v4, %v925_v27  ;;  %v7193_v4 = vld [vmem:[%s17378_s2 + $0xa0] sm:$0xff] }
 0x525   :  { %v11864_v27 = vld [vmem:[%s17374_s4 + $0x170] ss:$76 sps:$4 sm:$0xff]  }
 0x527   :  { %6905 = vmatpush1.bf16.msra.mxu0 %v11833_v37  ;;  %7028 = vmatpush1.bf16.msra.mxu1 %v11834_v43  ;;  %v7192_v37 = vld [vmem:[%s17378_s2 + $0x98] sm:$0xff] }
 0x528   :  { %6906 = vmatprep.subr.bf16.mxu0 %v11835_v20  ;;  %7029 = vmatprep.subr.bf16.mxu1 %v11836_v49  ;;  %v11857_v43 = vld [vmem:[%s17374_s4 + $0x1c18] ss:$76 sps:$4 sm:$0xff]   ;;  %v11858_v20 = vld [vmem:[%s17374_s4 + $0x1c20] ss:$76 sps:$4 sm:$0xff]   ;;  %v16245_v49 = vpack.c.bf16 %v7174_v34, %v7173_v33 }
 0x529   :  { %v7181_v34 = vld [vmem:[%s17378_s2 + $0x40] sm:$0xff] }
 0x52b   :  { %6907 = vmatpush1.bf16.msra.mxu0 %v11837_v55  ;;  %7030 = vmatpush1.bf16.msra.mxu1 %v11838_v56  ;;  %v11859_v55 = vld [vmem:[%s17374_s4 + $0x44] ss:$76 sps:$4 sm:$0xff]  }
 0x52c   :  { %6908 = vmatprep.subr.bf16.mxu0 %v11839_v5  ;;  %7031 = vmatprep.subr.bf16.mxu1 %v11840_v57  ;;  %v7175_v56 = vld [vmem:[%s17378_s2 + $0x10] sm:$0xff]  ;;  %v7176_v5 = vld [vmem:[%s17378_s2 + $0x18] sm:$0xff]  ;;  %v16260_v57 = vpack.c.bf16 %v7192_v37, %v7191_v36 }
 0x52d   :  { %v7199_v36 = vld [vmem:[%s17378_s2 + $0xd0] sm:$0xff]  ;;  %v7200_v37 = vld [vmem:[%s17378_s2 + $0xd8] sm:$0xff] }
 0x52f   :  { %6909 = vmatpush1.bf16.msra.mxu0 %v11841_v58  ;;  %7032 = vmatpush1.bf16.msra.mxu1 %v11842_v59  ;;  %v7194_v58 = vld [vmem:[%s17378_s2 + $0xa8] sm:$0xff]  ;;  %v7270_v59 = vmul.f32 %v9887_v35, %v16248_v46 }
 0x530   :  { %6910 = vmatprep.subr.bf16.mxu0 %v11843_v60  ;;  %7033 = vmatprep.subr.bf16.mxu1 %v11844_v61  ;;  %v16275_v60 = vpack.c.bf16 %v7176_v5, %v7175_v56  ;;  %v11861_v61 = vld [vmem:[%s17374_s4 + $0xdc] ss:$76 sps:$4 sm:$0xff]   ;;  %v16354_v56 = vpack.c.bf16 %v7200_v37, %v7199_v36  ;;  %v7183_v5 = vld [vmem:[%s17378_s2 + $0x50] sm:$0xff]  ;;  %v11870_v36 = vld [vmem:[%s17374_s4 + $0x338] ss:$76 sps:$4 sm:$0xff]  }
 0x531   :  { %v7182_v35 = vld [vmem:[%s17378_s2 + $0x48] sm:$0xff] }
 0x533   :  { %6911 = vmatpush1.bf16.msra.mxu0 %v11845_v62  ;;  %7034 = vmatpush1.bf16.msra.mxu1 %v11846_v9  ;;  %v16280_v62 = vpack.c.bf16 %v7194_v58, %v7193_v4  ;;  %v7177_v9 = vld [vmem:[%s17378_s2 + $0x20] sm:$0xff]  ;;  %v7184_v4 = vld [vmem:[%s17378_s2 + $0x58] sm:$0xff] }
 0x534   :  { %6912 = vmatprep.subr.bf16.mxu0 %v11847_v11  ;;  %7035 = vmatprep.subr.bf16.mxu1 %v11848_v13  ;;  %v7178_v11 = vld [vmem:[%s17378_s2 + $0x28] sm:$0xff]  ;;  %v7195_v13 = vld [vmem:[%s17378_s2 + $0xb0] sm:$0xff]  ;;  %v7201_v58 = vld [vmem:[%s17378_s2 + $0xe0] sm:$0xff] }
 0x537   :  { %6913 = vmatpush1.bf16.msra.mxu0 %v11849_v18  ;;  %7036 = vmatpush1.bf16.msra.mxu1 %v11850_v19  ;;  %v7196_v18 = vld [vmem:[%s17378_s2 + $0xb8] sm:$0xff] }
 0x538   :  { %6914 = vmatprep.subr.bf16.mxu0 %v11851_v12  ;;  %7037 = vmatprep.subr.bf16.mxu1 %v11852_v22  ;;  %v11862_v19 = vld [vmem:[%s17374_s4 + $0xd8] ss:$76 sps:$4 sm:$0xff]   ;;  %v16300_v12 = vpack.c.bf16 %v7178_v11, %v7177_v9  ;;  %v11863_v22 = vld [vmem:[%s17374_s4 + $0x174] ss:$76 sps:$4 sm:$0xff]   ;;  %v16306_v24 = vpack.c.bf16 %v7196_v18, %v7195_v13  ;;  %v17382_v9 = vsub.s32 6, %v16169_v10 }
 0x539   :  { %v11869_v11 = vld [vmem:[%s17374_s4 + $0x33c] ss:$76 sps:$4 sm:$0xff]   ;;  %v7185_v18 = vld [vmem:[%s17378_s2 + $0x60] sm:$0xff] }
 0x53b   :  { %6915 = vmatpush1.bf16.msra.mxu0 %v11853_v48  ;;  %7038 = vmatpush1.bf16.msra.mxu1 %v11854_v26  ;;  %v7197_v48 = vld [vmem:[%s17378_s2 + $0xc0] sm:$0xff]  ;;  %v7198_v26 = vld [vmem:[%s17378_s2 + $0xc8] sm:$0xff] }
 0x53c   :  { %6916 = vmatprep.subr.bf16.mxu0 %v11855_v28  ;;  %7039 = vmatprep.subr.bf16.mxu1 %v11856_v29  ;;  %v11865_v29 = vld [vmem:[%s17374_s4 + $0x20c] ss:$76 sps:$4 sm:$0xff]   ;;  %v16330_v33 = vpack.c.bf16 %v7198_v26, %v7197_v48  ;;  %v16398_v26 = vsub.s32 0, %v16169_v10 }
 0x53d   :  { %v7204_v48 = vld [vmem:[%s17378_s2 + $0xf8] sm:$0xff] }
 0x53e   :  { %17410 = vst [vmem:[#allocation12_spill] sm:$0xff] %v16398_v26 }
 0x53f   :  { %6917 = vmatpush1.bf16.msra.mxu0 %v11857_v43  ;;  %7040 = vmatpush1.bf16.msra.mxu1 %v11858_v20  ;;  %v11866_v43 = vld [vmem:[%s17374_s4 + $0x208] ss:$76 sps:$4 sm:$0xff]   ;;  %v16348_v20 = vpack.c.bf16 %v7182_v35, %v7181_v34 }
 0x540   :  { %7050 = vmatprep.subr.bf16.mxu0 %v11859_v55  ;;  %9689 = vmatprep.subr.bf16.mxu1 %v16223_v31  ;;  %v11867_v55 = vld [vmem:[%s17374_s4 + $0x2a4] ss:$76 sps:$4 sm:$0xff]   ;;  %v16407_v34 = vld [vmem:[%s17377_s5 + $0x8] sm:$0xff] }
 0x541   :  { %17412 = vst [vmem:[#allocation14_spill] sm:$0xff] %v16407_v34 }
 0x542   :  { %6919 = vmatmul.mubr.bf16.vlgmr.msra.gmra.mrb[24].mxu0 %v15008_v30  ;;  %7042 = vmatmul.mubr.bf16.vlgmr.msra.gmra.mrb[24].mxu1 %v15008_v30  ;;  %v16638_v30 = vrot.slane %v16407_v34, %v16398_v26 }
 0x543   :  { %7051 = vmatpush1.bf16.msra.mxu0 %v11860_v32  ;;  %9691 = vmatpush3.bf16.msra.mxu1 %v16245_v49  ;;  %v11868_v32 = vld [vmem:[%s17374_s4 + $0x2a0] ss:$76 sps:$4 sm:$0xff]  }
 0x544   :  { %7339 = vmatprep.mubr.f32.mxu1 %v7270_v59  ;;  %7052 = vmatprep.subr.bf16.mxu0 %v11861_v61  ;;  %v7202_v59 = vld [vmem:[%s17378_s2 + $0xe8] sm:$0xff]  ;;  %v16372_v61 = vpack.c.bf16 %v7184_v4, %v7183_v5  ;;  %v16419_v5 = vrot.slane %v16196_v23, %v17382_v9  ;;  %v11875_v9 = vld [vmem:[%s17374_s4 + $0x504] ss:$76 sps:$4 sm:$0xff]  }
 0x545   :  { %9693 = vmatprep.subr.bf16.mxu1 %v16260_v57  ;;  %7082 = vmatprep.mubr.bf16.mxu0 %v14402_v16  ;;  %v7179_v16 = vld [vmem:[%s17378_s2 + $0x30] sm:$0xff]  ;;  %v16379_v13 = vpack.c.bf16 %v7202_v59, %v7201_v58 }
 0x546   :  { %v16324_v28 = vpack.c.bf16 %v7180_v17, %v7179_v16  ;;  %v7203_v17 = vld [vmem:[%s17378_s2 + $0xf0] sm:$0xff] }
 0x547   :  { %7053 = vmatpush1.bf16.msra.mxu0 %v11862_v19  ;;  %9695 = vmatpush3.bf16.msra.mxu1 %v16275_v60  ;;  %v7186_v19 = vld [vmem:[%s17378_s2 + $0x68] sm:$0xff]  ;;  %v11871_v58 = vld [vmem:[%s17374_s4 + $0x3d4] ss:$76 sps:$4 sm:$0xff]  }
 0x548   :  { %7054 = vmatprep.subr.bf16.mxu0 %v11863_v22  ;;  %9697 = vmatprep.subr.bf16.mxu1 %v16280_v62  ;;  %v16413_v37 = vpack.c.bf16 %v7186_v19, %v7185_v18  ;;  %v7188_v18 = vld [vmem:[%s17378_s2 + $0x78] sm:$0xff]  ;;  %v7221_v19 = vld [vmem:[%s17378_s2 + $0x180] sm:$0xff] }
 0x54b   :  { %7055 = vmatpush1.bf16.msra.mxu0 %v11864_v27  ;;  %9699 = vmatpush3.bf16.msra.mxu1 %v16300_v12 }
 0x54c   :  { %7056 = vmatprep.subr.bf16.mxu0 %v11865_v29  ;;  %9701 = vmatprep.subr.bf16.mxu1 %v16306_v24 }
 0x54f   :  { %7057 = vmatpush1.bf16.msra.mxu0 %v11866_v43  ;;  %9703 = vmatpush3.bf16.msra.mxu1 %v16324_v28 }
 0x550   :  { %7058 = vmatprep.subr.bf16.mxu0 %v11867_v55  ;;  %9705 = vmatprep.subr.bf16.mxu1 %v16330_v33  ;;  %v17383_v55 = vsub.s32 3, %v16169_v10 }
 0x553   :  { %7059 = vmatpush1.bf16.msra.mxu0 %v11868_v32  ;;  %9707 = vmatpush3.bf16.msra.mxu1 %v16348_v20  ;;  %v16425_v32 = vpack.c.bf16 %v7204_v48, %v7203_v17  ;;  %v921_v17 = vrot.slane %v16196_v23, %v16398_v26  ;;  %v16443_v48 = vrot.slane %v16407_v34, %v16185_v21 }
 0x554   :  { %7060 = vmatprep.subr.bf16.mxu0 %v11869_v11  ;;  %9709 = vmatprep.subr.bf16.mxu1 %v16354_v56  ;;  %v7187_v11 = vld [vmem:[%s17378_s2 + $0x70] sm:$0xff] }
 0x555   :  { %v16387_v22 = vpop.f32.mrb[20].mxu0  ;;  %v16389_v16 = vpop.f32.mrb[20].mxu1 }
 0x556   :  { %17408 = vst [vmem:[#allocation10_spill] sm:$0xff] %v16387_v22  ;;  %17409 = vst [vmem:[#allocation11_spill] sm:$0xff] %v16389_v16  ;;  %v16400_v27 = vpop.f32.mrb[21].mxu0  ;;  %v16402_v29 = vpop.f32.mrb[21].mxu1  ;;  %v11887_v16 = vld [vmem:[%s17374_s4 + $0x894] ss:$76 sps:$4 sm:$0xff]  }
 0x557   :  { %17411 = vst [vmem:[#allocation13_spill] sm:$0xff] %v16402_v29  ;;  %v6801_v35 = vpop.f32.mrb[22].mxu1  ;;  %7061 = vmatpush1.bf16.msra.mxu0 %v11870_v36  ;;  %9711 = vmatpush3.bf16.msra.mxu1 %v16372_v61  ;;  %v6678_v43 = vpop.f32.mrb[22].mxu0  ;;  %v11872_v36 = vld [vmem:[%s17374_s4 + $0x3d0] ss:$76 sps:$4 sm:$0xff]  }
 0x558   :  { %v6802_v4 = vpop.f32.mrb[23].mxu1  ;;  %7062 = vmatprep.subr.bf16.mxu0 %v11871_v58  ;;  %9713 = vmatprep.subr.bf16.mxu1 %v16379_v13  ;;  %v6679_v59 = vpop.f32.mrb[23].mxu0  ;;  %v7222_v35 = vld [vmem:[%s17378_s2 + $0x188] sm:$0xff]  ;;  %v16449_v43 = vpack.c.bf16 %v7188_v18, %v7187_v11  ;;  %v9886_v58 = vadd.f32 %v13873_v44, %v16419_v5  ;;  %v7205_v11 = vld [vmem:[%s17378_s2 + $0x100] sm:$0xff]  ;;  %v9889_v44 = vadd.f32 %v14472_v41, %v16443_v48  ;;  %v11888_v29 = vld [vmem:[%s17374_s4 + $0x890] ss:$76 sps:$4 sm:$0xff]  }
 0x559   :  { %v933_v4 = vrot.slane %v16196_v23, %v17383_v55  ;;  %v11873_v59 = vld [vmem:[%s17374_s4 + $0x46c] ss:$76 sps:$4 sm:$0xff]   ;;  %v16460_v14 = vpack.c.bf16 %v7222_v35, %v7221_v19  ;;  %v11874_v35 = vld [vmem:[%s17374_s4 + $0x468] ss:$76 sps:$4 sm:$0xff]  }
 0x55a   :  { %v7206_v18 = vld [vmem:[%s17378_s2 + $0x108] sm:$0xff]  ;;  %v7224_v19 = vld [vmem:[%s17378_s2 + $0x198] sm:$0xff] }
 0x55b   :  { %7063 = vmatpush1.bf16.msra.mxu0 %v11872_v36  ;;  %9715 = vmatpush3.bf16.msra.mxu1 %v16413_v37  ;;  %v16469_v36 = vadd.f32 %v13279_v2, %v921_v17  ;;  %v16483_v2 = vpack.c.bf16 %v7206_v18, %v7205_v11  ;;  %v16486_v17 = vadd.f32 %v13281_v3, %v933_v4  ;;  %v7208_v11 = vld [vmem:[%s17378_s2 + $0x118] sm:$0xff]  ;;  %v7225_v3 = vld [vmem:[%s17378_s2 + $0x1a0] sm:$0xff] }
 0x55c   :  { %7064 = vmatprep.subr.bf16.mxu0 %v11873_v59  ;;  %9717 = vmatprep.subr.bf16.mxu1 %v16425_v32  ;;  %v7223_v59 = vld [vmem:[%s17378_s2 + $0x190] sm:$0xff] }
 0x55d   :  { %v7269_v41 = vmul.f32 %v9886_v58, %v16469_v36  ;;  %v16499_v18 = vpack.c.bf16 %v7224_v19, %v7223_v59  ;;  %v7272_v4 = vmul.f32 %v9889_v44, %v16486_v17  ;;  %v11876_v58 = vld [vmem:[%s17374_s4 + $0x500] ss:$76 sps:$4 sm:$0xff]   ;;  %v11877_v19 = vld [vmem:[%s17374_s4 + $0x59c] ss:$76 sps:$4 sm:$0xff]  }
 0x55e   :  { %v7209_v44 = vld [vmem:[%s17378_s2 + $0x120] sm:$0xff] }
 0x55f   :  { %7065 = vmatpush1.bf16.msra.mxu0 %v11874_v35  ;;  %9719 = vmatpush3.bf16.msra.mxu1 %v16449_v43  ;;  %v7207_v35 = vld [vmem:[%s17378_s2 + $0x110] sm:$0xff] }
 0x560   :  { %7066 = vmatprep.subr.bf16.mxu0 %v11875_v9  ;;  %9721 = vmatprep.subr.bf16.mxu1 %v16460_v14  ;;  %v7226_v9 = vld [vmem:[%s17378_s2 + $0x1a8] sm:$0xff]  ;;  %v16512_v59 = vpack.c.bf16 %v7208_v11, %v7207_v35  ;;  %v7227_v35 = vld [vmem:[%s17378_s2 + $0x1b0] sm:$0xff]  ;;  %v7228_v11 = vld [vmem:[%s17378_s2 + $0x1b8] sm:$0xff] }
 0x561   :  { %v16517_v55 = vpack.c.bf16 %v7226_v9, %v7225_v3  ;;  %v11878_v3 = vld [vmem:[%s17374_s4 + $0x598] ss:$76 sps:$4 sm:$0xff]  }
 0x562   :  { %7340 = vmatmul.mubr.f32.vlgmr.msra.gmra.mrb[28].mxu1 %v7269_v41  ;;  %v7210_v41 = vld [vmem:[%s17378_s2 + $0x128] sm:$0xff] }
 0x563   :  { %7067 = vmatpush1.bf16.msra.mxu0 %v11876_v58  ;;  %9723 = vmatpush3.bf16.msra.mxu1 %v16483_v2  ;;  %v16536_v9 = vpack.c.bf16 %v7210_v41, %v7209_v44  ;;  %v16542_v58 = vpack.c.bf16 %v7228_v11, %v7227_v35  ;;  %v7229_v44 = vld [vmem:[%s17378_s2 + $0x1c0] sm:$0xff]  ;;  %v7230_v41 = vld [vmem:[%s17378_s2 + $0x1c8] sm:$0xff]  ;;  %v11880_v35 = vld [vmem:[%s17374_s4 + $0x630] ss:$76 sps:$4 sm:$0xff]  }
 0x564   :  { %7409 = vmatprep.mubr.f32.mxu1 %v7272_v4  ;;  %7068 = vmatprep.subr.bf16.mxu0 %v11877_v19  ;;  %v11879_v4 = vld [vmem:[%s17374_s4 + $0x634] ss:$76 sps:$4 sm:$0xff]   ;;  %v16566_v54 = vpack.c.bf16 %v7230_v41, %v7229_v44 }
 0x565   :  { %9725 = vmatprep.subr.bf16.mxu1 %v16499_v18  ;;  %v7211_v19 = vld [vmem:[%s17378_s2 + $0x130] sm:$0xff] }
 0x566   :  { %v11882_v44 = vld [vmem:[%s17374_s4 + $0x6c8] ss:$76 sps:$4 sm:$0xff]  }
 0x567   :  { %7069 = vmatpush1.bf16.msra.mxu0 %v11878_v3  ;;  %9727 = vmatpush3.bf16.msra.mxu1 %v16512_v59  ;;  %v7212_v3 = vld [vmem:[%s17378_s2 + $0x138] sm:$0xff] }
 0x568   :  { %7070 = vmatprep.subr.bf16.mxu0 %v11879_v4  ;;  %9729 = vmatprep.subr.bf16.mxu1 %v16517_v55  ;;  %v16560_v11 = vpack.c.bf16 %v7212_v3, %v7211_v19  ;;  %v11881_v4 = vld [vmem:[%s17374_s4 + $0x6cc] ss:$76 sps:$4 sm:$0xff]   ;;  %v7231_v19 = vld [vmem:[%s17378_s2 + $0x1d0] sm:$0xff] }
 0x569   :  { %v7232_v3 = vld [vmem:[%s17378_s2 + $0x1d8] sm:$0xff] }
 0x56a   :  { %v16590_v21 = vpack.c.bf16 %v7232_v3, %v7231_v19  ;;  %v11884_v19 = vld [vmem:[%s17374_s4 + $0x760] ss:$76 sps:$4 sm:$0xff]  }
 0x56b   :  { %7071 = vmatpush1.bf16.msra.mxu0 %v11880_v35  ;;  %9731 = vmatpush3.bf16.msra.mxu1 %v16536_v9  ;;  %v7214_v35 = vld [vmem:[%s17378_s2 + $0x148] sm:$0xff] }
 0x56c   :  { %7072 = vmatprep.subr.bf16.mxu0 %v11881_v4  ;;  %9733 = vmatprep.subr.bf16.mxu1 %v16542_v58  ;;  %v16584_v41 = vpack.c.bf16 %v7214_v35, %v7213_v51  ;;  %v11883_v4 = vld [vmem:[%s17374_s4 + $0x764] ss:$76 sps:$4 sm:$0xff]   ;;  %17413 = vst [vmem:[#allocation15_spill] sm:$0xff] %v16590_v21  ;;  %v7234_v35 = vld [vmem:[%s17378_s2 + $0x1e8] sm:$0xff] }
 0x56d   :  { %v7233_v51 = vld [vmem:[%s17378_s2 + $0x1e0] sm:$0xff] }
 0x56e   :  { %v16614_v6 = vpack.c.bf16 %v7234_v35, %v7233_v51  ;;  %v11886_v51 = vld [vmem:[%s17374_s4 + $0x7f8] ss:$76 sps:$4 sm:$0xff]  }
 0x56f   :  { %7073 = vmatpush1.bf16.msra.mxu0 %v11882_v44  ;;  %9735 = vmatpush3.bf16.msra.mxu1 %v16560_v11  ;;  %v7216_v44 = vld [vmem:[%s17378_s2 + $0x158] sm:$0xff] }
 0x570   :  { %7074 = vmatprep.subr.bf16.mxu0 %v11883_v4  ;;  %9737 = vmatprep.subr.bf16.mxu1 %v16566_v54  ;;  %v16608_v3 = vpack.c.bf16 %v7216_v44, %v7215_v7  ;;  %v11885_v4 = vld [vmem:[%s17374_s4 + $0x7fc] ss:$76 sps:$4 sm:$0xff]   ;;  %17415 = vst [vmem:[#allocation17_spill] sm:$0xff] %v16614_v6  ;;  %v7235_v7 = vld [vmem:[%s17378_s2 + $0x1f0] sm:$0xff] }
 0x571   :  { %v7236_v44 = vld [vmem:[%s17378_s2 + $0x1f8] sm:$0xff] }
 0x572   :  { %17414 = vst [vmem:[#allocation16_spill] sm:$0xff] %v16608_v3 }
 0x573   :  { %7075 = vmatpush1.bf16.msra.mxu0 %v11884_v19  ;;  %9739 = vmatpush3.bf16.msra.mxu1 %v16584_v41  ;;  %v7218_v19 = vld [vmem:[%s17378_s2 + $0x168] sm:$0xff] }
 0x574   :  { %7076 = vmatprep.subr.bf16.mxu0 %v11885_v4  ;;  %9741 = vmatprep.subr.bf16.mxu1 %v16590_v21  ;;  %v16633_v35 = vpack.c.bf16 %v7218_v19, %v7217_v0  ;;  %v16644_v4 = vpack.c.bf16 %v7236_v44, %v7235_v7  ;;  %v7219_v0 = vld [vmem:[%s17378_s2 + $0x170] sm:$0xff]  ;;  %v7220_v19 = vld [vmem:[%s17378_s2 + $0x178] sm:$0xff]  ;;  %v929_v7 = vrot.slane %v16196_v23, %v17416_v63  ;;  %v17417_v44 = vsub.s32 3, %v16169_v10 }
 0x575   :  { %v16670_v22 = vpack.c.bf16 %v7220_v19, %v7219_v0  ;;  %v9888_v63 = vadd.f32 %v14468_v39, %v16638_v30  ;;  %v7255_v19 = vld [vmem:[%s17378_s2 + $0x290] sm:$0xff] }
 0x576   :  { %v16664_v26 = vrot.slane %v16407_v34, %v17417_v44  ;;  %v11889_v44 = vld [vmem:[%s17374_s4 + $0x92c] ss:$76 sps:$4 sm:$0xff]   ;;  %v16690_v0 = vadd.f32 %v13277_v1, %v929_v7 }
 0x577   :  { %7077 = vmatpush1.bf16.msra.mxu0 %v11886_v51  ;;  %9743 = vmatpush3.bf16.msra.mxu1 %v16608_v3  ;;  %v7253_v51 = vld [vmem:[%s17378_s2 + $0x280] sm:$0xff] }
 0x578   :  { %7078 = vmatprep.subr.bf16.mxu0 %v11887_v16  ;;  %9745 = vmatprep.subr.bf16.mxu1 %v16614_v6  ;;  %v7254_v16 = vld [vmem:[%s17378_s2 + $0x288] sm:$0xff]  ;;  %v17418_v6 = vsub.s32 5, %v16169_v10  ;;  %v9891_v39 = vadd.f32 %v14474_v42, %v16664_v26  ;;  %v7271_v42 = vmul.f32 %v9888_v63, %v16690_v0 }
 0x579   :  { %v16681_v21 = vpack.c.bf16 %v7254_v16, %v7253_v51  ;;  %v7256_v51 = vld [vmem:[%s17378_s2 + $0x298] sm:$0xff]  ;;  %v11890_v16 = vld [vmem:[%s17374_s4 + $0x928] ss:$76 sps:$4 sm:$0xff]  }
 0x57a   :  { %v941_v3 = vrot.slane %v16196_v23, %v17418_v6  ;;  %v7238_v6 = vld [vmem:[%s17378_s2 + $0x208] sm:$0xff] }
 0x57b   :  { %7079 = vmatpush1.bf16.msra.mxu0 %v11888_v29  ;;  %9747 = vmatpush3.bf16.msra.mxu1 %v16633_v35  ;;  %17419 = vst [vmem:[#allocation18_spill] sm:$0xff] %v16681_v21  ;;  %v7237_v29 = vld [vmem:[%s17378_s2 + $0x200] sm:$0xff] }
 0x57c   :  { %7080 = vmatprep.subr.bf16.mxu0 %v11889_v44  ;;  %9749 = vmatprep.subr.bf16.mxu1 %v16644_v4  ;;  %v16704_v1 = vpack.c.bf16 %v7238_v6, %v7237_v29  ;;  %v16707_v7 = vadd.f32 %v13879_v47, %v941_v3  ;;  %v11891_v44 = vld [vmem:[%s17374_s4 + $0x9c4] ss:$76 sps:$4 sm:$0xff]   ;;  %v7240_v29 = vld [vmem:[%s17378_s2 + $0x218] sm:$0xff]  ;;  %v16720_v6 = vpack.c.bf16 %v7256_v51, %v7255_v19  ;;  %v7258_v3 = vld [vmem:[%s17378_s2 + $0x2a8] sm:$0xff] }
 0x57d   :  { %v7257_v47 = vld [vmem:[%s17378_s2 + $0x2a0] sm:$0xff]  ;;  %v11893_v51 = vld [vmem:[%s17374_s4 + $0xa5c] ss:$76 sps:$4 sm:$0xff]  }
 0x57e   :  { %v7274_v63 = vmul.f32 %v9891_v39, %v16707_v7  ;;  %v7242_v39 = vld [vmem:[%s17378_s2 + $0x228] sm:$0xff] }
 0x57f   :  { %7081 = vmatpush1.bf16.msra.mxu0 %v11890_v16  ;;  %9751 = vmatpush3.bf16.msra.mxu1 %v16670_v22  ;;  %v7239_v16 = vld [vmem:[%s17378_s2 + $0x210] sm:$0xff] }
 0x580   :  { %7091 = vmatprep.subr.bf16.mxu0 %v11891_v44  ;;  %9753 = vmatprep.subr.bf16.mxu1 %v16681_v21  ;;  %v11892_v44 = vld [vmem:[%s17374_s4 + $0x9c0] ss:$76 sps:$4 sm:$0xff]   ;;  %v16734_v19 = vpack.c.bf16 %v7240_v29, %v7239_v16  ;;  %v16739_v21 = vpack.c.bf16 %v7258_v3, %v7257_v47  ;;  %v7260_v16 = vld [vmem:[%s17378_s2 + $0x2b8] sm:$0xff] }
 0x581   :  { %v11894_v29 = vld [vmem:[%s17374_s4 + $0xa58] ss:$76 sps:$4 sm:$0xff]   ;;  %v11895_v3 = vld [vmem:[%s17374_s4 + $0xaf4] ss:$76 sps:$4 sm:$0xff]  }
 0x582   :  { %7410 = vmatmul.mubr.f32.vlgmr.msra.gmra.mrb[30].mxu1 %v7271_v42  ;;  %7083 = vmatmul.mubr.bf16.vlgmr.msra.gmra.mrb[28].mxu0 %v14599_v38  ;;  %17420 = vst [vmem:[#allocation19_spill] sm:$0xff] %v16739_v21  ;;  %v7241_v38 = vld [vmem:[%s17378_s2 + $0x220] sm:$0xff]  ;;  %v7259_v42 = vld [vmem:[%s17378_s2 + $0x2b0] sm:$0xff] }
 0x583   :  { %7092 = vmatpush1.bf16.msra.mxu0 %v11892_v44  ;;  %9755 = vmatpush3.bf16.msra.mxu1 %v16704_v1  ;;  %v16759_v47 = vpack.c.bf16 %v7242_v39, %v7241_v38  ;;  %v7244_v44 = vld [vmem:[%s17378_s2 + $0x238] sm:$0xff]  ;;  %v7262_v38 = vld [vmem:[%s17378_s2 + $0x2c8] sm:$0xff] }
 0x584   :  { %7479 = vmatprep.mubr.f32.mxu1 %v7274_v63  ;;  %7093 = vmatprep.subr.bf16.mxu0 %v11893_v51  ;;  %v16765_v63 = vpack.c.bf16 %v7260_v16, %v7259_v42  ;;  %v7261_v51 = vld [vmem:[%s17378_s2 + $0x2c0] sm:$0xff]  ;;  %v11896_v39 = vld [vmem:[%s17374_s4 + $0xaf0] ss:$76 sps:$4 sm:$0xff]   ;;  %v11897_v16 = vld [vmem:[%s17374_s4 + $0xb8c] ss:$76 sps:$4 sm:$0xff]  }
 0x585   :  { %9757 = vmatprep.subr.bf16.mxu1 %v16720_v6  ;;  %7123 = vmatprep.mubr.bf16.mxu0 %v14616_v53  ;;  %17421 = vst [vmem:[#allocation20_spill] sm:$0xff] %v16759_v47  ;;  %v7243_v53 = vld [vmem:[%s17378_s2 + $0x230] sm:$0xff] }
 0x586   :  { %17422 = vst [vmem:[#allocation21_spill] sm:$0xff] %v16765_v63  ;;  %v16783_v42 = vpack.c.bf16 %v7244_v44, %v7243_v53  ;;  %v7263_v53 = vld [vmem:[%s17378_s2 + $0x2d0] sm:$0xff]  ;;  %v7264_v44 = vld [vmem:[%s17378_s2 + $0x2d8] sm:$0xff] }
 0x587   :  { %7094 = vmatpush1.bf16.msra.mxu0 %v11894_v29  ;;  %9759 = vmatpush3.bf16.msra.mxu1 %v16734_v19  ;;  %v16789_v29 = vpack.c.bf16 %v7262_v38, %v7261_v51  ;;  %v11898_v51 = vld [vmem:[%s17374_s4 + $0xb88] ss:$76 sps:$4 sm:$0xff]  }
 0x588   :  { %7095 = vmatprep.subr.bf16.mxu0 %v11895_v3  ;;  %9761 = vmatprep.subr.bf16.mxu1 %v16739_v21  ;;  %17423 = vst [vmem:[#allocation22_spill] sm:$0xff] %v16783_v42  ;;  %v7245_v3 = vld [vmem:[%s17378_s2 + $0x240] sm:$0xff] }
 0x589   :  { %17424 = vst [vmem:[#allocation23_spill] sm:$0xff] %v16789_v29  ;;  %v11903_v21 = vld [vmem:[%s17374_s4 + $0xd54] ss:$76 sps:$4 sm:$0xff]  }
 0x58b   :  { %7096 = vmatpush1.bf16.msra.mxu0 %v11896_v39  ;;  %9763 = vmatpush3.bf16.msra.mxu1 %v16759_v47  ;;  %v7246_v39 = vld [vmem:[%s17378_s2 + $0x248] sm:$0xff]  ;;  %v7247_v47 = vld [vmem:[%s17378_s2 + $0x250] sm:$0xff] }
 0x58c   :  { %7097 = vmatprep.subr.bf16.mxu0 %v11897_v16  ;;  %9765 = vmatprep.subr.bf16.mxu1 %v16765_v63  ;;  %v16807_v38 = vpack.c.bf16 %v7246_v39, %v7245_v3  ;;  %v11899_v16 = vld [vmem:[%s17374_s4 + $0xc24] ss:$76 sps:$4 sm:$0xff]   ;;  %v16813_v63 = vpack.c.bf16 %v7264_v44, %v7263_v53  ;;  %v7266_v39 = vld [vmem:[%s17378_s2 + $0x2e8] sm:$0xff] }
 0x58d   :  { %v7265_v3 = vld [vmem:[%s17378_s2 + $0x2e0] sm:$0xff] }
 0x58e   :  { %17425 = vst [vmem:[#allocation24_spill] sm:$0xff] %v16807_v38  ;;  %17426 = vst [vmem:[#allocation25_spill] sm:$0xff] %v16813_v63  ;;  %v11900_v53 = vld [vmem:[%s17374_s4 + $0xc20] ss:$76 sps:$4 sm:$0xff]  }
 0x58f   :  { %7098 = vmatpush1.bf16.msra.mxu0 %v11898_v51  ;;  %9767 = vmatpush3.bf16.msra.mxu1 %v16783_v42  ;;  %v7248_v51 = vld [vmem:[%s17378_s2 + $0x258] sm:$0xff]  ;;  %v7249_v42 = vld [vmem:[%s17378_s2 + $0x260] sm:$0xff] }
 0x590   :  { %7099 = vmatprep.subr.bf16.mxu0 %v11899_v16  ;;  %9769 = vmatprep.subr.bf16.mxu1 %v16789_v29  ;;  %v16831_v44 = vpack.c.bf16 %v7248_v51, %v7247_v47  ;;  %v11901_v16 = vld [vmem:[%s17374_s4 + $0xcbc] ss:$76 sps:$4 sm:$0xff]   ;;  %v16837_v29 = vpack.c.bf16 %v7266_v39, %v7265_v3  ;;  %v7267_v47 = vld [vmem:[%s17378_s2 + $0x2f0] sm:$0xff]  ;;  %v11902_v3 = vld [vmem:[%s17374_s4 + $0xcb8] ss:$76 sps:$4 sm:$0xff]  }
 0x591   :  { %v7268_v51 = vld [vmem:[%s17378_s2 + $0x2f8] sm:$0xff] }
 0x593   :  { %7100 = vmatpush1.bf16.msra.mxu0 %v11900_v53  ;;  %9771 = vmatpush3.bf16.msra.mxu1 %v16807_v38  ;;  %v7250_v53 = vld [vmem:[%s17378_s2 + $0x268] sm:$0xff] }
 0x594   :  { %7101 = vmatprep.subr.bf16.mxu0 %v11901_v16  ;;  %9773 = vmatprep.subr.bf16.mxu1 %v16813_v63  ;;  %v16856_v39 = vpack.c.bf16 %v7250_v53, %v7249_v42  ;;  %v17427_v63 = vsub.s32 2, %v16169_v10  ;;  %v16867_v16 = vpack.c.bf16 %v7268_v51, %v7267_v47  ;;  %v7252_v42 = vld [vmem:[%s17378_s2 + $0x278] sm:$0xff] }
 0x596   :  { %v16861_v38 = vrot.slane %v16407_v34, %v17427_v63  ;;  %v17428_v63 = vsub.s32 4, %v16169_v10  ;;  %v11905_v34 = vld [vmem:[%s17374_s4 + $0xdec] ss:$76 sps:$4 sm:$0xff]  }
 0x597   :  { %7102 = vmatpush1.bf16.msra.mxu0 %v11902_v3  ;;  %9775 = vmatpush3.bf16.msra.mxu1 %v16831_v44  ;;  %v7251_v3 = vld [vmem:[%s17378_s2 + $0x270] sm:$0xff] }
 0x598   :  { %7103 = vmatprep.subr.bf16.mxu0 %v11903_v21  ;;  %9777 = vmatprep.subr.bf16.mxu1 %v16837_v29  ;;  %v937_v53 = vrot.slane %v16196_v23, %v17428_v63  ;;  %v11904_v21 = vld [vmem:[%s17374_s4 + $0xd50] ss:$76 sps:$4 sm:$0xff]   ;;  %v16882_v47 = vpack.c.bf16 %v7252_v42, %v7251_v3  ;;  %v9890_v51 = vadd.f32 %v14470_v40, %v16861_v38  ;;  %v11906_v3 = vld [vmem:[%s17374_s4 + $0xde8] ss:$76 sps:$4 sm:$0xff]  }
 0x599   :  { %v9899_v63 = vadd.f32 %v15683_v52, %v16207_v25  ;;  %v11908_v52 = vld [vmem:[%s17374_s4 + $0xe80] ss:$76 sps:$4 sm:$0xff]   ;;  %v11909_v25 = vld [vmem:[%s17374_s4 + $0xf1c] ss:$76 sps:$4 sm:$0xff]  }
 0x59a   :  { %v16891_v23 = vadd.f32 %v13875_v45, %v937_v53  ;;  %v11922_v42 = vld [vmem:[%s17374_s4 + $0x12a8] ss:$76 sps:$4 sm:$0xff]   ;;  %v11937_v53 = vld [vmem:[%s17374_s4 + $0x176c] ss:$76 sps:$4 sm:$0xff]  }
 0x59b   :  { %7104 = vmatpush1.bf16.msra.mxu0 %v11904_v21  ;;  %9779 = vmatpush3.bf16.msra.mxu1 %v16856_v39  ;;  %v7487_v45 = vmul.f32 %v9899_v63, %v16248_v46  ;;  %v11911_v46 = vld [vmem:[%s17374_s4 + $0xfb4] ss:$76 sps:$4 sm:$0xff]   ;;  %v17433_v21 = vld [vmem:[#allocation13_spill] sm:$0xff] }
 0x59c   :  { %7105 = vmatprep.subr.bf16.mxu0 %v11905_v34  ;;  %9781 = vmatprep.subr.bf16.mxu1 %v16867_v16  ;;  %v7273_v40 = vmul.f32 %v9890_v51, %v16891_v23  ;;  %v11907_v34 = vld [vmem:[%s17374_s4 + $0xe84] ss:$76 sps:$4 sm:$0xff]   ;;  %v9903_v51 = vadd.f32 %v17433_v21, %v16664_v26  ;;  %v11938_v63 = vld [vmem:[%s17374_s4 + $0x1768] ss:$76 sps:$4 sm:$0xff]   ;;  %v11940_v26 = vld [vmem:[%s17374_s4 + $0x1800] ss:$76 sps:$4 sm:$0xff]  }
 0x59f   :  { %7106 = vmatpush1.bf16.msra.mxu0 %v11906_v3  ;;  %9783 = vmatpush3.bf16.msra.mxu1 %v16882_v47  ;;  %v17434_v3 = vld [vmem:[#allocation18_spill] sm:$0xff] }
 0x5a0   :  { %7107 = vmatprep.subr.bf16.mxu0 %v11907_v34  ;;  %9785 = vmatprep.subr.bf16.mxu1 %v16223_v31  ;;  %v11910_v31 = vld [vmem:[%s17374_s4 + $0xf18] ss:$76 sps:$4 sm:$0xff]  }
 0x5a1   :  { %v11945_v34 = vld [vmem:[%s17374_s4 + $0x19cc] ss:$76 sps:$4 sm:$0xff]  }
 0x5a2   :  { %7480 = vmatmul.mubr.f32.vlgmr.msra.gmra.mrb[32].mxu1 %v7273_v40  ;;  %v11944_v40 = vld [vmem:[%s17374_s4 + $0x1930] ss:$76 sps:$4 sm:$0xff]  }
 0x5a3   :  { %7108 = vmatpush1.bf16.msra.mxu0 %v11908_v52  ;;  %9787 = vmatpush3.bf16.msra.mxu1 %v16245_v49  ;;  %v11912_v49 = vld [vmem:[%s17374_s4 + $0xfb0] ss:$76 sps:$4 sm:$0xff]   ;;  %v17438_v52 = vld [vmem:[#allocation22_spill] sm:$0xff] }
 0x5a4   :  { %7556 = vmatprep.mubr.f32.mxu1 %v7487_v45  ;;  %7109 = vmatprep.subr.bf16.mxu0 %v11909_v25  ;;  %v11946_v45 = vld [vmem:[%s17374_s4 + $0x19c8] ss:$76 sps:$4 sm:$0xff]   ;;  %v11947_v25 = vld [vmem:[%s17374_s4 + $0x1a64] ss:$76 sps:$4 sm:$0xff]  }
 0x5a5   :  { %9789 = vmatprep.subr.bf16.mxu1 %v16260_v57  ;;  %v11913_v57 = vld [vmem:[%s17374_s4 + $0x104c] ss:$76 sps:$4 sm:$0xff]  }
 0x5a7   :  { %7110 = vmatpush1.bf16.msra.mxu0 %v11910_v31  ;;  %9791 = vmatpush3.bf16.msra.mxu1 %v16275_v60  ;;  %v11914_v60 = vld [vmem:[%s17374_s4 + $0x1048] ss:$76 sps:$4 sm:$0xff]  }
 0x5a8   :  { %7111 = vmatprep.subr.bf16.mxu0 %v11911_v46  ;;  %9793 = vmatprep.subr.bf16.mxu1 %v16280_v62  ;;  %v11915_v62 = vld [vmem:[%s17374_s4 + $0x10e4] ss:$76 sps:$4 sm:$0xff]   ;;  %v17439_v31 = vld [vmem:[#allocation23_spill] sm:$0xff] }
 0x5a9   :  { %v11948_v46 = vld [vmem:[%s17374_s4 + $0x1a60] ss:$76 sps:$4 sm:$0xff]  }
 0x5ab   :  { %7112 = vmatpush1.bf16.msra.mxu0 %v11912_v49  ;;  %9795 = vmatpush3.bf16.msra.mxu1 %v16300_v12  ;;  %v11916_v12 = vld [vmem:[%s17374_s4 + $0x10e0] ss:$76 sps:$4 sm:$0xff]   ;;  %v17440_v49 = vld [vmem:[#allocation24_spill] sm:$0xff] }
 0x5ac   :  { %7113 = vmatprep.subr.bf16.mxu0 %v11913_v57  ;;  %9797 = vmatprep.subr.bf16.mxu1 %v16306_v24  ;;  %v11917_v24 = vld [vmem:[%s17374_s4 + $0x117c] ss:$76 sps:$4 sm:$0xff]  }
 0x5ad   :  { %v11949_v57 = vld [vmem:[%s17374_s4 + $0x1afc] ss:$76 sps:$4 sm:$0xff]  }
 0x5af   :  { %7114 = vmatpush1.bf16.msra.mxu0 %v11914_v60  ;;  %9799 = vmatpush3.bf16.msra.mxu1 %v16324_v28  ;;  %v11918_v28 = vld [vmem:[%s17374_s4 + $0x1178] ss:$76 sps:$4 sm:$0xff]  }
 0x5b0   :  { %7115 = vmatprep.subr.bf16.mxu0 %v11915_v62  ;;  %9801 = vmatprep.subr.bf16.mxu1 %v16330_v33  ;;  %v11919_v33 = vld [vmem:[%s17374_s4 + $0x1214] ss:$76 sps:$4 sm:$0xff]   ;;  %v17441_v60 = vld [vmem:[#allocation25_spill] sm:$0xff] }
 0x5b1   :  { %v11950_v62 = vld [vmem:[%s17374_s4 + $0x1af8] ss:$76 sps:$4 sm:$0xff]  }
 0x5b3   :  { %7116 = vmatpush1.bf16.msra.mxu0 %v11916_v12  ;;  %9803 = vmatpush3.bf16.msra.mxu1 %v16348_v20  ;;  %v11920_v20 = vld [vmem:[%s17374_s4 + $0x1210] ss:$76 sps:$4 sm:$0xff]   ;;  %v11951_v12 = vld [vmem:[%s17374_s4 + $0x1b94] ss:$76 sps:$4 sm:$0xff]  }
 0x5b4   :  { %7117 = vmatprep.subr.bf16.mxu0 %v11917_v24  ;;  %9805 = vmatprep.subr.bf16.mxu1 %v16354_v56  ;;  %v9898_v56 = vadd.f32 %v15679_v50, %v16419_v5  ;;  %v11923_v50 = vld [vmem:[%s17374_s4 + $0x1344] ss:$76 sps:$4 sm:$0xff]  }
 0x5b5   :  { %v11952_v24 = vld [vmem:[%s17374_s4 + $0x1b90] ss:$76 sps:$4 sm:$0xff]  }
 0x5b7   :  { %7118 = vmatpush1.bf16.msra.mxu0 %v11918_v28  ;;  %9807 = vmatpush3.bf16.msra.mxu1 %v16372_v61  ;;  %v11921_v61 = vld [vmem:[%s17374_s4 + $0x12ac] ss:$76 sps:$4 sm:$0xff]  }
 0x5b8   :  { %7119 = vmatprep.subr.bf16.mxu0 %v11919_v33  ;;  %9809 = vmatprep.subr.bf16.mxu1 %v16379_v13  ;;  %v9901_v13 = vadd.f32 %v16400_v27, %v16443_v48  ;;  %v11924_v27 = vld [vmem:[%s17374_s4 + $0x1340] ss:$76 sps:$4 sm:$0xff]   ;;  %v11928_v48 = vld [vmem:[%s17374_s4 + $0x1470] ss:$76 sps:$4 sm:$0xff]  }
 0x5b9   :  { %v17442_v28 = vld [vmem:[#allocation11_spill] sm:$0xff] }
 0x5ba   :  { %v7489_v5 = vmul.f32 %v9901_v13, %v16486_v17  ;;  %v17429_v17 = vld [vmem:[#allocation15_spill] sm:$0xff]  ;;  %v9902_v33 = vadd.f32 %v17442_v28, %v16861_v38  ;;  %v17444_v38 = vsub.s32 6, %v16169_v10  ;;  %v17446_v13 = vsub.s32 4, %v16169_v10 }
 0x5bb   :  { %7120 = vmatpush1.bf16.msra.mxu0 %v11920_v20  ;;  %9811 = vmatpush3.bf16.msra.mxu1 %v16413_v37  ;;  %v7486_v37 = vmul.f32 %v9898_v56, %v16469_v36  ;;  %v11932_v36 = vld [vmem:[%s17374_s4 + $0x15a0] ss:$76 sps:$4 sm:$0xff]  }
 0x5bc   :  { %7121 = vmatprep.subr.bf16.mxu0 %v11921_v61  ;;  %9813 = vmatprep.subr.bf16.mxu1 %v16425_v32  ;;  %v11925_v32 = vld [vmem:[%s17374_s4 + $0x13dc] ss:$76 sps:$4 sm:$0xff]   ;;  %v7490_v20 = vmul.f32 %v9902_v33, %v16891_v23  ;;  %v17445_v56 = vld [vmem:[#allocation14_spill] sm:$0xff] }
 0x5bd   :  { %v977_v61 = vrot.slane %v17445_v56, %v17444_v38  ;;  %v11345_v28 = vld [vmem:[%s17374_s4 + $0x800] ss:$76 sps:$4 sm:$0xff]  }
 0x5be   :  { %v11346_v33 = vld [vmem:[%s17374_s4 + $0x340] ss:$76 sps:$4 sm:$0xff]  }
 0x5bf   :  { %7122 = vmatpush1.bf16.msra.mxu0 %v11922_v42  ;;  %9815 = vmatpush3.bf16.msra.mxu1 %v16449_v43  ;;  %v11930_v43 = vld [vmem:[%s17374_s4 + $0x1508] ss:$76 sps:$4 sm:$0xff]   ;;  %v17447_v42 = vsub.s32 7, %v16169_v10 }
 0x5c0   :  { %7132 = vmatprep.subr.bf16.mxu0 %v11923_v50  ;;  %9817 = vmatprep.subr.bf16.mxu1 %v16460_v14  ;;  %v11927_v14 = vld [vmem:[%s17374_s4 + $0x1474] ss:$76 sps:$4 sm:$0xff]   ;;  %v17448_v50 = vsub.s32 5, %v16169_v10 }
 0x5c1   :  { %v17452_v10 = vld [vmem:[#allocation6_spill] sm:$0xff] }
 0x5c2   :  { %7557 = vmatmul.mubr.f32.vlgmr.msra.gmra.mrb[34].mxu1 %v7486_v37  ;;  %7124 = vmatmul.mubr.bf16.vlgmr.msra.gmra.mrb[28].mxu0 %v14805_v8  ;;  %v11926_v8 = vld [vmem:[%s17374_s4 + $0x13d8] ss:$76 sps:$4 sm:$0xff]   ;;  %v981_v37 = vrot.slane %v17445_v56, %v17447_v42 }
 0x5c3   :  { %7133 = vmatpush1.bf16.msra.mxu0 %v11924_v27  ;;  %9819 = vmatpush3.bf16.msra.mxu1 %v16483_v2  ;;  %v11933_v2 = vld [vmem:[%s17374_s4 + $0x163c] ss:$76 sps:$4 sm:$0xff]  }
 0x5c4   :  { %7626 = vmatprep.mubr.f32.mxu1 %v7489_v5  ;;  %7134 = vmatprep.subr.bf16.mxu0 %v11925_v32  ;;  %v17449_v27 = vld [vmem:[#allocation3_spill] sm:$0xff] }
 0x5c5   :  { %9821 = vmatprep.subr.bf16.mxu1 %v16499_v18  ;;  %7164 = vmatprep.mubr.bf16.mxu0 %v14822_v15  ;;  %v11929_v15 = vld [vmem:[%s17374_s4 + $0x150c] ss:$76 sps:$4 sm:$0xff]   ;;  %v17124_v32 = vadd.f32 %v17449_v27, %v977_v61 }
 0x5c6   :  { %v11934_v18 = vld [vmem:[%s17374_s4 + $0x1638] ss:$76 sps:$4 sm:$0xff]  }
 0x5c7   :  { %7135 = vmatpush1.bf16.msra.mxu0 %v11926_v8  ;;  %9823 = vmatpush3.bf16.msra.mxu1 %v16512_v59  ;;  %v11935_v59 = vld [vmem:[%s17374_s4 + $0x16d4] ss:$76 sps:$4 sm:$0xff]  }
 0x5c8   :  { %7136 = vmatprep.subr.bf16.mxu0 %v11927_v14  ;;  %9825 = vmatprep.subr.bf16.mxu1 %v16517_v55  ;;  %v11931_v55 = vld [vmem:[%s17374_s4 + $0x15a4] ss:$76 sps:$4 sm:$0xff]  }
 0x5c9   :  { %v17450_v8 = vld [vmem:[#allocation4_spill] sm:$0xff] }
 0x5cb   :  { %7137 = vmatpush1.bf16.msra.mxu0 %v11928_v48  ;;  %9827 = vmatpush3.bf16.msra.mxu1 %v16536_v9  ;;  %v17431_v9 = vld [vmem:[#allocation17_spill] sm:$0xff] }
 0x5cc   :  { %7138 = vmatprep.subr.bf16.mxu0 %v11929_v15  ;;  %9829 = vmatprep.subr.bf16.mxu1 %v16542_v58  ;;  %v11936_v58 = vld [vmem:[%s17374_s4 + $0x16d0] ss:$76 sps:$4 sm:$0xff]  }
 0x5cf   :  { %7139 = vmatpush1.bf16.msra.mxu0 %v11930_v43  ;;  %9831 = vmatpush3.bf16.msra.mxu1 %v16560_v11  ;;  %v17432_v11 = vld [vmem:[#allocation10_spill] sm:$0xff] }
 0x5d0   :  { %7140 = vmatprep.subr.bf16.mxu0 %v11931_v55  ;;  %9833 = vmatprep.subr.bf16.mxu1 %v16566_v54  ;;  %v17430_v54 = vld [vmem:[#allocation16_spill] sm:$0xff] }
 0x5d3   :  { %7141 = vmatpush1.bf16.msra.mxu0 %v11932_v36  ;;  %9835 = vmatpush3.bf16.msra.mxu1 %v16584_v41  ;;  %v9900_v41 = vadd.f32 %v17432_v11, %v16638_v30  ;;  %v11939_v30 = vld [vmem:[%s17374_s4 + $0x1804] ss:$76 sps:$4 sm:$0xff]   ;;  %v17451_v36 = vld [vmem:[#allocation5_spill] sm:$0xff] }
 0x5d4   :  { %7142 = vmatprep.subr.bf16.mxu0 %v11933_v2  ;;  %9837 = vmatprep.subr.bf16.mxu1 %v17429_v17  ;;  %v17134_v2 = vadd.f32 %v17451_v36, %v981_v37  ;;  %v17456_v36 = vld [vmem:[#allocation8_spill] sm:$0xff] }
 0x5d7   :  { %7143 = vmatpush1.bf16.msra.mxu0 %v11934_v18  ;;  %9839 = vmatpush3.bf16.msra.mxu1 %v17430_v54 }
 0x5d8   :  { %7144 = vmatprep.subr.bf16.mxu0 %v11935_v59  ;;  %9841 = vmatprep.subr.bf16.mxu1 %v17431_v9 }
 0x5db   :  { %7145 = vmatpush1.bf16.msra.mxu0 %v11936_v58  ;;  %9843 = vmatpush3.bf16.msra.mxu1 %v16633_v35  ;;  %v7488_v35 = vmul.f32 %v9900_v41, %v16690_v0  ;;  %v11942_v0 = vld [vmem:[%s17374_s4 + $0x1898] ss:$76 sps:$4 sm:$0xff]  }
 0x5dc   :  { %7146 = vmatprep.subr.bf16.mxu0 %v11937_v53  ;;  %9845 = vmatprep.subr.bf16.mxu1 %v16644_v4  ;;  %v7491_v4 = vmul.f32 %v9903_v51, %v16707_v7  ;;  %v11943_v7 = vld [vmem:[%s17374_s4 + $0x1934] ss:$76 sps:$4 sm:$0xff]  }
 0x5df   :  { %7147 = vmatpush1.bf16.msra.mxu0 %v11938_v63  ;;  %9847 = vmatpush3.bf16.msra.mxu1 %v16670_v22  ;;  %v11941_v22 = vld [vmem:[%s17374_s4 + $0x189c] ss:$76 sps:$4 sm:$0xff]  }
 0x5e0   :  { %7148 = vmatprep.subr.bf16.mxu0 %v11939_v30  ;;  %9849 = vmatprep.subr.bf16.mxu1 %v17434_v3 }
 0x5e2   :  { %7627 = vmatmul.mubr.f32.vlgmr.msra.gmra.mrb[36].mxu1 %v7488_v35 }
 0x5e3   :  { %7149 = vmatpush1.bf16.msra.mxu0 %v11940_v26  ;;  %9851 = vmatpush3.bf16.msra.mxu1 %v16704_v1  ;;  %v17435_v1 = vld [vmem:[#allocation19_spill] sm:$0xff] }
 0x5e4   :  { %7696 = vmatprep.mubr.f32.mxu1 %v7491_v4  ;;  %7150 = vmatprep.subr.bf16.mxu0 %v11941_v22 }
 0x5e5   :  { %9853 = vmatprep.subr.bf16.mxu1 %v16720_v6  ;;  %v17436_v6 = vld [vmem:[#allocation20_spill] sm:$0xff] }
 0x5e7   :  { %7151 = vmatpush1.bf16.msra.mxu0 %v11942_v0  ;;  %9855 = vmatpush3.bf16.msra.mxu1 %v16734_v19  ;;  %v17437_v19 = vld [vmem:[#allocation21_spill] sm:$0xff]  ;;  %v7709_v0 = vld [vmem:[%s17379_s3 + $0x8] sm:$0x3f] }
 0x5e8   :  { %7152 = vmatprep.subr.bf16.mxu0 %v11943_v7  ;;  %9857 = vmatprep.subr.bf16.mxu1 %v17435_v1  ;;  %v7708_v7 = vld [vmem:[%s17379_s3] sm:$0x3f]  ;;  %v11955_v1 = vmov 0.0  }
 0x5eb   :  { %7153 = vmatpush1.bf16.msra.mxu0 %v11944_v40  ;;  %9859 = vmatpush3.bf16.msra.mxu1 %v17436_v6 }
 0x5ec   :  { %7154 = vmatprep.subr.bf16.mxu0 %v11945_v34  ;;  %9861 = vmatprep.subr.bf16.mxu1 %v17437_v19 }
 0x5ef   :  { %7155 = vmatpush1.bf16.msra.mxu0 %v11946_v45  ;;  %9863 = vmatpush3.bf16.msra.mxu1 %v17438_v52  ;;  %v7711_v45 = vld [vmem:[%s17379_s3 + $0x18] sm:$0x3f]  ;;  %v11327_v52 = vld [vmem:[%s17374_s4 + $0x508] ss:$76 sps:$4 sm:$0xff]  }
 0x5f0   :  { %7156 = vmatprep.subr.bf16.mxu0 %v11947_v25  ;;  %9865 = vmatprep.subr.bf16.mxu1 %v17439_v31  ;;  %v11328_v25 = vld [vmem:[%s17374_s4 + $0x48] ss:$76 sps:$4 sm:$0xff]   ;;  %v11329_v31 = vld [vmem:[%s17374_s4 + $0x5a0] ss:$76 sps:$4 sm:$0xff]  }
 0x5f3   :  { %7157 = vmatpush1.bf16.msra.mxu0 %v11948_v46  ;;  %9867 = vmatpush3.bf16.msra.mxu1 %v17440_v49  ;;  %v11330_v46 = vld [vmem:[%s17374_s4 + $0xe0] ss:$76 sps:$4 sm:$0xff]   ;;  %v11333_v49 = vld [vmem:[%s17374_s4 + $0x638] ss:$76 sps:$4 sm:$0xff]  }
 0x5f4   :  { %7158 = vmatprep.subr.bf16.mxu0 %v11949_v57  ;;  %9869 = vmatprep.subr.bf16.mxu1 %v17441_v60  ;;  %v11334_v57 = vld [vmem:[%s17374_s4 + $0x178] ss:$76 sps:$4 sm:$0xff]   ;;  %v11337_v60 = vld [vmem:[%s17374_s4 + $0x6d0] ss:$76 sps:$4 sm:$0xff]  }
 0x5f7   :  { %7159 = vmatpush1.bf16.msra.mxu0 %v11950_v62  ;;  %9871 = vmatpush3.bf16.msra.mxu1 %v16831_v44  ;;  %v11953_v44 = vld [vmem:[%s17374_s4 + $0x1c2c] ss:$76 sps:$4 sm:$0xff]   ;;  %v11338_v62 = vld [vmem:[%s17374_s4 + $0x210] ss:$76 sps:$4 sm:$0xff]  }
 0x5f8   :  { %7160 = vmatprep.subr.bf16.mxu0 %v11951_v12  ;;  %9873 = vmatprep.subr.bf16.mxu1 %v16837_v29  ;;  %v11954_v29 = vld [vmem:[%s17374_s4 + $0x1c28] ss:$76 sps:$4 sm:$0xff]  }
 0x5f9   :  { %v11341_v12 = vld [vmem:[%s17374_s4 + $0x768] ss:$76 sps:$4 sm:$0xff]  }
 0x5fb   :  { %7161 = vmatpush1.bf16.msra.mxu0 %v11952_v24  ;;  %9875 = vmatpush3.bf16.msra.mxu1 %v16856_v39  ;;  %v17443_v39 = vld [vmem:[#allocation2_spill] sm:$0xff]  ;;  %v11342_v24 = vld [vmem:[%s17374_s4 + $0x2a8] ss:$76 sps:$4 sm:$0xff]  }
 0x5fc   :  { %7162 = vmatprep.subr.bf16.mxu0 %v11953_v44  ;;  %9877 = vmatprep.subr.bf16.mxu1 %v16867_v16  ;;  %v969_v16 = vrot.slane %v17445_v56, %v17446_v13  ;;  %v914_v13 = vld [vmem:[%s17377_s5 + $0x10] sm:$0x3] }
 0x5fe   :  { %v17127_v14 = vadd.f32 %v17450_v8, %v969_v16 }
 0x5ff   :  { %7163 = vmatpush1.bf16.msra.mxu0 %v11954_v29  ;;  %9879 = vmatpush3.bf16.msra.mxu1 %v16882_v47  ;;  %v973_v47 = vrot.slane %v17445_v56, %v17448_v50 }
 0x600   :  { %9354 = vmatprep.subr.msk.mxu1 %vm7718_vm0, %v7709_v0  ;;  %9622 = vmatprep.subr.bf16.mxu0 %v11327_v52  ;;  %v11332_v52 = vld [vmem:[%s17374_s4 + $0x9c8] ss:$76 sps:$4 sm:$0xff]  }
 0x601   :  { %v17137_v17 = vadd.f32 %v17452_v10, %v973_v47 }
 0x602   :  { %7165 = vmatmul.mubr.bf16.vlgmr.msra.gmra.mrb[28].mxu0 %v17443_v39  ;;  %7697 = vmatmul.mubr.f32.vlgmr.msra.gmra.mrb[38].mxu1 %v7490_v20 }
 0x603   :  { %7801 = vmatprep.mubr.f32.mxu1 %v11955_v1  ;;  %9355 = vmatpush1.msk.msra.mxu1 %vm7718_vm0, %v7708_v7 }
 0x604   :  { %9357 = vmatprep.subr.msk.mxu1 %vm7718_vm0, %v7711_v45  ;;  %9623 = vmatpush3.bf16.msra.mxu0 %v11328_v25  ;;  %v11331_v45 = vld [vmem:[%s17374_s4 + $0xe88] ss:$76 sps:$4 sm:$0xff]   ;;  %v11335_v25 = vld [vmem:[%s17374_s4 + $0xf20] ss:$76 sps:$4 sm:$0xff]  }
 0x605   :  { %9624 = vmatprep.subr.bf16.mxu0 %v11329_v31  ;;  %v11336_v31 = vld [vmem:[%s17374_s4 + $0xa60] ss:$76 sps:$4 sm:$0xff]  }
 0x608   :  { %9625 = vmatpush3.bf16.msra.mxu0 %v11330_v46  ;;  %v11340_v46 = vld [vmem:[%s17374_s4 + $0xaf8] ss:$76 sps:$4 sm:$0xff]  }
 0x609   :  { %9626 = vmatprep.subr.bf16.mxu0 %v11333_v49  ;;  %v11343_v49 = vld [vmem:[%s17374_s4 + $0x1050] ss:$76 sps:$4 sm:$0xff]  }
 0x60c   :  { %9627 = vmatpush3.bf16.msra.mxu0 %v11334_v57  ;;  %v11344_v57 = vld [vmem:[%s17374_s4 + $0xb90] ss:$76 sps:$4 sm:$0xff]  }
 0x60d   :  { %9628 = vmatprep.subr.bf16.mxu0 %v11337_v60  ;;  %v11347_v60 = vld [vmem:[%s17374_s4 + $0x10e8] ss:$76 sps:$4 sm:$0xff]  }
 0x610   :  { %9629 = vmatpush3.bf16.msra.mxu0 %v11338_v62  ;;  %v11348_v62 = vld [vmem:[%s17374_s4 + $0xc28] ss:$76 sps:$4 sm:$0xff]  }
 0x611   :  { %9630 = vmatprep.subr.bf16.mxu0 %v11341_v12  ;;  %v11349_v12 = vld [vmem:[%s17374_s4 + $0x898] ss:$76 sps:$4 sm:$0xff]  }
 0x614   :  { %9631 = vmatpush3.bf16.msra.mxu0 %v11342_v24  ;;  %v11350_v24 = vld [vmem:[%s17374_s4 + $0x3d8] ss:$76 sps:$4 sm:$0xff]  }
 0x615   :  { %v6920_v23 = vpop.f32.mrb[24].mxu0  ;;  %v7043_v5 = vpop.f32.mrb[24].mxu1  ;;  %9632 = vmatprep.subr.bf16.mxu0 %v11345_v28  ;;  %v11351_v28 = vld [vmem:[%s17374_s4 + $0x1180] ss:$76 sps:$4 sm:$0xff]  }
 0x616   :  { %v17129_v48 = vadd.f32 %v6920_v23, %v969_v16  ;;  %v17131_v15 = vadd.f32 %v7043_v5, %v977_v61  ;;  %v6922_v43 = vpop.f32.mrb[25].mxu0  ;;  %v7045_v55 = vpop.f32.mrb[25].mxu1  ;;  %v17453_v16 = vld [vmem:[#allocation12_spill] sm:$0xff]  ;;  %v17455_v5 = vld [vmem:[#allocation7_spill] sm:$0xff] }
 0x617   :  { %v17139_v18 = vadd.f32 %v6922_v43, %v973_v47  ;;  %v17141_v54 = vadd.f32 %v7045_v55, %v981_v37  ;;  %v7047_v59 = vpop.f32.mrb[26].mxu1  ;;  %v6924_v9 = vpop.f32.mrb[26].mxu0  ;;  %v985_v42 = vrot.slane %v914_v13, %v17453_v16  ;;  %v17454_v37 = vld [vmem:[#allocation9_spill] sm:$0xff] }
 0x618   :  { %v7048_v58 = vpop.f32.mrb[27].mxu1  ;;  %v6925_v11 = vpop.f32.mrb[27].mxu0  ;;  %v7950_v41 = vsub.f32 %v17127_v14, %v17129_v48  ;;  %v7952_v53 = vsub.f32 %v17124_v32, %v17131_v15  ;;  %9633 = vmatpush3.bf16.msra.mxu0 %v11346_v33  ;;  %v989_v50 = vrot.slane %v914_v13, %v17454_v37  ;;  %v11352_v33 = vld [vmem:[%s17374_s4 + $0xcc0] ss:$76 sps:$4 sm:$0xff]  }
 0x619   :  { %v7951_v21 = vsub.f32 %v17137_v17, %v17139_v18  ;;  %v7953_v51 = vsub.f32 %v17134_v2, %v17141_v54  ;;  %v17206_v27 = vadd.f32 %v17455_v5, %v985_v42  ;;  %9634 = vmatprep.subr.bf16.mxu0 %v11349_v12  ;;  %v11359_v17 = vld [vmem:[%s17374_s4 + $0x1348] ss:$76 sps:$4 sm:$0xff]  }
 0x61a   :  { %v17211_v10 = vadd.f32 %v17456_v36, %v989_v50 }
 0x61c   :  { %9635 = vmatpush3.bf16.msra.mxu0 %v11350_v24 }
 0x635   :  { %v9444_v63 = vpop.f32.mrb[28].mxu1 }
 0x636   :  { %v9445_v35 = vpop.f32.mrb[29].mxu1 }
 0x637   :  { %v9446_v30 = vadd.f32 %v9445_v35, %v9444_v63 }
 0x655   :  { %v9479_v3 = vpop.f32.mrb[30].mxu1 }
 0x656   :  { %v9480_v4 = vpop.f32.mrb[31].mxu1 }
 0x657   :  { %v9481_v26 = vadd.f32 %v9480_v4, %v9479_v3 }
 0x659   :  { %v7412_v22 = vadd.f32 %v9481_v26, %v9446_v30 }
 0x675   :  { %v9514_v40 = vpop.f32.mrb[32].mxu1 }
 0x676   :  { %v9515_v6 = vpop.f32.mrb[33].mxu1 }
 0x677   :  { %v9516_v34 = vadd.f32 %v9515_v6, %v9514_v40  ;;  %v7710_v40 = vld [vmem:[%s17379_s3 + $0x10] sm:$0x3f] }
 0x679   :  { %v7482_v19 = vadd.f32 %v9516_v34, %v7412_v22  ;;  %v7713_v34 = vld [vmem:[%s17379_s3 + $0x28] sm:$0x3f] }
 0x67b   :  { %v7485_v3 = vmul.f32 0.088388346, %v7482_v19  ;;  %v7712_v19 = vld [vmem:[%s17379_s3 + $0x20] sm:$0x3f] }
 0x695   :  { %v9549_v44 = vpop.f32.mrb[34].mxu1 }
 0x696   :  { %v9550_v29 = vpop.f32.mrb[35].mxu1 }
 0x697   :  { %v9551_v20 = vadd.f32 %v9550_v29, %v9549_v44  ;;  %v11353_v44 = vld [vmem:[%s17374_s4 + $0x930] ss:$76 sps:$4 sm:$0xff]  }
 0x698   :  { %v11354_v29 = vld [vmem:[%s17374_s4 + $0x470] ss:$76 sps:$4 sm:$0xff]   ;;  %9636 = vmatprep.subr.bf16.mxu0 %v11353_v44 }
 0x699   :  { %9637 = vmatpush3.bf16.msra.mxu0 %v11354_v29 }
 0x6b5   :  { %v9584_v39 = vpop.f32.mrb[36].mxu1 }
 0x6b6   :  { %v9585_v38 = vpop.f32.mrb[37].mxu1 }
 0x6b7   :  { %v9586_v56 = vadd.f32 %v9585_v38, %v9584_v39  ;;  %v11356_v39 = vld [vmem:[%s17374_s4 + $0xd58] ss:$76 sps:$4 sm:$0xff]   ;;  %v11357_v38 = vld [vmem:[%s17374_s4 + $0x1808] ss:$76 sps:$4 sm:$0xff]  }
 0x6b8   :  { %9666 = vmatprep.subr.bf16.mxu0 %v11357_v38 }
 0x6b9   :  { %v7629_v61 = vadd.f32 %v9586_v56, %v9551_v20  ;;  %v11355_v20 = vld [vmem:[%s17374_s4 + $0x1218] ss:$76 sps:$4 sm:$0xff]   ;;  %v11358_v56 = vld [vmem:[%s17374_s4 + $0x12b0] ss:$76 sps:$4 sm:$0xff]  }
 0x6d5   :  { %v7166_v47 = vpop.f32.mrb[28].mxu0  ;;  %v9619_v23 = vpop.f32.mrb[38].mxu1 }
 0x6d6   :  { %v17208_v8 = vadd.f32 %v7166_v47, %v985_v42  ;;  %v7168_v43 = vpop.f32.mrb[29].mxu0  ;;  %v9620_v55 = vpop.f32.mrb[39].mxu1 }
 0x6d7   :  { %v17213_v59 = vadd.f32 %v7168_v43, %v989_v50  ;;  %v9621_v9 = vadd.f32 %v9620_v55, %v9619_v23  ;;  %v7170_v58 = vpop.f32.mrb[30].mxu0 }
 0x6d8   :  { %v7171_v11 = vpop.f32.mrb[31].mxu0  ;;  %v7954_v63 = vsub.f32 %v17206_v27, %v17208_v8  ;;  %v11363_v27 = vld [vmem:[%s17374_s4 + $0x1938] ss:$76 sps:$4 sm:$0xff]  }
 0x6d9   :  { %v7699_v35 = vadd.f32 %v9621_v9, %v7629_v61  ;;  %v7955_v30 = vsub.f32 %v17211_v10, %v17213_v59  ;;  %v11360_v61 = vld [vmem:[%s17374_s4 + $0xdf0] ss:$76 sps:$4 sm:$0xff]   ;;  %v11364_v10 = vld [vmem:[%s17374_s4 + $0x1478] ss:$76 sps:$4 sm:$0xff]  }
 0x6db   :  { %v7702_v4 = vmul.f32 0.088388346, %v7699_v35  ;;  %v11368_v35 = vld [vmem:[%s17374_s4 + $0x15a8] ss:$76 sps:$4 sm:$0xff]  }
 0x6dd   :  { %v7703_v26 = vsub.f32 %v7702_v4, %v7485_v3  ;;  %v11370_v3 = vld [vmem:[%s17374_s4 + $0x1640] ss:$76 sps:$4 sm:$0xff]   ;;  %v11371_v4 = vld [vmem:[%s17374_s4 + $0x1b98] ss:$76 sps:$4 sm:$0xff]  }
 0x6df   :  { %v7704_v22 = vmul.f32 1.442695, %v7703_v26  ;;  %v11372_v26 = vld [vmem:[%s17374_s4 + $0x16d8] ss:$76 sps:$4 sm:$0xff]  }
 0x6e1   :  { %11375 = vpow2.f32 %v7704_v22  ;;  %v11373_v22 = vld [vmem:[%s17374_s4 + $0x1c30] ss:$76 sps:$4 sm:$0xff]  }
 0x6eb   :  { %v11376_v0 = vpop.eup %11375 }
 0x6ec   :  { %v7706_v7 = vadd.f32 1.0, %v11376_v0  ;;  %v11374_v0 = vld [vmem:[%s17374_s4 + $0x1770] ss:$76 sps:$4 sm:$0xff]  }
 0x6ee   :  { %11377 = vrcp.f32 %v7706_v7 }
 0x6f8   :  { %v11378_v6 = vpop.eup %11377 }
 0x6f9   :  { %9356 = vmatmul.mubr.msk.f32.vlgmr.msra.gmra.mrb[40].mxu1 %vm7714_vm1, %v11378_v6 }
 0x6fa   :  { %9358 = vmatpush1.msk.msra.mxu1 %vm7718_vm0, %v7710_v40  ;;  %7872 = vmatprep.mubr.f32.mxu1 %v11955_v1 }
 0x6fb   :  { %9360 = vmatprep.subr.msk.mxu1 %vm7718_vm0, %v7713_v34 }
 0x6fd   :  { %9359 = vmatmul.mubr.msk.f32.vlgmr.msra.gmra.mrb[42].mxu1 %vm7714_vm1, %v11378_v6 }
 0x6fe   :  { %9361 = vmatpush1.msk.msra.mxu1 %vm7718_vm0, %v7712_v19  ;;  %7943 = vmatprep.mubr.f32.mxu1 %v11955_v1  ;;  %v11339_v1 = vld [vmem:[%s17374_s4 + $0xfb8] ss:$76 sps:$4 sm:$0xff]  }
 0x6ff   :  { %9644 = vmatprep.subr.bf16.mxu1 %v11331_v45  ;;  %v9363_v45 = vld [vmem:[%s17377_s5 + $0x12] ss:$0 sm:$0xff] }
 0x701   :  { %9362 = vmatmul.mubr.msk.f32.vlgmr.msra.gmra.mrb[44].mxu1 %vm7714_vm1, %v11378_v6 }
 0x702   :  { %9645 = vmatpush3.bf16.msra.mxu1 %v11332_v52 }
 0x703   :  { %9646 = vmatprep.subr.bf16.mxu1 %v11335_v25 }
 0x706   :  { %9647 = vmatpush3.bf16.msra.mxu1 %v11336_v31 }
 0x707   :  { %9648 = vmatprep.subr.bf16.mxu1 %v11339_v1 }
 0x70a   :  { %9649 = vmatpush3.bf16.msra.mxu1 %v11340_v46 }
 0x70b   :  { %9650 = vmatprep.subr.bf16.mxu1 %v11343_v49 }
 0x70e   :  { %9651 = vmatpush3.bf16.msra.mxu1 %v11344_v57 }
 0x70f   :  { %9652 = vmatprep.subr.bf16.mxu1 %v11347_v60 }
 0x712   :  { %9653 = vmatpush3.bf16.msra.mxu1 %v11348_v62 }
 0x713   :  { %9654 = vmatprep.subr.bf16.mxu1 %v11351_v28 }
 0x716   :  { %9655 = vmatpush3.bf16.msra.mxu1 %v11352_v33 }
 0x717   :  { %9656 = vmatprep.subr.bf16.mxu1 %v11355_v20 }
 0x71a   :  { %9657 = vmatpush3.bf16.msra.mxu1 %v11356_v39 }
 0x71b   :  { %9658 = vmatprep.subr.bf16.mxu1 %v11358_v56 }
 0x71e   :  { %9659 = vmatpush3.bf16.msra.mxu1 %v11360_v61 }
 0x7cc   :  { %v7803_v13 = vpop.f32.mrb[40].mxu1 }
 0x7cd   :  { %v7956_v16 = vmul.f32 %v7950_v41, %v7803_v13  ;;  %v7805_v42 = vpop.f32.mrb[41].mxu1 }
 0x7ce   :  { %v7957_v37 = vmul.f32 %v7951_v21, %v7805_v42 }
 0x7cf   :  { %v7962_v50 = vadd.f32 %v17129_v48, %v7956_v16 }
 0x7d0   :  { %v7963_v47 = vadd.f32 %v17139_v18, %v7957_v37  ;;  %v7874_v23 = vpop.f32.mrb[42].mxu1  ;;  %v11361_v18 = vld [vmem:[%s17374_s4 + $0x18a0] ss:$76 sps:$4 sm:$0xff]  }
 0x7d1   :  { %v7958_v5 = vmul.f32 %v7952_v53, %v7874_v23  ;;  %v7876_v43 = vpop.f32.mrb[43].mxu1  ;;  %v7968_v41 = vpack.c.bf16 %v7962_v50, %v7962_v50 }
 0x7d2   :  { %v7969_v55 = vpack.c.bf16 %v7963_v47, %v7963_v47  ;;  %v7959_v14 = vmul.f32 %v7953_v51, %v7876_v43 }
 0x7d3   :  { %v7964_v48 = vadd.f32 %v17131_v15, %v7958_v5  ;;  %v11362_v15 = vld [vmem:[%s17374_s4 + $0x13e0] ss:$76 sps:$4 sm:$0xff]  }
 0x7d4   :  { %v7965_v32 = vadd.f32 %v17141_v54, %v7959_v14  ;;  %v7945_v53 = vpop.f32.mrb[44].mxu1  ;;  %8397 = vmatprep.mubr.bf16.mxu0 %v7969_v55 }
 0x7d5   :  { %v7960_v2 = vmul.f32 %v7954_v63, %v7945_v53  ;;  %v7947_v21 = vpop.f32.mrb[45].mxu1  ;;  %8398 = vmatmul.mubr.bf16.vlgmr.msra.gmra.mrb[32].mxu0 %v7968_v41  ;;  %v7970_v9 = vpack.c.bf16 %v7964_v48, %v7964_v48  ;;  %v11366_v63 = vld [vmem:[%s17374_s4 + $0x1510] ss:$76 sps:$4 sm:$0xff]  }
 0x7d6   :  { %v7971_v51 = vpack.c.bf16 %v7965_v32, %v7965_v32  ;;  %v7961_v36 = vmul.f32 %v7955_v30, %v7947_v21  ;;  %9667 = vmatpush3.bf16.msra.mxu0 %v11359_v17  ;;  %v11369_v30 = vld [vmem:[%s17374_s4 + $0x1b00] ss:$76 sps:$4 sm:$0xff]  }
 0x7d7   :  { %v7966_v54 = vadd.f32 %v17208_v8, %v7960_v2  ;;  %9668 = vmatprep.subr.bf16.mxu0 %v11361_v18  ;;  %v11365_v8 = vld [vmem:[%s17374_s4 + $0x19d0] ss:$76 sps:$4 sm:$0xff]  }
 0x7d8   :  { %v7967_v58 = vadd.f32 %v17213_v59, %v7961_v36  ;;  %8437 = vmatprep.mubr.bf16.mxu1 %v7971_v51  ;;  %v11367_v59 = vld [vmem:[%s17374_s4 + $0x1a68] ss:$76 sps:$4 sm:$0xff]  }
 0x7d9   :  { %8438 = vmatmul.mubr.bf16.vlgmr.msra.gmra.mrb[48].mxu1 %v7970_v9  ;;  %v7972_v7 = vpack.c.bf16 %v7966_v54, %v7966_v54 }
 0x7da   :  { %v7973_v11 = vpack.c.bf16 %v7967_v58, %v7967_v58  ;;  %9669 = vmatpush3.bf16.msra.mxu0 %v11362_v15 }
 0x7db   :  { %9670 = vmatprep.subr.bf16.mxu0 %v11363_v27 }
 0x7dc   :  { %8477 = vmatprep.mubr.bf16.mxu0 %v7973_v11 }
 0x7de   :  { %9671 = vmatpush3.bf16.msra.mxu0 %v11364_v10 }
 0x7df   :  { %9672 = vmatprep.subr.bf16.mxu0 %v11365_v8 }
 0x7e2   :  { %9673 = vmatpush3.bf16.msra.mxu0 %v11366_v63 }
 0x7e3   :  { %9674 = vmatprep.subr.bf16.mxu0 %v11367_v59 }
 0x7e6   :  { %9675 = vmatpush3.bf16.msra.mxu0 %v11368_v35 }
 0x7e7   :  { %9676 = vmatprep.subr.bf16.mxu0 %v11369_v30 }
 0x7ea   :  { %9677 = vmatpush3.bf16.msra.mxu0 %v11370_v3 }
 0x7eb   :  { %9678 = vmatprep.subr.bf16.mxu0 %v11371_v4 }
 0x7ee   :  { %9679 = vmatpush3.bf16.msra.mxu0 %v11372_v26 }
 0x7ef   :  { %9680 = vmatprep.subr.bf16.mxu0 %v11373_v22 }
 0x7f2   :  { %9681 = vmatpush3.bf16.msra.mxu0 %v11374_v0 }
 0x7f5   :  { %8478 = vmatmul.mubr.bf16.vlgmr.msra.gmra.mrb[36].mxu0 %v7972_v7 }
 0x8a8   :  { %v9638_v40 = vpop.f32.mrb[32].mxu0 }
 0x8a9   :  { %v9639_v6 = vpop.f32.mrb[33].mxu0 }
 0x8aa   :  { %v9640_v34 = vadd.f32 %v9639_v6, %v9638_v40  ;;  %v9641_v19 = vpop.f32.mrb[34].mxu0 }
 0x8ab   :  { %v9642_v52 = vpop.f32.mrb[35].mxu0 }
 0x8ac   :  { %v9660_v25 = vpop.f32.mrb[48].mxu1  ;;  %v8400_v1 = vadd.f32 %v9640_v34, %v9363_v45 }
 0x8ad   :  { %v9661_v31 = vpop.f32.mrb[49].mxu1 }
 0x8ae   :  { %v9662_v46 = vadd.f32 %v9661_v31, %v9660_v25  ;;  %v9663_v49 = vpop.f32.mrb[50].mxu1 }
 0x8af   :  { %v9664_v57 = vpop.f32.mrb[51].mxu1 }
 0x8b0   :  { %v8440_v60 = vadd.f32 %v9662_v46, %v8400_v1 }
 0x8c8   :  { %v9682_v62 = vpop.f32.mrb[36].mxu0 }
 0x8c9   :  { %v9683_v12 = vpop.f32.mrb[37].mxu0 }
 0x8ca   :  { %v9684_v24 = vadd.f32 %v9683_v12, %v9682_v62  ;;  %v9685_v28 = vpop.f32.mrb[38].mxu0 }
 0x8cb   :  { %v9686_v33 = vpop.f32.mrb[39].mxu0 }
 0x8cc   :  { %v8480_v44 = vadd.f32 %v9684_v24, %v8440_v60 }
 0x8ce   :  { %8485 = vst [vmem:[%s17380_s6] sm:$0xff] %v8480_v44 }

</bundles_post_ra>
